<compile_context>
chip_gen: v6e
topology: v6e:2x2x1
jax: 0.10.0
libtpu: 0.0.40
codegen_flags: <defaults>
</compile_context>

<pallas_src>
import math
import jax
import jax.numpy as jnp
from jax import lax
from jax.experimental import pallas as pl
from jax.experimental.pallas import tpu as pltpu

D_MODEL = 768
D_FF = 768 * 4
TM_DEFAULT = 256  # rows per grid step (keeps the MXU well fed; ~30 MiB peak VMEM)


def _gelu(x):
    # exact erf-based gelu, matching the PyTorch reference
    return x * 0.5 * (1.0 + lax.erf(x / math.sqrt(2.0)))


def ffn_kernel(x_ref, w1_ref, b1_ref, w2_ref, b2_ref, o_ref):
    # x tile: [tm, d_model] f32 -> bf16 for the MXU
    x = x_ref[...].astype(jnp.bfloat16)

    # fc1: h = x @ W1^T   (W1 is [d_ff, d_model]; contract last dims -> [tm, d_ff])
    h = lax.dot_general(
        x, w1_ref[...],
        dimension_numbers=(((1,), (1,)), ((), ())),
        preferred_element_type=jnp.float32,
    )
    h = _gelu(h + b1_ref[...])  # bias + exact gelu in f32

    # fc2: y = h @ W2^T   (W2 is [d_model, d_ff]; contract last dims -> [tm, d_model])
    y = lax.dot_general(
        h.astype(jnp.bfloat16), w2_ref[...],
        dimension_numbers=(((1,), (1,)), ((), ())),
        preferred_element_type=jnp.float32,
    )
    o_ref[...] = (y + b2_ref[...]).astype(o_ref.dtype)


def poswise_ffn(x, w1, b1, w2, b2, tm=TM_DEFAULT):
    """x: [B, S, d_model]; w1: [d_ff, d_model]; b1: [d_ff];
    w2: [d_model, d_ff]; b2: [d_model]  (PyTorch nn.Linear layout)."""
    B, S, D = x.shape
    assert D == D_MODEL
    M = B * S
    x2d = x.reshape(M, D)

    # One-time dtype prep (no transposes: the kernel contracts on the last dims).
    w1b = w1.astype(jnp.bfloat16)                   # [d_ff, d_model], resident
    w2b = w2.astype(jnp.bfloat16)                   # [d_model, d_ff], resident
    b1r = b1.reshape(1, D_FF).astype(jnp.float32)   # [1, d_ff]
    b2r = b2.reshape(1, D_MODEL).astype(jnp.float32)

    # tm == M (full-dim block, any M) or a multiple of 8; Pallas masks the final
    # partial block when tm does not divide M, and rows are independent so the
    # padded garbage rows never contaminate valid output.
    tm = min(tm, M)
    grid = (pl.cdiv(M, tm),)

    out2d = pl.pallas_call(
        ffn_kernel,
        out_shape=jax.ShapeDtypeStruct((M, D_MODEL), x.dtype),
        grid_spec=pltpu.PrefetchScalarGridSpec(
            num_scalar_prefetch=0,
            grid=grid,
            in_specs=[
                pl.BlockSpec((tm, D_MODEL), lambda i: (i, 0)),     # x tile (streamed)
                pl.BlockSpec((D_FF, D_MODEL), lambda i: (0, 0)),   # W1 (resident, bf16)
                pl.BlockSpec((1, D_FF), lambda i: (0, 0)),         # b1 (resident)
                pl.BlockSpec((D_MODEL, D_FF), lambda i: (0, 0)),   # W2 (resident, bf16)
                pl.BlockSpec((1, D_MODEL), lambda i: (0, 0)),      # b2 (resident)
            ],
            out_specs=pl.BlockSpec((tm, D_MODEL), lambda i: (i, 0)),  # out tile
        ),
        compiler_params=pltpu.CompilerParams(
            dimension_semantics=("parallel",),
            # Resident bf16 weights (~9.4 MiB, double-buffered ~19 MiB) + streamed
            # tiles + f32 temps ~= 30 MiB peak. 48 MiB fits v7x's 64 MiB physical
            # VMEM and lifts the 16/32 MiB scoped defaults on v5e/v6e.
            vmem_limit_bytes=48 * 1024 * 1024,
        ),
    )(x2d, w1b, b1r, w2b, b2r)

    return out2d.reshape(B, S, D_MODEL)


if __name__ == "__main__":
    key = jax.random.PRNGKey(0)
    k_x, k_w1, k_b1, k_w2, k_b2 = jax.random.split(key, 5)

    batch, seq = 2, 8
    x = jax.random.normal(k_x, (batch, seq, D_MODEL), dtype=jnp.float32)

    # Deterministic parameter init (nn.Linear-style uniform bounds)
    lim1 = 1.0 / math.sqrt(D_MODEL)
    lim2 = 1.0 / math.sqrt(D_FF)
    w1 = jax.random.uniform(k_w1, (D_FF, D_MODEL), jnp.float32, -lim1, lim1)
    b1 = jax.random.uniform(k_b1, (D_FF,), jnp.float32, -lim1, lim1)
    w2 = jax.random.uniform(k_w2, (D_MODEL, D_FF), jnp.float32, -lim2, lim2)
    b2 = jax.random.uniform(k_b2, (D_MODEL,), jnp.float32, -lim2, lim2)

    out = poswise_ffn(x, w1, b1, w2, b2)
    out = jax.block_until_ready(out)

    # pure-JAX f32 reference (bf16 MXU inputs -> loosened tolerance)
    h_ref = x.reshape(-1, D_MODEL) @ w1.T + b1
    h_ref = h_ref * 0.5 * (1.0 + lax.erf(h_ref / math.sqrt(2.0)))
    y_ref = (h_ref @ w2.T + b2).reshape(batch, seq, D_MODEL)
    assert out.shape == y_ref.shape
    assert jnp.allclose(out, y_ref, atol=2e-2, rtol=2e-2), "mismatch vs reference"

    print("KERNEL_OK")
</pallas_src>

<mosaic_0001>
module attributes {stable_mosaic.version = 11 : i64} {
  func.func @ffn_kernel(%arg0: i32, %arg1: memref<16x768xf32, #tpu.memory_space<vmem>>, %arg2: memref<3072x768xbf16, #tpu.memory_space<vmem>>, %arg3: memref<1x3072xf32, #tpu.memory_space<vmem>>, %arg4: memref<768x3072xbf16, #tpu.memory_space<vmem>>, %arg5: memref<1x768xf32, #tpu.memory_space<vmem>>, %arg6: memref<16x768xf32, #tpu.memory_space<vmem>>) attributes {dimension_semantics = [#tpu.dimension_semantics<parallel>], iteration_bounds = array<i64: 1>, scalar_prefetch = 0 : i64, scratch_operands = 0 : i64, tpu.core_type = #tpu.core_type<tc>, window_params = [{transform_indices = @transform_0, window_bounds = array<i64: 16, 768>}, {pipeline_mode = #tpu.pipeline_mode<synchronous>, transform_indices = @transform_1, window_bounds = array<i64: 3072, 768>}, {pipeline_mode = #tpu.pipeline_mode<synchronous>, transform_indices = @transform_2, window_bounds = array<i64: 1, 3072>}, {pipeline_mode = #tpu.pipeline_mode<synchronous>, transform_indices = @transform_3, window_bounds = array<i64: 768, 3072>}, {pipeline_mode = #tpu.pipeline_mode<synchronous>, transform_indices = @transform_4, window_bounds = array<i64: 1, 768>}, {transform_indices = @transform_5, window_bounds = array<i64: 16, 768>}]} {
    %c0 = arith.constant 0 : index
    %c0_0 = arith.constant 0 : index
    %0 = vector.load %arg1[%c0, %c0_0] : memref<16x768xf32, #tpu.memory_space<vmem>>, vector<16x768xf32>
    %1 = arith.truncf %0 : vector<16x768xf32> to vector<16x768xbf16>
    %c0_1 = arith.constant 0 : index
    %c0_2 = arith.constant 0 : index
    %2 = vector.load %arg2[%c0_1, %c0_2] : memref<3072x768xbf16, #tpu.memory_space<vmem>>, vector<3072x768xbf16>
    %cst = arith.constant dense<0.000000e+00> : vector<16x3072xf32>
    %3 = tpu.matmul %1, %2, %cst {dimension_numbers = #tpu.dot_dimension_numbers<[1], [1], [0], [0], [0, 0, 1, 0], [], []>} : vector<16x768xbf16>, vector<3072x768xbf16>, vector<16x3072xf32> -> vector<16x3072xf32>
    %c0_3 = arith.constant 0 : index
    %c0_4 = arith.constant 0 : index
    %4 = vector.load %arg3[%c0_3, %c0_4] : memref<1x3072xf32, #tpu.memory_space<vmem>>, vector<1x3072xf32>
    %5 = vector.broadcast %4 : vector<1x3072xf32> to vector<16x3072xf32>
    %6 = arith.addf %3, %5 : vector<16x3072xf32>
    %cst_5 = arith.constant 5.000000e-01 : f32
    %7 = vector.broadcast %cst_5 : f32 to vector<16x3072xf32>
    %8 = arith.mulf %6, %7 : vector<16x3072xf32>
    %cst_6 = arith.constant 1.41421354 : f32
    %9 = vector.broadcast %cst_6 : f32 to vector<16x3072xf32>
    %10 = arith.divf %6, %9 : vector<16x3072xf32>
    %11 = math.erf %10 : vector<16x3072xf32>
    %cst_7 = arith.constant 1.000000e+00 : f32
    %12 = vector.broadcast %cst_7 : f32 to vector<16x3072xf32>
    %13 = arith.addf %12, %11 : vector<16x3072xf32>
    %14 = arith.mulf %8, %13 : vector<16x3072xf32>
    %15 = arith.truncf %14 : vector<16x3072xf32> to vector<16x3072xbf16>
    %c0_8 = arith.constant 0 : index
    %c0_9 = arith.constant 0 : index
    %16 = vector.load %arg4[%c0_8, %c0_9] : memref<768x3072xbf16, #tpu.memory_space<vmem>>, vector<768x3072xbf16>
    %cst_10 = arith.constant dense<0.000000e+00> : vector<16x768xf32>
    %17 = tpu.matmul %15, %16, %cst_10 {dimension_numbers = #tpu.dot_dimension_numbers<[1], [1], [0], [0], [0, 0, 1, 0], [], []>} : vector<16x3072xbf16>, vector<768x3072xbf16>, vector<16x768xf32> -> vector<16x768xf32>
    %c0_11 = arith.constant 0 : index
    %c0_12 = arith.constant 0 : index
    %18 = vector.load %arg5[%c0_11, %c0_12] : memref<1x768xf32, #tpu.memory_space<vmem>>, vector<1x768xf32>
    %19 = vector.broadcast %18 : vector<1x768xf32> to vector<16x768xf32>
    %20 = arith.addf %17, %19 : vector<16x768xf32>
    %c0_13 = arith.constant 0 : index
    %c0_14 = arith.constant 0 : index
    %21 = vector.load %arg6[%c0_13, %c0_14] : memref<16x768xf32, #tpu.memory_space<vmem>>, vector<16x768xf32>
    tpu.vector_store %arg6[%c0_13, %c0_14], %20 {strides = array<i32>} : memref<16x768xf32, #tpu.memory_space<vmem>>, vector<16x768xf32>,
    return
  }
  func.func @transform_0(%arg0: i32) -> (i32, i32) {
    %c0_i32 = arith.constant 0 : i32
    %c0_i32_0 = arith.constant 0 : i32
    return %arg0, %c0_i32 : i32, i32
  }
  func.func @transform_1(%arg0: i32) -> (i32, i32) {
    %c0_i32 = arith.constant 0 : i32
    %c0_i32_0 = arith.constant 0 : i32
    %c0_i32_1 = arith.constant 0 : i32
    return %c0_i32, %c0_i32_0 : i32, i32
  }
  func.func @transform_2(%arg0: i32) -> (i32, i32) {
    %c0_i32 = arith.constant 0 : i32
    %c0_i32_0 = arith.constant 0 : i32
    %c0_i32_1 = arith.constant 0 : i32
    return %c0_i32, %c0_i32_0 : i32, i32
  }
  func.func @transform_3(%arg0: i32) -> (i32, i32) {
    %c0_i32 = arith.constant 0 : i32
    %c0_i32_0 = arith.constant 0 : i32
    %c0_i32_1 = arith.constant 0 : i32
    return %c0_i32, %c0_i32_0 : i32, i32
  }
  func.func @transform_4(%arg0: i32) -> (i32, i32) {
    %c0_i32 = arith.constant 0 : i32
    %c0_i32_0 = arith.constant 0 : i32
    %c0_i32_1 = arith.constant 0 : i32
    return %c0_i32, %c0_i32_0 : i32, i32
  }
  func.func @transform_5(%arg0: i32) -> (i32, i32) {
    %c0_i32 = arith.constant 0 : i32
    %c0_i32_0 = arith.constant 0 : i32
    return %arg0, %c0_i32 : i32, i32
  }
}

</mosaic_0001>

<bundles_post_ra>
// kernel: tpu_custom_call.1
= control target key start
LH: loop header
LB: loop body
LE: loop exit
PB: predicated region body
PF: predicated region fallthrough
CT: control target
= control target key end

     0   :  { %10 = vsyncpa [#allocation3], 0  ;;  %s22508_s0 = inlined_call_operand.hbm [shape: f32[16,768], index: 0, kind: input, shape index: {}]   ;;  %s22509_s1 = inlined_call_operand.hbm [shape: bf16[3072,768], index: 1, kind: input, shape index: {}]   ;;  %s22510_s2 = inlined_call_operand.hbm [shape: f32[1,3072], index: 2, kind: input, shape index: {}]   ;;  %s22511_s3 = inlined_call_operand.hbm [shape: bf16[768,3072], index: 3, kind: input, shape index: {}]   ;;  %s22512_s4 = inlined_call_operand.hbm [shape: f32[1,768], index: 4, kind: input, shape index: {}]   ;;  %s22513_s5 = inlined_call_operand.hbm [shape: f32[16,768], index: 5, kind: output, shape index: {}]  }
   0x1   :  { %11 = vsyncpa [#allocation6], 0 }
   0x2   :  { %12 = vsyncpa [#allocation9], 0 }
   0x3   :  { %13 = vsyncpa [#allocation4], 0  ;;  %s21753_s18 = smov [#allocation5]  }
   0x4   :  { %s31_s19 = sshll.u32 %s21753_s18, 4  ;;  %s32_s19 = int_to_ptr.vmem [resolvable:$true] %s31_s19 }
   0x5   :  { %s21633_s20 = scalar_lea.vmem %s32_s19, 147456  ;;  %p21638_p1 = scmp.lt.s32.totalorder %s32_s19, %s32_s19 }
   0x6   :  { %p21634_p0 = scmp.ne.s32.totalorder %s32_s19, %s21633_s20  ;;  %p21639_p2 = scmp.lt.s32.totalorder %s21633_s20, %s21633_s20 }
   0x8   :  { %p21640_p3 = por %p21639_p2, %p21638_p1 }
   0xa   :  { %p21641_p4 = pnand %p21640_p3, %p21634_p0 }
   0xc   :  { %21644 = shalt.err (!%p21641_p4)
}
   0xd   :  { %s21754_s21 = smov 384   ;;  %s21755_s22 = smov 24  }
   0xe   :  { %37 = dma.hbm_to_vmem [thread:$0]  %s22509_s1, 147456, %s32_s19, [#allocation6], %s21754_s21, %s21754_s21, %s21755_s22  }
   0xf   :  { %s21756_s25 = smov [#allocation8]  }
  0x10   :  { %s53_s26 = sshll.u32 %s21756_s25, 4  ;;  %s54_s26 = int_to_ptr.vmem [resolvable:$true] %s53_s26 }
  0x11   :  { %s21653_s27 = scalar_lea.vmem %s54_s26, 147456  ;;  %p21658_p6 = scmp.lt.s32.totalorder %s54_s26, %s54_s26 }
  0x12   :  { %p21654_p5 = scmp.ne.s32.totalorder %s54_s26, %s21653_s27  ;;  %p21659_p7 = scmp.lt.s32.totalorder %s21653_s27, %s21653_s27 }
  0x14   :  { %p21660_p8 = por %p21659_p7, %p21658_p6 }
  0x16   :  { %p21661_p9 = pnand %p21660_p8, %p21654_p5 }
  0x18   :  { %21664 = shalt.err (!%p21661_p9)
}
  0x19   :  { %s21757_s28 = smov 1536   ;;  %s21758_s29 = smov 96  }
  0x1a   :  { %59 = dma.hbm_to_vmem [thread:$0]  %s22511_s3, 147456, %s54_s26, [#allocation9], %s21757_s28, %s21757_s28, %s21758_s29  }
  0x1b   :  { %s21759_s7 = smov [#allocation2]  }
  0x1c   :  { %s19_s8 = sshll.u32 %s21759_s7, 4  ;;  %s20_s8 = int_to_ptr.vmem [resolvable:$true] %s19_s8 }
  0x1d   :  { %s21673_s1 = scalar_lea.vmem %s20_s8, 1536  ;;  %p21678_p11 = scmp.lt.s32.totalorder %s20_s8, %s20_s8 }
  0x1e   :  { %p21674_p10 = scmp.ne.s32.totalorder %s20_s8, %s21673_s1  ;;  %p21679_p12 = scmp.lt.s32.totalorder %s21673_s1, %s21673_s1 }
  0x20   :  { %p21680_p13 = por %p21679_p12, %p21678_p11 }
  0x22   :  { %p21681_p0 = pnand %p21680_p13, %p21674_p10 }
  0x24   :  { %21684 = shalt.err (!%p21681_p0)
}
  0x25   :  { %s21760_s9 = smov 768   ;;  %s21761_s10 = smov 48  }
  0x26   :  { %25 = dma.hbm_to_vmem [thread:$0]  %s22508_s0, 1536, %s20_s8, [#allocation3], %s21760_s9, %s21760_s9, %s21761_s10  }
  0x27   :  { %s21762_s3 = smov [#allocation7]   ;;  %s21763_s14 = smov [#allocation10]  }
  0x28   :  { %s44_s13 = sshll.u32 %s21762_s3, 4  ;;  %s66_s15 = sshll.u32 %s21763_s14, 4  ;;  %s45_s13 = int_to_ptr.vmem [resolvable:$true] %s44_s13  ;;  %s67_s15 = int_to_ptr.vmem [resolvable:$true] %s66_s15 }
  0x29   :  { %s21693_s16 = scalar_lea.vmem %s45_s13, 384  ;;  %p21698_p2 = scmp.lt.s32.totalorder %s45_s13, %s45_s13 }
  0x2a   :  { %p21694_p1 = scmp.ne.s32.totalorder %s45_s13, %s21693_s16  ;;  %p21699_p3 = scmp.lt.s32.totalorder %s21693_s16, %s21693_s16 }
  0x2c   :  { %p21700_p4 = por %p21699_p3, %p21698_p2 }
  0x2e   :  { %p21701_p5 = pnand %p21700_p4, %p21694_p1 }
  0x30   :  { %21704 = shalt.err (!%p21701_p5)
}
  0x31   :  { %47 = dma.hbm_to_vmem [thread:$0]  %s22510_s2, 384, %s45_s13, [#allocation6]  }
  0x32   :  { %s21713_s19 = scalar_lea.vmem %s67_s15, 96  ;;  %p21718_p7 = scmp.lt.s32.totalorder %s67_s15, %s67_s15 }
  0x33   :  { %p21714_p6 = scmp.ne.s32.totalorder %s67_s15, %s21713_s19  ;;  %p21719_p8 = scmp.lt.s32.totalorder %s21713_s19, %s21713_s19 }
  0x35   :  { %p21720_p9 = por %p21719_p8, %p21718_p7 }
  0x37   :  { %p21721_p10 = pnand %p21720_p9, %p21714_p6 }
  0x39   :  { %21724 = shalt.err (!%p21721_p10)
}
  0x3a   :  { %69 = dma.hbm_to_vmem [thread:$0]  %s22512_s4, 96, %s67_s15, [#allocation9]  }
  0x3b   :  { %21745 = dma.done.wait [#allocation3], 1536  }
  0x3c   :  { %21746 = vsyncadd [#allocation3], 4294965760 }
  0x3d   :  { %21747 = dma.done.wait [#allocation6], 147840  }
  0x3e   :  { %21748 = vsyncadd [#allocation6], 4294819456 }
  0x3f   :  { %21749 = dma.done.wait [#allocation9], 147552  }
  0x40   :  { %21750 = vsyncadd [#allocation9], 4294819744  ;;  %v19793_v0 = vld [vmem:[#allocation5 + $0x154] ss:$24 sps:$4 sm:$0xff]   ;;  %v19797_v2 = vld [vmem:[#allocation5 + $0x150] ss:$24 sps:$4 sm:$0xff]  }
  0x41   :  { %v19795_v1 = vld [vmem:[#allocation5 + $0x15c] ss:$24 sps:$4 sm:$0xff]   ;;  %7141 = vmatprep.subr.bf16.mxu0 %v19793_v0  ;;  %v19798_v3 = vld [vmem:[#allocation5 + $0x158] ss:$24 sps:$4 sm:$0xff]   ;;  %v19801_v5 = vld [vmem:[#allocation5 + $0x12c] ss:$24 sps:$4 sm:$0xff]  }
  0x42   :  { %7184 = vmatprep.subr.bf16.mxu1 %v19795_v1  ;;  %v19799_v4 = vld [vmem:[#allocation5 + $0x124] ss:$24 sps:$4 sm:$0xff]   ;;  %7142 = vmatpush1.bf16.xpose.msra.mxu0 %v19797_v2  ;;  %v19803_v6 = vld [vmem:[#allocation5 + $0x120] ss:$24 sps:$4 sm:$0xff]   ;;  %v19805_v8 = vld [vmem:[#allocation5 + $0xf4] ss:$24 sps:$4 sm:$0xff]  }
  0x43   :  { %7185 = vmatpush1.bf16.xpose.msra.mxu1 %v19798_v3  ;;  %7143 = vmatprep.subr.bf16.mxu0 %v19799_v4  ;;  %v19804_v7 = vld [vmem:[#allocation5 + $0x128] ss:$24 sps:$4 sm:$0xff]   ;;  %v19807_v9 = vld [vmem:[#allocation5 + $0xfc] ss:$24 sps:$4 sm:$0xff]   ;;  %v19810_v11 = vld [vmem:[#allocation5 + $0xf8] ss:$24 sps:$4 sm:$0xff]  }
  0x44   :  { %7186 = vmatprep.subr.bf16.mxu1 %v19801_v5  ;;  %v19809_v10 = vld [vmem:[#allocation5 + $0xf0] ss:$24 sps:$4 sm:$0xff]   ;;  %v19811_v12 = vld [vmem:[#allocation5 + $0xc4] ss:$24 sps:$4 sm:$0xff]   ;;  %v19815_v14 = vld [vmem:[#allocation5 + $0xc0] ss:$24 sps:$4 sm:$0xff]  }
  0x45   :  { %v19813_v13 = vld [vmem:[#allocation5 + $0xcc] ss:$24 sps:$4 sm:$0xff]   ;;  %v19816_v15 = vld [vmem:[#allocation5 + $0xc8] ss:$24 sps:$4 sm:$0xff]   ;;  %v19819_v17 = vld [vmem:[#allocation5 + $0x9c] ss:$24 sps:$4 sm:$0xff]  }
  0x46   :  { %v19817_v16 = vld [vmem:[#allocation5 + $0x94] ss:$24 sps:$4 sm:$0xff]   ;;  %v19821_v18 = vld [vmem:[#allocation5 + $0x90] ss:$24 sps:$4 sm:$0xff]   ;;  %v19823_v20 = vld [vmem:[#allocation5 + $0x64] ss:$24 sps:$4 sm:$0xff]  }
  0x47   :  { %v19822_v19 = vld [vmem:[#allocation5 + $0x98] ss:$24 sps:$4 sm:$0xff]   ;;  %v19825_v21 = vld [vmem:[#allocation5 + $0x6c] ss:$24 sps:$4 sm:$0xff]   ;;  %v19828_v23 = vld [vmem:[#allocation5 + $0x68] ss:$24 sps:$4 sm:$0xff]  }
  0x48   :  { %v19827_v22 = vld [vmem:[#allocation5 + $0x60] ss:$24 sps:$4 sm:$0xff]   ;;  %v19829_v24 = vld [vmem:[#allocation5 + $0x34] ss:$24 sps:$4 sm:$0xff]   ;;  %v19833_v32 = vld [vmem:[#allocation5 + $0x30] ss:$24 sps:$4 sm:$0xff]  }
  0x49   :  { %v19831_v25 = vld [vmem:[#allocation5 + $0x3c] ss:$24 sps:$4 sm:$0xff]   ;;  %v86_v26 = vld [vmem:[#allocation2 + $0x8] sm:$0xff]  ;;  %v19834_v33 = vld [vmem:[#allocation5 + $0x38] ss:$24 sps:$4 sm:$0xff]   ;;  %s21764_s2 = smov [#allocation11]  }
  0x4a   :  { %7144 = vmatpush1.bf16.xpose.msra.mxu0 %v19803_v6  ;;  %v92_v27 = vld [vmem:[#allocation2 + $0x38] sm:$0xff]  ;;  %v94_v29 = vld [vmem:[#allocation2 + $0x48] sm:$0xff]  ;;  %s17463_s4 = sshll.u32 %s21764_s2, 4  ;;  %s17464_s4 = int_to_ptr.vmem [resolvable:$true] %s17463_s4 }
  0x4b   :  { %7187 = vmatpush1.bf16.xpose.msra.mxu1 %v19804_v7  ;;  %7145 = vmatprep.subr.bf16.mxu0 %v19805_v8  ;;  %v88_v28 = vld [vmem:[#allocation2 + $0x18] sm:$0xff]  ;;  %v21813_v30 = vpack.c.bf16 %v92_v27, %v86_v26  ;;  %v19837_v35 = vld [vmem:[#allocation5 + $0xc] ss:$24 sps:$4 sm:$0xff]   ;;  %v19840_v37 = vld [vmem:[#allocation5 + $0x8] ss:$24 sps:$4 sm:$0xff]   ;;  %s21725_s21 = scalar_lea.vmem %s17464_s4, 1536  ;;  %p21730_p12 = scmp.lt.s32.totalorder %s17464_s4, %s17464_s4 }
  0x4c   :  { %7188 = vmatprep.subr.bf16.mxu1 %v19807_v9  ;;  %v21815_v31 = vpack.c.bf16 %v94_v29, %v88_v28  ;;  %v19835_v34 = vld [vmem:[#allocation5 + $0x4] ss:$24 sps:$4 sm:$0xff]   ;;  %v19839_v36 = vld [vmem:[#allocation5] ss:$24 sps:$4 sm:$0xff]   ;;  %v19841_v38 = vld [vmem:[#allocation5 + $0x2d4] ss:$24 sps:$4 sm:$0xff]   ;;  %p21726_p11 = scmp.ne.s32.totalorder %s17464_s4, %s21725_s21  ;;  %p21731_p13 = scmp.lt.s32.totalorder %s21725_s21, %s21725_s21 }
  0x4d   :  { %7173 = vmatprep.mubr.bf16.mxu0 %v21813_v30  ;;  %v19843_v39 = vld [vmem:[#allocation5 + $0x2dc] ss:$24 sps:$4 sm:$0xff]   ;;  %v19845_v40 = vld [vmem:[#allocation5 + $0x2d0] ss:$24 sps:$4 sm:$0xff]   ;;  %v19849_v43 = vld [vmem:[#allocation5 + $0x2ac] ss:$24 sps:$4 sm:$0xff]  }
  0x4e   :  { %7216 = vmatprep.mubr.bf16.mxu1 %v21815_v31  ;;  %v19846_v41 = vld [vmem:[#allocation5 + $0x2d8] ss:$24 sps:$4 sm:$0xff]   ;;  %v19847_v42 = vld [vmem:[#allocation5 + $0x2a4] ss:$24 sps:$4 sm:$0xff]   ;;  %v19852_v45 = vld [vmem:[#allocation5 + $0x2a8] ss:$24 sps:$4 sm:$0xff]   ;;  %p21732_p0 = por %p21731_p13, %p21730_p12 }
  0x4f   :  { %v19851_v44 = vld [vmem:[#allocation5 + $0x2a0] ss:$24 sps:$4 sm:$0xff]   ;;  %v19853_v46 = vld [vmem:[#allocation5 + $0x274] ss:$24 sps:$4 sm:$0xff]   ;;  %v19857_v48 = vld [vmem:[#allocation5 + $0x270] ss:$24 sps:$4 sm:$0xff]  }
  0x50   :  { %v19855_v47 = vld [vmem:[#allocation5 + $0x27c] ss:$24 sps:$4 sm:$0xff]   ;;  %v19858_v49 = vld [vmem:[#allocation5 + $0x278] ss:$24 sps:$4 sm:$0xff]   ;;  %v19861_v51 = vld [vmem:[#allocation5 + $0x24c] ss:$24 sps:$4 sm:$0xff]   ;;  %p21733_p1 = pnand %p21732_p0, %p21726_p11 }
  0x51   :  { %v19859_v50 = vld [vmem:[#allocation5 + $0x244] ss:$24 sps:$4 sm:$0xff]   ;;  %v19863_v52 = vld [vmem:[#allocation5 + $0x240] ss:$24 sps:$4 sm:$0xff]   ;;  %v19865_v54 = vld [vmem:[#allocation5 + $0x214] ss:$24 sps:$4 sm:$0xff]  }
  0x52   :  { %7146 = vmatpush1.bf16.xpose.msra.mxu0 %v19809_v10  ;;  %v19864_v53 = vld [vmem:[#allocation5 + $0x248] ss:$24 sps:$4 sm:$0xff]   ;;  %v19867_v55 = vld [vmem:[#allocation5 + $0x21c] ss:$24 sps:$4 sm:$0xff]   ;;  %v19870_v57 = vld [vmem:[#allocation5 + $0x218] ss:$24 sps:$4 sm:$0xff]  }
  0x53   :  { %7189 = vmatpush1.bf16.xpose.msra.mxu1 %v19810_v11  ;;  %7147 = vmatprep.subr.bf16.mxu0 %v19811_v12  ;;  %v19869_v56 = vld [vmem:[#allocation5 + $0x210] ss:$24 sps:$4 sm:$0xff]   ;;  %v19871_v58 = vld [vmem:[#allocation5 + $0x1e4] ss:$24 sps:$4 sm:$0xff]   ;;  %v19875_v60 = vld [vmem:[#allocation5 + $0x1e0] ss:$24 sps:$4 sm:$0xff]  }
  0x54   :  { %7190 = vmatprep.subr.bf16.mxu1 %v19813_v13  ;;  %v19873_v59 = vld [vmem:[#allocation5 + $0x1ec] ss:$24 sps:$4 sm:$0xff]   ;;  %v19876_v61 = vld [vmem:[#allocation5 + $0x1e8] ss:$24 sps:$4 sm:$0xff]   ;;  %v19879_v63 = vld [vmem:[#allocation5 + $0x1bc] ss:$24 sps:$4 sm:$0xff]  }
  0x55   :  { %v19877_v62 = vld [vmem:[#allocation5 + $0x1b4] ss:$24 sps:$4 sm:$0xff]   ;;  %v19881_v0 = vld [vmem:[#allocation5 + $0x1b0] ss:$24 sps:$4 sm:$0xff]   ;;  %v19883_v2 = vld [vmem:[#allocation5 + $0x184] ss:$24 sps:$4 sm:$0xff]  }
  0x56   :  { %v19882_v1 = vld [vmem:[#allocation5 + $0x1b8] ss:$24 sps:$4 sm:$0xff]   ;;  %v19885_v3 = vld [vmem:[#allocation5 + $0x18c] ss:$24 sps:$4 sm:$0xff]   ;;  %v19888_v5 = vld [vmem:[#allocation5 + $0x188] ss:$24 sps:$4 sm:$0xff]  }
  0x57   :  { %v19887_v4 = vld [vmem:[#allocation5 + $0x180] ss:$24 sps:$4 sm:$0xff]   ;;  %v19891_v6 = vld [vmem:[#allocation5 + $0x164] ss:$24 sps:$4 sm:$0xff]   ;;  %v19894_v7 = vld [vmem:[#allocation5 + $0x454] ss:$24 sps:$4 sm:$0xff]  }
  0x58   :  { %v85_v8 = vld [vmem:[#allocation2] sm:$0xff]  ;;  %v91_v9 = vld [vmem:[#allocation2 + $0x30] sm:$0xff]  ;;  %v90_v12 = vld [vmem:[#allocation2 + $0x28] sm:$0xff] }
  0x59   :  { %v87_v10 = vld [vmem:[#allocation2 + $0x10] sm:$0xff]  ;;  %v93_v11 = vld [vmem:[#allocation2 + $0x40] sm:$0xff]  ;;  %v96_v13 = vld [vmem:[#allocation2 + $0x58] sm:$0xff] }
  0x5a   :  { %7148 = vmatpush1.bf16.xpose.msra.mxu0 %v19815_v14  ;;  %v19889_v14 = vld [vmem:[#allocation5 + $0x160] ss:$24 sps:$4 sm:$0xff]   ;;  %v19904_v26 = vld [vmem:[#allocation5 + $0x3f0] ss:$24 sps:$4 sm:$0xff]   ;;  %v19909_v27 = vld [vmem:[#allocation5 + $0xd4] ss:$24 sps:$4 sm:$0xff]  }
  0x5b   :  { %7191 = vmatpush1.bf16.xpose.msra.mxu1 %v19816_v15  ;;  %7149 = vmatprep.subr.bf16.mxu0 %v19817_v16  ;;  %v19892_v15 = vld [vmem:[#allocation5 + $0x450] ss:$24 sps:$4 sm:$0xff]   ;;  %v21819_v16 = vpack.c.bf16 %v91_v9, %v85_v8  ;;  %v19912_v28 = vld [vmem:[#allocation5 + $0x3c4] ss:$24 sps:$4 sm:$0xff]   ;;  %v19970_v8 = vld [vmem:[#allocation5 + $0x4e0] ss:$24 sps:$4 sm:$0xff]  }
  0x5c   :  { %7192 = vmatprep.subr.bf16.mxu1 %v19819_v17  ;;  %v21821_v17 = vpack.c.bf16 %v93_v11, %v87_v10  ;;  %v19907_v29 = vld [vmem:[#allocation5 + $0xd0] ss:$24 sps:$4 sm:$0xff]   ;;  %v19975_v9 = vld [vmem:[#allocation5 + $0x1c4] ss:$24 sps:$4 sm:$0xff]   ;;  %v19978_v10 = vld [vmem:[#allocation5 + $0x4b4] ss:$24 sps:$4 sm:$0xff]  }
  0x5d   :  { %v19973_v11 = vld [vmem:[#allocation5 + $0x1c0] ss:$24 sps:$4 sm:$0xff]  }
  0x62   :  { %7150 = vmatpush1.bf16.xpose.msra.mxu0 %v19821_v18  ;;  %v19897_v18 = vld [vmem:[#allocation5 + $0x134] ss:$24 sps:$4 sm:$0xff]  }
  0x63   :  { %7193 = vmatpush1.bf16.xpose.msra.mxu1 %v19822_v19  ;;  %7151 = vmatprep.subr.bf16.mxu0 %v19823_v20  ;;  %v19900_v19 = vld [vmem:[#allocation5 + $0x424] ss:$24 sps:$4 sm:$0xff]   ;;  %v21823_v20 = vpack.c.bf16 %v96_v13, %v90_v12  ;;  %v19976_v12 = vld [vmem:[#allocation5 + $0x4b0] ss:$24 sps:$4 sm:$0xff]   ;;  %v19981_v13 = vld [vmem:[#allocation5 + $0x194] ss:$24 sps:$4 sm:$0xff]  }
  0x64   :  { %7194 = vmatprep.subr.bf16.mxu1 %v19825_v21  ;;  %v19895_v21 = vld [vmem:[#allocation5 + $0x130] ss:$24 sps:$4 sm:$0xff]  }
  0x6a   :  { %7152 = vmatpush1.bf16.xpose.msra.mxu0 %v19827_v22  ;;  %v19898_v22 = vld [vmem:[#allocation5 + $0x420] ss:$24 sps:$4 sm:$0xff]  }
  0x6b   :  { %7195 = vmatpush1.bf16.xpose.msra.mxu1 %v19828_v23  ;;  %7153 = vmatprep.subr.bf16.mxu0 %v19829_v24  ;;  %v19903_v23 = vld [vmem:[#allocation5 + $0x104] ss:$24 sps:$4 sm:$0xff]   ;;  %v19906_v24 = vld [vmem:[#allocation5 + $0x3f4] ss:$24 sps:$4 sm:$0xff]  }
  0x6c   :  { %7196 = vmatprep.subr.bf16.mxu1 %v19831_v25  ;;  %v19901_v25 = vld [vmem:[#allocation5 + $0x100] ss:$24 sps:$4 sm:$0xff]  }
  0x72   :  { %7154 = vmatpush1.bf16.xpose.msra.mxu0 %v19833_v32  ;;  %v19910_v32 = vld [vmem:[#allocation5 + $0x3c0] ss:$24 sps:$4 sm:$0xff]  }
  0x73   :  { %7197 = vmatpush1.bf16.xpose.msra.mxu1 %v19834_v33  ;;  %7155 = vmatprep.subr.bf16.mxu0 %v19835_v34  ;;  %v19915_v33 = vld [vmem:[#allocation5 + $0xa4] ss:$24 sps:$4 sm:$0xff]   ;;  %v19918_v34 = vld [vmem:[#allocation5 + $0x394] ss:$24 sps:$4 sm:$0xff]  }
  0x74   :  { %7198 = vmatprep.subr.bf16.mxu1 %v19837_v35  ;;  %v19913_v35 = vld [vmem:[#allocation5 + $0xa0] ss:$24 sps:$4 sm:$0xff]  }
  0x7a   :  { %7156 = vmatpush1.bf16.xpose.msra.mxu0 %v19839_v36  ;;  %v19916_v36 = vld [vmem:[#allocation5 + $0x390] ss:$24 sps:$4 sm:$0xff]  }
  0x7b   :  { %7199 = vmatpush1.bf16.xpose.msra.mxu1 %v19840_v37  ;;  %7157 = vmatprep.subr.bf16.mxu0 %v19841_v38  ;;  %v19921_v37 = vld [vmem:[#allocation5 + $0x74] ss:$24 sps:$4 sm:$0xff]   ;;  %v19924_v38 = vld [vmem:[#allocation5 + $0x364] ss:$24 sps:$4 sm:$0xff]  }
  0x7c   :  { %7200 = vmatprep.subr.bf16.mxu1 %v19843_v39  ;;  %v19919_v39 = vld [vmem:[#allocation5 + $0x70] ss:$24 sps:$4 sm:$0xff]  }
  0x82   :  { %7158 = vmatpush2.bf16.xpose.msra.mxu0 %v19845_v40  ;;  %v19922_v40 = vld [vmem:[#allocation5 + $0x360] ss:$24 sps:$4 sm:$0xff]  }
  0x83   :  { %7201 = vmatpush2.bf16.xpose.msra.mxu1 %v19846_v41  ;;  %7159 = vmatprep.subr.bf16.mxu0 %v19847_v42  ;;  %v19927_v41 = vld [vmem:[#allocation5 + $0x44] ss:$24 sps:$4 sm:$0xff]   ;;  %v19930_v42 = vld [vmem:[#allocation5 + $0x334] ss:$24 sps:$4 sm:$0xff]  }
  0x84   :  { %7202 = vmatprep.subr.bf16.mxu1 %v19849_v43  ;;  %v19925_v43 = vld [vmem:[#allocation5 + $0x40] ss:$24 sps:$4 sm:$0xff]  }
  0x8a   :  { %7160 = vmatpush2.bf16.xpose.msra.mxu0 %v19851_v44  ;;  %v19928_v44 = vld [vmem:[#allocation5 + $0x330] ss:$24 sps:$4 sm:$0xff]  }
  0x8b   :  { %7203 = vmatpush2.bf16.xpose.msra.mxu1 %v19852_v45  ;;  %7161 = vmatprep.subr.bf16.mxu0 %v19853_v46  ;;  %v19933_v45 = vld [vmem:[#allocation5 + $0x14] ss:$24 sps:$4 sm:$0xff]   ;;  %v19936_v46 = vld [vmem:[#allocation5 + $0x304] ss:$24 sps:$4 sm:$0xff]  }
  0x8c   :  { %7204 = vmatprep.subr.bf16.mxu1 %v19855_v47  ;;  %v19931_v47 = vld [vmem:[#allocation5 + $0x10] ss:$24 sps:$4 sm:$0xff]  }
  0x92   :  { %7162 = vmatpush2.bf16.xpose.msra.mxu0 %v19857_v48  ;;  %v19934_v48 = vld [vmem:[#allocation5 + $0x300] ss:$24 sps:$4 sm:$0xff]  }
  0x93   :  { %7205 = vmatpush2.bf16.xpose.msra.mxu1 %v19858_v49  ;;  %7163 = vmatprep.subr.bf16.mxu0 %v19859_v50  ;;  %v19939_v49 = vld [vmem:[#allocation5 + $0x2e4] ss:$24 sps:$4 sm:$0xff]   ;;  %v19942_v50 = vld [vmem:[#allocation5 + $0x5d4] ss:$24 sps:$4 sm:$0xff]  }
  0x94   :  { %7206 = vmatprep.subr.bf16.mxu1 %v19861_v51  ;;  %v19937_v51 = vld [vmem:[#allocation5 + $0x2e0] ss:$24 sps:$4 sm:$0xff]  }
  0x9a   :  { %7164 = vmatpush2.bf16.xpose.msra.mxu0 %v19863_v52  ;;  %v19940_v52 = vld [vmem:[#allocation5 + $0x5d0] ss:$24 sps:$4 sm:$0xff]  }
  0x9b   :  { %7207 = vmatpush2.bf16.xpose.msra.mxu1 %v19864_v53  ;;  %7165 = vmatprep.subr.bf16.mxu0 %v19865_v54  ;;  %v19945_v53 = vld [vmem:[#allocation5 + $0x2b4] ss:$24 sps:$4 sm:$0xff]   ;;  %v19948_v54 = vld [vmem:[#allocation5 + $0x5a4] ss:$24 sps:$4 sm:$0xff]  }
  0x9c   :  { %7208 = vmatprep.subr.bf16.mxu1 %v19867_v55  ;;  %v19943_v55 = vld [vmem:[#allocation5 + $0x2b0] ss:$24 sps:$4 sm:$0xff]  }
  0xa2   :  { %7166 = vmatpush2.bf16.xpose.msra.mxu0 %v19869_v56  ;;  %v19946_v56 = vld [vmem:[#allocation5 + $0x5a0] ss:$24 sps:$4 sm:$0xff]  }
  0xa3   :  { %7209 = vmatpush2.bf16.xpose.msra.mxu1 %v19870_v57  ;;  %7167 = vmatprep.subr.bf16.mxu0 %v19871_v58  ;;  %v19951_v57 = vld [vmem:[#allocation5 + $0x284] ss:$24 sps:$4 sm:$0xff]   ;;  %v19954_v58 = vld [vmem:[#allocation5 + $0x574] ss:$24 sps:$4 sm:$0xff]  }
  0xa4   :  { %7210 = vmatprep.subr.bf16.mxu1 %v19873_v59  ;;  %v19949_v59 = vld [vmem:[#allocation5 + $0x280] ss:$24 sps:$4 sm:$0xff]  }
  0xaa   :  { %7168 = vmatpush2.bf16.xpose.msra.mxu0 %v19875_v60  ;;  %v19952_v60 = vld [vmem:[#allocation5 + $0x570] ss:$24 sps:$4 sm:$0xff]  }
  0xab   :  { %7211 = vmatpush2.bf16.xpose.msra.mxu1 %v19876_v61  ;;  %7169 = vmatprep.subr.bf16.mxu0 %v19877_v62  ;;  %v19957_v61 = vld [vmem:[#allocation5 + $0x254] ss:$24 sps:$4 sm:$0xff]   ;;  %v19960_v62 = vld [vmem:[#allocation5 + $0x544] ss:$24 sps:$4 sm:$0xff]  }
  0xac   :  { %7212 = vmatprep.subr.bf16.mxu1 %v19879_v63  ;;  %v19955_v63 = vld [vmem:[#allocation5 + $0x250] ss:$24 sps:$4 sm:$0xff]  }
  0xb2   :  { %7170 = vmatpush2.bf16.xpose.msra.mxu0 %v19881_v0  ;;  %v19958_v0 = vld [vmem:[#allocation5 + $0x540] ss:$24 sps:$4 sm:$0xff]  }
  0xb3   :  { %7213 = vmatpush2.bf16.xpose.msra.mxu1 %v19882_v1  ;;  %7171 = vmatprep.subr.bf16.mxu0 %v19883_v2  ;;  %v19963_v1 = vld [vmem:[#allocation5 + $0x224] ss:$24 sps:$4 sm:$0xff]   ;;  %v19966_v2 = vld [vmem:[#allocation5 + $0x514] ss:$24 sps:$4 sm:$0xff]  }
  0xb4   :  { %7214 = vmatprep.subr.bf16.mxu1 %v19885_v3  ;;  %v19961_v3 = vld [vmem:[#allocation5 + $0x220] ss:$24 sps:$4 sm:$0xff]  }
  0xba   :  { %7172 = vmatpush2.bf16.xpose.msra.mxu0 %v19887_v4  ;;  %v19964_v4 = vld [vmem:[#allocation5 + $0x510] ss:$24 sps:$4 sm:$0xff]  }
  0xbb   :  { %7215 = vmatpush2.bf16.xpose.msra.mxu1 %v19888_v5  ;;  %7227 = vmatprep.subr.bf16.mxu0 %v19891_v6  ;;  %v19969_v5 = vld [vmem:[#allocation5 + $0x1f4] ss:$24 sps:$4 sm:$0xff]   ;;  %v19972_v6 = vld [vmem:[#allocation5 + $0x4e4] ss:$24 sps:$4 sm:$0xff]  }
  0xbc   :  { %7270 = vmatprep.subr.bf16.mxu1 %v19894_v7  ;;  %v19967_v7 = vld [vmem:[#allocation5 + $0x1f0] ss:$24 sps:$4 sm:$0xff]  }
  0xc1   :  { %7174 = vmatmul.mubr.bf16.vlgmr.msra.gmra.mxu0 %v21819_v16 }
  0xc2   :  { %7217 = vmatmul.mubr.bf16.vlgmr.msra.gmra.mxu1 %v21821_v17  ;;  %7228 = vmatpush1.bf16.xpose.msra.mxu0 %v19889_v14  ;;  %v19984_v14 = vld [vmem:[#allocation5 + $0x484] ss:$24 sps:$4 sm:$0xff]  }
  0xc3   :  { %7271 = vmatpush1.bf16.xpose.msra.mxu1 %v19892_v15  ;;  %7229 = vmatprep.subr.bf16.mxu0 %v19897_v18  ;;  %v19979_v15 = vld [vmem:[#allocation5 + $0x190] ss:$24 sps:$4 sm:$0xff]   ;;  %v19982_v18 = vld [vmem:[#allocation5 + $0x480] ss:$24 sps:$4 sm:$0xff]  }
  0xc4   :  { %7272 = vmatprep.subr.bf16.mxu1 %v19900_v19  ;;  %7259 = vmatprep.mubr.bf16.mxu0 %v21823_v20  ;;  %v19987_v19 = vld [vmem:[#allocation5 + $0x45c] ss:$24 sps:$4 sm:$0xff]  }
  0xc5   :  { %7302 = vmatprep.mubr.bf16.mxu1 %v21813_v30 }
  0xca   :  { %7230 = vmatpush1.bf16.xpose.msra.mxu0 %v19895_v21  ;;  %v19990_v21 = vld [vmem:[#allocation5 + $0x464] ss:$24 sps:$4 sm:$0xff]  }
  0xcb   :  { %7273 = vmatpush1.bf16.xpose.msra.mxu1 %v19898_v22  ;;  %7231 = vmatprep.subr.bf16.mxu0 %v19903_v23  ;;  %v89_v22 = vld [vmem:[#allocation2 + $0x20] sm:$0xff]  ;;  %v95_v23 = vld [vmem:[#allocation2 + $0x50] sm:$0xff] }
  0xcc   :  { %7274 = vmatprep.subr.bf16.mxu1 %v19906_v24  ;;  %v19985_v24 = vld [vmem:[#allocation5 + $0x458] ss:$24 sps:$4 sm:$0xff]  }
  0xd2   :  { %7232 = vmatpush1.bf16.xpose.msra.mxu0 %v19901_v25  ;;  %v19988_v25 = vld [vmem:[#allocation5 + $0x460] ss:$24 sps:$4 sm:$0xff]  }
  0xd3   :  { %7275 = vmatpush1.bf16.xpose.msra.mxu1 %v19904_v26  ;;  %7233 = vmatprep.subr.bf16.mxu0 %v19909_v27  ;;  %v21829_v26 = vpack.c.bf16 %v95_v23, %v89_v22  ;;  %v19993_v27 = vld [vmem:[#allocation5 + $0x42c] ss:$24 sps:$4 sm:$0xff]   ;;  %v20048_v22 = vld [vmem:[#allocation5 + $0x580] ss:$24 sps:$4 sm:$0xff]  }
  0xd4   :  { %7276 = vmatprep.subr.bf16.mxu1 %v19912_v28  ;;  %v19996_v28 = vld [vmem:[#allocation5 + $0x434] ss:$24 sps:$4 sm:$0xff]  }
  0xd5   :  { %v20053_v23 = vld [vmem:[#allocation5 + $0x54c] ss:$24 sps:$4 sm:$0xff]  }
  0xda   :  { %7234 = vmatpush1.bf16.xpose.msra.mxu0 %v19907_v29  ;;  %v19991_v29 = vld [vmem:[#allocation5 + $0x428] ss:$24 sps:$4 sm:$0xff]  }
  0xdb   :  { %7277 = vmatpush1.bf16.xpose.msra.mxu1 %v19910_v32  ;;  %7235 = vmatprep.subr.bf16.mxu0 %v19915_v33  ;;  %v19994_v32 = vld [vmem:[#allocation5 + $0x430] ss:$24 sps:$4 sm:$0xff]   ;;  %v19999_v33 = vld [vmem:[#allocation5 + $0x3fc] ss:$24 sps:$4 sm:$0xff]  }
  0xdc   :  { %7278 = vmatprep.subr.bf16.mxu1 %v19918_v34  ;;  %v20002_v34 = vld [vmem:[#allocation5 + $0x404] ss:$24 sps:$4 sm:$0xff]  }
  0xe2   :  { %7236 = vmatpush1.bf16.xpose.msra.mxu0 %v19913_v35  ;;  %v19997_v35 = vld [vmem:[#allocation5 + $0x3f8] ss:$24 sps:$4 sm:$0xff]  }
  0xe3   :  { %7279 = vmatpush1.bf16.xpose.msra.mxu1 %v19916_v36  ;;  %7237 = vmatprep.subr.bf16.mxu0 %v19921_v37  ;;  %v20000_v36 = vld [vmem:[#allocation5 + $0x400] ss:$24 sps:$4 sm:$0xff]   ;;  %v20005_v37 = vld [vmem:[#allocation5 + $0x3cc] ss:$24 sps:$4 sm:$0xff]  }
  0xe4   :  { %7280 = vmatprep.subr.bf16.mxu1 %v19924_v38  ;;  %v20008_v38 = vld [vmem:[#allocation5 + $0x3d4] ss:$24 sps:$4 sm:$0xff]  }
  0xea   :  { %7238 = vmatpush1.bf16.xpose.msra.mxu0 %v19919_v39  ;;  %v20003_v39 = vld [vmem:[#allocation5 + $0x3c8] ss:$24 sps:$4 sm:$0xff]  }
  0xeb   :  { %7281 = vmatpush1.bf16.xpose.msra.mxu1 %v19922_v40  ;;  %7239 = vmatprep.subr.bf16.mxu0 %v19927_v41  ;;  %v20006_v40 = vld [vmem:[#allocation5 + $0x3d0] ss:$24 sps:$4 sm:$0xff]   ;;  %v20011_v41 = vld [vmem:[#allocation5 + $0x39c] ss:$24 sps:$4 sm:$0xff]  }
  0xec   :  { %7282 = vmatprep.subr.bf16.mxu1 %v19930_v42  ;;  %v20014_v42 = vld [vmem:[#allocation5 + $0x3a4] ss:$24 sps:$4 sm:$0xff]  }
  0xf2   :  { %7240 = vmatpush1.bf16.xpose.msra.mxu0 %v19925_v43  ;;  %v20009_v43 = vld [vmem:[#allocation5 + $0x398] ss:$24 sps:$4 sm:$0xff]  }
  0xf3   :  { %7283 = vmatpush1.bf16.xpose.msra.mxu1 %v19928_v44  ;;  %7241 = vmatprep.subr.bf16.mxu0 %v19933_v45  ;;  %v20012_v44 = vld [vmem:[#allocation5 + $0x3a0] ss:$24 sps:$4 sm:$0xff]   ;;  %v20017_v45 = vld [vmem:[#allocation5 + $0x36c] ss:$24 sps:$4 sm:$0xff]  }
  0xf4   :  { %7284 = vmatprep.subr.bf16.mxu1 %v19936_v46  ;;  %v20020_v46 = vld [vmem:[#allocation5 + $0x374] ss:$24 sps:$4 sm:$0xff]  }
  0xfa   :  { %7242 = vmatpush1.bf16.xpose.msra.mxu0 %v19931_v47  ;;  %v20015_v47 = vld [vmem:[#allocation5 + $0x368] ss:$24 sps:$4 sm:$0xff]  }
  0xfb   :  { %7285 = vmatpush1.bf16.xpose.msra.mxu1 %v19934_v48  ;;  %7243 = vmatprep.subr.bf16.mxu0 %v19939_v49  ;;  %v20018_v48 = vld [vmem:[#allocation5 + $0x370] ss:$24 sps:$4 sm:$0xff]   ;;  %v20023_v49 = vld [vmem:[#allocation5 + $0x33c] ss:$24 sps:$4 sm:$0xff]  }
  0xfc   :  { %7286 = vmatprep.subr.bf16.mxu1 %v19942_v50  ;;  %v20026_v50 = vld [vmem:[#allocation5 + $0x344] ss:$24 sps:$4 sm:$0xff]  }
 0x102   :  { %7244 = vmatpush2.bf16.xpose.msra.mxu0 %v19937_v51  ;;  %v20021_v51 = vld [vmem:[#allocation5 + $0x338] ss:$24 sps:$4 sm:$0xff]  }
 0x103   :  { %7287 = vmatpush2.bf16.xpose.msra.mxu1 %v19940_v52  ;;  %7245 = vmatprep.subr.bf16.mxu0 %v19945_v53  ;;  %v20024_v52 = vld [vmem:[#allocation5 + $0x340] ss:$24 sps:$4 sm:$0xff]   ;;  %v20029_v53 = vld [vmem:[#allocation5 + $0x30c] ss:$24 sps:$4 sm:$0xff]  }
 0x104   :  { %7288 = vmatprep.subr.bf16.mxu1 %v19948_v54  ;;  %v20032_v54 = vld [vmem:[#allocation5 + $0x314] ss:$24 sps:$4 sm:$0xff]  }
 0x10a   :  { %7246 = vmatpush2.bf16.xpose.msra.mxu0 %v19943_v55  ;;  %v1261_v55 = vlaneseq }
 0x10b   :  { %7289 = vmatpush2.bf16.xpose.msra.mxu1 %v19946_v56  ;;  %7247 = vmatprep.subr.bf16.mxu0 %v19951_v57  ;;  %v20027_v56 = vld [vmem:[#allocation5 + $0x308] ss:$24 sps:$4 sm:$0xff]  }
 0x10c   :  { %7290 = vmatprep.subr.bf16.mxu1 %v19954_v58  ;;  %v20030_v57 = vld [vmem:[#allocation5 + $0x310] ss:$24 sps:$4 sm:$0xff]   ;;  %v20035_v58 = vld [vmem:[#allocation5 + $0x5dc] ss:$24 sps:$4 sm:$0xff]  }
 0x112   :  { %7248 = vmatpush2.bf16.xpose.msra.mxu0 %v19949_v59  ;;  %v20038_v59 = vld [vmem:[#allocation5 + $0x5e4] ss:$24 sps:$4 sm:$0xff]  }
 0x113   :  { %7291 = vmatpush2.bf16.xpose.msra.mxu1 %v19952_v60  ;;  %7249 = vmatprep.subr.bf16.mxu0 %v19957_v61  ;;  %v21835_v60 = vshrl.u32 %v1261_v55, 7  ;;  %v1255_v61 = vld [vmem:[#allocation7] sm:$0xff]  ;;  %v20098_v55 = vld [vmem:[#allocation5 + $0x6fc] ss:$24 sps:$4 sm:$0xff]  }
 0x114   :  { %7292 = vmatprep.subr.bf16.mxu1 %v19960_v62 }
 0x115   :  { %v21838_v62 = vsub.s32 0, %v21835_v60 }
 0x117   :  { %22537 = vst [vmem:[#allocation16_spill] sm:$0xff] %v21838_v62 }
 0x11a   :  { %7250 = vmatpush2.bf16.xpose.msra.mxu0 %v19955_v63  ;;  %v20033_v63 = vld [vmem:[#allocation5 + $0x5d8] ss:$24 sps:$4 sm:$0xff]  }
 0x11b   :  { %7293 = vmatpush2.bf16.xpose.msra.mxu1 %v19958_v0  ;;  %7251 = vmatprep.subr.bf16.mxu0 %v19963_v1  ;;  %v20036_v0 = vld [vmem:[#allocation5 + $0x5e0] ss:$24 sps:$4 sm:$0xff]   ;;  %v1264_v1 = vrot.slane %v1255_v61, %v21838_v62 }
 0x11c   :  { %7294 = vmatprep.subr.bf16.mxu1 %v19966_v2  ;;  %v20041_v2 = vld [vmem:[#allocation5 + $0x5ac] ss:$24 sps:$4 sm:$0xff]   ;;  %v20099_v61 = vld [vmem:[#allocation5 + $0x6c0] ss:$24 sps:$4 sm:$0xff]  }
 0x122   :  { %7252 = vmatpush2.bf16.xpose.msra.mxu0 %v19961_v3  ;;  %v20044_v3 = vld [vmem:[#allocation5 + $0x5b4] ss:$24 sps:$4 sm:$0xff]  }
 0x123   :  { %7295 = vmatpush2.bf16.xpose.msra.mxu1 %v19964_v4  ;;  %7253 = vmatprep.subr.bf16.mxu0 %v19969_v5 }
 0x124   :  { %7296 = vmatprep.subr.bf16.mxu1 %v19972_v6 }
 0x12a   :  { %7254 = vmatpush2.bf16.xpose.msra.mxu0 %v19967_v7 }
 0x12b   :  { %7297 = vmatpush2.bf16.xpose.msra.mxu1 %v19970_v8  ;;  %7255 = vmatprep.subr.bf16.mxu0 %v19975_v9 }
 0x12c   :  { %7298 = vmatprep.subr.bf16.mxu1 %v19978_v10  ;;  %v20039_v10 = vld [vmem:[#allocation5 + $0x5a8] ss:$24 sps:$4 sm:$0xff]  }
 0x132   :  { %7256 = vmatpush2.bf16.xpose.msra.mxu0 %v19973_v11  ;;  %v20042_v11 = vld [vmem:[#allocation5 + $0x5b0] ss:$24 sps:$4 sm:$0xff]  }
 0x133   :  { %7299 = vmatpush2.bf16.xpose.msra.mxu1 %v19976_v12  ;;  %7257 = vmatprep.subr.bf16.mxu0 %v19981_v13  ;;  %v20047_v13 = vld [vmem:[#allocation5 + $0x57c] ss:$24 sps:$4 sm:$0xff]  }
 0x134   :  { %7300 = vmatprep.subr.bf16.mxu1 %v19984_v14  ;;  %v20050_v14 = vld [vmem:[#allocation5 + $0x584] ss:$24 sps:$4 sm:$0xff]  }
 0x13a   :  { %7258 = vmatpush2.bf16.xpose.msra.mxu0 %v19979_v15 }
 0x13b   :  { %7301 = vmatpush2.bf16.xpose.msra.mxu1 %v19982_v18  ;;  %7313 = vmatprep.subr.bf16.mxu0 %v19987_v19 }
 0x13c   :  { %7356 = vmatprep.subr.bf16.mxu1 %v19990_v21  ;;  %v20045_v21 = vld [vmem:[#allocation5 + $0x578] ss:$24 sps:$4 sm:$0xff]  }
 0x141   :  { %7260 = vmatmul.mubr.bf16.vlgmr.msra.gmra.mxu0 %v21829_v26 }
 0x142   :  { %7303 = vmatmul.mubr.bf16.vlgmr.msra.gmra.mxu1 %v21819_v16  ;;  %7314 = vmatpush1.bf16.xpose.msra.mxu0 %v19985_v24  ;;  %v20056_v24 = vld [vmem:[#allocation5 + $0x554] ss:$24 sps:$4 sm:$0xff]  }
 0x143   :  { %7357 = vmatpush1.bf16.xpose.msra.mxu1 %v19988_v25  ;;  %7315 = vmatprep.subr.bf16.mxu0 %v19993_v27  ;;  %v20051_v25 = vld [vmem:[#allocation5 + $0x548] ss:$24 sps:$4 sm:$0xff]  }
 0x144   :  { %7358 = vmatprep.subr.bf16.mxu1 %v19996_v28  ;;  %7345 = vmatprep.mubr.bf16.mxu0 %v21815_v31  ;;  %v20054_v27 = vld [vmem:[#allocation5 + $0x550] ss:$24 sps:$4 sm:$0xff]   ;;  %v20059_v28 = vld [vmem:[#allocation5 + $0x51c] ss:$24 sps:$4 sm:$0xff]  }
 0x145   :  { %7388 = vmatprep.mubr.bf16.mxu1 %v21823_v20 }
 0x14a   :  { %7316 = vmatpush1.bf16.xpose.msra.mxu0 %v19991_v29  ;;  %v20062_v29 = vld [vmem:[#allocation5 + $0x524] ss:$24 sps:$4 sm:$0xff]  }
 0x14b   :  { %7359 = vmatpush1.bf16.xpose.msra.mxu1 %v19994_v32  ;;  %7317 = vmatprep.subr.bf16.mxu0 %v19999_v33  ;;  %v20057_v32 = vld [vmem:[#allocation5 + $0x518] ss:$24 sps:$4 sm:$0xff]  }
 0x14c   :  { %7360 = vmatprep.subr.bf16.mxu1 %v20002_v34  ;;  %v20060_v33 = vld [vmem:[#allocation5 + $0x520] ss:$24 sps:$4 sm:$0xff]   ;;  %v20065_v34 = vld [vmem:[#allocation5 + $0x4ec] ss:$24 sps:$4 sm:$0xff]  }
 0x152   :  { %7318 = vmatpush1.bf16.xpose.msra.mxu0 %v19997_v35  ;;  %v20068_v35 = vld [vmem:[#allocation5 + $0x4f4] ss:$24 sps:$4 sm:$0xff]  }
 0x153   :  { %7361 = vmatpush1.bf16.xpose.msra.mxu1 %v20000_v36  ;;  %7319 = vmatprep.subr.bf16.mxu0 %v20005_v37  ;;  %v20063_v36 = vld [vmem:[#allocation5 + $0x4e8] ss:$24 sps:$4 sm:$0xff]  }
 0x154   :  { %7362 = vmatprep.subr.bf16.mxu1 %v20008_v38  ;;  %v20066_v37 = vld [vmem:[#allocation5 + $0x4f0] ss:$24 sps:$4 sm:$0xff]   ;;  %v20071_v38 = vld [vmem:[#allocation5 + $0x4bc] ss:$24 sps:$4 sm:$0xff]  }
 0x15a   :  { %7320 = vmatpush1.bf16.xpose.msra.mxu0 %v20003_v39  ;;  %v20074_v39 = vld [vmem:[#allocation5 + $0x4c4] ss:$24 sps:$4 sm:$0xff]  }
 0x15b   :  { %7363 = vmatpush1.bf16.xpose.msra.mxu1 %v20006_v40  ;;  %7321 = vmatprep.subr.bf16.mxu0 %v20011_v41  ;;  %v20069_v40 = vld [vmem:[#allocation5 + $0x4b8] ss:$24 sps:$4 sm:$0xff]  }
 0x15c   :  { %7364 = vmatprep.subr.bf16.mxu1 %v20014_v42  ;;  %v20072_v41 = vld [vmem:[#allocation5 + $0x4c0] ss:$24 sps:$4 sm:$0xff]   ;;  %v20077_v42 = vld [vmem:[#allocation5 + $0x48c] ss:$24 sps:$4 sm:$0xff]  }
 0x162   :  { %7322 = vmatpush1.bf16.xpose.msra.mxu0 %v20009_v43  ;;  %v20080_v43 = vld [vmem:[#allocation5 + $0x494] ss:$24 sps:$4 sm:$0xff]  }
 0x163   :  { %7365 = vmatpush1.bf16.xpose.msra.mxu1 %v20012_v44  ;;  %7323 = vmatprep.subr.bf16.mxu0 %v20017_v45  ;;  %v20075_v44 = vld [vmem:[#allocation5 + $0x488] ss:$24 sps:$4 sm:$0xff]  }
 0x164   :  { %7366 = vmatprep.subr.bf16.mxu1 %v20020_v46  ;;  %v20078_v45 = vld [vmem:[#allocation5 + $0x490] ss:$24 sps:$4 sm:$0xff]   ;;  %v20083_v46 = vld [vmem:[#allocation5 + $0x754] ss:$24 sps:$4 sm:$0xff]  }
 0x16a   :  { %7324 = vmatpush1.bf16.xpose.msra.mxu0 %v20015_v47  ;;  %v20086_v47 = vld [vmem:[#allocation5 + $0x75c] ss:$24 sps:$4 sm:$0xff]  }
 0x16b   :  { %7367 = vmatpush1.bf16.xpose.msra.mxu1 %v20018_v48  ;;  %7325 = vmatprep.subr.bf16.mxu0 %v20023_v49  ;;  %v20081_v48 = vld [vmem:[#allocation5 + $0x750] ss:$24 sps:$4 sm:$0xff]  }
 0x16c   :  { %7368 = vmatprep.subr.bf16.mxu1 %v20026_v50  ;;  %v20084_v49 = vld [vmem:[#allocation5 + $0x758] ss:$24 sps:$4 sm:$0xff]   ;;  %v20089_v50 = vld [vmem:[#allocation5 + $0x724] ss:$24 sps:$4 sm:$0xff]  }
 0x172   :  { %7326 = vmatpush1.bf16.xpose.msra.mxu0 %v20021_v51  ;;  %v20092_v51 = vld [vmem:[#allocation5 + $0x72c] ss:$24 sps:$4 sm:$0xff]  }
 0x173   :  { %7369 = vmatpush1.bf16.xpose.msra.mxu1 %v20024_v52  ;;  %7327 = vmatprep.subr.bf16.mxu0 %v20029_v53  ;;  %v20087_v52 = vld [vmem:[#allocation5 + $0x720] ss:$24 sps:$4 sm:$0xff]  }
 0x174   :  { %7370 = vmatprep.subr.bf16.mxu1 %v20032_v54  ;;  %v20090_v53 = vld [vmem:[#allocation5 + $0x728] ss:$24 sps:$4 sm:$0xff]   ;;  %v20095_v54 = vld [vmem:[#allocation5 + $0x6f4] ss:$24 sps:$4 sm:$0xff]  }
 0x17a   :  { %7328 = vmatpush1.bf16.xpose.msra.mxu0 %v20027_v56  ;;  %v20093_v56 = vld [vmem:[#allocation5 + $0x6f0] ss:$24 sps:$4 sm:$0xff]  }
 0x17b   :  { %7371 = vmatpush1.bf16.xpose.msra.mxu1 %v20030_v57  ;;  %7329 = vmatprep.subr.bf16.mxu0 %v20035_v58  ;;  %v20096_v57 = vld [vmem:[#allocation5 + $0x6f8] ss:$24 sps:$4 sm:$0xff]   ;;  %v20101_v58 = vld [vmem:[#allocation5 + $0x6c4] ss:$24 sps:$4 sm:$0xff]  }
 0x17c   :  { %7372 = vmatprep.subr.bf16.mxu1 %v20038_v59  ;;  %v20104_v59 = vld [vmem:[#allocation5 + $0x6cc] ss:$24 sps:$4 sm:$0xff]  }
 0x181   :  { %v7175_v4 = vpop.f32.mrf.mxu0 }
 0x182   :  { %v7218_v5 = vpop.f32.mrf.mxu1  ;;  %v7176_v6 = vadd.f32 %v7175_v4, %v1264_v1  ;;  %7330 = vmatpush2.bf16.xpose.msra.mxu0 %v20033_v63  ;;  %v20102_v63 = vld [vmem:[#allocation5 + $0x6c8] ss:$24 sps:$4 sm:$0xff]   ;;  %v20113_v4 = vld [vmem:[#allocation5 + $0x664] ss:$24 sps:$4 sm:$0xff]  }
 0x183   :  { %7373 = vmatpush2.bf16.xpose.msra.mxu1 %v20036_v0  ;;  %v21841_v7 = vpop.f32.mrf.mxu0  ;;  %7331 = vmatprep.subr.bf16.mxu0 %v20041_v2  ;;  %v20107_v0 = vld [vmem:[#allocation5 + $0x694] ss:$24 sps:$4 sm:$0xff]   ;;  %v20105_v2 = vld [vmem:[#allocation5 + $0x690] ss:$24 sps:$4 sm:$0xff]  }
 0x184   :  { %v21843_v8 = vpop.f32.mrf.mxu1  ;;  %7374 = vmatprep.subr.bf16.mxu1 %v20044_v3  ;;  %v21845_v9 = vadd.f32 %v7218_v5, %v7176_v6  ;;  %v20108_v3 = vld [vmem:[#allocation5 + $0x698] ss:$24 sps:$4 sm:$0xff]   ;;  %v20116_v5 = vld [vmem:[#allocation5 + $0x66c] ss:$24 sps:$4 sm:$0xff]  }
 0x185   :  { %v7179_v12 = vpop.f32.mrf.mxu0  ;;  %v20111_v6 = vld [vmem:[#allocation5 + $0x660] ss:$24 sps:$4 sm:$0xff]  }
 0x186   :  { %v7180_v15 = vadd.f32 %v7179_v12, %v1264_v1  ;;  %v7222_v18 = vpop.f32.mrf.mxu1  ;;  %v20110_v1 = vld [vmem:[#allocation5 + $0x69c] ss:$24 sps:$4 sm:$0xff]  }
 0x187   :  { %v20122_v12 = vld [vmem:[#allocation5 + $0x63c] ss:$24 sps:$4 sm:$0xff]  }
 0x188   :  { %v21847_v19 = vadd.f32 %v7222_v18, %v7180_v15  ;;  %v20125_v15 = vld [vmem:[#allocation5 + $0x604] ss:$24 sps:$4 sm:$0xff]  }
 0x189   :  { %v20128_v18 = vld [vmem:[#allocation5 + $0x60c] ss:$24 sps:$4 sm:$0xff]  }
 0x18a   :  { %7332 = vmatpush2.bf16.xpose.msra.mxu0 %v20039_v10  ;;  %v20114_v10 = vld [vmem:[#allocation5 + $0x668] ss:$24 sps:$4 sm:$0xff]  }
 0x18b   :  { %7375 = vmatpush2.bf16.xpose.msra.mxu1 %v20042_v11  ;;  %7333 = vmatprep.subr.bf16.mxu0 %v20047_v13  ;;  %v20119_v11 = vld [vmem:[#allocation5 + $0x634] ss:$24 sps:$4 sm:$0xff]   ;;  %v20117_v13 = vld [vmem:[#allocation5 + $0x630] ss:$24 sps:$4 sm:$0xff]  }
 0x18c   :  { %7376 = vmatprep.subr.bf16.mxu1 %v20050_v14  ;;  %v20120_v14 = vld [vmem:[#allocation5 + $0x638] ss:$24 sps:$4 sm:$0xff]  }
 0x192   :  { %7334 = vmatpush2.bf16.xpose.msra.mxu0 %v20045_v21  ;;  %v20123_v21 = vld [vmem:[#allocation5 + $0x600] ss:$24 sps:$4 sm:$0xff]  }
 0x193   :  { %7377 = vmatpush2.bf16.xpose.msra.mxu1 %v20048_v22  ;;  %7335 = vmatprep.subr.bf16.mxu0 %v20053_v23  ;;  %v20126_v22 = vld [vmem:[#allocation5 + $0x608] ss:$24 sps:$4 sm:$0xff]   ;;  %v20131_v23 = vld [vmem:[#allocation5 + $0x8d4] ss:$24 sps:$4 sm:$0xff]  }
 0x194   :  { %7378 = vmatprep.subr.bf16.mxu1 %v20056_v24  ;;  %v20134_v24 = vld [vmem:[#allocation5 + $0x8dc] ss:$24 sps:$4 sm:$0xff]  }
 0x19a   :  { %7336 = vmatpush2.bf16.xpose.msra.mxu0 %v20051_v25  ;;  %v20129_v25 = vld [vmem:[#allocation5 + $0x8d0] ss:$24 sps:$4 sm:$0xff]  }
 0x19b   :  { %7379 = vmatpush2.bf16.xpose.msra.mxu1 %v20054_v27  ;;  %7337 = vmatprep.subr.bf16.mxu0 %v20059_v28  ;;  %v20132_v27 = vld [vmem:[#allocation5 + $0x8d8] ss:$24 sps:$4 sm:$0xff]   ;;  %v20137_v28 = vld [vmem:[#allocation5 + $0x8a4] ss:$24 sps:$4 sm:$0xff]  }
 0x19c   :  { %7380 = vmatprep.subr.bf16.mxu1 %v20062_v29  ;;  %v20140_v29 = vld [vmem:[#allocation5 + $0x8ac] ss:$24 sps:$4 sm:$0xff]  }
 0x1a2   :  { %7338 = vmatpush2.bf16.xpose.msra.mxu0 %v20057_v32  ;;  %v21853_v32 = vpop.f32.mrf.mxu0 }
 0x1a3   :  { %7381 = vmatpush2.bf16.xpose.msra.mxu1 %v20060_v33  ;;  %7339 = vmatprep.subr.bf16.mxu0 %v20065_v34 }
 0x1a4   :  { %7382 = vmatprep.subr.bf16.mxu1 %v20068_v35 }
 0x1aa   :  { %7340 = vmatpush2.bf16.xpose.msra.mxu0 %v20063_v36 }
 0x1ab   :  { %7383 = vmatpush2.bf16.xpose.msra.mxu1 %v20066_v37  ;;  %7341 = vmatprep.subr.bf16.mxu0 %v20071_v38  ;;  %v20135_v37 = vld [vmem:[#allocation5 + $0x8a0] ss:$24 sps:$4 sm:$0xff]  }
 0x1ac   :  { %7384 = vmatprep.subr.bf16.mxu1 %v20074_v39  ;;  %v20138_v38 = vld [vmem:[#allocation5 + $0x8a8] ss:$24 sps:$4 sm:$0xff]  }
 0x1b2   :  { %7342 = vmatpush2.bf16.xpose.msra.mxu0 %v20069_v40  ;;  %v20143_v40 = vld [vmem:[#allocation5 + $0x874] ss:$24 sps:$4 sm:$0xff]  }
 0x1b3   :  { %7385 = vmatpush2.bf16.xpose.msra.mxu1 %v20072_v41  ;;  %7343 = vmatprep.subr.bf16.mxu0 %v20077_v42  ;;  %v20146_v41 = vld [vmem:[#allocation5 + $0x87c] ss:$24 sps:$4 sm:$0xff]  }
 0x1b4   :  { %7386 = vmatprep.subr.bf16.mxu1 %v20080_v43 }
 0x1ba   :  { %7344 = vmatpush2.bf16.xpose.msra.mxu0 %v20075_v44  ;;  %v20144_v44 = vld [vmem:[#allocation5 + $0x878] ss:$24 sps:$4 sm:$0xff]  }
 0x1bb   :  { %7387 = vmatpush2.bf16.xpose.msra.mxu1 %v20078_v45  ;;  %7399 = vmatprep.subr.bf16.mxu0 %v20083_v46  ;;  %v20149_v45 = vld [vmem:[#allocation5 + $0x844] ss:$24 sps:$4 sm:$0xff]  }
 0x1bc   :  { %7442 = vmatprep.subr.bf16.mxu1 %v20086_v47  ;;  %v20152_v46 = vld [vmem:[#allocation5 + $0x84c] ss:$24 sps:$4 sm:$0xff]  }
 0x1c1   :  { %7346 = vmatmul.mubr.bf16.vlgmr.msra.gmra.mxu0 %v21821_v17 }
 0x1c2   :  { %7389 = vmatmul.mubr.bf16.vlgmr.msra.gmra.mxu1 %v21829_v26  ;;  %7400 = vmatpush1.bf16.xpose.msra.mxu0 %v20081_v48  ;;  %v20147_v48 = vld [vmem:[#allocation5 + $0x840] ss:$24 sps:$4 sm:$0xff]  }
 0x1c3   :  { %7443 = vmatpush1.bf16.xpose.msra.mxu1 %v20084_v49  ;;  %7401 = vmatprep.subr.bf16.mxu0 %v20089_v50  ;;  %v20150_v49 = vld [vmem:[#allocation5 + $0x848] ss:$24 sps:$4 sm:$0xff]   ;;  %v20155_v50 = vld [vmem:[#allocation5 + $0x814] ss:$24 sps:$4 sm:$0xff]  }
 0x1c4   :  { %7444 = vmatprep.subr.bf16.mxu1 %v20092_v51  ;;  %7431 = vmatprep.mubr.bf16.mxu0 %v21813_v30  ;;  %v20158_v51 = vld [vmem:[#allocation5 + $0x81c] ss:$24 sps:$4 sm:$0xff]  }
 0x1c5   :  { %7474 = vmatprep.mubr.bf16.mxu1 %v21815_v31 }
 0x1ca   :  { %7402 = vmatpush1.bf16.xpose.msra.mxu0 %v20087_v52 }
 0x1cb   :  { %7445 = vmatpush1.bf16.xpose.msra.mxu1 %v20090_v53  ;;  %7403 = vmatprep.subr.bf16.mxu0 %v20095_v54 }
 0x1cc   :  { %7446 = vmatprep.subr.bf16.mxu1 %v20098_v55 }
 0x1d2   :  { %7404 = vmatpush1.bf16.xpose.msra.mxu0 %v20093_v56 }
 0x1d3   :  { %7447 = vmatpush1.bf16.xpose.msra.mxu1 %v20096_v57  ;;  %7405 = vmatprep.subr.bf16.mxu0 %v20101_v58 }
 0x1d4   :  { %7448 = vmatprep.subr.bf16.mxu1 %v20104_v59  ;;  %v20153_v59 = vld [vmem:[#allocation5 + $0x810] ss:$24 sps:$4 sm:$0xff]  }
 0x1da   :  { %7406 = vmatpush1.bf16.xpose.msra.mxu0 %v20099_v61  ;;  %v20156_v61 = vld [vmem:[#allocation5 + $0x818] ss:$24 sps:$4 sm:$0xff]  }
 0x1db   :  { %7449 = vmatpush1.bf16.xpose.msra.mxu1 %v20102_v63  ;;  %7407 = vmatprep.subr.bf16.mxu0 %v20107_v0  ;;  %v20161_v63 = vld [vmem:[#allocation5 + $0x7e4] ss:$24 sps:$4 sm:$0xff]  }
 0x1dc   :  { %7450 = vmatprep.subr.bf16.mxu1 %v20110_v1  ;;  %v20164_v0 = vld [vmem:[#allocation5 + $0x7ec] ss:$24 sps:$4 sm:$0xff]   ;;  %v20159_v1 = vld [vmem:[#allocation5 + $0x7e0] ss:$24 sps:$4 sm:$0xff]  }
 0x1e2   :  { %7408 = vmatpush1.bf16.xpose.msra.mxu0 %v20105_v2  ;;  %v20162_v2 = vld [vmem:[#allocation5 + $0x7e8] ss:$24 sps:$4 sm:$0xff]  }
 0x1e3   :  { %7451 = vmatpush1.bf16.xpose.msra.mxu1 %v20108_v3  ;;  %7409 = vmatprep.subr.bf16.mxu0 %v20113_v4  ;;  %v20167_v3 = vld [vmem:[#allocation5 + $0x7b4] ss:$24 sps:$4 sm:$0xff]  }
 0x1e4   :  { %7452 = vmatprep.subr.bf16.mxu1 %v20116_v5  ;;  %v20170_v4 = vld [vmem:[#allocation5 + $0x7bc] ss:$24 sps:$4 sm:$0xff]   ;;  %v20165_v5 = vld [vmem:[#allocation5 + $0x7b0] ss:$24 sps:$4 sm:$0xff]  }
 0x1ea   :  { %7410 = vmatpush1.bf16.xpose.msra.mxu0 %v20111_v6  ;;  %v20168_v6 = vld [vmem:[#allocation5 + $0x7b8] ss:$24 sps:$4 sm:$0xff]  }
 0x1eb   :  { %7453 = vmatpush1.bf16.xpose.msra.mxu1 %v20114_v10  ;;  %7411 = vmatprep.subr.bf16.mxu0 %v20119_v11  ;;  %v20173_v10 = vld [vmem:[#allocation5 + $0x784] ss:$24 sps:$4 sm:$0xff]  }
 0x1ec   :  { %7454 = vmatprep.subr.bf16.mxu1 %v20122_v12  ;;  %v20176_v11 = vld [vmem:[#allocation5 + $0x78c] ss:$24 sps:$4 sm:$0xff]   ;;  %v20171_v12 = vld [vmem:[#allocation5 + $0x780] ss:$24 sps:$4 sm:$0xff]  }
 0x1f2   :  { %7412 = vmatpush1.bf16.xpose.msra.mxu0 %v20117_v13  ;;  %v20174_v13 = vld [vmem:[#allocation5 + $0x788] ss:$24 sps:$4 sm:$0xff]  }
 0x1f3   :  { %7455 = vmatpush1.bf16.xpose.msra.mxu1 %v20120_v14  ;;  %7413 = vmatprep.subr.bf16.mxu0 %v20125_v15  ;;  %v20179_v14 = vld [vmem:[#allocation5 + $0x764] ss:$24 sps:$4 sm:$0xff]   ;;  %v20182_v15 = vld [vmem:[#allocation5 + $0xa54] ss:$24 sps:$4 sm:$0xff]  }
 0x1f4   :  { %7456 = vmatprep.subr.bf16.mxu1 %v20128_v18  ;;  %v20177_v18 = vld [vmem:[#allocation5 + $0x760] ss:$24 sps:$4 sm:$0xff]  }
 0x1fa   :  { %7414 = vmatpush1.bf16.xpose.msra.mxu0 %v20123_v21  ;;  %v20180_v21 = vld [vmem:[#allocation5 + $0xa50] ss:$24 sps:$4 sm:$0xff]  }
 0x1fb   :  { %7457 = vmatpush1.bf16.xpose.msra.mxu1 %v20126_v22  ;;  %7415 = vmatprep.subr.bf16.mxu0 %v20131_v23  ;;  %v20185_v22 = vld [vmem:[#allocation5 + $0x734] ss:$24 sps:$4 sm:$0xff]   ;;  %v20188_v23 = vld [vmem:[#allocation5 + $0xa24] ss:$24 sps:$4 sm:$0xff]  }
 0x1fc   :  { %7458 = vmatprep.subr.bf16.mxu1 %v20134_v24  ;;  %v20183_v24 = vld [vmem:[#allocation5 + $0x730] ss:$24 sps:$4 sm:$0xff]  }
 0x201   :  { %v7261_v33 = vpop.f32.mrf.mxu0 }
 0x202   :  { %v7262_v34 = vadd.f32 %v7261_v33, %v21845_v9  ;;  %7416 = vmatpush2.bf16.xpose.msra.mxu0 %v20129_v25  ;;  %v20141_v9 = vld [vmem:[#allocation5 + $0x870] ss:$24 sps:$4 sm:$0xff]   ;;  %v20186_v25 = vld [vmem:[#allocation5 + $0xa20] ss:$24 sps:$4 sm:$0xff]  }
 0x203   :  { %7459 = vmatpush2.bf16.xpose.msra.mxu1 %v20132_v27  ;;  %v21856_v35 = vpop.f32.mrf.mxu0  ;;  %7417 = vmatprep.subr.bf16.mxu0 %v20137_v28  ;;  %v20191_v27 = vld [vmem:[#allocation5 + $0x704] ss:$24 sps:$4 sm:$0xff]   ;;  %v20194_v28 = vld [vmem:[#allocation5 + $0x9f4] ss:$24 sps:$4 sm:$0xff]   ;;  %v20192_v33 = vld [vmem:[#allocation5 + $0x9f0] ss:$24 sps:$4 sm:$0xff]  }
 0x204   :  { %7460 = vmatprep.subr.bf16.mxu1 %v20140_v29  ;;  %v8738_v36 = vmul.f32 0.70710677, %v7262_v34  ;;  %v8689_v53 = vmul.f32 0.5, %v7262_v34  ;;  %v20189_v29 = vld [vmem:[#allocation5 + $0x700] ss:$24 sps:$4 sm:$0xff]  }
 0x205   :  { %v7265_v39 = vpop.f32.mrf.mxu0  ;;  %v20197_v34 = vld [vmem:[#allocation5 + $0x6d4] ss:$24 sps:$4 sm:$0xff]  }
 0x206   :  { %21521 = verf.f32 %v8738_v36  ;;  %v7266_v42 = vadd.f32 %v7265_v39, %v21847_v19  ;;  %v20200_v36 = vld [vmem:[#allocation5 + $0x9c4] ss:$24 sps:$4 sm:$0xff]  }
 0x207   :  { %v20203_v39 = vld [vmem:[#allocation5 + $0x6a4] ss:$24 sps:$4 sm:$0xff]  }
 0x208   :  { %v8762_v43 = vmul.f32 0.70710677, %v7266_v42  ;;  %v8713_v54 = vmul.f32 0.5, %v7266_v42  ;;  %v20204_v42 = vld [vmem:[#allocation5 + $0x990] ss:$24 sps:$4 sm:$0xff]  }
 0x20a   :  { %21523 = verf.f32 %v8762_v43  ;;  %7418 = vmatpush2.bf16.xpose.msra.mxu0 %v20135_v37  ;;  %v20195_v37 = vld [vmem:[#allocation5 + $0x6d0] ss:$24 sps:$4 sm:$0xff]   ;;  %v20209_v43 = vld [vmem:[#allocation5 + $0x674] ss:$24 sps:$4 sm:$0xff]  }
 0x20b   :  { %7461 = vmatpush2.bf16.xpose.msra.mxu1 %v20138_v38  ;;  %7419 = vmatprep.subr.bf16.mxu0 %v20143_v40  ;;  %v20198_v38 = vld [vmem:[#allocation5 + $0x9c0] ss:$24 sps:$4 sm:$0xff]   ;;  %v20206_v40 = vld [vmem:[#allocation5 + $0x994] ss:$24 sps:$4 sm:$0xff]  }
 0x20c   :  { %7462 = vmatprep.subr.bf16.mxu1 %v20146_v41  ;;  %v20201_v41 = vld [vmem:[#allocation5 + $0x6a0] ss:$24 sps:$4 sm:$0xff]  }
 0x212   :  { %7420 = vmatpush2.bf16.xpose.msra.mxu0 %v20141_v9  ;;  %v20212_v9 = vld [vmem:[#allocation5 + $0x964] ss:$24 sps:$4 sm:$0xff]  }
 0x213   :  { %7463 = vmatpush2.bf16.xpose.msra.mxu1 %v20144_v44  ;;  %v21522_v47 = vpop.eup %21521  ;;  %7421 = vmatprep.subr.bf16.mxu0 %v20149_v45  ;;  %v20207_v44 = vld [vmem:[#allocation5 + $0x670] ss:$24 sps:$4 sm:$0xff]   ;;  %v20210_v45 = vld [vmem:[#allocation5 + $0x960] ss:$24 sps:$4 sm:$0xff]  }
 0x214   :  { %7464 = vmatprep.subr.bf16.mxu1 %v20152_v46  ;;  %v8834_v19 = vadd.f32 1.0, %v21522_v47  ;;  %v20215_v46 = vld [vmem:[#allocation5 + $0x644] ss:$24 sps:$4 sm:$0xff]   ;;  %v20218_v47 = vld [vmem:[#allocation5 + $0x934] ss:$24 sps:$4 sm:$0xff]  }
 0x216   :  { %v8882_v56 = vmul.f32 %v8834_v19, %v8689_v53  ;;  %v21865_v19 = vpop.f32.mrf.mxu1  ;;  %v20219_v53 = vld [vmem:[#allocation5 + $0x610] ss:$24 sps:$4 sm:$0xff]  }
 0x217   :  { %v21524_v52 = vpop.eup %21523 }
 0x218   :  { %v8858_v55 = vadd.f32 1.0, %v21524_v52  ;;  %v7304_v52 = vpop.f32.mrf.mxu1 }
 0x21a   :  { %v8906_v57 = vmul.f32 %v8858_v55, %v8713_v54  ;;  %7422 = vmatpush2.bf16.xpose.msra.mxu0 %v20147_v48  ;;  %v20213_v48 = vld [vmem:[#allocation5 + $0x640] ss:$24 sps:$4 sm:$0xff]   ;;  %v21867_v55 = vpop.f32.mrf.mxu1 }
 0x21b   :  { %7465 = vmatpush2.bf16.xpose.msra.mxu1 %v20150_v49  ;;  %7423 = vmatprep.subr.bf16.mxu0 %v20155_v50  ;;  %v20216_v49 = vld [vmem:[#allocation5 + $0x930] ss:$24 sps:$4 sm:$0xff]   ;;  %v20221_v50 = vld [vmem:[#allocation5 + $0x614] ss:$24 sps:$4 sm:$0xff]   ;;  %v20222_v54 = vld [vmem:[#allocation5 + $0x900] ss:$24 sps:$4 sm:$0xff]  }
 0x21c   :  { %7466 = vmatprep.subr.bf16.mxu1 %v20158_v51  ;;  %v21859_v58 = vpack.c.bf16 %v8906_v57, %v8882_v56  ;;  %v20224_v51 = vld [vmem:[#allocation5 + $0x904] ss:$24 sps:$4 sm:$0xff]   ;;  %v20230_v57 = vld [vmem:[#allocation5 + $0xbd4] ss:$24 sps:$4 sm:$0xff]  }
 0x21d   :  { %v20227_v56 = vld [vmem:[#allocation5 + $0x8e4] ss:$24 sps:$4 sm:$0xff]  }
 0x21e   :  { %22538 = vst [vmem:[#allocation17_spill] sm:$0xff] %v21859_v58 }
 0x222   :  { %7424 = vmatpush2.bf16.xpose.msra.mxu0 %v20153_v59  ;;  %v21870_v59 = vsub.s32 2, %v21835_v60 }
 0x223   :  { %7467 = vmatpush2.bf16.xpose.msra.mxu1 %v20156_v61  ;;  %7425 = vmatprep.subr.bf16.mxu0 %v20161_v63  ;;  %v7308_v61 = vpop.f32.mrf.mxu1  ;;  %v21872_v63 = vld [vmem:[#allocation7] sm:$0xff] }
 0x224   :  { %7468 = vmatprep.subr.bf16.mxu1 %v20164_v0  ;;  %22539 = vst [vmem:[#allocation18_spill] sm:$0xff] %v21870_v59  ;;  %v1272_v0 = vrot.slane %v21872_v63, %v21870_v59 }
 0x22a   :  { %7426 = vmatpush2.bf16.xpose.msra.mxu0 %v20159_v1  ;;  %v20225_v1 = vld [vmem:[#allocation5 + $0x8e0] ss:$24 sps:$4 sm:$0xff]  }
 0x22b   :  { %7469 = vmatpush2.bf16.xpose.msra.mxu1 %v20162_v2  ;;  %7427 = vmatprep.subr.bf16.mxu0 %v20167_v3  ;;  %v20228_v2 = vld [vmem:[#allocation5 + $0xbd0] ss:$24 sps:$4 sm:$0xff]   ;;  %v21876_v3 = vpop.f32.mrf.mxu0 }
 0x22c   :  { %7470 = vmatprep.subr.bf16.mxu1 %v20170_v4  ;;  %v21878_v4 = vpop.f32.mrf.mxu1 }
 0x232   :  { %7428 = vmatpush2.bf16.xpose.msra.mxu0 %v20165_v5  ;;  %v20233_v5 = vld [vmem:[#allocation5 + $0x8b4] ss:$24 sps:$4 sm:$0xff]  }
 0x233   :  { %7471 = vmatpush2.bf16.xpose.msra.mxu1 %v20168_v6  ;;  %7429 = vmatprep.subr.bf16.mxu0 %v20173_v10  ;;  %v20236_v6 = vld [vmem:[#allocation5 + $0xba4] ss:$24 sps:$4 sm:$0xff]   ;;  %v7305_v10 = vadd.f32 %v7304_v52, %v1272_v0 }
 0x234   :  { %7472 = vmatprep.subr.bf16.mxu1 %v20176_v11 }
 0x23a   :  { %7430 = vmatpush2.bf16.xpose.msra.mxu0 %v20171_v12 }
 0x23b   :  { %7473 = vmatpush2.bf16.xpose.msra.mxu1 %v20174_v13  ;;  %7485 = vmatprep.subr.bf16.mxu0 %v20179_v14 }
 0x23c   :  { %7528 = vmatprep.subr.bf16.mxu1 %v20182_v15 }
 0x241   :  { %7432 = vmatmul.mubr.bf16.vlgmr.msra.gmra.mxu0 %v21819_v16 }
 0x242   :  { %7475 = vmatmul.mubr.bf16.vlgmr.msra.gmra.mxu1 %v21821_v17  ;;  %7486 = vmatpush1.bf16.xpose.msra.mxu0 %v20177_v18  ;;  %v7309_v18 = vadd.f32 %v7308_v61, %v1272_v0  ;;  %v20255_v61 = vld [vmem:[#allocation5 + $0x7f0] ss:$24 sps:$4 sm:$0xff]   ;;  %v20258_v0 = vld [vmem:[#allocation5 + $0xae0] ss:$24 sps:$4 sm:$0xff]  }
 0x243   :  { %7529 = vmatpush1.bf16.xpose.msra.mxu1 %v20180_v21  ;;  %7487 = vmatprep.subr.bf16.mxu0 %v20185_v22 }
 0x244   :  { %7530 = vmatprep.subr.bf16.mxu1 %v20188_v23  ;;  %7517 = vmatprep.mubr.bf16.mxu0 %v21823_v20 }
 0x245   :  { %7560 = vmatprep.mubr.bf16.mxu1 %v21813_v30 }
 0x24a   :  { %7488 = vmatpush1.bf16.xpose.msra.mxu0 %v20183_v24 }
 0x24b   :  { %7531 = vmatpush1.bf16.xpose.msra.mxu1 %v20186_v25  ;;  %7489 = vmatprep.subr.bf16.mxu0 %v20191_v27  ;;  %v20231_v25 = vld [vmem:[#allocation5 + $0x8b0] ss:$24 sps:$4 sm:$0xff]   ;;  %v20234_v27 = vld [vmem:[#allocation5 + $0xba0] ss:$24 sps:$4 sm:$0xff]  }
 0x24c   :  { %7532 = vmatprep.subr.bf16.mxu1 %v20194_v28 }
 0x252   :  { %7490 = vmatpush1.bf16.xpose.msra.mxu0 %v20189_v29  ;;  %v20239_v29 = vld [vmem:[#allocation5 + $0x884] ss:$24 sps:$4 sm:$0xff]  }
 0x253   :  { %7533 = vmatpush1.bf16.xpose.msra.mxu1 %v20192_v33  ;;  %7491 = vmatprep.subr.bf16.mxu0 %v20197_v34  ;;  %v20242_v33 = vld [vmem:[#allocation5 + $0xb74] ss:$24 sps:$4 sm:$0xff]  }
 0x254   :  { %7534 = vmatprep.subr.bf16.mxu1 %v20200_v36 }
 0x25a   :  { %7492 = vmatpush1.bf16.xpose.msra.mxu0 %v20195_v37  ;;  %v20237_v37 = vld [vmem:[#allocation5 + $0x880] ss:$24 sps:$4 sm:$0xff]  }
 0x25b   :  { %7535 = vmatpush1.bf16.xpose.msra.mxu1 %v20198_v38  ;;  %7493 = vmatprep.subr.bf16.mxu0 %v20203_v39  ;;  %v20240_v38 = vld [vmem:[#allocation5 + $0xb70] ss:$24 sps:$4 sm:$0xff]   ;;  %v20245_v39 = vld [vmem:[#allocation5 + $0x854] ss:$24 sps:$4 sm:$0xff]  }
 0x25c   :  { %7536 = vmatprep.subr.bf16.mxu1 %v20206_v40  ;;  %v20248_v40 = vld [vmem:[#allocation5 + $0xb44] ss:$24 sps:$4 sm:$0xff]  }
 0x262   :  { %7494 = vmatpush1.bf16.xpose.msra.mxu0 %v20201_v41 }
 0x263   :  { %7537 = vmatpush1.bf16.xpose.msra.mxu1 %v20204_v42  ;;  %7495 = vmatprep.subr.bf16.mxu0 %v20209_v43  ;;  %v20243_v42 = vld [vmem:[#allocation5 + $0x850] ss:$24 sps:$4 sm:$0xff]   ;;  %v20246_v43 = vld [vmem:[#allocation5 + $0xb40] ss:$24 sps:$4 sm:$0xff]  }
 0x264   :  { %7538 = vmatprep.subr.bf16.mxu1 %v20212_v9  ;;  %v20251_v9 = vld [vmem:[#allocation5 + $0x824] ss:$24 sps:$4 sm:$0xff]  }
 0x26a   :  { %7496 = vmatpush1.bf16.xpose.msra.mxu0 %v20207_v44  ;;  %v20254_v44 = vld [vmem:[#allocation5 + $0xb14] ss:$24 sps:$4 sm:$0xff]  }
 0x26b   :  { %7539 = vmatpush1.bf16.xpose.msra.mxu1 %v20210_v45  ;;  %7497 = vmatprep.subr.bf16.mxu0 %v20215_v46 }
 0x26c   :  { %7540 = vmatprep.subr.bf16.mxu1 %v20218_v47 }
 0x272   :  { %7498 = vmatpush1.bf16.xpose.msra.mxu0 %v20213_v48 }
 0x273   :  { %7541 = vmatpush1.bf16.xpose.msra.mxu1 %v20216_v49  ;;  %7499 = vmatprep.subr.bf16.mxu0 %v20221_v50 }
 0x274   :  { %7542 = vmatprep.subr.bf16.mxu1 %v20224_v51 }
 0x27a   :  { %7500 = vmatpush1.bf16.xpose.msra.mxu0 %v20219_v53  ;;  %v20249_v53 = vld [vmem:[#allocation5 + $0x820] ss:$24 sps:$4 sm:$0xff]  }
 0x27b   :  { %7543 = vmatpush1.bf16.xpose.msra.mxu1 %v20222_v54  ;;  %7501 = vmatprep.subr.bf16.mxu0 %v20227_v56  ;;  %v20252_v54 = vld [vmem:[#allocation5 + $0xb10] ss:$24 sps:$4 sm:$0xff]   ;;  %v20257_v56 = vld [vmem:[#allocation5 + $0x7f4] ss:$24 sps:$4 sm:$0xff]  }
 0x27c   :  { %7544 = vmatprep.subr.bf16.mxu1 %v20230_v57  ;;  %v20260_v57 = vld [vmem:[#allocation5 + $0xae4] ss:$24 sps:$4 sm:$0xff]  }
 0x281   :  { %v7347_v11 = vpop.f32.mrf.mxu0 }
 0x282   :  { %v7390_v12 = vpop.f32.mrf.mxu1  ;;  %v7348_v13 = vadd.f32 %v7347_v11, %v7305_v10  ;;  %7502 = vmatpush2.bf16.xpose.msra.mxu0 %v20225_v1  ;;  %v20263_v1 = vld [vmem:[#allocation5 + $0x7c4] ss:$24 sps:$4 sm:$0xff]   ;;  %v20269_v10 = vld [vmem:[#allocation5 + $0x794] ss:$24 sps:$4 sm:$0xff]  }
 0x283   :  { %7545 = vmatpush2.bf16.xpose.msra.mxu1 %v20228_v2  ;;  %v21880_v14 = vpop.f32.mrf.mxu0  ;;  %7503 = vmatprep.subr.bf16.mxu0 %v20233_v5  ;;  %v20266_v2 = vld [vmem:[#allocation5 + $0xab4] ss:$24 sps:$4 sm:$0xff]   ;;  %v20261_v5 = vld [vmem:[#allocation5 + $0x7c0] ss:$24 sps:$4 sm:$0xff]   ;;  %v20272_v11 = vld [vmem:[#allocation5 + $0xa84] ss:$24 sps:$4 sm:$0xff]  }
 0x284   :  { %v21882_v15 = vpop.f32.mrf.mxu1  ;;  %7546 = vmatprep.subr.bf16.mxu1 %v20236_v6  ;;  %v7391_v21 = vadd.f32 %v7390_v12, %v7348_v13  ;;  %v20264_v6 = vld [vmem:[#allocation5 + $0xab0] ss:$24 sps:$4 sm:$0xff]   ;;  %v20270_v13 = vld [vmem:[#allocation5 + $0xa80] ss:$24 sps:$4 sm:$0xff]  }
 0x285   :  { %v7351_v22 = vpop.f32.mrf.mxu0  ;;  %v20267_v12 = vld [vmem:[#allocation5 + $0x790] ss:$24 sps:$4 sm:$0xff]  }
 0x286   :  { %v8740_v23 = vmul.f32 0.70710677, %v7391_v21  ;;  %v7352_v24 = vadd.f32 %v7351_v22, %v7309_v18  ;;  %v7394_v28 = vpop.f32.mrf.mxu1  ;;  %v8691_v47 = vmul.f32 0.5, %v7391_v21  ;;  %v20275_v18 = vld [vmem:[#allocation5 + $0xa5c] ss:$24 sps:$4 sm:$0xff]  }
 0x287   :  { %v20278_v21 = vld [vmem:[#allocation5 + $0xa64] ss:$24 sps:$4 sm:$0xff]   ;;  %v20273_v22 = vld [vmem:[#allocation5 + $0xa58] ss:$24 sps:$4 sm:$0xff]  }
 0x288   :  { %21525 = verf.f32 %v8740_v23  ;;  %v7395_v34 = vadd.f32 %v7394_v28, %v7352_v24  ;;  %v20276_v23 = vld [vmem:[#allocation5 + $0xa60] ss:$24 sps:$4 sm:$0xff]   ;;  %v20281_v24 = vld [vmem:[#allocation5 + $0xa2c] ss:$24 sps:$4 sm:$0xff]   ;;  %v20282_v28 = vld [vmem:[#allocation5 + $0xa30] ss:$24 sps:$4 sm:$0xff]  }
 0x28a   :  { %v8764_v36 = vmul.f32 0.70710677, %v7395_v34  ;;  %7504 = vmatpush2.bf16.xpose.msra.mxu0 %v20231_v25  ;;  %v8715_v48 = vmul.f32 0.5, %v7395_v34  ;;  %v20284_v25 = vld [vmem:[#allocation5 + $0xa34] ss:$24 sps:$4 sm:$0xff]  }
 0x28b   :  { %7547 = vmatpush2.bf16.xpose.msra.mxu1 %v20234_v27  ;;  %7505 = vmatprep.subr.bf16.mxu0 %v20239_v29  ;;  %v20279_v27 = vld [vmem:[#allocation5 + $0xa28] ss:$24 sps:$4 sm:$0xff]   ;;  %v20287_v29 = vld [vmem:[#allocation5 + $0x9fc] ss:$24 sps:$4 sm:$0xff]   ;;  %v20285_v34 = vld [vmem:[#allocation5 + $0x9f8] ss:$24 sps:$4 sm:$0xff]  }
 0x28c   :  { %7548 = vmatprep.subr.bf16.mxu1 %v20242_v33  ;;  %21527 = verf.f32 %v8764_v36  ;;  %v20290_v33 = vld [vmem:[#allocation5 + $0xa04] ss:$24 sps:$4 sm:$0xff]   ;;  %v20288_v36 = vld [vmem:[#allocation5 + $0xa00] ss:$24 sps:$4 sm:$0xff]  }
 0x292   :  { %7506 = vmatpush2.bf16.xpose.msra.mxu0 %v20237_v37  ;;  %v20293_v37 = vld [vmem:[#allocation5 + $0x9cc] ss:$24 sps:$4 sm:$0xff]  }
 0x293   :  { %7549 = vmatpush2.bf16.xpose.msra.mxu1 %v20240_v38  ;;  %7507 = vmatprep.subr.bf16.mxu0 %v20245_v39  ;;  %v20296_v38 = vld [vmem:[#allocation5 + $0x9d4] ss:$24 sps:$4 sm:$0xff]   ;;  %v20291_v39 = vld [vmem:[#allocation5 + $0x9c8] ss:$24 sps:$4 sm:$0xff]  }
 0x294   :  { %7550 = vmatprep.subr.bf16.mxu1 %v20248_v40  ;;  %v20294_v40 = vld [vmem:[#allocation5 + $0x9d0] ss:$24 sps:$4 sm:$0xff]  }
 0x295   :  { %v21526_v41 = vpop.eup %21525 }
 0x296   :  { %v8836_v45 = vadd.f32 1.0, %v21526_v41  ;;  %v20299_v41 = vld [vmem:[#allocation5 + $0x99c] ss:$24 sps:$4 sm:$0xff]  }
 0x298   :  { %v8884_v50 = vmul.f32 %v8836_v45, %v8691_v47  ;;  %v20308_v45 = vld [vmem:[#allocation5 + $0x974] ss:$24 sps:$4 sm:$0xff]   ;;  %v20306_v47 = vld [vmem:[#allocation5 + $0x970] ss:$24 sps:$4 sm:$0xff]  }
 0x299   :  { %v21528_v46 = vpop.eup %21527 }
 0x29a   :  { %v8860_v49 = vadd.f32 1.0, %v21528_v46  ;;  %7508 = vmatpush2.bf16.xpose.msra.mxu0 %v20243_v42  ;;  %v20302_v42 = vld [vmem:[#allocation5 + $0x9a4] ss:$24 sps:$4 sm:$0xff]   ;;  %v20303_v46 = vld [vmem:[#allocation5 + $0x968] ss:$24 sps:$4 sm:$0xff]  }
 0x29b   :  { %7551 = vmatpush2.bf16.xpose.msra.mxu1 %v20246_v43  ;;  %7509 = vmatprep.subr.bf16.mxu0 %v20251_v9  ;;  %v20297_v43 = vld [vmem:[#allocation5 + $0x998] ss:$24 sps:$4 sm:$0xff]  }
 0x29c   :  { %7552 = vmatprep.subr.bf16.mxu1 %v20254_v44  ;;  %v8908_v51 = vmul.f32 %v8860_v49, %v8715_v48  ;;  %v20300_v9 = vld [vmem:[#allocation5 + $0x9a0] ss:$24 sps:$4 sm:$0xff]   ;;  %v20305_v44 = vld [vmem:[#allocation5 + $0x96c] ss:$24 sps:$4 sm:$0xff]   ;;  %v20311_v48 = vld [vmem:[#allocation5 + $0x93c] ss:$24 sps:$4 sm:$0xff]  }
 0x29d   :  { %v20314_v49 = vld [vmem:[#allocation5 + $0x944] ss:$24 sps:$4 sm:$0xff]  }
 0x29e   :  { %v21884_v52 = vpack.c.bf16 %v8908_v51, %v8884_v50  ;;  %v20309_v50 = vld [vmem:[#allocation5 + $0x938] ss:$24 sps:$4 sm:$0xff]  }
 0x29f   :  { %v20312_v51 = vld [vmem:[#allocation5 + $0x940] ss:$24 sps:$4 sm:$0xff]  }
 0x2a0   :  { %22540 = vst [vmem:[#allocation19_spill] sm:$0xff] %v21884_v52 }
 0x2a2   :  { %7510 = vmatpush2.bf16.xpose.msra.mxu0 %v20249_v53  ;;  %v20317_v53 = vld [vmem:[#allocation5 + $0x90c] ss:$24 sps:$4 sm:$0xff]  }
 0x2a3   :  { %7553 = vmatpush2.bf16.xpose.msra.mxu1 %v20252_v54  ;;  %7511 = vmatprep.subr.bf16.mxu0 %v20257_v56  ;;  %v20320_v54 = vld [vmem:[#allocation5 + $0x914] ss:$24 sps:$4 sm:$0xff]   ;;  %v20315_v56 = vld [vmem:[#allocation5 + $0x908] ss:$24 sps:$4 sm:$0xff]  }
 0x2a4   :  { %7554 = vmatprep.subr.bf16.mxu1 %v20260_v57  ;;  %v20318_v57 = vld [vmem:[#allocation5 + $0x910] ss:$24 sps:$4 sm:$0xff]  }
 0x2aa   :  { %7512 = vmatpush2.bf16.xpose.msra.mxu0 %v20255_v61  ;;  %v20323_v61 = vld [vmem:[#allocation5 + $0xbdc] ss:$24 sps:$4 sm:$0xff]  }
 0x2ab   :  { %7555 = vmatpush2.bf16.xpose.msra.mxu1 %v20258_v0  ;;  %7513 = vmatprep.subr.bf16.mxu0 %v20263_v1  ;;  %v20326_v0 = vld [vmem:[#allocation5 + $0xbe4] ss:$24 sps:$4 sm:$0xff]   ;;  %v21891_v1 = vsub.s32 4, %v21835_v60 }
 0x2ac   :  { %7556 = vmatprep.subr.bf16.mxu1 %v20266_v2 }
 0x2ad   :  { %22541 = vst [vmem:[#allocation20_spill] sm:$0xff] %v21891_v1  ;;  %v1280_v2 = vrot.slane %v21872_v63, %v21891_v1 }
 0x2b2   :  { %7514 = vmatpush2.bf16.xpose.msra.mxu0 %v20261_v5  ;;  %v20321_v5 = vld [vmem:[#allocation5 + $0xbd8] ss:$24 sps:$4 sm:$0xff]  }
 0x2b3   :  { %7557 = vmatpush2.bf16.xpose.msra.mxu1 %v20264_v6  ;;  %7515 = vmatprep.subr.bf16.mxu0 %v20269_v10  ;;  %v20324_v6 = vld [vmem:[#allocation5 + $0xbe0] ss:$24 sps:$4 sm:$0xff]   ;;  %v21895_v10 = vpop.f32.mrf.mxu0 }
 0x2b4   :  { %7558 = vmatprep.subr.bf16.mxu1 %v20272_v11  ;;  %v21897_v11 = vpop.f32.mrf.mxu1 }
 0x2ba   :  { %7516 = vmatpush2.bf16.xpose.msra.mxu0 %v20267_v12  ;;  %v20329_v12 = vld [vmem:[#allocation5 + $0xbac] ss:$24 sps:$4 sm:$0xff]  }
 0x2bb   :  { %7559 = vmatpush2.bf16.xpose.msra.mxu1 %v20270_v13  ;;  %7571 = vmatprep.subr.bf16.mxu0 %v20275_v18  ;;  %v20332_v13 = vld [vmem:[#allocation5 + $0xbb4] ss:$24 sps:$4 sm:$0xff]  }
 0x2bc   :  { %7614 = vmatprep.subr.bf16.mxu1 %v20278_v21 }
 0x2c1   :  { %7518 = vmatmul.mubr.bf16.vlgmr.msra.gmra.mxu0 %v21829_v26 }
 0x2c2   :  { %7561 = vmatmul.mubr.bf16.vlgmr.msra.gmra.mxu1 %v21819_v16  ;;  %7572 = vmatpush1.bf16.xpose.msra.mxu0 %v20273_v22 }
 0x2c3   :  { %7615 = vmatpush1.bf16.xpose.msra.mxu1 %v20276_v23  ;;  %7573 = vmatprep.subr.bf16.mxu0 %v20281_v24 }
 0x2c4   :  { %7616 = vmatprep.subr.bf16.mxu1 %v20284_v25  ;;  %7603 = vmatprep.mubr.bf16.mxu0 %v21815_v31 }
 0x2c5   :  { %7646 = vmatprep.mubr.bf16.mxu1 %v21823_v20 }
 0x2ca   :  { %7574 = vmatpush1.bf16.xpose.msra.mxu0 %v20279_v27 }
 0x2cb   :  { %7617 = vmatpush1.bf16.xpose.msra.mxu1 %v20282_v28  ;;  %7575 = vmatprep.subr.bf16.mxu0 %v20287_v29  ;;  %v20327_v29 = vld [vmem:[#allocation5 + $0xba8] ss:$24 sps:$4 sm:$0xff]  }
 0x2cc   :  { %7618 = vmatprep.subr.bf16.mxu1 %v20290_v33  ;;  %v20330_v33 = vld [vmem:[#allocation5 + $0xbb0] ss:$24 sps:$4 sm:$0xff]  }
 0x2d2   :  { %7576 = vmatpush1.bf16.xpose.msra.mxu0 %v20285_v34 }
 0x2d3   :  { %7619 = vmatpush1.bf16.xpose.msra.mxu1 %v20288_v36  ;;  %7577 = vmatprep.subr.bf16.mxu0 %v20293_v37  ;;  %v20335_v36 = vld [vmem:[#allocation5 + $0xb7c] ss:$24 sps:$4 sm:$0xff]  }
 0x2d4   :  { %7620 = vmatprep.subr.bf16.mxu1 %v20296_v38  ;;  %v20338_v37 = vld [vmem:[#allocation5 + $0xb84] ss:$24 sps:$4 sm:$0xff]  }
 0x2da   :  { %7578 = vmatpush1.bf16.xpose.msra.mxu0 %v20291_v39  ;;  %v20333_v39 = vld [vmem:[#allocation5 + $0xb78] ss:$24 sps:$4 sm:$0xff]  }
 0x2db   :  { %7621 = vmatpush1.bf16.xpose.msra.mxu1 %v20294_v40  ;;  %7579 = vmatprep.subr.bf16.mxu0 %v20299_v41  ;;  %v20336_v40 = vld [vmem:[#allocation5 + $0xb80] ss:$24 sps:$4 sm:$0xff]   ;;  %v20341_v41 = vld [vmem:[#allocation5 + $0xb4c] ss:$24 sps:$4 sm:$0xff]  }
 0x2dc   :  { %7622 = vmatprep.subr.bf16.mxu1 %v20302_v42  ;;  %v20344_v42 = vld [vmem:[#allocation5 + $0xb54] ss:$24 sps:$4 sm:$0xff]  }
 0x2e2   :  { %7580 = vmatpush1.bf16.xpose.msra.mxu0 %v20297_v43  ;;  %v20339_v43 = vld [vmem:[#allocation5 + $0xb48] ss:$24 sps:$4 sm:$0xff]  }
 0x2e3   :  { %7623 = vmatpush1.bf16.xpose.msra.mxu1 %v20300_v9  ;;  %7581 = vmatprep.subr.bf16.mxu0 %v20305_v44  ;;  %v20342_v9 = vld [vmem:[#allocation5 + $0xb50] ss:$24 sps:$4 sm:$0xff]   ;;  %v20347_v44 = vld [vmem:[#allocation5 + $0xb1c] ss:$24 sps:$4 sm:$0xff]  }
 0x2e4   :  { %7624 = vmatprep.subr.bf16.mxu1 %v20308_v45  ;;  %v20350_v45 = vld [vmem:[#allocation5 + $0xb24] ss:$24 sps:$4 sm:$0xff]  }
 0x2ea   :  { %7582 = vmatpush1.bf16.xpose.msra.mxu0 %v20303_v46  ;;  %v20345_v46 = vld [vmem:[#allocation5 + $0xb18] ss:$24 sps:$4 sm:$0xff]  }
 0x2eb   :  { %7625 = vmatpush1.bf16.xpose.msra.mxu1 %v20306_v47  ;;  %7583 = vmatprep.subr.bf16.mxu0 %v20311_v48  ;;  %v20348_v47 = vld [vmem:[#allocation5 + $0xb20] ss:$24 sps:$4 sm:$0xff]   ;;  %v20353_v48 = vld [vmem:[#allocation5 + $0xaec] ss:$24 sps:$4 sm:$0xff]  }
 0x2ec   :  { %7626 = vmatprep.subr.bf16.mxu1 %v20314_v49  ;;  %v20356_v49 = vld [vmem:[#allocation5 + $0xaf4] ss:$24 sps:$4 sm:$0xff]  }
 0x2f2   :  { %7584 = vmatpush1.bf16.xpose.msra.mxu0 %v20309_v50  ;;  %v20351_v50 = vld [vmem:[#allocation5 + $0xae8] ss:$24 sps:$4 sm:$0xff]  }
 0x2f3   :  { %7627 = vmatpush1.bf16.xpose.msra.mxu1 %v20312_v51  ;;  %7585 = vmatprep.subr.bf16.mxu0 %v20317_v53  ;;  %v20354_v51 = vld [vmem:[#allocation5 + $0xaf0] ss:$24 sps:$4 sm:$0xff]   ;;  %v20359_v53 = vld [vmem:[#allocation5 + $0xabc] ss:$24 sps:$4 sm:$0xff]  }
 0x2f4   :  { %7628 = vmatprep.subr.bf16.mxu1 %v20320_v54  ;;  %v20362_v54 = vld [vmem:[#allocation5 + $0xac4] ss:$24 sps:$4 sm:$0xff]  }
 0x2fa   :  { %7586 = vmatpush1.bf16.xpose.msra.mxu0 %v20315_v56  ;;  %v20357_v56 = vld [vmem:[#allocation5 + $0xab8] ss:$24 sps:$4 sm:$0xff]  }
 0x2fb   :  { %7629 = vmatpush1.bf16.xpose.msra.mxu1 %v20318_v57  ;;  %7587 = vmatprep.subr.bf16.mxu0 %v20323_v61  ;;  %v20360_v57 = vld [vmem:[#allocation5 + $0xac0] ss:$24 sps:$4 sm:$0xff]   ;;  %v20365_v61 = vld [vmem:[#allocation5 + $0xa8c] ss:$24 sps:$4 sm:$0xff]  }
 0x2fc   :  { %7630 = vmatprep.subr.bf16.mxu1 %v20326_v0  ;;  %v20368_v0 = vld [vmem:[#allocation5 + $0xa94] ss:$24 sps:$4 sm:$0xff]  }
 0x301   :  { %v7433_v18 = vpop.f32.mrf.mxu0 }
 0x302   :  { %v7476_v21 = vpop.f32.mrf.mxu1  ;;  %v7434_v22 = vadd.f32 %v7433_v18, %v1280_v2  ;;  %7588 = vmatpush2.bf16.xpose.msra.mxu0 %v20321_v5  ;;  %v20366_v5 = vld [vmem:[#allocation5 + $0xa90] ss:$24 sps:$4 sm:$0xff]  }
 0x303   :  { %7631 = vmatpush2.bf16.xpose.msra.mxu1 %v20324_v6  ;;  %v21899_v23 = vpop.f32.mrf.mxu0  ;;  %7589 = vmatprep.subr.bf16.mxu0 %v20329_v12  ;;  %v20371_v6 = vld [vmem:[#allocation5 + $0xd54] ss:$24 sps:$4 sm:$0xff]   ;;  %v20372_v18 = vld [vmem:[#allocation5 + $0xd58] ss:$24 sps:$4 sm:$0xff]  }
 0x304   :  { %v21901_v24 = vpop.f32.mrf.mxu1  ;;  %7632 = vmatprep.subr.bf16.mxu1 %v20332_v13  ;;  %v21903_v25 = vadd.f32 %v7476_v21, %v7434_v22  ;;  %v20374_v12 = vld [vmem:[#allocation5 + $0xd5c] ss:$24 sps:$4 sm:$0xff]   ;;  %v20369_v13 = vld [vmem:[#allocation5 + $0xd50] ss:$24 sps:$4 sm:$0xff]   ;;  %v20380_v22 = vld [vmem:[#allocation5 + $0xd2c] ss:$24 sps:$4 sm:$0xff]  }
 0x305   :  { %v7437_v27 = vpop.f32.mrf.mxu0  ;;  %v20377_v21 = vld [vmem:[#allocation5 + $0xd24] ss:$24 sps:$4 sm:$0xff]  }
 0x306   :  { %v7438_v28 = vadd.f32 %v7437_v27, %v1280_v2  ;;  %v7480_v34 = vpop.f32.mrf.mxu1  ;;  %v20363_v2 = vld [vmem:[#allocation5 + $0xa88] ss:$24 sps:$4 sm:$0xff]  }
 0x307   :  { %v20375_v27 = vld [vmem:[#allocation5 + $0xd20] ss:$24 sps:$4 sm:$0xff]  }
 0x308   :  { %v21905_v38 = vadd.f32 %v7480_v34, %v7438_v28  ;;  %v20378_v28 = vld [vmem:[#allocation5 + $0xd28] ss:$24 sps:$4 sm:$0xff]  }
 0x309   :  { %v20381_v34 = vld [vmem:[#allocation5 + $0xcf0] ss:$24 sps:$4 sm:$0xff]  }
 0x30a   :  { %7590 = vmatpush2.bf16.xpose.msra.mxu0 %v20327_v29  ;;  %v20383_v29 = vld [vmem:[#allocation5 + $0xcf4] ss:$24 sps:$4 sm:$0xff]  }
 0x30b   :  { %7633 = vmatpush2.bf16.xpose.msra.mxu1 %v20330_v33  ;;  %7591 = vmatprep.subr.bf16.mxu0 %v20335_v36  ;;  %v20386_v33 = vld [vmem:[#allocation5 + $0xcfc] ss:$24 sps:$4 sm:$0xff]   ;;  %v20384_v36 = vld [vmem:[#allocation5 + $0xcf8] ss:$24 sps:$4 sm:$0xff]  }
 0x30c   :  { %7634 = vmatprep.subr.bf16.mxu1 %v20338_v37  ;;  %v20389_v37 = vld [vmem:[#allocation5 + $0xcc4] ss:$24 sps:$4 sm:$0xff]  }
 0x312   :  { %7592 = vmatpush2.bf16.xpose.msra.mxu0 %v20333_v39  ;;  %v20392_v39 = vld [vmem:[#allocation5 + $0xccc] ss:$24 sps:$4 sm:$0xff]  }
 0x313   :  { %7635 = vmatpush2.bf16.xpose.msra.mxu1 %v20336_v40  ;;  %7593 = vmatprep.subr.bf16.mxu0 %v20341_v41  ;;  %v20387_v40 = vld [vmem:[#allocation5 + $0xcc0] ss:$24 sps:$4 sm:$0xff]  }
 0x314   :  { %7636 = vmatprep.subr.bf16.mxu1 %v20344_v42  ;;  %v20390_v41 = vld [vmem:[#allocation5 + $0xcc8] ss:$24 sps:$4 sm:$0xff]   ;;  %v20395_v42 = vld [vmem:[#allocation5 + $0xc94] ss:$24 sps:$4 sm:$0xff]  }
 0x31a   :  { %7594 = vmatpush2.bf16.xpose.msra.mxu0 %v20339_v43  ;;  %v20398_v43 = vld [vmem:[#allocation5 + $0xc9c] ss:$24 sps:$4 sm:$0xff]  }
 0x31b   :  { %7637 = vmatpush2.bf16.xpose.msra.mxu1 %v20342_v9  ;;  %7595 = vmatprep.subr.bf16.mxu0 %v20347_v44  ;;  %v20393_v9 = vld [vmem:[#allocation5 + $0xc90] ss:$24 sps:$4 sm:$0xff]  }
 0x31c   :  { %7638 = vmatprep.subr.bf16.mxu1 %v20350_v45  ;;  %v20396_v44 = vld [vmem:[#allocation5 + $0xc98] ss:$24 sps:$4 sm:$0xff]   ;;  %v20401_v45 = vld [vmem:[#allocation5 + $0xc64] ss:$24 sps:$4 sm:$0xff]  }
 0x322   :  { %7596 = vmatpush2.bf16.xpose.msra.mxu0 %v20345_v46  ;;  %v20404_v46 = vld [vmem:[#allocation5 + $0xc6c] ss:$24 sps:$4 sm:$0xff]  }
 0x323   :  { %7639 = vmatpush2.bf16.xpose.msra.mxu1 %v20348_v47  ;;  %7597 = vmatprep.subr.bf16.mxu0 %v20353_v48  ;;  %v20399_v47 = vld [vmem:[#allocation5 + $0xc60] ss:$24 sps:$4 sm:$0xff]  }
 0x324   :  { %7640 = vmatprep.subr.bf16.mxu1 %v20356_v49  ;;  %v20402_v48 = vld [vmem:[#allocation5 + $0xc68] ss:$24 sps:$4 sm:$0xff]   ;;  %v20407_v49 = vld [vmem:[#allocation5 + $0xc34] ss:$24 sps:$4 sm:$0xff]  }
 0x32a   :  { %7598 = vmatpush2.bf16.xpose.msra.mxu0 %v20351_v50  ;;  %v20410_v50 = vld [vmem:[#allocation5 + $0xc3c] ss:$24 sps:$4 sm:$0xff]  }
 0x32b   :  { %7641 = vmatpush2.bf16.xpose.msra.mxu1 %v20354_v51  ;;  %7599 = vmatprep.subr.bf16.mxu0 %v20359_v53  ;;  %v20405_v51 = vld [vmem:[#allocation5 + $0xc30] ss:$24 sps:$4 sm:$0xff]  }
 0x32c   :  { %7642 = vmatprep.subr.bf16.mxu1 %v20362_v54  ;;  %v20408_v53 = vld [vmem:[#allocation5 + $0xc38] ss:$24 sps:$4 sm:$0xff]   ;;  %v20413_v54 = vld [vmem:[#allocation5 + $0xc04] ss:$24 sps:$4 sm:$0xff]  }
 0x332   :  { %7600 = vmatpush2.bf16.xpose.msra.mxu0 %v20357_v56  ;;  %v20416_v56 = vld [vmem:[#allocation5 + $0xc0c] ss:$24 sps:$4 sm:$0xff]  }
 0x333   :  { %7643 = vmatpush2.bf16.xpose.msra.mxu1 %v20360_v57  ;;  %7601 = vmatprep.subr.bf16.mxu0 %v20365_v61  ;;  %v20411_v57 = vld [vmem:[#allocation5 + $0xc00] ss:$24 sps:$4 sm:$0xff]  }
 0x334   :  { %7644 = vmatprep.subr.bf16.mxu1 %v20368_v0  ;;  %v20414_v61 = vld [vmem:[#allocation5 + $0xc08] ss:$24 sps:$4 sm:$0xff]   ;;  %v20419_v0 = vld [vmem:[#allocation5 + $0xed4] ss:$24 sps:$4 sm:$0xff]  }
 0x33a   :  { %7602 = vmatpush2.bf16.xpose.msra.mxu0 %v20363_v2  ;;  %v20422_v2 = vld [vmem:[#allocation5 + $0xedc] ss:$24 sps:$4 sm:$0xff]  }
 0x33b   :  { %7645 = vmatpush2.bf16.xpose.msra.mxu1 %v20366_v5  ;;  %7657 = vmatprep.subr.bf16.mxu0 %v20371_v6  ;;  %v20417_v5 = vld [vmem:[#allocation5 + $0xed0] ss:$24 sps:$4 sm:$0xff]  }
 0x33c   :  { %7700 = vmatprep.subr.bf16.mxu1 %v20374_v12  ;;  %v20420_v6 = vld [vmem:[#allocation5 + $0xed8] ss:$24 sps:$4 sm:$0xff]   ;;  %v21911_v12 = vpop.f32.mrf.mxu0 }
 0x341   :  { %7604 = vmatmul.mubr.bf16.vlgmr.msra.gmra.mxu0 %v21821_v17 }
 0x342   :  { %7647 = vmatmul.mubr.bf16.vlgmr.msra.gmra.mxu1 %v21829_v26  ;;  %7658 = vmatpush1.bf16.xpose.msra.mxu0 %v20369_v13  ;;  %v20425_v13 = vld [vmem:[#allocation5 + $0xea4] ss:$24 sps:$4 sm:$0xff]  }
 0x343   :  { %7701 = vmatpush1.bf16.xpose.msra.mxu1 %v20372_v18  ;;  %7659 = vmatprep.subr.bf16.mxu0 %v20377_v21  ;;  %v20428_v18 = vld [vmem:[#allocation5 + $0xeac] ss:$24 sps:$4 sm:$0xff]  }
 0x344   :  { %7702 = vmatprep.subr.bf16.mxu1 %v20380_v22  ;;  %7689 = vmatprep.mubr.bf16.mxu0 %v21813_v30 }
 0x345   :  { %7732 = vmatprep.mubr.bf16.mxu1 %v21815_v31 }
 0x34a   :  { %7660 = vmatpush1.bf16.xpose.msra.mxu0 %v20375_v27 }
 0x34b   :  { %7703 = vmatpush1.bf16.xpose.msra.mxu1 %v20378_v28  ;;  %7661 = vmatprep.subr.bf16.mxu0 %v20383_v29 }
 0x34c   :  { %7704 = vmatprep.subr.bf16.mxu1 %v20386_v33 }
 0x352   :  { %7662 = vmatpush1.bf16.xpose.msra.mxu0 %v20381_v34  ;;  %v20423_v34 = vld [vmem:[#allocation5 + $0xea0] ss:$24 sps:$4 sm:$0xff]  }
 0x353   :  { %7705 = vmatpush1.bf16.xpose.msra.mxu1 %v20384_v36  ;;  %7663 = vmatprep.subr.bf16.mxu0 %v20389_v37  ;;  %v20426_v36 = vld [vmem:[#allocation5 + $0xea8] ss:$24 sps:$4 sm:$0xff]   ;;  %v20431_v37 = vld [vmem:[#allocation5 + $0xe74] ss:$24 sps:$4 sm:$0xff]  }
 0x354   :  { %7706 = vmatprep.subr.bf16.mxu1 %v20392_v39  ;;  %v20434_v39 = vld [vmem:[#allocation5 + $0xe7c] ss:$24 sps:$4 sm:$0xff]  }
 0x35a   :  { %7664 = vmatpush1.bf16.xpose.msra.mxu0 %v20387_v40 }
 0x35b   :  { %7707 = vmatpush1.bf16.xpose.msra.mxu1 %v20390_v41  ;;  %7665 = vmatprep.subr.bf16.mxu0 %v20395_v42  ;;  %v20432_v41 = vld [vmem:[#allocation5 + $0xe78] ss:$24 sps:$4 sm:$0xff]   ;;  %v20437_v42 = vld [vmem:[#allocation5 + $0xe44] ss:$24 sps:$4 sm:$0xff]  }
 0x35c   :  { %7708 = vmatprep.subr.bf16.mxu1 %v20398_v43  ;;  %v20440_v43 = vld [vmem:[#allocation5 + $0xe4c] ss:$24 sps:$4 sm:$0xff]  }
 0x362   :  { %7666 = vmatpush1.bf16.xpose.msra.mxu0 %v20393_v9 }
 0x363   :  { %7709 = vmatpush1.bf16.xpose.msra.mxu1 %v20396_v44  ;;  %7667 = vmatprep.subr.bf16.mxu0 %v20401_v45  ;;  %v20435_v44 = vld [vmem:[#allocation5 + $0xe40] ss:$24 sps:$4 sm:$0xff]  }
 0x364   :  { %7710 = vmatprep.subr.bf16.mxu1 %v20404_v46  ;;  %v20438_v45 = vld [vmem:[#allocation5 + $0xe48] ss:$24 sps:$4 sm:$0xff]  }
 0x36a   :  { %7668 = vmatpush1.bf16.xpose.msra.mxu0 %v20399_v47  ;;  %v20443_v47 = vld [vmem:[#allocation5 + $0xe14] ss:$24 sps:$4 sm:$0xff]  }
 0x36b   :  { %7711 = vmatpush1.bf16.xpose.msra.mxu1 %v20402_v48  ;;  %7669 = vmatprep.subr.bf16.mxu0 %v20407_v49  ;;  %v20446_v48 = vld [vmem:[#allocation5 + $0xe1c] ss:$24 sps:$4 sm:$0xff]  }
 0x36c   :  { %7712 = vmatprep.subr.bf16.mxu1 %v20410_v50 }
 0x372   :  { %7670 = vmatpush1.bf16.xpose.msra.mxu0 %v20405_v51 }
 0x373   :  { %7713 = vmatpush1.bf16.xpose.msra.mxu1 %v20408_v53  ;;  %7671 = vmatprep.subr.bf16.mxu0 %v20413_v54 }
 0x374   :  { %7714 = vmatprep.subr.bf16.mxu1 %v20416_v56 }
 0x37a   :  { %7672 = vmatpush1.bf16.xpose.msra.mxu0 %v20411_v57  ;;  %v20441_v57 = vld [vmem:[#allocation5 + $0xe10] ss:$24 sps:$4 sm:$0xff]  }
 0x37b   :  { %7715 = vmatpush1.bf16.xpose.msra.mxu1 %v20414_v61  ;;  %7673 = vmatprep.subr.bf16.mxu0 %v20419_v0  ;;  %v20444_v61 = vld [vmem:[#allocation5 + $0xe18] ss:$24 sps:$4 sm:$0xff]   ;;  %v20449_v0 = vld [vmem:[#allocation5 + $0xde4] ss:$24 sps:$4 sm:$0xff]  }
 0x37c   :  { %7716 = vmatprep.subr.bf16.mxu1 %v20422_v2  ;;  %v20452_v2 = vld [vmem:[#allocation5 + $0xdec] ss:$24 sps:$4 sm:$0xff]  }
 0x381   :  { %v7519_v21 = vpop.f32.mrf.mxu0 }
 0x382   :  { %v7520_v22 = vadd.f32 %v7519_v21, %v21903_v25  ;;  %7674 = vmatpush2.bf16.xpose.msra.mxu0 %v20417_v5  ;;  %v20429_v25 = vld [vmem:[#allocation5 + $0xe70] ss:$24 sps:$4 sm:$0xff]   ;;  %v20447_v5 = vld [vmem:[#allocation5 + $0xde0] ss:$24 sps:$4 sm:$0xff]  }
 0x383   :  { %7717 = vmatpush2.bf16.xpose.msra.mxu1 %v20420_v6  ;;  %v21914_v27 = vpop.f32.mrf.mxu0  ;;  %7675 = vmatprep.subr.bf16.mxu0 %v20425_v13  ;;  %v20450_v6 = vld [vmem:[#allocation5 + $0xde8] ss:$24 sps:$4 sm:$0xff]   ;;  %v20455_v13 = vld [vmem:[#allocation5 + $0xdb4] ss:$24 sps:$4 sm:$0xff]  }
 0x384   :  { %7718 = vmatprep.subr.bf16.mxu1 %v20428_v18  ;;  %v8742_v28 = vmul.f32 0.70710677, %v7520_v22  ;;  %v8693_v49 = vmul.f32 0.5, %v7520_v22  ;;  %v20458_v18 = vld [vmem:[#allocation5 + $0xdbc] ss:$24 sps:$4 sm:$0xff]  }
 0x385   :  { %v7523_v29 = vpop.f32.mrf.mxu0  ;;  %v20453_v21 = vld [vmem:[#allocation5 + $0xdb0] ss:$24 sps:$4 sm:$0xff]  }
 0x386   :  { %21529 = verf.f32 %v8742_v28  ;;  %v7524_v33 = vadd.f32 %v7523_v29, %v21905_v38  ;;  %v20456_v22 = vld [vmem:[#allocation5 + $0xdb8] ss:$24 sps:$4 sm:$0xff]   ;;  %v20461_v28 = vld [vmem:[#allocation5 + $0xd84] ss:$24 sps:$4 sm:$0xff]  }
 0x387   :  { %v20464_v29 = vld [vmem:[#allocation5 + $0xd8c] ss:$24 sps:$4 sm:$0xff]  }
 0x388   :  { %v8766_v40 = vmul.f32 0.70710677, %v7524_v33  ;;  %v8717_v50 = vmul.f32 0.5, %v7524_v33  ;;  %v20459_v33 = vld [vmem:[#allocation5 + $0xd80] ss:$24 sps:$4 sm:$0xff]  }
 0x38a   :  { %21531 = verf.f32 %v8766_v40  ;;  %7676 = vmatpush2.bf16.xpose.msra.mxu0 %v20423_v34  ;;  %v20462_v34 = vld [vmem:[#allocation5 + $0xd88] ss:$24 sps:$4 sm:$0xff]  }
 0x38b   :  { %7719 = vmatpush2.bf16.xpose.msra.mxu1 %v20426_v36  ;;  %7677 = vmatprep.subr.bf16.mxu0 %v20431_v37  ;;  %v20467_v36 = vld [vmem:[#allocation5 + $0xd64] ss:$24 sps:$4 sm:$0xff]   ;;  %v20470_v37 = vld [vmem:[#allocation5 + $0x1054] ss:$24 sps:$4 sm:$0xff]   ;;  %v20468_v40 = vld [vmem:[#allocation5 + $0x1050] ss:$24 sps:$4 sm:$0xff]  }
 0x38c   :  { %7720 = vmatprep.subr.bf16.mxu1 %v20434_v39  ;;  %v20465_v39 = vld [vmem:[#allocation5 + $0xd60] ss:$24 sps:$4 sm:$0xff]  }
 0x392   :  { %7678 = vmatpush2.bf16.xpose.msra.mxu0 %v20429_v25  ;;  %v20473_v25 = vld [vmem:[#allocation5 + $0xd34] ss:$24 sps:$4 sm:$0xff]  }
 0x393   :  { %7721 = vmatpush2.bf16.xpose.msra.mxu1 %v20432_v41  ;;  %v21530_v9 = vpop.eup %21529  ;;  %7679 = vmatprep.subr.bf16.mxu0 %v20437_v42  ;;  %v20476_v41 = vld [vmem:[#allocation5 + $0x1024] ss:$24 sps:$4 sm:$0xff]   ;;  %v20471_v42 = vld [vmem:[#allocation5 + $0xd30] ss:$24 sps:$4 sm:$0xff]  }
 0x394   :  { %7722 = vmatprep.subr.bf16.mxu1 %v20440_v43  ;;  %v8838_v38 = vadd.f32 1.0, %v21530_v9  ;;  %v20474_v43 = vld [vmem:[#allocation5 + $0x1020] ss:$24 sps:$4 sm:$0xff]   ;;  %v20479_v9 = vld [vmem:[#allocation5 + $0xd04] ss:$24 sps:$4 sm:$0xff]  }
 0x396   :  { %v8886_v53 = vmul.f32 %v8838_v38, %v8693_v49  ;;  %v20482_v38 = vld [vmem:[#allocation5 + $0xff4] ss:$24 sps:$4 sm:$0xff]   ;;  %v20486_v49 = vld [vmem:[#allocation5 + $0xfc0] ss:$24 sps:$4 sm:$0xff]  }
 0x397   :  { %v21532_v46 = vpop.eup %21531 }
 0x398   :  { %v8862_v51 = vadd.f32 1.0, %v21532_v46  ;;  %v20485_v46 = vld [vmem:[#allocation5 + $0xcd4] ss:$24 sps:$4 sm:$0xff]  }
 0x39a   :  { %v8910_v54 = vmul.f32 %v8862_v51, %v8717_v50  ;;  %7680 = vmatpush2.bf16.xpose.msra.mxu0 %v20435_v44  ;;  %v20477_v44 = vld [vmem:[#allocation5 + $0xd00] ss:$24 sps:$4 sm:$0xff]   ;;  %v20491_v50 = vld [vmem:[#allocation5 + $0xca4] ss:$24 sps:$4 sm:$0xff]   ;;  %v20494_v51 = vld [vmem:[#allocation5 + $0xf94] ss:$24 sps:$4 sm:$0xff]  }
 0x39b   :  { %7723 = vmatpush2.bf16.xpose.msra.mxu1 %v20438_v45  ;;  %7681 = vmatprep.subr.bf16.mxu0 %v20443_v47  ;;  %v20480_v45 = vld [vmem:[#allocation5 + $0xff0] ss:$24 sps:$4 sm:$0xff]   ;;  %v20488_v47 = vld [vmem:[#allocation5 + $0xfc4] ss:$24 sps:$4 sm:$0xff]  }
 0x39c   :  { %7724 = vmatprep.subr.bf16.mxu1 %v20446_v48  ;;  %v21917_v56 = vpack.c.bf16 %v8910_v54, %v8886_v53  ;;  %v20483_v48 = vld [vmem:[#allocation5 + $0xcd0] ss:$24 sps:$4 sm:$0xff]   ;;  %v20489_v53 = vld [vmem:[#allocation5 + $0xca0] ss:$24 sps:$4 sm:$0xff]  }
 0x39d   :  { %v20492_v54 = vld [vmem:[#allocation5 + $0xf90] ss:$24 sps:$4 sm:$0xff]  }
 0x39e   :  { %22542 = vst [vmem:[#allocation21_spill] sm:$0xff] %v21917_v56 }
 0x3a2   :  { %7682 = vmatpush2.bf16.xpose.msra.mxu0 %v20441_v57  ;;  %v20497_v57 = vld [vmem:[#allocation5 + $0xc74] ss:$24 sps:$4 sm:$0xff]  }
 0x3a3   :  { %7725 = vmatpush2.bf16.xpose.msra.mxu1 %v20444_v61  ;;  %7683 = vmatprep.subr.bf16.mxu0 %v20449_v0  ;;  %v20500_v61 = vld [vmem:[#allocation5 + $0xf64] ss:$24 sps:$4 sm:$0xff]   ;;  %v20495_v0 = vld [vmem:[#allocation5 + $0xc70] ss:$24 sps:$4 sm:$0xff]  }
 0x3a4   :  { %7726 = vmatprep.subr.bf16.mxu1 %v20452_v2  ;;  %v20498_v2 = vld [vmem:[#allocation5 + $0xf60] ss:$24 sps:$4 sm:$0xff]  }
 0x3aa   :  { %7684 = vmatpush2.bf16.xpose.msra.mxu0 %v20447_v5  ;;  %v20503_v5 = vld [vmem:[#allocation5 + $0xc44] ss:$24 sps:$4 sm:$0xff]  }
 0x3ab   :  { %7727 = vmatpush2.bf16.xpose.msra.mxu1 %v20450_v6  ;;  %7685 = vmatprep.subr.bf16.mxu0 %v20455_v13  ;;  %v20506_v6 = vld [vmem:[#allocation5 + $0xf34] ss:$24 sps:$4 sm:$0xff]   ;;  %v20501_v13 = vld [vmem:[#allocation5 + $0xc40] ss:$24 sps:$4 sm:$0xff]  }
 0x3ac   :  { %7728 = vmatprep.subr.bf16.mxu1 %v20458_v18  ;;  %v20504_v18 = vld [vmem:[#allocation5 + $0xf30] ss:$24 sps:$4 sm:$0xff]  }
 0x3b2   :  { %7686 = vmatpush2.bf16.xpose.msra.mxu0 %v20453_v21  ;;  %v20509_v21 = vld [vmem:[#allocation5 + $0xc14] ss:$24 sps:$4 sm:$0xff]  }
 0x3b3   :  { %7729 = vmatpush2.bf16.xpose.msra.mxu1 %v20456_v22  ;;  %7687 = vmatprep.subr.bf16.mxu0 %v20461_v28  ;;  %v20512_v22 = vld [vmem:[#allocation5 + $0xf04] ss:$24 sps:$4 sm:$0xff]   ;;  %v21923_v28 = vpop.f32.mrf.mxu1 }
 0x3b4   :  { %7730 = vmatprep.subr.bf16.mxu1 %v20464_v29 }
 0x3b5   :  { %v7562_v29 = vpop.f32.mrf.mxu1 }
 0x3ba   :  { %7688 = vmatpush2.bf16.xpose.msra.mxu0 %v20459_v33  ;;  %v20507_v33 = vld [vmem:[#allocation5 + $0xc10] ss:$24 sps:$4 sm:$0xff]  }
 0x3bb   :  { %7731 = vmatpush2.bf16.xpose.msra.mxu1 %v20462_v34  ;;  %7743 = vmatprep.subr.bf16.mxu0 %v20467_v36  ;;  %v20510_v34 = vld [vmem:[#allocation5 + $0xf00] ss:$24 sps:$4 sm:$0xff]   ;;  %v21925_v36 = vpop.f32.mrf.mxu1 }
 0x3bc   :  { %7786 = vmatprep.subr.bf16.mxu1 %v20470_v37  ;;  %v20515_v37 = vld [vmem:[#allocation5 + $0xee4] ss:$24 sps:$4 sm:$0xff]  }
 0x3c1   :  { %7690 = vmatmul.mubr.bf16.vlgmr.msra.gmra.mxu0 %v21819_v16 }
 0x3c2   :  { %7733 = vmatmul.mubr.bf16.vlgmr.msra.gmra.mxu1 %v21821_v17  ;;  %7744 = vmatpush1.bf16.xpose.msra.mxu0 %v20465_v39  ;;  %v20518_v39 = vld [vmem:[#allocation5 + $0x11d4] ss:$24 sps:$4 sm:$0xff]  }
 0x3c3   :  { %7787 = vmatpush1.bf16.xpose.msra.mxu1 %v20468_v40  ;;  %7745 = vmatprep.subr.bf16.mxu0 %v20473_v25  ;;  %v21928_v40 = vsub.s32 6, %v21835_v60  ;;  %v7566_v25 = vpop.f32.mrf.mxu1 }
 0x3c4   :  { %7788 = vmatprep.subr.bf16.mxu1 %v20476_v41  ;;  %7775 = vmatprep.mubr.bf16.mxu0 %v21823_v20 }
 0x3c5   :  { %7818 = vmatprep.mubr.bf16.mxu1 %v21813_v30  ;;  %v1288_v41 = vrot.slane %v21872_v63, %v21928_v40 }
 0x3c7   :  { %v7567_v63 = vadd.f32 %v7566_v25, %v1288_v41  ;;  %v20534_v25 = vld [vmem:[#allocation5 + $0x1140] ss:$24 sps:$4 sm:$0xff]  }
 0x3ca   :  { %7746 = vmatpush1.bf16.xpose.msra.mxu0 %v20471_v42  ;;  %v20513_v42 = vld [vmem:[#allocation5 + $0xee0] ss:$24 sps:$4 sm:$0xff]  }
 0x3cb   :  { %7789 = vmatpush1.bf16.xpose.msra.mxu1 %v20474_v43  ;;  %7747 = vmatprep.subr.bf16.mxu0 %v20479_v9  ;;  %v20516_v43 = vld [vmem:[#allocation5 + $0x11d0] ss:$24 sps:$4 sm:$0xff]   ;;  %v21932_v9 = vpop.f32.mrf.mxu0 }
 0x3cc   :  { %7790 = vmatprep.subr.bf16.mxu1 %v20482_v38  ;;  %v21934_v38 = vpop.f32.mrf.mxu1 }
 0x3d2   :  { %7748 = vmatpush1.bf16.xpose.msra.mxu0 %v20477_v44  ;;  %v20521_v44 = vld [vmem:[#allocation5 + $0xeb4] ss:$24 sps:$4 sm:$0xff]  }
 0x3d3   :  { %7791 = vmatpush1.bf16.xpose.msra.mxu1 %v20480_v45  ;;  %7749 = vmatprep.subr.bf16.mxu0 %v20485_v46  ;;  %v20524_v45 = vld [vmem:[#allocation5 + $0x11a4] ss:$24 sps:$4 sm:$0xff]   ;;  %v7563_v46 = vadd.f32 %v7562_v29, %v1288_v41  ;;  %v20528_v29 = vld [vmem:[#allocation5 + $0x1170] ss:$24 sps:$4 sm:$0xff]  }
 0x3d4   :  { %7792 = vmatprep.subr.bf16.mxu1 %v20488_v47  ;;  %v20539_v41 = vld [vmem:[#allocation5 + $0xe24] ss:$24 sps:$4 sm:$0xff]  }
 0x3da   :  { %7750 = vmatpush1.bf16.xpose.msra.mxu0 %v20483_v48 }
 0x3db   :  { %7793 = vmatpush1.bf16.xpose.msra.mxu1 %v20486_v49  ;;  %7751 = vmatprep.subr.bf16.mxu0 %v20491_v50 }
 0x3dc   :  { %7794 = vmatprep.subr.bf16.mxu1 %v20494_v51 }
 0x3e2   :  { %7752 = vmatpush1.bf16.xpose.msra.mxu0 %v20489_v53 }
 0x3e3   :  { %7795 = vmatpush1.bf16.xpose.msra.mxu1 %v20492_v54  ;;  %7753 = vmatprep.subr.bf16.mxu0 %v20497_v57 }
 0x3e4   :  { %7796 = vmatprep.subr.bf16.mxu1 %v20500_v61 }
 0x3ea   :  { %7754 = vmatpush1.bf16.xpose.msra.mxu0 %v20495_v0  ;;  %v20519_v0 = vld [vmem:[#allocation5 + $0xeb0] ss:$24 sps:$4 sm:$0xff]  }
 0x3eb   :  { %7797 = vmatpush1.bf16.xpose.msra.mxu1 %v20498_v2  ;;  %7755 = vmatprep.subr.bf16.mxu0 %v20503_v5  ;;  %v20522_v2 = vld [vmem:[#allocation5 + $0x11a0] ss:$24 sps:$4 sm:$0xff]  }
 0x3ec   :  { %7798 = vmatprep.subr.bf16.mxu1 %v20506_v6  ;;  %v20527_v6 = vld [vmem:[#allocation5 + $0xe84] ss:$24 sps:$4 sm:$0xff]  }
 0x3f2   :  { %7756 = vmatpush1.bf16.xpose.msra.mxu0 %v20501_v13  ;;  %v20530_v13 = vld [vmem:[#allocation5 + $0x1174] ss:$24 sps:$4 sm:$0xff]  }
 0x3f3   :  { %7799 = vmatpush1.bf16.xpose.msra.mxu1 %v20504_v18  ;;  %7757 = vmatprep.subr.bf16.mxu0 %v20509_v21 }
 0x3f4   :  { %7800 = vmatprep.subr.bf16.mxu1 %v20512_v22  ;;  %v20525_v22 = vld [vmem:[#allocation5 + $0xe80] ss:$24 sps:$4 sm:$0xff]  }
 0x3fa   :  { %7758 = vmatpush1.bf16.xpose.msra.mxu0 %v20507_v33  ;;  %v20533_v33 = vld [vmem:[#allocation5 + $0xe54] ss:$24 sps:$4 sm:$0xff]  }
 0x3fb   :  { %7801 = vmatpush1.bf16.xpose.msra.mxu1 %v20510_v34  ;;  %7759 = vmatprep.subr.bf16.mxu0 %v20515_v37  ;;  %v20536_v34 = vld [vmem:[#allocation5 + $0x1144] ss:$24 sps:$4 sm:$0xff]  }
 0x3fc   :  { %7802 = vmatprep.subr.bf16.mxu1 %v20518_v39  ;;  %v20531_v39 = vld [vmem:[#allocation5 + $0xe50] ss:$24 sps:$4 sm:$0xff]  }
 0x401   :  { %v7605_v47 = vpop.f32.mrf.mxu0 }
 0x402   :  { %v7648_v48 = vpop.f32.mrf.mxu1  ;;  %v7606_v49 = vadd.f32 %v7605_v47, %v7563_v46  ;;  %7760 = vmatpush2.bf16.xpose.msra.mxu0 %v20513_v42  ;;  %v20542_v42 = vld [vmem:[#allocation5 + $0x1114] ss:$24 sps:$4 sm:$0xff]  }
 0x403   :  { %7803 = vmatpush2.bf16.xpose.msra.mxu1 %v20516_v43  ;;  %v21936_v50 = vpop.f32.mrf.mxu0  ;;  %7761 = vmatprep.subr.bf16.mxu0 %v20521_v44 }
 0x404   :  { %v21938_v51 = vpop.f32.mrf.mxu1  ;;  %7804 = vmatprep.subr.bf16.mxu1 %v20524_v45  ;;  %v7649_v53 = vadd.f32 %v7648_v48, %v7606_v49 }
 0x405   :  { %v7609_v54 = vpop.f32.mrf.mxu0 }
 0x406   :  { %v8744_v57 = vmul.f32 0.70710677, %v7649_v53  ;;  %v7610_v61 = vadd.f32 %v7609_v54, %v7567_v63  ;;  %v7652_v5 = vpop.f32.mrf.mxu1  ;;  %v8695_v45 = vmul.f32 0.5, %v7649_v53  ;;  %v20537_v54 = vld [vmem:[#allocation5 + $0xe20] ss:$24 sps:$4 sm:$0xff]  }
 0x407   :  { %v20546_v53 = vld [vmem:[#allocation5 + $0x10e0] ss:$24 sps:$4 sm:$0xff]  }
 0x408   :  { %21533 = verf.f32 %v8744_v57  ;;  %v7653_v18 = vadd.f32 %v7652_v5, %v7610_v61  ;;  %v20540_v57 = vld [vmem:[#allocation5 + $0x1110] ss:$24 sps:$4 sm:$0xff]   ;;  %v20545_v61 = vld [vmem:[#allocation5 + $0xdf4] ss:$24 sps:$4 sm:$0xff]   ;;  %v20551_v5 = vld [vmem:[#allocation5 + $0xdc4] ss:$24 sps:$4 sm:$0xff]  }
 0x40a   :  { %v8768_v21 = vmul.f32 0.70710677, %v7653_v18  ;;  %7762 = vmatpush2.bf16.xpose.msra.mxu0 %v20519_v0  ;;  %v8719_v46 = vmul.f32 0.5, %v7653_v18  ;;  %v20548_v0 = vld [vmem:[#allocation5 + $0x10e4] ss:$24 sps:$4 sm:$0xff]  }
 0x40b   :  { %7805 = vmatpush2.bf16.xpose.msra.mxu1 %v20522_v2  ;;  %7763 = vmatprep.subr.bf16.mxu0 %v20527_v6  ;;  %v20543_v2 = vld [vmem:[#allocation5 + $0xdf0] ss:$24 sps:$4 sm:$0xff]   ;;  %v20554_v6 = vld [vmem:[#allocation5 + $0x10b4] ss:$24 sps:$4 sm:$0xff]  }
 0x40c   :  { %7806 = vmatprep.subr.bf16.mxu1 %v20530_v13  ;;  %21535 = verf.f32 %v8768_v21  ;;  %v20549_v13 = vld [vmem:[#allocation5 + $0xdc0] ss:$24 sps:$4 sm:$0xff]   ;;  %v20552_v18 = vld [vmem:[#allocation5 + $0x10b0] ss:$24 sps:$4 sm:$0xff]   ;;  %v20557_v21 = vld [vmem:[#allocation5 + $0xd94] ss:$24 sps:$4 sm:$0xff]  }
 0x412   :  { %7764 = vmatpush2.bf16.xpose.msra.mxu0 %v20525_v22  ;;  %v20560_v22 = vld [vmem:[#allocation5 + $0x1084] ss:$24 sps:$4 sm:$0xff]  }
 0x413   :  { %7807 = vmatpush2.bf16.xpose.msra.mxu1 %v20528_v29  ;;  %7765 = vmatprep.subr.bf16.mxu0 %v20533_v33  ;;  %v20555_v29 = vld [vmem:[#allocation5 + $0xd90] ss:$24 sps:$4 sm:$0xff]   ;;  %v20558_v33 = vld [vmem:[#allocation5 + $0x1080] ss:$24 sps:$4 sm:$0xff]  }
 0x414   :  { %7808 = vmatprep.subr.bf16.mxu1 %v20536_v34  ;;  %v20563_v34 = vld [vmem:[#allocation5 + $0x105c] ss:$24 sps:$4 sm:$0xff]  }
 0x415   :  { %v21534_v37 = vpop.eup %21533 }
 0x416   :  { %v8840_v43 = vadd.f32 1.0, %v21534_v37  ;;  %v20566_v37 = vld [vmem:[#allocation5 + $0x1064] ss:$24 sps:$4 sm:$0xff]  }
 0x418   :  { %v8888_v48 = vmul.f32 %v8840_v43, %v8695_v45  ;;  %v20567_v43 = vld [vmem:[#allocation5 + $0x1028] ss:$24 sps:$4 sm:$0xff]   ;;  %v20575_v45 = vld [vmem:[#allocation5 + $0xffc] ss:$24 sps:$4 sm:$0xff]  }
 0x419   :  { %v21536_v44 = vpop.eup %21535 }
 0x41a   :  { %v8864_v47 = vadd.f32 1.0, %v21536_v44  ;;  %7766 = vmatpush2.bf16.xpose.msra.mxu0 %v20531_v39  ;;  %v20561_v39 = vld [vmem:[#allocation5 + $0x1058] ss:$24 sps:$4 sm:$0xff]  }
 0x41b   :  { %7809 = vmatpush2.bf16.xpose.msra.mxu1 %v20534_v25  ;;  %7767 = vmatprep.subr.bf16.mxu0 %v20539_v41  ;;  %v20564_v25 = vld [vmem:[#allocation5 + $0x1060] ss:$24 sps:$4 sm:$0xff]   ;;  %v20569_v41 = vld [vmem:[#allocation5 + $0x102c] ss:$24 sps:$4 sm:$0xff]   ;;  %v20570_v44 = vld [vmem:[#allocation5 + $0x1030] ss:$24 sps:$4 sm:$0xff]  }
 0x41c   :  { %7810 = vmatprep.subr.bf16.mxu1 %v20542_v42  ;;  %v8912_v49 = vmul.f32 %v8864_v47, %v8719_v46  ;;  %v20572_v42 = vld [vmem:[#allocation5 + $0x1034] ss:$24 sps:$4 sm:$0xff]   ;;  %v20578_v46 = vld [vmem:[#allocation5 + $0x1004] ss:$24 sps:$4 sm:$0xff]   ;;  %v20573_v47 = vld [vmem:[#allocation5 + $0xff8] ss:$24 sps:$4 sm:$0xff]  }
 0x41e   :  { %v21940_v63 = vpack.c.bf16 %v8912_v49, %v8888_v48  ;;  %v20576_v48 = vld [vmem:[#allocation5 + $0x1000] ss:$24 sps:$4 sm:$0xff]   ;;  %v20581_v49 = vld [vmem:[#allocation5 + $0xfcc] ss:$24 sps:$4 sm:$0xff]  }
 0x420   :  { %22543 = vst [vmem:[#allocation22_spill] sm:$0xff] %v21940_v63 }
 0x422   :  { %7768 = vmatpush2.bf16.xpose.msra.mxu0 %v20537_v54  ;;  %v20584_v54 = vld [vmem:[#allocation5 + $0xfd4] ss:$24 sps:$4 sm:$0xff]  }
 0x423   :  { %7811 = vmatpush2.bf16.xpose.msra.mxu1 %v20540_v57  ;;  %7769 = vmatprep.subr.bf16.mxu0 %v20545_v61  ;;  %v20579_v57 = vld [vmem:[#allocation5 + $0xfc8] ss:$24 sps:$4 sm:$0xff]  }
 0x424   :  { %7812 = vmatprep.subr.bf16.mxu1 %v20548_v0  ;;  %v20582_v61 = vld [vmem:[#allocation5 + $0xfd0] ss:$24 sps:$4 sm:$0xff]   ;;  %v20587_v0 = vld [vmem:[#allocation5 + $0xf9c] ss:$24 sps:$4 sm:$0xff]  }
 0x42a   :  { %7770 = vmatpush2.bf16.xpose.msra.mxu0 %v20543_v2  ;;  %v20590_v2 = vld [vmem:[#allocation5 + $0xfa4] ss:$24 sps:$4 sm:$0xff]  }
 0x42b   :  { %7813 = vmatpush2.bf16.xpose.msra.mxu1 %v20546_v53  ;;  %7771 = vmatprep.subr.bf16.mxu0 %v20551_v5  ;;  %v20585_v53 = vld [vmem:[#allocation5 + $0xf98] ss:$24 sps:$4 sm:$0xff]  }
 0x42c   :  { %7814 = vmatprep.subr.bf16.mxu1 %v20554_v6  ;;  %v20588_v5 = vld [vmem:[#allocation5 + $0xfa0] ss:$24 sps:$4 sm:$0xff]   ;;  %v20593_v6 = vld [vmem:[#allocation5 + $0xf6c] ss:$24 sps:$4 sm:$0xff]  }
 0x432   :  { %7772 = vmatpush2.bf16.xpose.msra.mxu0 %v20549_v13  ;;  %v20596_v13 = vld [vmem:[#allocation5 + $0xf74] ss:$24 sps:$4 sm:$0xff]  }
 0x433   :  { %7815 = vmatpush2.bf16.xpose.msra.mxu1 %v20552_v18  ;;  %7773 = vmatprep.subr.bf16.mxu0 %v20557_v21  ;;  %v20591_v18 = vld [vmem:[#allocation5 + $0xf68] ss:$24 sps:$4 sm:$0xff]  }
 0x434   :  { %7816 = vmatprep.subr.bf16.mxu1 %v20560_v22  ;;  %v20594_v21 = vld [vmem:[#allocation5 + $0xf70] ss:$24 sps:$4 sm:$0xff]   ;;  %v20599_v22 = vld [vmem:[#allocation5 + $0xf3c] ss:$24 sps:$4 sm:$0xff]  }
 0x43a   :  { %7774 = vmatpush2.bf16.xpose.msra.mxu0 %v20555_v29  ;;  %v20602_v29 = vld [vmem:[#allocation5 + $0xf44] ss:$24 sps:$4 sm:$0xff]  }
 0x43b   :  { %7817 = vmatpush2.bf16.xpose.msra.mxu1 %v20558_v33  ;;  %7829 = vmatprep.subr.bf16.mxu0 %v20563_v34  ;;  %v20597_v33 = vld [vmem:[#allocation5 + $0xf38] ss:$24 sps:$4 sm:$0xff]  }
 0x43c   :  { %7872 = vmatprep.subr.bf16.mxu1 %v20566_v37  ;;  %v20600_v34 = vld [vmem:[#allocation5 + $0xf40] ss:$24 sps:$4 sm:$0xff]   ;;  %v20605_v37 = vld [vmem:[#allocation5 + $0xf0c] ss:$24 sps:$4 sm:$0xff]  }
 0x441   :  { %7776 = vmatmul.mubr.bf16.vlgmr.msra.gmra.mxu0 %v21829_v26 }
 0x442   :  { %7819 = vmatmul.mubr.bf16.vlgmr.msra.gmra.mxu1 %v21819_v16  ;;  %7830 = vmatpush1.bf16.xpose.msra.mxu0 %v20561_v39  ;;  %v20608_v39 = vld [vmem:[#allocation5 + $0xf14] ss:$24 sps:$4 sm:$0xff]  }
 0x443   :  { %7873 = vmatpush1.bf16.xpose.msra.mxu1 %v20564_v25  ;;  %7831 = vmatprep.subr.bf16.mxu0 %v20569_v41  ;;  %v20603_v25 = vld [vmem:[#allocation5 + $0xf08] ss:$24 sps:$4 sm:$0xff]  }
 0x444   :  { %7874 = vmatprep.subr.bf16.mxu1 %v20572_v42  ;;  %7861 = vmatprep.mubr.bf16.mxu0 %v21815_v31  ;;  %v20606_v41 = vld [vmem:[#allocation5 + $0xf10] ss:$24 sps:$4 sm:$0xff]   ;;  %v20611_v42 = vld [vmem:[#allocation5 + $0x11dc] ss:$24 sps:$4 sm:$0xff]  }
 0x445   :  { %7904 = vmatprep.mubr.bf16.mxu1 %v21823_v20 }
 0x44a   :  { %7832 = vmatpush1.bf16.xpose.msra.mxu0 %v20567_v43  ;;  %v20614_v43 = vld [vmem:[#allocation5 + $0x11e4] ss:$24 sps:$4 sm:$0xff]  }
 0x44b   :  { %7875 = vmatpush1.bf16.xpose.msra.mxu1 %v20570_v44  ;;  %7833 = vmatprep.subr.bf16.mxu0 %v20575_v45  ;;  %v21946_v44 = vld [vmem:[#allocation7 + $0x8] sm:$0xff] }
 0x44c   :  { %7876 = vmatprep.subr.bf16.mxu1 %v20578_v46  ;;  %v1296_v45 = vrot.slane %v21946_v44, %v21838_v62  ;;  %v20609_v46 = vld [vmem:[#allocation5 + $0x11d8] ss:$24 sps:$4 sm:$0xff]  }
 0x452   :  { %7834 = vmatpush1.bf16.xpose.msra.mxu0 %v20573_v47  ;;  %v20612_v47 = vld [vmem:[#allocation5 + $0x11e0] ss:$24 sps:$4 sm:$0xff]  }
 0x453   :  { %7877 = vmatpush1.bf16.xpose.msra.mxu1 %v20576_v48  ;;  %7835 = vmatprep.subr.bf16.mxu0 %v20581_v49  ;;  %v21950_v48 = vpop.f32.mrf.mxu0  ;;  %v21952_v49 = vpop.f32.mrf.mxu1 }
 0x454   :  { %7878 = vmatprep.subr.bf16.mxu1 %v20584_v54  ;;  %v20617_v54 = vld [vmem:[#allocation5 + $0x11ac] ss:$24 sps:$4 sm:$0xff]  }
 0x45a   :  { %7836 = vmatpush1.bf16.xpose.msra.mxu0 %v20579_v57  ;;  %v20620_v57 = vld [vmem:[#allocation5 + $0x11b4] ss:$24 sps:$4 sm:$0xff]  }
 0x45b   :  { %7879 = vmatpush1.bf16.xpose.msra.mxu1 %v20582_v61  ;;  %7837 = vmatprep.subr.bf16.mxu0 %v20587_v0 }
 0x45c   :  { %7880 = vmatprep.subr.bf16.mxu1 %v20590_v2 }
 0x462   :  { %7838 = vmatpush1.bf16.xpose.msra.mxu0 %v20585_v53 }
 0x463   :  { %7881 = vmatpush1.bf16.xpose.msra.mxu1 %v20588_v5  ;;  %7839 = vmatprep.subr.bf16.mxu0 %v20593_v6 }
 0x464   :  { %7882 = vmatprep.subr.bf16.mxu1 %v20596_v13 }
 0x46a   :  { %7840 = vmatpush1.bf16.xpose.msra.mxu0 %v20591_v18 }
 0x46b   :  { %7883 = vmatpush1.bf16.xpose.msra.mxu1 %v20594_v21  ;;  %7841 = vmatprep.subr.bf16.mxu0 %v20599_v22  ;;  %v20615_v21 = vld [vmem:[#allocation5 + $0x11a8] ss:$24 sps:$4 sm:$0xff]  }
 0x46c   :  { %7884 = vmatprep.subr.bf16.mxu1 %v20602_v29  ;;  %v20618_v22 = vld [vmem:[#allocation5 + $0x11b0] ss:$24 sps:$4 sm:$0xff]  }
 0x472   :  { %7842 = vmatpush1.bf16.xpose.msra.mxu0 %v20597_v33  ;;  %v20623_v33 = vld [vmem:[#allocation5 + $0x117c] ss:$24 sps:$4 sm:$0xff]  }
 0x473   :  { %7885 = vmatpush1.bf16.xpose.msra.mxu1 %v20600_v34  ;;  %7843 = vmatprep.subr.bf16.mxu0 %v20605_v37  ;;  %v20626_v34 = vld [vmem:[#allocation5 + $0x1184] ss:$24 sps:$4 sm:$0xff]  }
 0x474   :  { %7886 = vmatprep.subr.bf16.mxu1 %v20608_v39  ;;  %v20621_v39 = vld [vmem:[#allocation5 + $0x1178] ss:$24 sps:$4 sm:$0xff]  }
 0x47a   :  { %7844 = vmatpush1.bf16.xpose.msra.mxu0 %v20603_v25  ;;  %v20624_v25 = vld [vmem:[#allocation5 + $0x1180] ss:$24 sps:$4 sm:$0xff]  }
 0x47b   :  { %7887 = vmatpush1.bf16.xpose.msra.mxu1 %v20606_v41  ;;  %7845 = vmatprep.subr.bf16.mxu0 %v20611_v42  ;;  %v20629_v41 = vld [vmem:[#allocation5 + $0x114c] ss:$24 sps:$4 sm:$0xff]  }
 0x47c   :  { %7888 = vmatprep.subr.bf16.mxu1 %v20614_v43  ;;  %v20632_v42 = vld [vmem:[#allocation5 + $0x1154] ss:$24 sps:$4 sm:$0xff]   ;;  %v20627_v43 = vld [vmem:[#allocation5 + $0x1148] ss:$24 sps:$4 sm:$0xff]  }
 0x481   :  { %v7691_v61 = vpop.f32.mrf.mxu0 }
 0x482   :  { %v7734_v0 = vpop.f32.mrf.mxu1  ;;  %v7692_v2 = vadd.f32 %v7691_v61, %v1296_v45  ;;  %7846 = vmatpush2.bf16.xpose.msra.mxu0 %v20609_v46  ;;  %v20635_v46 = vld [vmem:[#allocation5 + $0x111c] ss:$24 sps:$4 sm:$0xff]   ;;  %v20641_v61 = vld [vmem:[#allocation5 + $0x10ec] ss:$24 sps:$4 sm:$0xff]  }
 0x483   :  { %7889 = vmatpush2.bf16.xpose.msra.mxu1 %v20612_v47  ;;  %v21954_v53 = vpop.f32.mrf.mxu0  ;;  %7847 = vmatprep.subr.bf16.mxu0 %v20617_v54  ;;  %v20638_v47 = vld [vmem:[#allocation5 + $0x1124] ss:$24 sps:$4 sm:$0xff]   ;;  %v20633_v54 = vld [vmem:[#allocation5 + $0x1118] ss:$24 sps:$4 sm:$0xff]  }
 0x484   :  { %v21956_v5 = vpop.f32.mrf.mxu1  ;;  %7890 = vmatprep.subr.bf16.mxu1 %v20620_v57  ;;  %v21958_v6 = vadd.f32 %v7734_v0, %v7692_v2  ;;  %v20636_v57 = vld [vmem:[#allocation5 + $0x1120] ss:$24 sps:$4 sm:$0xff]   ;;  %v20644_v0 = vld [vmem:[#allocation5 + $0x10f4] ss:$24 sps:$4 sm:$0xff]  }
 0x485   :  { %22544 = vst [vmem:[#allocation23_spill] sm:$0xff] %v21956_v5  ;;  %v7695_v13 = vpop.f32.mrf.mxu0  ;;  %v20639_v2 = vld [vmem:[#allocation5 + $0x10e8] ss:$24 sps:$4 sm:$0xff]  }
 0x486   :  { %v7696_v18 = vadd.f32 %v7695_v13, %v1296_v45  ;;  %v7738_v29 = vpop.f32.mrf.mxu1  ;;  %v20630_v45 = vld [vmem:[#allocation5 + $0x1150] ss:$24 sps:$4 sm:$0xff]  }
 0x487   :  { %v20642_v13 = vld [vmem:[#allocation5 + $0x10f0] ss:$24 sps:$4 sm:$0xff]  }
 0x488   :  { %v21960_v37 = vadd.f32 %v7738_v29, %v7696_v18  ;;  %v20647_v18 = vld [vmem:[#allocation5 + $0x10bc] ss:$24 sps:$4 sm:$0xff]   ;;  %v20648_v29 = vld [vmem:[#allocation5 + $0x10c0] ss:$24 sps:$4 sm:$0xff]  }
 0x48a   :  { %7848 = vmatpush2.bf16.xpose.msra.mxu0 %v20615_v21  ;;  %v20650_v21 = vld [vmem:[#allocation5 + $0x10c4] ss:$24 sps:$4 sm:$0xff]  }
 0x48b   :  { %7891 = vmatpush2.bf16.xpose.msra.mxu1 %v20618_v22  ;;  %7849 = vmatprep.subr.bf16.mxu0 %v20623_v33  ;;  %v20645_v22 = vld [vmem:[#allocation5 + $0x10b8] ss:$24 sps:$4 sm:$0xff]   ;;  %v20653_v33 = vld [vmem:[#allocation5 + $0x108c] ss:$24 sps:$4 sm:$0xff]  }
 0x48c   :  { %7892 = vmatprep.subr.bf16.mxu1 %v20626_v34  ;;  %v20656_v34 = vld [vmem:[#allocation5 + $0x1094] ss:$24 sps:$4 sm:$0xff]  }
 0x492   :  { %7850 = vmatpush2.bf16.xpose.msra.mxu0 %v20621_v39  ;;  %v20651_v39 = vld [vmem:[#allocation5 + $0x1088] ss:$24 sps:$4 sm:$0xff]  }
 0x493   :  { %7893 = vmatpush2.bf16.xpose.msra.mxu1 %v20624_v25  ;;  %7851 = vmatprep.subr.bf16.mxu0 %v20629_v41  ;;  %v20654_v25 = vld [vmem:[#allocation5 + $0x1090] ss:$24 sps:$4 sm:$0xff]   ;;  %v20659_v41 = vld [vmem:[#allocation5 + $0x1354] ss:$24 sps:$4 sm:$0xff]  }
 0x494   :  { %7894 = vmatprep.subr.bf16.mxu1 %v20632_v42  ;;  %v20662_v42 = vld [vmem:[#allocation5 + $0x135c] ss:$24 sps:$4 sm:$0xff]  }
 0x49a   :  { %7852 = vmatpush2.bf16.xpose.msra.mxu0 %v20627_v43  ;;  %v20657_v43 = vld [vmem:[#allocation5 + $0x1350] ss:$24 sps:$4 sm:$0xff]  }
 0x49b   :  { %7895 = vmatpush2.bf16.xpose.msra.mxu1 %v20630_v45  ;;  %7853 = vmatprep.subr.bf16.mxu0 %v20635_v46  ;;  %v20660_v45 = vld [vmem:[#allocation5 + $0x1358] ss:$24 sps:$4 sm:$0xff]   ;;  %v20665_v46 = vld [vmem:[#allocation5 + $0x1324] ss:$24 sps:$4 sm:$0xff]  }
 0x49c   :  { %7896 = vmatprep.subr.bf16.mxu1 %v20638_v47  ;;  %v20668_v47 = vld [vmem:[#allocation5 + $0x132c] ss:$24 sps:$4 sm:$0xff]  }
 0x4a2   :  { %7854 = vmatpush2.bf16.xpose.msra.mxu0 %v20633_v54  ;;  %v20663_v54 = vld [vmem:[#allocation5 + $0x1320] ss:$24 sps:$4 sm:$0xff]  }
 0x4a3   :  { %7897 = vmatpush2.bf16.xpose.msra.mxu1 %v20636_v57  ;;  %7855 = vmatprep.subr.bf16.mxu0 %v20641_v61  ;;  %v20666_v57 = vld [vmem:[#allocation5 + $0x1328] ss:$24 sps:$4 sm:$0xff]   ;;  %v20671_v61 = vld [vmem:[#allocation5 + $0x12f4] ss:$24 sps:$4 sm:$0xff]  }
 0x4a4   :  { %7898 = vmatprep.subr.bf16.mxu1 %v20644_v0  ;;  %v20674_v0 = vld [vmem:[#allocation5 + $0x12fc] ss:$24 sps:$4 sm:$0xff]  }
 0x4aa   :  { %7856 = vmatpush2.bf16.xpose.msra.mxu0 %v20639_v2  ;;  %v20669_v2 = vld [vmem:[#allocation5 + $0x12f0] ss:$24 sps:$4 sm:$0xff]  }
 0x4ab   :  { %7899 = vmatpush2.bf16.xpose.msra.mxu1 %v20642_v13  ;;  %7857 = vmatprep.subr.bf16.mxu0 %v20647_v18  ;;  %v20672_v13 = vld [vmem:[#allocation5 + $0x12f8] ss:$24 sps:$4 sm:$0xff]   ;;  %v20677_v18 = vld [vmem:[#allocation5 + $0x12c4] ss:$24 sps:$4 sm:$0xff]  }
 0x4ac   :  { %7900 = vmatprep.subr.bf16.mxu1 %v20650_v21  ;;  %v20680_v21 = vld [vmem:[#allocation5 + $0x12cc] ss:$24 sps:$4 sm:$0xff]  }
 0x4b2   :  { %7858 = vmatpush2.bf16.xpose.msra.mxu0 %v20645_v22  ;;  %v20675_v22 = vld [vmem:[#allocation5 + $0x12c0] ss:$24 sps:$4 sm:$0xff]  }
 0x4b3   :  { %7901 = vmatpush2.bf16.xpose.msra.mxu1 %v20648_v29  ;;  %7859 = vmatprep.subr.bf16.mxu0 %v20653_v33  ;;  %v20678_v29 = vld [vmem:[#allocation5 + $0x12c8] ss:$24 sps:$4 sm:$0xff]   ;;  %v20683_v33 = vld [vmem:[#allocation5 + $0x1294] ss:$24 sps:$4 sm:$0xff]  }
 0x4b4   :  { %7902 = vmatprep.subr.bf16.mxu1 %v20656_v34  ;;  %v20686_v34 = vld [vmem:[#allocation5 + $0x129c] ss:$24 sps:$4 sm:$0xff]  }
 0x4ba   :  { %7860 = vmatpush2.bf16.xpose.msra.mxu0 %v20651_v39  ;;  %v20681_v39 = vld [vmem:[#allocation5 + $0x1290] ss:$24 sps:$4 sm:$0xff]  }
 0x4bb   :  { %7903 = vmatpush2.bf16.xpose.msra.mxu1 %v20654_v25  ;;  %7915 = vmatprep.subr.bf16.mxu0 %v20659_v41  ;;  %v20684_v25 = vld [vmem:[#allocation5 + $0x1298] ss:$24 sps:$4 sm:$0xff]   ;;  %v20689_v41 = vld [vmem:[#allocation5 + $0x1264] ss:$24 sps:$4 sm:$0xff]  }
 0x4bc   :  { %7958 = vmatprep.subr.bf16.mxu1 %v20662_v42  ;;  %v20692_v42 = vld [vmem:[#allocation5 + $0x126c] ss:$24 sps:$4 sm:$0xff]  }
 0x4c1   :  { %7862 = vmatmul.mubr.bf16.vlgmr.msra.gmra.mxu0 %v21821_v17 }
 0x4c2   :  { %7905 = vmatmul.mubr.bf16.vlgmr.msra.gmra.mxu1 %v21829_v26  ;;  %7916 = vmatpush1.bf16.xpose.msra.mxu0 %v20657_v43  ;;  %v20687_v43 = vld [vmem:[#allocation5 + $0x1260] ss:$24 sps:$4 sm:$0xff]  }
 0x4c3   :  { %7959 = vmatpush1.bf16.xpose.msra.mxu1 %v20660_v45  ;;  %7917 = vmatprep.subr.bf16.mxu0 %v20665_v46  ;;  %v20690_v45 = vld [vmem:[#allocation5 + $0x1268] ss:$24 sps:$4 sm:$0xff]   ;;  %v20695_v46 = vld [vmem:[#allocation5 + $0x1234] ss:$24 sps:$4 sm:$0xff]  }
 0x4c4   :  { %7960 = vmatprep.subr.bf16.mxu1 %v20668_v47  ;;  %7947 = vmatprep.mubr.bf16.mxu0 %v21813_v30  ;;  %v20698_v47 = vld [vmem:[#allocation5 + $0x123c] ss:$24 sps:$4 sm:$0xff]  }
 0x4c5   :  { %7990 = vmatprep.mubr.bf16.mxu1 %v21815_v31 }
 0x4ca   :  { %7918 = vmatpush1.bf16.xpose.msra.mxu0 %v20663_v54  ;;  %v20693_v54 = vld [vmem:[#allocation5 + $0x1230] ss:$24 sps:$4 sm:$0xff]  }
 0x4cb   :  { %7961 = vmatpush1.bf16.xpose.msra.mxu1 %v20666_v57  ;;  %7919 = vmatprep.subr.bf16.mxu0 %v20671_v61  ;;  %v20696_v57 = vld [vmem:[#allocation5 + $0x1238] ss:$24 sps:$4 sm:$0xff]   ;;  %v20701_v61 = vld [vmem:[#allocation5 + $0x1204] ss:$24 sps:$4 sm:$0xff]  }
 0x4cc   :  { %7962 = vmatprep.subr.bf16.mxu1 %v20674_v0  ;;  %v20704_v0 = vld [vmem:[#allocation5 + $0x120c] ss:$24 sps:$4 sm:$0xff]  }
 0x4d2   :  { %7920 = vmatpush1.bf16.xpose.msra.mxu0 %v20669_v2  ;;  %v20699_v2 = vld [vmem:[#allocation5 + $0x1200] ss:$24 sps:$4 sm:$0xff]  }
 0x4d3   :  { %7963 = vmatpush1.bf16.xpose.msra.mxu1 %v20672_v13  ;;  %7921 = vmatprep.subr.bf16.mxu0 %v20677_v18  ;;  %v20702_v13 = vld [vmem:[#allocation5 + $0x1208] ss:$24 sps:$4 sm:$0xff]   ;;  %v20707_v18 = vld [vmem:[#allocation5 + $0x14d4] ss:$24 sps:$4 sm:$0xff]  }
 0x4d4   :  { %7964 = vmatprep.subr.bf16.mxu1 %v20680_v21  ;;  %v20710_v21 = vld [vmem:[#allocation5 + $0x14dc] ss:$24 sps:$4 sm:$0xff]  }
 0x4da   :  { %7922 = vmatpush1.bf16.xpose.msra.mxu0 %v20675_v22  ;;  %v20705_v22 = vld [vmem:[#allocation5 + $0x14d0] ss:$24 sps:$4 sm:$0xff]  }
 0x4db   :  { %7965 = vmatpush1.bf16.xpose.msra.mxu1 %v20678_v29  ;;  %7923 = vmatprep.subr.bf16.mxu0 %v20683_v33  ;;  %v20708_v29 = vld [vmem:[#allocation5 + $0x14d8] ss:$24 sps:$4 sm:$0xff]   ;;  %v21966_v33 = vpop.f32.mrf.mxu0 }
 0x4dc   :  { %7966 = vmatprep.subr.bf16.mxu1 %v20686_v34  ;;  %v20713_v34 = vld [vmem:[#allocation5 + $0x14a4] ss:$24 sps:$4 sm:$0xff]  }
 0x4e2   :  { %7924 = vmatpush1.bf16.xpose.msra.mxu0 %v20681_v39  ;;  %v20716_v39 = vld [vmem:[#allocation5 + $0x14ac] ss:$24 sps:$4 sm:$0xff]  }
 0x4e3   :  { %7967 = vmatpush1.bf16.xpose.msra.mxu1 %v20684_v25  ;;  %7925 = vmatprep.subr.bf16.mxu0 %v20689_v41 }
 0x4e4   :  { %7968 = vmatprep.subr.bf16.mxu1 %v20692_v42 }
 0x4ea   :  { %7926 = vmatpush1.bf16.xpose.msra.mxu0 %v20687_v43 }
 0x4eb   :  { %7969 = vmatpush1.bf16.xpose.msra.mxu1 %v20690_v45  ;;  %7927 = vmatprep.subr.bf16.mxu0 %v20695_v46 }
 0x4ec   :  { %7970 = vmatprep.subr.bf16.mxu1 %v20698_v47  ;;  %v20711_v47 = vld [vmem:[#allocation5 + $0x14a0] ss:$24 sps:$4 sm:$0xff]  }
 0x4f2   :  { %7928 = vmatpush1.bf16.xpose.msra.mxu0 %v20693_v54  ;;  %v20714_v54 = vld [vmem:[#allocation5 + $0x14a8] ss:$24 sps:$4 sm:$0xff]  }
 0x4f3   :  { %7971 = vmatpush1.bf16.xpose.msra.mxu1 %v20696_v57  ;;  %7929 = vmatprep.subr.bf16.mxu0 %v20701_v61  ;;  %v20719_v57 = vld [vmem:[#allocation5 + $0x1474] ss:$24 sps:$4 sm:$0xff]  }
 0x4f4   :  { %7972 = vmatprep.subr.bf16.mxu1 %v20704_v0  ;;  %v20722_v61 = vld [vmem:[#allocation5 + $0x147c] ss:$24 sps:$4 sm:$0xff]  }
 0x4fa   :  { %7930 = vmatpush1.bf16.xpose.msra.mxu0 %v20699_v2  ;;  %v20720_v2 = vld [vmem:[#allocation5 + $0x1478] ss:$24 sps:$4 sm:$0xff]  }
 0x4fb   :  { %7973 = vmatpush1.bf16.xpose.msra.mxu1 %v20702_v13  ;;  %7931 = vmatprep.subr.bf16.mxu0 %v20707_v18  ;;  %v20725_v13 = vld [vmem:[#allocation5 + $0x1444] ss:$24 sps:$4 sm:$0xff]  }
 0x4fc   :  { %7974 = vmatprep.subr.bf16.mxu1 %v20710_v21  ;;  %v20728_v18 = vld [vmem:[#allocation5 + $0x144c] ss:$24 sps:$4 sm:$0xff]  }
 0x501   :  { %v7777_v25 = vpop.f32.mrf.mxu0 }
 0x502   :  { %v7778_v41 = vadd.f32 %v7777_v25, %v21958_v6  ;;  %7932 = vmatpush2.bf16.xpose.msra.mxu0 %v20705_v22  ;;  %v20717_v6 = vld [vmem:[#allocation5 + $0x1470] ss:$24 sps:$4 sm:$0xff]   ;;  %v20723_v22 = vld [vmem:[#allocation5 + $0x1440] ss:$24 sps:$4 sm:$0xff]   ;;  %v20734_v25 = vld [vmem:[#allocation5 + $0x141c] ss:$24 sps:$4 sm:$0xff]  }
 0x503   :  { %7975 = vmatpush2.bf16.xpose.msra.mxu1 %v20708_v29  ;;  %v21969_v42 = vpop.f32.mrf.mxu0  ;;  %7933 = vmatprep.subr.bf16.mxu0 %v20713_v34  ;;  %v20726_v29 = vld [vmem:[#allocation5 + $0x1448] ss:$24 sps:$4 sm:$0xff]  }
 0x504   :  { %22545 = vst [vmem:[#allocation24_spill] sm:$0xff] %v21969_v42  ;;  %7976 = vmatprep.subr.bf16.mxu1 %v20716_v39  ;;  %v8746_v43 = vmul.f32 0.70710677, %v7778_v41  ;;  %v20731_v39 = vld [vmem:[#allocation5 + $0x1414] ss:$24 sps:$4 sm:$0xff]  }
 0x505   :  { %v7781_v45 = vpop.f32.mrf.mxu0  ;;  %v20807_v42 = vld [vmem:[#allocation5 + $0x14b0] ss:$24 sps:$4 sm:$0xff]  }
 0x506   :  { %21537 = verf.f32 %v8746_v43  ;;  %v7782_v46 = vadd.f32 %v7781_v45, %v21960_v37  ;;  %v8697_v43 = vmul.f32 0.5, %v7778_v41  ;;  %v20738_v41 = vld [vmem:[#allocation5 + $0x13e8] ss:$24 sps:$4 sm:$0xff]  }
 0x508   :  { %v8770_v0 = vmul.f32 0.70710677, %v7782_v46  ;;  %v8721_v45 = vmul.f32 0.5, %v7782_v46  ;;  %v20743_v46 = vld [vmem:[#allocation5 + $0x13b4] ss:$24 sps:$4 sm:$0xff]  }
 0x50a   :  { %21539 = verf.f32 %v8770_v0  ;;  %7934 = vmatpush2.bf16.xpose.msra.mxu0 %v20711_v47  ;;  %v20729_v0 = vld [vmem:[#allocation5 + $0x1410] ss:$24 sps:$4 sm:$0xff]  }
 0x50b   :  { %7977 = vmatpush2.bf16.xpose.msra.mxu1 %v20714_v54  ;;  %7935 = vmatprep.subr.bf16.mxu0 %v20719_v57 }
 0x50c   :  { %7978 = vmatprep.subr.bf16.mxu1 %v20722_v61 }
 0x512   :  { %7936 = vmatpush2.bf16.xpose.msra.mxu0 %v20717_v6  ;;  %v20732_v6 = vld [vmem:[#allocation5 + $0x1418] ss:$24 sps:$4 sm:$0xff]  }
 0x513   :  { %7979 = vmatpush2.bf16.xpose.msra.mxu1 %v20720_v2  ;;  %v21538_v21 = vpop.eup %21537  ;;  %7937 = vmatprep.subr.bf16.mxu0 %v20725_v13  ;;  %v20737_v2 = vld [vmem:[#allocation5 + $0x13e4] ss:$24 sps:$4 sm:$0xff]  }
 0x514   :  { %7980 = vmatprep.subr.bf16.mxu1 %v20728_v18  ;;  %v8842_v37 = vadd.f32 1.0, %v21538_v21  ;;  %v20740_v13 = vld [vmem:[#allocation5 + $0x13ec] ss:$24 sps:$4 sm:$0xff]   ;;  %v20735_v18 = vld [vmem:[#allocation5 + $0x13e0] ss:$24 sps:$4 sm:$0xff]  }
 0x515   :  { %v20746_v21 = vld [vmem:[#allocation5 + $0x13bc] ss:$24 sps:$4 sm:$0xff]  }
 0x516   :  { %v8890_v54 = vmul.f32 %v8842_v37, %v8697_v43  ;;  %v20741_v37 = vld [vmem:[#allocation5 + $0x13b0] ss:$24 sps:$4 sm:$0xff]   ;;  %v20755_v43 = vld [vmem:[#allocation5 + $0x1364] ss:$24 sps:$4 sm:$0xff]  }
 0x517   :  { %v21540_v34 = vpop.eup %21539 }
 0x518   :  { %v8866_v47 = vadd.f32 1.0, %v21540_v34  ;;  %v20752_v34 = vld [vmem:[#allocation5 + $0x138c] ss:$24 sps:$4 sm:$0xff]  }
 0x51a   :  { %v8914_v57 = vmul.f32 %v8866_v47, %v8721_v45  ;;  %7938 = vmatpush2.bf16.xpose.msra.mxu0 %v20723_v22  ;;  %v20744_v22 = vld [vmem:[#allocation5 + $0x13b8] ss:$24 sps:$4 sm:$0xff]   ;;  %v20758_v45 = vld [vmem:[#allocation5 + $0x1654] ss:$24 sps:$4 sm:$0xff]  }
 0x51b   :  { %7981 = vmatpush2.bf16.xpose.msra.mxu1 %v20726_v29  ;;  %7939 = vmatprep.subr.bf16.mxu0 %v20731_v39  ;;  %v20749_v29 = vld [vmem:[#allocation5 + $0x1384] ss:$24 sps:$4 sm:$0xff]   ;;  %v20747_v39 = vld [vmem:[#allocation5 + $0x1380] ss:$24 sps:$4 sm:$0xff]  }
 0x51c   :  { %7982 = vmatprep.subr.bf16.mxu1 %v20734_v25  ;;  %v21972_v61 = vpack.c.bf16 %v8914_v57, %v8890_v54  ;;  %v20750_v25 = vld [vmem:[#allocation5 + $0x1388] ss:$24 sps:$4 sm:$0xff]   ;;  %v20761_v57 = vld [vmem:[#allocation5 + $0x1334] ss:$24 sps:$4 sm:$0xff]  }
 0x51d   :  { %v20753_v47 = vld [vmem:[#allocation5 + $0x1360] ss:$24 sps:$4 sm:$0xff]   ;;  %v20756_v54 = vld [vmem:[#allocation5 + $0x1650] ss:$24 sps:$4 sm:$0xff]  }
 0x51e   :  { %22546 = vst [vmem:[#allocation25_spill] sm:$0xff] %v21972_v61 }
 0x522   :  { %7940 = vmatpush2.bf16.xpose.msra.mxu0 %v20729_v0  ;;  %v20764_v0 = vld [vmem:[#allocation5 + $0x1624] ss:$24 sps:$4 sm:$0xff]  }
 0x523   :  { %7983 = vmatpush2.bf16.xpose.msra.mxu1 %v20732_v6  ;;  %7941 = vmatprep.subr.bf16.mxu0 %v20737_v2  ;;  %v20759_v6 = vld [vmem:[#allocation5 + $0x1330] ss:$24 sps:$4 sm:$0xff]   ;;  %v20762_v2 = vld [vmem:[#allocation5 + $0x1620] ss:$24 sps:$4 sm:$0xff]  }
 0x524   :  { %7984 = vmatprep.subr.bf16.mxu1 %v20740_v13  ;;  %v20767_v13 = vld [vmem:[#allocation5 + $0x1304] ss:$24 sps:$4 sm:$0xff]  }
 0x52a   :  { %7942 = vmatpush2.bf16.xpose.msra.mxu0 %v20735_v18  ;;  %v20770_v18 = vld [vmem:[#allocation5 + $0x15f4] ss:$24 sps:$4 sm:$0xff]  }
 0x52b   :  { %7985 = vmatpush2.bf16.xpose.msra.mxu1 %v20738_v41  ;;  %7943 = vmatprep.subr.bf16.mxu0 %v20743_v46  ;;  %v20765_v41 = vld [vmem:[#allocation5 + $0x1300] ss:$24 sps:$4 sm:$0xff]   ;;  %v20768_v46 = vld [vmem:[#allocation5 + $0x15f0] ss:$24 sps:$4 sm:$0xff]  }
 0x52c   :  { %7986 = vmatprep.subr.bf16.mxu1 %v20746_v21  ;;  %v20773_v21 = vld [vmem:[#allocation5 + $0x12d4] ss:$24 sps:$4 sm:$0xff]  }
 0x532   :  { %7944 = vmatpush2.bf16.xpose.msra.mxu0 %v20741_v37  ;;  %v20776_v37 = vld [vmem:[#allocation5 + $0x15c4] ss:$24 sps:$4 sm:$0xff]  }
 0x533   :  { %7987 = vmatpush2.bf16.xpose.msra.mxu1 %v20744_v22  ;;  %7945 = vmatprep.subr.bf16.mxu0 %v20749_v29  ;;  %v20771_v22 = vld [vmem:[#allocation5 + $0x12d0] ss:$24 sps:$4 sm:$0xff]   ;;  %v20774_v29 = vld [vmem:[#allocation5 + $0x15c0] ss:$24 sps:$4 sm:$0xff]  }
 0x534   :  { %7988 = vmatprep.subr.bf16.mxu1 %v20752_v34  ;;  %v20779_v34 = vld [vmem:[#allocation5 + $0x12a4] ss:$24 sps:$4 sm:$0xff]  }
 0x53a   :  { %7946 = vmatpush2.bf16.xpose.msra.mxu0 %v20747_v39  ;;  %v20782_v39 = vld [vmem:[#allocation5 + $0x1594] ss:$24 sps:$4 sm:$0xff]  }
 0x53b   :  { %7989 = vmatpush2.bf16.xpose.msra.mxu1 %v20750_v25  ;;  %8001 = vmatprep.subr.bf16.mxu0 %v20755_v43  ;;  %v20777_v25 = vld [vmem:[#allocation5 + $0x12a0] ss:$24 sps:$4 sm:$0xff]   ;;  %v20780_v43 = vld [vmem:[#allocation5 + $0x1590] ss:$24 sps:$4 sm:$0xff]  }
 0x53c   :  { %8044 = vmatprep.subr.bf16.mxu1 %v20758_v45  ;;  %v20785_v45 = vld [vmem:[#allocation5 + $0x1274] ss:$24 sps:$4 sm:$0xff]  }
 0x541   :  { %7948 = vmatmul.mubr.bf16.vlgmr.msra.gmra.mxu0 %v21819_v16 }
 0x542   :  { %7991 = vmatmul.mubr.bf16.vlgmr.msra.gmra.mxu1 %v21821_v17  ;;  %8002 = vmatpush1.bf16.xpose.msra.mxu0 %v20753_v47  ;;  %v20788_v47 = vld [vmem:[#allocation5 + $0x1564] ss:$24 sps:$4 sm:$0xff]  }
 0x543   :  { %8045 = vmatpush1.bf16.xpose.msra.mxu1 %v20756_v54  ;;  %8003 = vmatprep.subr.bf16.mxu0 %v20761_v57  ;;  %v20783_v54 = vld [vmem:[#allocation5 + $0x1270] ss:$24 sps:$4 sm:$0xff]   ;;  %v20786_v57 = vld [vmem:[#allocation5 + $0x1560] ss:$24 sps:$4 sm:$0xff]  }
 0x544   :  { %8046 = vmatprep.subr.bf16.mxu1 %v20764_v0  ;;  %8033 = vmatprep.mubr.bf16.mxu0 %v21823_v20  ;;  %v20791_v0 = vld [vmem:[#allocation5 + $0x1244] ss:$24 sps:$4 sm:$0xff]  }
 0x545   :  { %8076 = vmatprep.mubr.bf16.mxu1 %v21813_v30 }
 0x54a   :  { %8004 = vmatpush1.bf16.xpose.msra.mxu0 %v20759_v6  ;;  %v20794_v6 = vld [vmem:[#allocation5 + $0x1534] ss:$24 sps:$4 sm:$0xff]  }
 0x54b   :  { %8047 = vmatpush1.bf16.xpose.msra.mxu1 %v20762_v2  ;;  %8005 = vmatprep.subr.bf16.mxu0 %v20767_v13  ;;  %v20789_v2 = vld [vmem:[#allocation5 + $0x1240] ss:$24 sps:$4 sm:$0xff]   ;;  %v20792_v13 = vld [vmem:[#allocation5 + $0x1530] ss:$24 sps:$4 sm:$0xff]  }
 0x54c   :  { %8048 = vmatprep.subr.bf16.mxu1 %v20770_v18  ;;  %v20797_v18 = vld [vmem:[#allocation5 + $0x1214] ss:$24 sps:$4 sm:$0xff]  }
 0x552   :  { %8006 = vmatpush1.bf16.xpose.msra.mxu0 %v20765_v41  ;;  %v20800_v41 = vld [vmem:[#allocation5 + $0x1504] ss:$24 sps:$4 sm:$0xff]  }
 0x553   :  { %8049 = vmatpush1.bf16.xpose.msra.mxu1 %v20768_v46  ;;  %8007 = vmatprep.subr.bf16.mxu0 %v20773_v21  ;;  %v21978_v46 = vpop.f32.mrf.mxu1 }
 0x554   :  { %8050 = vmatprep.subr.bf16.mxu1 %v20776_v37  ;;  %22547 = vst [vmem:[#allocation26_spill] sm:$0xff] %v21978_v46  ;;  %v20795_v37 = vld [vmem:[#allocation5 + $0x1210] ss:$24 sps:$4 sm:$0xff]   ;;  %v20818_v46 = vld [vmem:[#allocation5 + $0x1774] ss:$24 sps:$4 sm:$0xff]  }
 0x555   :  { %v7820_v21 = vpop.f32.mrf.mxu1 }
 0x55a   :  { %8008 = vmatpush1.bf16.xpose.msra.mxu0 %v20771_v22  ;;  %v20798_v22 = vld [vmem:[#allocation5 + $0x1500] ss:$24 sps:$4 sm:$0xff]  }
 0x55b   :  { %8051 = vmatpush1.bf16.xpose.msra.mxu1 %v20774_v29  ;;  %8009 = vmatprep.subr.bf16.mxu0 %v20779_v34  ;;  %v21980_v29 = vpop.f32.mrf.mxu1  ;;  %v20803_v34 = vld [vmem:[#allocation5 + $0x14e4] ss:$24 sps:$4 sm:$0xff]  }
 0x55c   :  { %8052 = vmatprep.subr.bf16.mxu1 %v20782_v39  ;;  %v20806_v39 = vld [vmem:[#allocation5 + $0x17d4] ss:$24 sps:$4 sm:$0xff]  }
 0x562   :  { %8010 = vmatpush1.bf16.xpose.msra.mxu0 %v20777_v25  ;;  %v7824_v25 = vpop.f32.mrf.mxu1 }
 0x563   :  { %8053 = vmatpush1.bf16.xpose.msra.mxu1 %v20780_v43  ;;  %8011 = vmatprep.subr.bf16.mxu0 %v20785_v45  ;;  %v1304_v43 = vrot.slane %v21946_v44, %v21870_v59  ;;  %v20801_v45 = vld [vmem:[#allocation5 + $0x14e0] ss:$24 sps:$4 sm:$0xff]  }
 0x564   :  { %8054 = vmatprep.subr.bf16.mxu1 %v20788_v47  ;;  %v20804_v47 = vld [vmem:[#allocation5 + $0x17d0] ss:$24 sps:$4 sm:$0xff]  }
 0x56a   :  { %8012 = vmatpush1.bf16.xpose.msra.mxu0 %v20783_v54  ;;  %v21984_v54 = vpop.f32.mrf.mxu0 }
 0x56b   :  { %8055 = vmatpush1.bf16.xpose.msra.mxu1 %v20786_v57  ;;  %8013 = vmatprep.subr.bf16.mxu0 %v20791_v0  ;;  %22548 = vst [vmem:[#allocation27_spill] sm:$0xff] %v21984_v54  ;;  %v21986_v57 = vpop.f32.mrf.mxu1  ;;  %v20809_v0 = vld [vmem:[#allocation5 + $0x14b4] ss:$24 sps:$4 sm:$0xff]   ;;  %v20810_v54 = vld [vmem:[#allocation5 + $0x17a0] ss:$24 sps:$4 sm:$0xff]  }
 0x56c   :  { %8056 = vmatprep.subr.bf16.mxu1 %v20794_v6  ;;  %v20812_v6 = vld [vmem:[#allocation5 + $0x17a4] ss:$24 sps:$4 sm:$0xff]  }
 0x572   :  { %8014 = vmatpush1.bf16.xpose.msra.mxu0 %v20789_v2  ;;  %v7821_v2 = vadd.f32 %v7820_v21, %v1304_v43  ;;  %v20815_v21 = vld [vmem:[#allocation5 + $0x1484] ss:$24 sps:$4 sm:$0xff]  }
 0x573   :  { %8057 = vmatpush1.bf16.xpose.msra.mxu1 %v20792_v13  ;;  %8015 = vmatprep.subr.bf16.mxu0 %v20797_v18 }
 0x574   :  { %8058 = vmatprep.subr.bf16.mxu1 %v20800_v41 }
 0x57a   :  { %8016 = vmatpush1.bf16.xpose.msra.mxu0 %v20795_v37 }
 0x57b   :  { %8059 = vmatpush1.bf16.xpose.msra.mxu1 %v20798_v22  ;;  %8017 = vmatprep.subr.bf16.mxu0 %v20803_v34  ;;  %v7825_v34 = vadd.f32 %v7824_v25, %v1304_v43  ;;  %v20821_v25 = vld [vmem:[#allocation5 + $0x1454] ss:$24 sps:$4 sm:$0xff]   ;;  %v20824_v43 = vld [vmem:[#allocation5 + $0x1744] ss:$24 sps:$4 sm:$0xff]  }
 0x57c   :  { %8060 = vmatprep.subr.bf16.mxu1 %v20806_v39 }
 0x581   :  { %v7863_v13 = vpop.f32.mrf.mxu0 }
 0x582   :  { %v7906_v18 = vpop.f32.mrf.mxu1  ;;  %v7864_v41 = vadd.f32 %v7863_v13, %v7821_v2  ;;  %8018 = vmatpush2.bf16.xpose.msra.mxu0 %v20801_v45  ;;  %v20822_v13 = vld [vmem:[#allocation5 + $0x1740] ss:$24 sps:$4 sm:$0xff]  }
 0x583   :  { %8061 = vmatpush2.bf16.xpose.msra.mxu1 %v20804_v47  ;;  %v21988_v37 = vpop.f32.mrf.mxu0  ;;  %8019 = vmatprep.subr.bf16.mxu0 %v20809_v0  ;;  %v20813_v47 = vld [vmem:[#allocation5 + $0x1480] ss:$24 sps:$4 sm:$0xff]   ;;  %v20816_v0 = vld [vmem:[#allocation5 + $0x1770] ss:$24 sps:$4 sm:$0xff]  }
 0x584   :  { %22549 = vst [vmem:[#allocation28_spill] sm:$0xff] %v21988_v37  ;;  %v21990_v22 = vpop.f32.mrf.mxu1  ;;  %8062 = vmatprep.subr.bf16.mxu1 %v20812_v6  ;;  %v7907_v39 = vadd.f32 %v7906_v18, %v7864_v41  ;;  %v20819_v6 = vld [vmem:[#allocation5 + $0x1450] ss:$24 sps:$4 sm:$0xff]   ;;  %v20827_v18 = vld [vmem:[#allocation5 + $0x1424] ss:$24 sps:$4 sm:$0xff]  }
 0x585   :  { %22550 = vst [vmem:[#allocation29_spill] sm:$0xff] %v21990_v22  ;;  %v7867_v61 = vpop.f32.mrf.mxu0  ;;  %v21098_v22 = vld [vmem:[#allocation5 + $0x1da0] ss:$24 sps:$4 sm:$0xff]   ;;  %v21106_v37 = vld [vmem:[#allocation5 + $0x1d74] ss:$24 sps:$4 sm:$0xff]  }
 0x586   :  { %v8748_v63 = vmul.f32 0.70710677, %v7907_v39  ;;  %v7868_v56 = vadd.f32 %v7867_v61, %v7825_v34  ;;  %v7910_v5 = vpop.f32.mrf.mxu1 }
 0x588   :  { %21541 = verf.f32 %v8748_v63  ;;  %v7911_v2 = vadd.f32 %v7910_v5, %v7868_v56  ;;  %v20830_v63 = vld [vmem:[#allocation5 + $0x1714] ss:$24 sps:$4 sm:$0xff]  }
 0x58a   :  { %v8772_v45 = vmul.f32 0.70710677, %v7911_v2  ;;  %8020 = vmatpush2.bf16.xpose.msra.mxu0 %v20807_v42  ;;  %v8699_v42 = vmul.f32 0.5, %v7907_v39  ;;  %v20834_v39 = vld [vmem:[#allocation5 + $0x16e0] ss:$24 sps:$4 sm:$0xff]  }
 0x58b   :  { %8063 = vmatpush2.bf16.xpose.msra.mxu1 %v20810_v54  ;;  %8021 = vmatprep.subr.bf16.mxu0 %v20815_v21  ;;  %v8723_v54 = vmul.f32 0.5, %v7911_v2  ;;  %v20839_v2 = vld [vmem:[#allocation5 + $0x13c4] ss:$24 sps:$4 sm:$0xff]  }
 0x58c   :  { %8064 = vmatprep.subr.bf16.mxu1 %v20818_v46  ;;  %21543 = verf.f32 %v8772_v45  ;;  %v20825_v45 = vld [vmem:[#allocation5 + $0x1420] ss:$24 sps:$4 sm:$0xff]  }
 0x592   :  { %8022 = vmatpush2.bf16.xpose.msra.mxu0 %v20813_v47  ;;  %v20828_v47 = vld [vmem:[#allocation5 + $0x1710] ss:$24 sps:$4 sm:$0xff]  }
 0x593   :  { %8065 = vmatpush2.bf16.xpose.msra.mxu1 %v20816_v0  ;;  %8023 = vmatprep.subr.bf16.mxu0 %v20821_v25  ;;  %v20833_v0 = vld [vmem:[#allocation5 + $0x13f4] ss:$24 sps:$4 sm:$0xff]   ;;  %v20836_v25 = vld [vmem:[#allocation5 + $0x16e4] ss:$24 sps:$4 sm:$0xff]  }
 0x594   :  { %8066 = vmatprep.subr.bf16.mxu1 %v20824_v43  ;;  %v20831_v43 = vld [vmem:[#allocation5 + $0x13f0] ss:$24 sps:$4 sm:$0xff]  }
 0x595   :  { %v21542_v61 = vpop.eup %21541 }
 0x596   :  { %v8844_v56 = vadd.f32 1.0, %v21542_v61  ;;  %v20842_v61 = vld [vmem:[#allocation5 + $0x16b4] ss:$24 sps:$4 sm:$0xff]  }
 0x598   :  { %v8892_v46 = vmul.f32 %v8844_v56, %v8699_v42  ;;  %v20843_v56 = vld [vmem:[#allocation5 + $0x1390] ss:$24 sps:$4 sm:$0xff]   ;;  %v20851_v42 = vld [vmem:[#allocation5 + $0x165c] ss:$24 sps:$4 sm:$0xff]  }
 0x599   :  { %v21544_v5 = vpop.eup %21543 }
 0x59a   :  { %v8868_v41 = vadd.f32 1.0, %v21544_v5  ;;  %8024 = vmatpush2.bf16.xpose.msra.mxu0 %v20819_v6  ;;  %v20837_v6 = vld [vmem:[#allocation5 + $0x13c0] ss:$24 sps:$4 sm:$0xff]  }
 0x59b   :  { %8067 = vmatpush2.bf16.xpose.msra.mxu1 %v20822_v13  ;;  %8025 = vmatprep.subr.bf16.mxu0 %v20827_v18  ;;  %v20840_v13 = vld [vmem:[#allocation5 + $0x16b0] ss:$24 sps:$4 sm:$0xff]   ;;  %v20845_v18 = vld [vmem:[#allocation5 + $0x1394] ss:$24 sps:$4 sm:$0xff]   ;;  %v20846_v5 = vld [vmem:[#allocation5 + $0x1680] ss:$24 sps:$4 sm:$0xff]  }
 0x59c   :  { %8068 = vmatprep.subr.bf16.mxu1 %v20830_v63  ;;  %v8916_v34 = vmul.f32 %v8868_v41, %v8723_v54  ;;  %v20848_v63 = vld [vmem:[#allocation5 + $0x1684] ss:$24 sps:$4 sm:$0xff]   ;;  %v20849_v41 = vld [vmem:[#allocation5 + $0x1658] ss:$24 sps:$4 sm:$0xff]  }
 0x59d   :  { %v20854_v54 = vld [vmem:[#allocation5 + $0x1664] ss:$24 sps:$4 sm:$0xff]  }
 0x59e   :  { %v21992_v21 = vpack.c.bf16 %v8916_v34, %v8892_v46  ;;  %v20852_v46 = vld [vmem:[#allocation5 + $0x1660] ss:$24 sps:$4 sm:$0xff]   ;;  %v20857_v34 = vld [vmem:[#allocation5 + $0x162c] ss:$24 sps:$4 sm:$0xff]  }
 0x5a0   :  { %22551 = vst [vmem:[#allocation30_spill] sm:$0xff] %v21992_v21 }
 0x5a2   :  { %8026 = vmatpush2.bf16.xpose.msra.mxu0 %v20825_v45  ;;  %v20860_v45 = vld [vmem:[#allocation5 + $0x1634] ss:$24 sps:$4 sm:$0xff]  }
 0x5a3   :  { %8069 = vmatpush2.bf16.xpose.msra.mxu1 %v20828_v47  ;;  %8027 = vmatprep.subr.bf16.mxu0 %v20833_v0  ;;  %v20855_v47 = vld [vmem:[#allocation5 + $0x1628] ss:$24 sps:$4 sm:$0xff]  }
 0x5a4   :  { %8070 = vmatprep.subr.bf16.mxu1 %v20836_v25  ;;  %v20858_v0 = vld [vmem:[#allocation5 + $0x1630] ss:$24 sps:$4 sm:$0xff]   ;;  %v20863_v25 = vld [vmem:[#allocation5 + $0x15fc] ss:$24 sps:$4 sm:$0xff]  }
 0x5aa   :  { %8028 = vmatpush2.bf16.xpose.msra.mxu0 %v20831_v43  ;;  %v20866_v43 = vld [vmem:[#allocation5 + $0x1604] ss:$24 sps:$4 sm:$0xff]  }
 0x5ab   :  { %8071 = vmatpush2.bf16.xpose.msra.mxu1 %v20834_v39  ;;  %8029 = vmatprep.subr.bf16.mxu0 %v20839_v2  ;;  %v20861_v39 = vld [vmem:[#allocation5 + $0x15f8] ss:$24 sps:$4 sm:$0xff]  }
 0x5ac   :  { %8072 = vmatprep.subr.bf16.mxu1 %v20842_v61  ;;  %v20864_v2 = vld [vmem:[#allocation5 + $0x1600] ss:$24 sps:$4 sm:$0xff]   ;;  %v20869_v61 = vld [vmem:[#allocation5 + $0x15cc] ss:$24 sps:$4 sm:$0xff]  }
 0x5b2   :  { %8030 = vmatpush2.bf16.xpose.msra.mxu0 %v20837_v6  ;;  %v20872_v6 = vld [vmem:[#allocation5 + $0x15d4] ss:$24 sps:$4 sm:$0xff]  }
 0x5b3   :  { %8073 = vmatpush2.bf16.xpose.msra.mxu1 %v20840_v13  ;;  %8031 = vmatprep.subr.bf16.mxu0 %v20845_v18  ;;  %v20867_v13 = vld [vmem:[#allocation5 + $0x15c8] ss:$24 sps:$4 sm:$0xff]  }
 0x5b4   :  { %8074 = vmatprep.subr.bf16.mxu1 %v20848_v63  ;;  %v20870_v18 = vld [vmem:[#allocation5 + $0x15d0] ss:$24 sps:$4 sm:$0xff]   ;;  %v20875_v63 = vld [vmem:[#allocation5 + $0x159c] ss:$24 sps:$4 sm:$0xff]  }
 0x5ba   :  { %8032 = vmatpush2.bf16.xpose.msra.mxu0 %v20843_v56  ;;  %v20878_v56 = vld [vmem:[#allocation5 + $0x15a4] ss:$24 sps:$4 sm:$0xff]  }
 0x5bb   :  { %8075 = vmatpush2.bf16.xpose.msra.mxu1 %v20846_v5  ;;  %8087 = vmatprep.subr.bf16.mxu0 %v20851_v42  ;;  %v20873_v5 = vld [vmem:[#allocation5 + $0x1598] ss:$24 sps:$4 sm:$0xff]  }
 0x5bc   :  { %8130 = vmatprep.subr.bf16.mxu1 %v20854_v54  ;;  %v20876_v42 = vld [vmem:[#allocation5 + $0x15a0] ss:$24 sps:$4 sm:$0xff]   ;;  %v20881_v54 = vld [vmem:[#allocation5 + $0x156c] ss:$24 sps:$4 sm:$0xff]  }
 0x5c1   :  { %8034 = vmatmul.mubr.bf16.vlgmr.msra.gmra.mxu0 %v21829_v26 }
 0x5c2   :  { %8077 = vmatmul.mubr.bf16.vlgmr.msra.gmra.mxu1 %v21819_v16  ;;  %8088 = vmatpush1.bf16.xpose.msra.mxu0 %v20849_v41  ;;  %v20884_v41 = vld [vmem:[#allocation5 + $0x1574] ss:$24 sps:$4 sm:$0xff]  }
 0x5c3   :  { %8131 = vmatpush1.bf16.xpose.msra.mxu1 %v20852_v46  ;;  %8089 = vmatprep.subr.bf16.mxu0 %v20857_v34  ;;  %v20879_v46 = vld [vmem:[#allocation5 + $0x1568] ss:$24 sps:$4 sm:$0xff]  }
 0x5c4   :  { %8132 = vmatprep.subr.bf16.mxu1 %v20860_v45  ;;  %8119 = vmatprep.mubr.bf16.mxu0 %v21815_v31  ;;  %v20882_v34 = vld [vmem:[#allocation5 + $0x1570] ss:$24 sps:$4 sm:$0xff]   ;;  %v20887_v45 = vld [vmem:[#allocation5 + $0x153c] ss:$24 sps:$4 sm:$0xff]  }
 0x5c5   :  { %8162 = vmatprep.mubr.bf16.mxu1 %v21823_v20 }
 0x5ca   :  { %8090 = vmatpush1.bf16.xpose.msra.mxu0 %v20855_v47  ;;  %v20890_v47 = vld [vmem:[#allocation5 + $0x1544] ss:$24 sps:$4 sm:$0xff]  }
 0x5cb   :  { %8133 = vmatpush1.bf16.xpose.msra.mxu1 %v20858_v0  ;;  %8091 = vmatprep.subr.bf16.mxu0 %v20863_v25  ;;  %v20885_v0 = vld [vmem:[#allocation5 + $0x1538] ss:$24 sps:$4 sm:$0xff]  }
 0x5cc   :  { %8134 = vmatprep.subr.bf16.mxu1 %v20866_v43  ;;  %v20888_v25 = vld [vmem:[#allocation5 + $0x1540] ss:$24 sps:$4 sm:$0xff]   ;;  %v20893_v43 = vld [vmem:[#allocation5 + $0x150c] ss:$24 sps:$4 sm:$0xff]  }
 0x5d2   :  { %8092 = vmatpush1.bf16.xpose.msra.mxu0 %v20861_v39  ;;  %v20896_v39 = vld [vmem:[#allocation5 + $0x1514] ss:$24 sps:$4 sm:$0xff]  }
 0x5d3   :  { %8135 = vmatpush1.bf16.xpose.msra.mxu1 %v20864_v2  ;;  %8093 = vmatprep.subr.bf16.mxu0 %v20869_v61  ;;  %v20891_v2 = vld [vmem:[#allocation5 + $0x1508] ss:$24 sps:$4 sm:$0xff]  }
 0x5d4   :  { %8136 = vmatprep.subr.bf16.mxu1 %v20872_v6  ;;  %v20894_v61 = vld [vmem:[#allocation5 + $0x1510] ss:$24 sps:$4 sm:$0xff]   ;;  %v20899_v6 = vld [vmem:[#allocation5 + $0x17dc] ss:$24 sps:$4 sm:$0xff]  }
 0x5da   :  { %8094 = vmatpush1.bf16.xpose.msra.mxu0 %v20867_v13  ;;  %v20902_v13 = vld [vmem:[#allocation5 + $0x17e4] ss:$24 sps:$4 sm:$0xff]  }
 0x5db   :  { %8137 = vmatpush1.bf16.xpose.msra.mxu1 %v20870_v18  ;;  %8095 = vmatprep.subr.bf16.mxu0 %v20875_v63  ;;  %v1312_v18 = vrot.slane %v21946_v44, %v21891_v1  ;;  %v20897_v63 = vld [vmem:[#allocation5 + $0x17d8] ss:$24 sps:$4 sm:$0xff]  }
 0x5dc   :  { %8138 = vmatprep.subr.bf16.mxu1 %v20878_v56  ;;  %v20900_v56 = vld [vmem:[#allocation5 + $0x17e0] ss:$24 sps:$4 sm:$0xff]  }
 0x5e2   :  { %8096 = vmatpush1.bf16.xpose.msra.mxu0 %v20873_v5  ;;  %v22000_v5 = vpop.f32.mrf.mxu0 }
 0x5e3   :  { %8139 = vmatpush1.bf16.xpose.msra.mxu1 %v20876_v42  ;;  %8097 = vmatprep.subr.bf16.mxu0 %v20881_v54  ;;  %v22002_v42 = vpop.f32.mrf.mxu1  ;;  %v20905_v54 = vld [vmem:[#allocation5 + $0x17ac] ss:$24 sps:$4 sm:$0xff]  }
 0x5e4   :  { %8140 = vmatprep.subr.bf16.mxu1 %v20884_v41  ;;  %22552 = vst [vmem:[#allocation31_spill] sm:$0xff] %v22002_v42  ;;  %v20908_v41 = vld [vmem:[#allocation5 + $0x17b4] ss:$24 sps:$4 sm:$0xff]  }
 0x5ea   :  { %8098 = vmatpush1.bf16.xpose.msra.mxu0 %v20879_v46 }
 0x5eb   :  { %8141 = vmatpush1.bf16.xpose.msra.mxu1 %v20882_v34  ;;  %8099 = vmatprep.subr.bf16.mxu0 %v20887_v45 }
 0x5ec   :  { %8142 = vmatprep.subr.bf16.mxu1 %v20890_v47 }
 0x5f2   :  { %8100 = vmatpush1.bf16.xpose.msra.mxu0 %v20885_v0 }
 0x5f3   :  { %8143 = vmatpush1.bf16.xpose.msra.mxu1 %v20888_v25  ;;  %8101 = vmatprep.subr.bf16.mxu0 %v20893_v43 }
 0x5f4   :  { %8144 = vmatprep.subr.bf16.mxu1 %v20896_v39  ;;  %v20903_v39 = vld [vmem:[#allocation5 + $0x17a8] ss:$24 sps:$4 sm:$0xff]  }
 0x5fa   :  { %8102 = vmatpush1.bf16.xpose.msra.mxu0 %v20891_v2  ;;  %v20906_v2 = vld [vmem:[#allocation5 + $0x17b0] ss:$24 sps:$4 sm:$0xff]  }
 0x5fb   :  { %8145 = vmatpush1.bf16.xpose.msra.mxu1 %v20894_v61  ;;  %8103 = vmatprep.subr.bf16.mxu0 %v20899_v6  ;;  %v20911_v6 = vld [vmem:[#allocation5 + $0x177c] ss:$24 sps:$4 sm:$0xff]  }
 0x5fc   :  { %8146 = vmatprep.subr.bf16.mxu1 %v20902_v13  ;;  %v20914_v13 = vld [vmem:[#allocation5 + $0x1784] ss:$24 sps:$4 sm:$0xff]  }
 0x601   :  { %v7949_v46 = vpop.f32.mrf.mxu0 }
 0x602   :  { %v7992_v34 = vpop.f32.mrf.mxu1  ;;  %v7950_v45 = vadd.f32 %v7949_v46, %v1312_v18  ;;  %8104 = vmatpush2.bf16.xpose.msra.mxu0 %v20897_v63  ;;  %v20909_v63 = vld [vmem:[#allocation5 + $0x1778] ss:$24 sps:$4 sm:$0xff]   ;;  %v20917_v46 = vld [vmem:[#allocation5 + $0x174c] ss:$24 sps:$4 sm:$0xff]  }
 0x603   :  { %8147 = vmatpush2.bf16.xpose.msra.mxu1 %v20900_v56  ;;  %v22004_v47 = vpop.f32.mrf.mxu0  ;;  %8105 = vmatprep.subr.bf16.mxu0 %v20905_v54  ;;  %v20912_v56 = vld [vmem:[#allocation5 + $0x1780] ss:$24 sps:$4 sm:$0xff]   ;;  %v20920_v54 = vld [vmem:[#allocation5 + $0x1754] ss:$24 sps:$4 sm:$0xff]  }
 0x604   :  { %22553 = vst [vmem:[#allocation32_spill] sm:$0xff] %v22004_v47  ;;  %v22006_v0 = vpop.f32.mrf.mxu1  ;;  %8148 = vmatprep.subr.bf16.mxu1 %v20908_v41  ;;  %v22008_v44 = vadd.f32 %v7992_v34, %v7950_v45  ;;  %v20918_v41 = vld [vmem:[#allocation5 + $0x1750] ss:$24 sps:$4 sm:$0xff]   ;;  %v20923_v34 = vld [vmem:[#allocation5 + $0x171c] ss:$24 sps:$4 sm:$0xff]  }
 0x605   :  { %22554 = vst [vmem:[#allocation33_spill] sm:$0xff] %v22006_v0  ;;  %v7953_v25 = vpop.f32.mrf.mxu0  ;;  %v20926_v45 = vld [vmem:[#allocation5 + $0x1724] ss:$24 sps:$4 sm:$0xff]  }
 0x606   :  { %v7954_v43 = vadd.f32 %v7953_v25, %v1312_v18  ;;  %v7996_v61 = vpop.f32.mrf.mxu1  ;;  %v20915_v18 = vld [vmem:[#allocation5 + $0x1748] ss:$24 sps:$4 sm:$0xff]   ;;  %v20921_v25 = vld [vmem:[#allocation5 + $0x1718] ss:$24 sps:$4 sm:$0xff]   ;;  %v21022_v47 = vld [vmem:[#allocation5 + $0x1a1c] ss:$24 sps:$4 sm:$0xff]  }
 0x608   :  { %v22010_v21 = vadd.f32 %v7996_v61, %v7954_v43  ;;  %v20924_v43 = vld [vmem:[#allocation5 + $0x1720] ss:$24 sps:$4 sm:$0xff]  }
 0x609   :  { %v20927_v61 = vld [vmem:[#allocation5 + $0x16e8] ss:$24 sps:$4 sm:$0xff]  }
 0x60a   :  { %8106 = vmatpush2.bf16.xpose.msra.mxu0 %v20903_v39  ;;  %v20929_v39 = vld [vmem:[#allocation5 + $0x16ec] ss:$24 sps:$4 sm:$0xff]  }
 0x60b   :  { %8149 = vmatpush2.bf16.xpose.msra.mxu1 %v20906_v2  ;;  %8107 = vmatprep.subr.bf16.mxu0 %v20911_v6  ;;  %v20932_v2 = vld [vmem:[#allocation5 + $0x16f4] ss:$24 sps:$4 sm:$0xff]   ;;  %v20930_v6 = vld [vmem:[#allocation5 + $0x16f0] ss:$24 sps:$4 sm:$0xff]  }
 0x60c   :  { %8150 = vmatprep.subr.bf16.mxu1 %v20914_v13  ;;  %v20935_v13 = vld [vmem:[#allocation5 + $0x16bc] ss:$24 sps:$4 sm:$0xff]  }
 0x612   :  { %8108 = vmatpush2.bf16.xpose.msra.mxu0 %v20909_v63  ;;  %v20938_v63 = vld [vmem:[#allocation5 + $0x16c4] ss:$24 sps:$4 sm:$0xff]  }
 0x613   :  { %8151 = vmatpush2.bf16.xpose.msra.mxu1 %v20912_v56  ;;  %8109 = vmatprep.subr.bf16.mxu0 %v20917_v46  ;;  %v20933_v56 = vld [vmem:[#allocation5 + $0x16b8] ss:$24 sps:$4 sm:$0xff]  }
 0x614   :  { %8152 = vmatprep.subr.bf16.mxu1 %v20920_v54  ;;  %v20936_v46 = vld [vmem:[#allocation5 + $0x16c0] ss:$24 sps:$4 sm:$0xff]   ;;  %v20941_v54 = vld [vmem:[#allocation5 + $0x168c] ss:$24 sps:$4 sm:$0xff]  }
 0x61a   :  { %8110 = vmatpush2.bf16.xpose.msra.mxu0 %v20915_v18  ;;  %v20944_v18 = vld [vmem:[#allocation5 + $0x1694] ss:$24 sps:$4 sm:$0xff]  }
 0x61b   :  { %8153 = vmatpush2.bf16.xpose.msra.mxu1 %v20918_v41  ;;  %8111 = vmatprep.subr.bf16.mxu0 %v20923_v34  ;;  %v20939_v41 = vld [vmem:[#allocation5 + $0x1688] ss:$24 sps:$4 sm:$0xff]  }
 0x61c   :  { %8154 = vmatprep.subr.bf16.mxu1 %v20926_v45  ;;  %v20942_v34 = vld [vmem:[#allocation5 + $0x1690] ss:$24 sps:$4 sm:$0xff]   ;;  %v20947_v45 = vld [vmem:[#allocation5 + $0x1954] ss:$24 sps:$4 sm:$0xff]  }
 0x622   :  { %8112 = vmatpush2.bf16.xpose.msra.mxu0 %v20921_v25  ;;  %v20950_v25 = vld [vmem:[#allocation5 + $0x195c] ss:$24 sps:$4 sm:$0xff]  }
 0x623   :  { %8155 = vmatpush2.bf16.xpose.msra.mxu1 %v20924_v43  ;;  %8113 = vmatprep.subr.bf16.mxu0 %v20929_v39  ;;  %v20945_v43 = vld [vmem:[#allocation5 + $0x1950] ss:$24 sps:$4 sm:$0xff]  }
 0x624   :  { %8156 = vmatprep.subr.bf16.mxu1 %v20932_v2  ;;  %v20948_v39 = vld [vmem:[#allocation5 + $0x1958] ss:$24 sps:$4 sm:$0xff]   ;;  %v20953_v2 = vld [vmem:[#allocation5 + $0x1924] ss:$24 sps:$4 sm:$0xff]  }
 0x62a   :  { %8114 = vmatpush2.bf16.xpose.msra.mxu0 %v20927_v61  ;;  %v20956_v61 = vld [vmem:[#allocation5 + $0x192c] ss:$24 sps:$4 sm:$0xff]  }
 0x62b   :  { %8157 = vmatpush2.bf16.xpose.msra.mxu1 %v20930_v6  ;;  %8115 = vmatprep.subr.bf16.mxu0 %v20935_v13  ;;  %v20951_v6 = vld [vmem:[#allocation5 + $0x1920] ss:$24 sps:$4 sm:$0xff]  }
 0x62c   :  { %8158 = vmatprep.subr.bf16.mxu1 %v20938_v63  ;;  %v20954_v13 = vld [vmem:[#allocation5 + $0x1928] ss:$24 sps:$4 sm:$0xff]   ;;  %v20959_v63 = vld [vmem:[#allocation5 + $0x18f4] ss:$24 sps:$4 sm:$0xff]  }
 0x632   :  { %8116 = vmatpush2.bf16.xpose.msra.mxu0 %v20933_v56  ;;  %v20962_v56 = vld [vmem:[#allocation5 + $0x18fc] ss:$24 sps:$4 sm:$0xff]  }
 0x633   :  { %8159 = vmatpush2.bf16.xpose.msra.mxu1 %v20936_v46  ;;  %8117 = vmatprep.subr.bf16.mxu0 %v20941_v54  ;;  %v20957_v46 = vld [vmem:[#allocation5 + $0x18f0] ss:$24 sps:$4 sm:$0xff]  }
 0x634   :  { %8160 = vmatprep.subr.bf16.mxu1 %v20944_v18  ;;  %v20960_v54 = vld [vmem:[#allocation5 + $0x18f8] ss:$24 sps:$4 sm:$0xff]   ;;  %v20965_v18 = vld [vmem:[#allocation5 + $0x18c4] ss:$24 sps:$4 sm:$0xff]  }
 0x63a   :  { %8118 = vmatpush2.bf16.xpose.msra.mxu0 %v20939_v41  ;;  %v20968_v41 = vld [vmem:[#allocation5 + $0x18cc] ss:$24 sps:$4 sm:$0xff]  }
 0x63b   :  { %8161 = vmatpush2.bf16.xpose.msra.mxu1 %v20942_v34  ;;  %8173 = vmatprep.subr.bf16.mxu0 %v20947_v45  ;;  %v20963_v34 = vld [vmem:[#allocation5 + $0x18c0] ss:$24 sps:$4 sm:$0xff]  }
 0x63c   :  { %8216 = vmatprep.subr.bf16.mxu1 %v20950_v25  ;;  %v20966_v45 = vld [vmem:[#allocation5 + $0x18c8] ss:$24 sps:$4 sm:$0xff]   ;;  %v20971_v25 = vld [vmem:[#allocation5 + $0x1894] ss:$24 sps:$4 sm:$0xff]  }
 0x641   :  { %8120 = vmatmul.mubr.bf16.vlgmr.msra.gmra.mxu0 %v21821_v17 }
 0x642   :  { %8163 = vmatmul.mubr.bf16.vlgmr.msra.gmra.mxu1 %v21829_v26  ;;  %8174 = vmatpush1.bf16.xpose.msra.mxu0 %v20945_v43  ;;  %v20974_v43 = vld [vmem:[#allocation5 + $0x189c] ss:$24 sps:$4 sm:$0xff]  }
 0x643   :  { %8217 = vmatpush1.bf16.xpose.msra.mxu1 %v20948_v39  ;;  %8175 = vmatprep.subr.bf16.mxu0 %v20953_v2  ;;  %v20969_v39 = vld [vmem:[#allocation5 + $0x1890] ss:$24 sps:$4 sm:$0xff]  }
 0x644   :  { %8218 = vmatprep.subr.bf16.mxu1 %v20956_v61  ;;  %8205 = vmatprep.mubr.bf16.mxu0 %v21813_v30  ;;  %v20972_v2 = vld [vmem:[#allocation5 + $0x1898] ss:$24 sps:$4 sm:$0xff]   ;;  %v20977_v61 = vld [vmem:[#allocation5 + $0x1864] ss:$24 sps:$4 sm:$0xff]  }
 0x645   :  { %8248 = vmatprep.mubr.bf16.mxu1 %v21815_v31 }
 0x64a   :  { %8176 = vmatpush1.bf16.xpose.msra.mxu0 %v20951_v6  ;;  %v20980_v6 = vld [vmem:[#allocation5 + $0x186c] ss:$24 sps:$4 sm:$0xff]  }
 0x64b   :  { %8219 = vmatpush1.bf16.xpose.msra.mxu1 %v20954_v13  ;;  %8177 = vmatprep.subr.bf16.mxu0 %v20959_v63  ;;  %v20975_v13 = vld [vmem:[#allocation5 + $0x1860] ss:$24 sps:$4 sm:$0xff]  }
 0x64c   :  { %8220 = vmatprep.subr.bf16.mxu1 %v20962_v56  ;;  %v20978_v63 = vld [vmem:[#allocation5 + $0x1868] ss:$24 sps:$4 sm:$0xff]   ;;  %v20983_v56 = vld [vmem:[#allocation5 + $0x1834] ss:$24 sps:$4 sm:$0xff]  }
 0x652   :  { %8178 = vmatpush1.bf16.xpose.msra.mxu0 %v20957_v46  ;;  %v20986_v46 = vld [vmem:[#allocation5 + $0x183c] ss:$24 sps:$4 sm:$0xff]  }
 0x653   :  { %8221 = vmatpush1.bf16.xpose.msra.mxu1 %v20960_v54  ;;  %8179 = vmatprep.subr.bf16.mxu0 %v20965_v18  ;;  %v20981_v54 = vld [vmem:[#allocation5 + $0x1830] ss:$24 sps:$4 sm:$0xff]  }
 0x654   :  { %8222 = vmatprep.subr.bf16.mxu1 %v20968_v41  ;;  %v20984_v18 = vld [vmem:[#allocation5 + $0x1838] ss:$24 sps:$4 sm:$0xff]   ;;  %v20989_v41 = vld [vmem:[#allocation5 + $0x1804] ss:$24 sps:$4 sm:$0xff]  }
 0x65a   :  { %8180 = vmatpush1.bf16.xpose.msra.mxu0 %v20963_v34  ;;  %v20992_v34 = vld [vmem:[#allocation5 + $0x180c] ss:$24 sps:$4 sm:$0xff]  }
 0x65b   :  { %8223 = vmatpush1.bf16.xpose.msra.mxu1 %v20966_v45  ;;  %8181 = vmatprep.subr.bf16.mxu0 %v20971_v25  ;;  %v20987_v45 = vld [vmem:[#allocation5 + $0x1800] ss:$24 sps:$4 sm:$0xff]  }
 0x65c   :  { %8224 = vmatprep.subr.bf16.mxu1 %v20974_v43  ;;  %v20990_v25 = vld [vmem:[#allocation5 + $0x1808] ss:$24 sps:$4 sm:$0xff]   ;;  %v20995_v43 = vld [vmem:[#allocation5 + $0x1ad4] ss:$24 sps:$4 sm:$0xff]  }
 0x662   :  { %8182 = vmatpush1.bf16.xpose.msra.mxu0 %v20969_v39  ;;  %v20998_v39 = vld [vmem:[#allocation5 + $0x1adc] ss:$24 sps:$4 sm:$0xff]  }
 0x663   :  { %8225 = vmatpush1.bf16.xpose.msra.mxu1 %v20972_v2  ;;  %8183 = vmatprep.subr.bf16.mxu0 %v20977_v61  ;;  %v20993_v2 = vld [vmem:[#allocation5 + $0x1ad0] ss:$24 sps:$4 sm:$0xff]  }
 0x664   :  { %8226 = vmatprep.subr.bf16.mxu1 %v20980_v6  ;;  %v20996_v61 = vld [vmem:[#allocation5 + $0x1ad8] ss:$24 sps:$4 sm:$0xff]   ;;  %v22016_v6 = vpop.f32.mrf.mxu0 }
 0x665   :  { %22555 = vst [vmem:[#allocation34_spill] sm:$0xff] %v22016_v6  ;;  %v21023_v6 = vld [vmem:[#allocation5 + $0x19e0] ss:$24 sps:$4 sm:$0xff]  }
 0x66a   :  { %8184 = vmatpush1.bf16.xpose.msra.mxu0 %v20975_v13  ;;  %v21001_v13 = vld [vmem:[#allocation5 + $0x1aa4] ss:$24 sps:$4 sm:$0xff]  }
 0x66b   :  { %8227 = vmatpush1.bf16.xpose.msra.mxu1 %v20978_v63  ;;  %8185 = vmatprep.subr.bf16.mxu0 %v20983_v56  ;;  %v21004_v63 = vld [vmem:[#allocation5 + $0x1aac] ss:$24 sps:$4 sm:$0xff]  }
 0x66c   :  { %8228 = vmatprep.subr.bf16.mxu1 %v20986_v46 }
 0x672   :  { %8186 = vmatpush1.bf16.xpose.msra.mxu0 %v20981_v54 }
 0x673   :  { %8229 = vmatpush1.bf16.xpose.msra.mxu1 %v20984_v18  ;;  %8187 = vmatprep.subr.bf16.mxu0 %v20989_v41 }
 0x674   :  { %8230 = vmatprep.subr.bf16.mxu1 %v20992_v34 }
 0x67a   :  { %8188 = vmatpush1.bf16.xpose.msra.mxu0 %v20987_v45  ;;  %v20999_v45 = vld [vmem:[#allocation5 + $0x1aa0] ss:$24 sps:$4 sm:$0xff]  }
 0x67b   :  { %8231 = vmatpush1.bf16.xpose.msra.mxu1 %v20990_v25  ;;  %8189 = vmatprep.subr.bf16.mxu0 %v20995_v43  ;;  %v21002_v25 = vld [vmem:[#allocation5 + $0x1aa8] ss:$24 sps:$4 sm:$0xff]   ;;  %v21007_v43 = vld [vmem:[#allocation5 + $0x1a74] ss:$24 sps:$4 sm:$0xff]  }
 0x67c   :  { %8232 = vmatprep.subr.bf16.mxu1 %v20998_v39  ;;  %v21010_v39 = vld [vmem:[#allocation5 + $0x1a7c] ss:$24 sps:$4 sm:$0xff]  }
 0x681   :  { %v8035_v56 = vpop.f32.mrf.mxu0 }
 0x682   :  { %v8036_v46 = vadd.f32 %v8035_v56, %v22008_v44  ;;  %8190 = vmatpush2.bf16.xpose.msra.mxu0 %v20993_v2  ;;  %v21005_v44 = vld [vmem:[#allocation5 + $0x1a70] ss:$24 sps:$4 sm:$0xff]   ;;  %v21011_v56 = vld [vmem:[#allocation5 + $0x1a40] ss:$24 sps:$4 sm:$0xff]  }
 0x683   :  { %8233 = vmatpush2.bf16.xpose.msra.mxu1 %v20996_v61  ;;  %v22019_v54 = vpop.f32.mrf.mxu0  ;;  %8191 = vmatprep.subr.bf16.mxu0 %v21001_v13  ;;  %v21008_v2 = vld [vmem:[#allocation5 + $0x1a78] ss:$24 sps:$4 sm:$0xff]   ;;  %v21013_v61 = vld [vmem:[#allocation5 + $0x1a44] ss:$24 sps:$4 sm:$0xff]  }
 0x684   :  { %22556 = vst [vmem:[#allocation35_spill] sm:$0xff] %v22019_v54  ;;  %8234 = vmatprep.subr.bf16.mxu1 %v21004_v63  ;;  %v8750_v18 = vmul.f32 0.70710677, %v8036_v46  ;;  %v21016_v13 = vld [vmem:[#allocation5 + $0x1a4c] ss:$24 sps:$4 sm:$0xff]  }
 0x685   :  { %v8039_v41 = vpop.f32.mrf.mxu0  ;;  %v21019_v54 = vld [vmem:[#allocation5 + $0x1a14] ss:$24 sps:$4 sm:$0xff]  }
 0x686   :  { %21545 = verf.f32 %v8750_v18  ;;  %v8040_v34 = vadd.f32 %v8039_v41, %v22010_v21  ;;  %v21014_v18 = vld [vmem:[#allocation5 + $0x1a48] ss:$24 sps:$4 sm:$0xff]  }
 0x688   :  { %v8774_v0 = vmul.f32 0.70710677, %v8040_v34 }
 0x68a   :  { %21547 = verf.f32 %v8774_v0  ;;  %8192 = vmatpush2.bf16.xpose.msra.mxu0 %v20999_v45  ;;  %v8701_v0 = vmul.f32 0.5, %v8036_v46  ;;  %v8725_v45 = vmul.f32 0.5, %v8040_v34  ;;  %v21026_v46 = vld [vmem:[#allocation5 + $0x19e8] ss:$24 sps:$4 sm:$0xff]   ;;  %v21031_v34 = vld [vmem:[#allocation5 + $0x19b4] ss:$24 sps:$4 sm:$0xff]  }
 0x68b   :  { %8235 = vmatpush2.bf16.xpose.msra.mxu1 %v21002_v25  ;;  %8193 = vmatprep.subr.bf16.mxu0 %v21007_v43 }
 0x68c   :  { %8236 = vmatprep.subr.bf16.mxu1 %v21010_v39 }
 0x692   :  { %8194 = vmatpush2.bf16.xpose.msra.mxu0 %v21005_v44 }
 0x693   :  { %8237 = vmatpush2.bf16.xpose.msra.mxu1 %v21008_v2  ;;  %v21546_v63 = vpop.eup %21545  ;;  %8195 = vmatprep.subr.bf16.mxu0 %v21013_v61  ;;  %v21017_v2 = vld [vmem:[#allocation5 + $0x1a10] ss:$24 sps:$4 sm:$0xff]  }
 0x694   :  { %8238 = vmatprep.subr.bf16.mxu1 %v21016_v13  ;;  %v8846_v21 = vadd.f32 1.0, %v21546_v63  ;;  %v21020_v61 = vld [vmem:[#allocation5 + $0x1a18] ss:$24 sps:$4 sm:$0xff]   ;;  %v21025_v13 = vld [vmem:[#allocation5 + $0x19e4] ss:$24 sps:$4 sm:$0xff]  }
 0x695   :  { %v21028_v63 = vld [vmem:[#allocation5 + $0x19ec] ss:$24 sps:$4 sm:$0xff]  }
 0x696   :  { %v8894_v43 = vmul.f32 %v8846_v21, %v8701_v0  ;;  %v21037_v21 = vld [vmem:[#allocation5 + $0x1984] ss:$24 sps:$4 sm:$0xff]   ;;  %v21038_v0 = vld [vmem:[#allocation5 + $0x1988] ss:$24 sps:$4 sm:$0xff]  }
 0x697   :  { %v21548_v41 = vpop.eup %21547 }
 0x698   :  { %v8870_v25 = vadd.f32 1.0, %v21548_v41  ;;  %v21034_v41 = vld [vmem:[#allocation5 + $0x19bc] ss:$24 sps:$4 sm:$0xff]  }
 0x69a   :  { %v8918_v39 = vmul.f32 %v8870_v25, %v8725_v45  ;;  %8196 = vmatpush2.bf16.xpose.msra.mxu0 %v21011_v56  ;;  %v21040_v56 = vld [vmem:[#allocation5 + $0x198c] ss:$24 sps:$4 sm:$0xff]  }
 0x69b   :  { %8239 = vmatpush2.bf16.xpose.msra.mxu1 %v21014_v18  ;;  %8197 = vmatprep.subr.bf16.mxu0 %v21019_v54  ;;  %v21029_v54 = vld [vmem:[#allocation5 + $0x19b0] ss:$24 sps:$4 sm:$0xff]   ;;  %v21035_v18 = vld [vmem:[#allocation5 + $0x1980] ss:$24 sps:$4 sm:$0xff]   ;;  %v21043_v45 = vld [vmem:[#allocation5 + $0x1964] ss:$24 sps:$4 sm:$0xff]  }
 0x69c   :  { %8240 = vmatprep.subr.bf16.mxu1 %v21022_v47  ;;  %v22022_v44 = vpack.c.bf16 %v8918_v39, %v8894_v43  ;;  %v21032_v47 = vld [vmem:[#allocation5 + $0x19b8] ss:$24 sps:$4 sm:$0xff]   ;;  %v21046_v25 = vld [vmem:[#allocation5 + $0x1c54] ss:$24 sps:$4 sm:$0xff]  }
 0x69d   :  { %v21044_v43 = vld [vmem:[#allocation5 + $0x1c50] ss:$24 sps:$4 sm:$0xff]   ;;  %v21049_v39 = vld [vmem:[#allocation5 + $0x1934] ss:$24 sps:$4 sm:$0xff]  }
 0x69e   :  { %22557 = vst [vmem:[#allocation36_spill] sm:$0xff] %v22022_v44 }
 0x6a2   :  { %8198 = vmatpush2.bf16.xpose.msra.mxu0 %v21017_v2  ;;  %v21052_v2 = vld [vmem:[#allocation5 + $0x1c24] ss:$24 sps:$4 sm:$0xff]  }
 0x6a3   :  { %8241 = vmatpush2.bf16.xpose.msra.mxu1 %v21020_v61  ;;  %8199 = vmatprep.subr.bf16.mxu0 %v21025_v13  ;;  %v21047_v61 = vld [vmem:[#allocation5 + $0x1930] ss:$24 sps:$4 sm:$0xff]   ;;  %v21050_v13 = vld [vmem:[#allocation5 + $0x1c20] ss:$24 sps:$4 sm:$0xff]  }
 0x6a4   :  { %8242 = vmatprep.subr.bf16.mxu1 %v21028_v63  ;;  %v21055_v63 = vld [vmem:[#allocation5 + $0x1904] ss:$24 sps:$4 sm:$0xff]  }
 0x6aa   :  { %8200 = vmatpush2.bf16.xpose.msra.mxu0 %v21023_v6  ;;  %v21041_v6 = vld [vmem:[#allocation5 + $0x1960] ss:$24 sps:$4 sm:$0xff]  }
 0x6ab   :  { %8243 = vmatpush2.bf16.xpose.msra.mxu1 %v21026_v46  ;;  %8201 = vmatprep.subr.bf16.mxu0 %v21031_v34  ;;  %v21058_v46 = vld [vmem:[#allocation5 + $0x1bf4] ss:$24 sps:$4 sm:$0xff]   ;;  %v21053_v34 = vld [vmem:[#allocation5 + $0x1900] ss:$24 sps:$4 sm:$0xff]  }
 0x6ac   :  { %8244 = vmatprep.subr.bf16.mxu1 %v21034_v41  ;;  %v21056_v41 = vld [vmem:[#allocation5 + $0x1bf0] ss:$24 sps:$4 sm:$0xff]  }
 0x6b2   :  { %8202 = vmatpush2.bf16.xpose.msra.mxu0 %v21029_v54  ;;  %v21061_v54 = vld [vmem:[#allocation5 + $0x18d4] ss:$24 sps:$4 sm:$0xff]  }
 0x6b3   :  { %8245 = vmatpush2.bf16.xpose.msra.mxu1 %v21032_v47  ;;  %8203 = vmatprep.subr.bf16.mxu0 %v21037_v21  ;;  %v21064_v47 = vld [vmem:[#allocation5 + $0x1bc4] ss:$24 sps:$4 sm:$0xff]   ;;  %v21059_v21 = vld [vmem:[#allocation5 + $0x18d0] ss:$24 sps:$4 sm:$0xff]  }
 0x6b4   :  { %8246 = vmatprep.subr.bf16.mxu1 %v21040_v56  ;;  %v21062_v56 = vld [vmem:[#allocation5 + $0x1bc0] ss:$24 sps:$4 sm:$0xff]  }
 0x6ba   :  { %8204 = vmatpush2.bf16.xpose.msra.mxu0 %v21035_v18  ;;  %v21067_v18 = vld [vmem:[#allocation5 + $0x18a4] ss:$24 sps:$4 sm:$0xff]  }
 0x6bb   :  { %8247 = vmatpush2.bf16.xpose.msra.mxu1 %v21038_v0  ;;  %8259 = vmatprep.subr.bf16.mxu0 %v21043_v45  ;;  %v21070_v0 = vld [vmem:[#allocation5 + $0x1b94] ss:$24 sps:$4 sm:$0xff]   ;;  %v21065_v45 = vld [vmem:[#allocation5 + $0x18a0] ss:$24 sps:$4 sm:$0xff]  }
 0x6bc   :  { %8302 = vmatprep.subr.bf16.mxu1 %v21046_v25  ;;  %v21068_v25 = vld [vmem:[#allocation5 + $0x1b90] ss:$24 sps:$4 sm:$0xff]  }
 0x6c1   :  { %8206 = vmatmul.mubr.bf16.vlgmr.msra.gmra.mxu0 %v21819_v16 }
 0x6c2   :  { %8249 = vmatmul.mubr.bf16.vlgmr.msra.gmra.mxu1 %v21821_v17  ;;  %8260 = vmatpush1.bf16.xpose.msra.mxu0 %v21041_v6  ;;  %v21073_v6 = vld [vmem:[#allocation5 + $0x1874] ss:$24 sps:$4 sm:$0xff]  }
 0x6c3   :  { %8303 = vmatpush1.bf16.xpose.msra.mxu1 %v21044_v43  ;;  %8261 = vmatprep.subr.bf16.mxu0 %v21049_v39  ;;  %v21076_v43 = vld [vmem:[#allocation5 + $0x1b64] ss:$24 sps:$4 sm:$0xff]   ;;  %v21071_v39 = vld [vmem:[#allocation5 + $0x1870] ss:$24 sps:$4 sm:$0xff]  }
 0x6c4   :  { %8304 = vmatprep.subr.bf16.mxu1 %v21052_v2  ;;  %8291 = vmatprep.mubr.bf16.mxu0 %v21823_v20  ;;  %v21074_v2 = vld [vmem:[#allocation5 + $0x1b60] ss:$24 sps:$4 sm:$0xff]  }
 0x6c5   :  { %8334 = vmatprep.mubr.bf16.mxu1 %v21813_v30 }
 0x6ca   :  { %8262 = vmatpush1.bf16.xpose.msra.mxu0 %v21047_v61  ;;  %v21079_v61 = vld [vmem:[#allocation5 + $0x1844] ss:$24 sps:$4 sm:$0xff]  }
 0x6cb   :  { %8305 = vmatpush1.bf16.xpose.msra.mxu1 %v21050_v13  ;;  %8263 = vmatprep.subr.bf16.mxu0 %v21055_v63  ;;  %v21082_v13 = vld [vmem:[#allocation5 + $0x1b34] ss:$24 sps:$4 sm:$0xff]   ;;  %v21077_v63 = vld [vmem:[#allocation5 + $0x1840] ss:$24 sps:$4 sm:$0xff]  }
 0x6cc   :  { %8306 = vmatprep.subr.bf16.mxu1 %v21058_v46  ;;  %v21080_v46 = vld [vmem:[#allocation5 + $0x1b30] ss:$24 sps:$4 sm:$0xff]  }
 0x6d2   :  { %8264 = vmatpush1.bf16.xpose.msra.mxu0 %v21053_v34  ;;  %v21085_v34 = vld [vmem:[#allocation5 + $0x1814] ss:$24 sps:$4 sm:$0xff]  }
 0x6d3   :  { %8307 = vmatpush1.bf16.xpose.msra.mxu1 %v21056_v41  ;;  %8265 = vmatprep.subr.bf16.mxu0 %v21061_v54  ;;  %v21088_v41 = vld [vmem:[#allocation5 + $0x1b04] ss:$24 sps:$4 sm:$0xff]   ;;  %v22028_v54 = vpop.f32.mrf.mxu1 }
 0x6d4   :  { %8308 = vmatprep.subr.bf16.mxu1 %v21064_v47  ;;  %22558 = vst [vmem:[#allocation37_spill] sm:$0xff] %v22028_v54 }
 0x6d5   :  { %v8078_v47 = vpop.f32.mrf.mxu1 }
 0x6da   :  { %8266 = vmatpush1.bf16.xpose.msra.mxu0 %v21059_v21  ;;  %v21083_v21 = vld [vmem:[#allocation5 + $0x1810] ss:$24 sps:$4 sm:$0xff]  }
 0x6db   :  { %8309 = vmatpush1.bf16.xpose.msra.mxu1 %v21062_v56  ;;  %8267 = vmatprep.subr.bf16.mxu0 %v21067_v18  ;;  %v21086_v56 = vld [vmem:[#allocation5 + $0x1b00] ss:$24 sps:$4 sm:$0xff]   ;;  %v22030_v18 = vpop.f32.mrf.mxu1 }
 0x6dc   :  { %8310 = vmatprep.subr.bf16.mxu1 %v21070_v0  ;;  %22559 = vst [vmem:[#allocation38_spill] sm:$0xff] %v22030_v18  ;;  %v21091_v0 = vld [vmem:[#allocation5 + $0x1ae4] ss:$24 sps:$4 sm:$0xff]  }
 0x6e2   :  { %8268 = vmatpush1.bf16.xpose.msra.mxu0 %v21065_v45  ;;  %v21094_v45 = vld [vmem:[#allocation5 + $0x1dd4] ss:$24 sps:$4 sm:$0xff]  }
 0x6e3   :  { %8311 = vmatpush1.bf16.xpose.msra.mxu1 %v21068_v25  ;;  %8269 = vmatprep.subr.bf16.mxu0 %v21073_v6  ;;  %v8082_v25 = vpop.f32.mrf.mxu1  ;;  %v21618_v6 = vld [vmem:[#allocation7 + $0x8] sm:$0xff] }
 0x6e4   :  { %8312 = vmatprep.subr.bf16.mxu1 %v21076_v43  ;;  %v1320_v43 = vrot.slane %v21618_v6, %v21928_v40 }
 0x6ea   :  { %8270 = vmatpush1.bf16.xpose.msra.mxu0 %v21071_v39  ;;  %v21089_v39 = vld [vmem:[#allocation5 + $0x1ae0] ss:$24 sps:$4 sm:$0xff]  }
 0x6eb   :  { %8313 = vmatpush1.bf16.xpose.msra.mxu1 %v21074_v2  ;;  %8271 = vmatprep.subr.bf16.mxu0 %v21079_v61  ;;  %v21092_v2 = vld [vmem:[#allocation5 + $0x1dd0] ss:$24 sps:$4 sm:$0xff]   ;;  %v22033_v61 = vpop.f32.mrf.mxu0 }
 0x6ec   :  { %8314 = vmatprep.subr.bf16.mxu1 %v21082_v13  ;;  %22560 = vst [vmem:[#allocation39_spill] sm:$0xff] %v22033_v61  ;;  %v22035_v13 = vpop.f32.mrf.mxu1 }
 0x6ed   :  { %22561 = vst [vmem:[#allocation40_spill] sm:$0xff] %v22035_v13  ;;  %v21095_v13 = vld [vmem:[#allocation5 + $0x1ab0] ss:$24 sps:$4 sm:$0xff]  }
 0x6f2   :  { %8272 = vmatpush1.bf16.xpose.msra.mxu0 %v21077_v63  ;;  %v21097_v63 = vld [vmem:[#allocation5 + $0x1ab4] ss:$24 sps:$4 sm:$0xff]  }
 0x6f3   :  { %8315 = vmatpush1.bf16.xpose.msra.mxu1 %v21080_v46  ;;  %8273 = vmatprep.subr.bf16.mxu0 %v21085_v34  ;;  %v21100_v46 = vld [vmem:[#allocation5 + $0x1da4] ss:$24 sps:$4 sm:$0xff]   ;;  %v8079_v34 = vadd.f32 %v8078_v47, %v1320_v43 }
 0x6f4   :  { %8316 = vmatprep.subr.bf16.mxu1 %v21088_v41  ;;  %v21103_v47 = vld [vmem:[#allocation5 + $0x1a84] ss:$24 sps:$4 sm:$0xff]  }
 0x6fa   :  { %8274 = vmatpush1.bf16.xpose.msra.mxu0 %v21083_v21 }
 0x6fb   :  { %8317 = vmatpush1.bf16.xpose.msra.mxu1 %v21086_v56  ;;  %8275 = vmatprep.subr.bf16.mxu0 %v21091_v0  ;;  %v8083_v0 = vadd.f32 %v8082_v25, %v1320_v43  ;;  %v21109_v25 = vld [vmem:[#allocation5 + $0x1a54] ss:$24 sps:$4 sm:$0xff]   ;;  %v21107_v43 = vld [vmem:[#allocation5 + $0x1a50] ss:$24 sps:$4 sm:$0xff]  }
 0x6fc   :  { %8318 = vmatprep.subr.bf16.mxu1 %v21094_v45 }
 0x701   :  { %v8121_v41 = vpop.f32.mrf.mxu0 }
 0x702   :  { %v8164_v44 = vpop.f32.mrf.mxu1  ;;  %v8122_v54 = vadd.f32 %v8121_v41, %v8079_v34  ;;  %8276 = vmatpush2.bf16.xpose.msra.mxu0 %v21089_v39  ;;  %v21115_v41 = vld [vmem:[#allocation5 + $0x1a24] ss:$24 sps:$4 sm:$0xff]  }
 0x703   :  { %8319 = vmatpush2.bf16.xpose.msra.mxu1 %v21092_v2  ;;  %v22037_v21 = vpop.f32.mrf.mxu0  ;;  %8277 = vmatprep.subr.bf16.mxu0 %v21097_v63  ;;  %v21101_v2 = vld [vmem:[#allocation5 + $0x1a80] ss:$24 sps:$4 sm:$0xff]   ;;  %v21104_v63 = vld [vmem:[#allocation5 + $0x1d70] ss:$24 sps:$4 sm:$0xff]  }
 0x704   :  { %v22039_v56 = vpop.f32.mrf.mxu1  ;;  %8320 = vmatprep.subr.bf16.mxu1 %v21100_v46  ;;  %v8165_v45 = vadd.f32 %v8164_v44, %v8122_v54  ;;  %v21112_v44 = vld [vmem:[#allocation5 + $0x1d44] ss:$24 sps:$4 sm:$0xff]   ;;  %v21110_v46 = vld [vmem:[#allocation5 + $0x1d40] ss:$24 sps:$4 sm:$0xff]  }
 0x705   :  { %22562 = vst [vmem:[#allocation41_spill] sm:$0xff] %v22039_v56  ;;  %v8125_v6 = vpop.f32.mrf.mxu0 }
 0x706   :  { %v8752_v61 = vmul.f32 0.70710677, %v8165_v45  ;;  %v8126_v18 = vadd.f32 %v8125_v6, %v8083_v0  ;;  %v8168_v42 = vpop.f32.mrf.mxu1 }
 0x708   :  { %21549 = verf.f32 %v8752_v61  ;;  %v8169_v34 = vadd.f32 %v8168_v42, %v8126_v18  ;;  %v21118_v61 = vld [vmem:[#allocation5 + $0x1d14] ss:$24 sps:$4 sm:$0xff]  }
 0x70a   :  { %v8776_v39 = vmul.f32 0.70710677, %v8169_v34  ;;  %8278 = vmatpush2.bf16.xpose.msra.mxu0 %v21095_v13  ;;  %v8703_v13 = vmul.f32 0.5, %v8165_v45  ;;  %v21122_v45 = vld [vmem:[#allocation5 + $0x1ce0] ss:$24 sps:$4 sm:$0xff]  }
 0x70b   :  { %8321 = vmatpush2.bf16.xpose.msra.mxu1 %v21098_v22  ;;  %8279 = vmatprep.subr.bf16.mxu0 %v21103_v47  ;;  %v8727_v22 = vmul.f32 0.5, %v8169_v34  ;;  %v21127_v34 = vld [vmem:[#allocation5 + $0x19c4] ss:$24 sps:$4 sm:$0xff]  }
 0x70c   :  { %8322 = vmatprep.subr.bf16.mxu1 %v21106_v37  ;;  %21551 = verf.f32 %v8776_v39  ;;  %v21113_v39 = vld [vmem:[#allocation5 + $0x1a20] ss:$24 sps:$4 sm:$0xff]  }
 0x712   :  { %8280 = vmatpush2.bf16.xpose.msra.mxu0 %v21101_v2  ;;  %v21116_v2 = vld [vmem:[#allocation5 + $0x1d10] ss:$24 sps:$4 sm:$0xff]  }
 0x713   :  { %8323 = vmatpush2.bf16.xpose.msra.mxu1 %v21104_v63  ;;  %8281 = vmatprep.subr.bf16.mxu0 %v21109_v25  ;;  %v21121_v63 = vld [vmem:[#allocation5 + $0x19f4] ss:$24 sps:$4 sm:$0xff]   ;;  %v21124_v25 = vld [vmem:[#allocation5 + $0x1ce4] ss:$24 sps:$4 sm:$0xff]  }
 0x714   :  { %8324 = vmatprep.subr.bf16.mxu1 %v21112_v44  ;;  %v21119_v44 = vld [vmem:[#allocation5 + $0x19f0] ss:$24 sps:$4 sm:$0xff]  }
 0x715   :  { %v21550_v54 = vpop.eup %21549 }
 0x716   :  { %v8848_v42 = vadd.f32 1.0, %v21550_v54  ;;  %v21130_v54 = vld [vmem:[#allocation5 + $0x1cb4] ss:$24 sps:$4 sm:$0xff]  }
 0x718   :  { %v8896_v37 = vmul.f32 %v8848_v42, %v8703_v13  ;;  %v21131_v42 = vld [vmem:[#allocation5 + $0x1990] ss:$24 sps:$4 sm:$0xff]   ;;  %v21139_v13 = vld [vmem:[#allocation5 + $0x1c5c] ss:$24 sps:$4 sm:$0xff]  }
 0x719   :  { %v21552_v18 = vpop.eup %21551 }
 0x71a   :  { %v8872_v0 = vadd.f32 1.0, %v21552_v18  ;;  %8282 = vmatpush2.bf16.xpose.msra.mxu0 %v21107_v43  ;;  %v21125_v43 = vld [vmem:[#allocation5 + $0x19c0] ss:$24 sps:$4 sm:$0xff]  }
 0x71b   :  { %8325 = vmatpush2.bf16.xpose.msra.mxu1 %v21110_v46  ;;  %8283 = vmatprep.subr.bf16.mxu0 %v21115_v41  ;;  %v21128_v46 = vld [vmem:[#allocation5 + $0x1cb0] ss:$24 sps:$4 sm:$0xff]   ;;  %v21133_v41 = vld [vmem:[#allocation5 + $0x1994] ss:$24 sps:$4 sm:$0xff]   ;;  %v21134_v18 = vld [vmem:[#allocation5 + $0x1c80] ss:$24 sps:$4 sm:$0xff]  }
 0x71c   :  { %8326 = vmatprep.subr.bf16.mxu1 %v21118_v61  ;;  %v8920_v6 = vmul.f32 %v8872_v0, %v8727_v22  ;;  %v21136_v61 = vld [vmem:[#allocation5 + $0x1c84] ss:$24 sps:$4 sm:$0xff]   ;;  %v21137_v0 = vld [vmem:[#allocation5 + $0x1c58] ss:$24 sps:$4 sm:$0xff]  }
 0x71d   :  { %v21142_v22 = vld [vmem:[#allocation5 + $0x1c64] ss:$24 sps:$4 sm:$0xff]  }
 0x71e   :  { %v22041_v47 = vpack.c.bf16 %v8920_v6, %v8896_v37  ;;  %v21140_v37 = vld [vmem:[#allocation5 + $0x1c60] ss:$24 sps:$4 sm:$0xff]   ;;  %v21145_v6 = vld [vmem:[#allocation5 + $0x1c2c] ss:$24 sps:$4 sm:$0xff]  }
 0x720   :  { %22563 = vst [vmem:[#allocation42_spill] sm:$0xff] %v22041_v47  ;;  %v21202_v47 = vld [vmem:[#allocation5 + $0x1d84] ss:$24 sps:$4 sm:$0xff]  }
 0x722   :  { %8284 = vmatpush2.bf16.xpose.msra.mxu0 %v21113_v39  ;;  %v21148_v39 = vld [vmem:[#allocation5 + $0x1c34] ss:$24 sps:$4 sm:$0xff]  }
 0x723   :  { %8327 = vmatpush2.bf16.xpose.msra.mxu1 %v21116_v2  ;;  %8285 = vmatprep.subr.bf16.mxu0 %v21121_v63  ;;  %v21143_v2 = vld [vmem:[#allocation5 + $0x1c28] ss:$24 sps:$4 sm:$0xff]  }
 0x724   :  { %8328 = vmatprep.subr.bf16.mxu1 %v21124_v25  ;;  %v21146_v63 = vld [vmem:[#allocation5 + $0x1c30] ss:$24 sps:$4 sm:$0xff]   ;;  %v21151_v25 = vld [vmem:[#allocation5 + $0x1bfc] ss:$24 sps:$4 sm:$0xff]  }
 0x72a   :  { %8286 = vmatpush2.bf16.xpose.msra.mxu0 %v21119_v44  ;;  %v21154_v44 = vld [vmem:[#allocation5 + $0x1c04] ss:$24 sps:$4 sm:$0xff]  }
 0x72b   :  { %8329 = vmatpush2.bf16.xpose.msra.mxu1 %v21122_v45  ;;  %8287 = vmatprep.subr.bf16.mxu0 %v21127_v34  ;;  %v21149_v45 = vld [vmem:[#allocation5 + $0x1bf8] ss:$24 sps:$4 sm:$0xff]  }
 0x72c   :  { %8330 = vmatprep.subr.bf16.mxu1 %v21130_v54  ;;  %v21152_v34 = vld [vmem:[#allocation5 + $0x1c00] ss:$24 sps:$4 sm:$0xff]   ;;  %v21157_v54 = vld [vmem:[#allocation5 + $0x1bcc] ss:$24 sps:$4 sm:$0xff]  }
 0x732   :  { %8288 = vmatpush2.bf16.xpose.msra.mxu0 %v21125_v43  ;;  %v21160_v43 = vld [vmem:[#allocation5 + $0x1bd4] ss:$24 sps:$4 sm:$0xff]  }
 0x733   :  { %8331 = vmatpush2.bf16.xpose.msra.mxu1 %v21128_v46  ;;  %8289 = vmatprep.subr.bf16.mxu0 %v21133_v41  ;;  %v21155_v46 = vld [vmem:[#allocation5 + $0x1bc8] ss:$24 sps:$4 sm:$0xff]  }
 0x734   :  { %8332 = vmatprep.subr.bf16.mxu1 %v21136_v61  ;;  %v21158_v41 = vld [vmem:[#allocation5 + $0x1bd0] ss:$24 sps:$4 sm:$0xff]   ;;  %v21163_v61 = vld [vmem:[#allocation5 + $0x1b9c] ss:$24 sps:$4 sm:$0xff]  }
 0x73a   :  { %8290 = vmatpush2.bf16.xpose.msra.mxu0 %v21131_v42  ;;  %v21166_v42 = vld [vmem:[#allocation5 + $0x1ba4] ss:$24 sps:$4 sm:$0xff]  }
 0x73b   :  { %8333 = vmatpush2.bf16.xpose.msra.mxu1 %v21134_v18  ;;  %8345 = vmatprep.subr.bf16.mxu0 %v21139_v13  ;;  %v21161_v18 = vld [vmem:[#allocation5 + $0x1b98] ss:$24 sps:$4 sm:$0xff]  }
 0x73c   :  { %8388 = vmatprep.subr.bf16.mxu1 %v21142_v22  ;;  %v21164_v13 = vld [vmem:[#allocation5 + $0x1ba0] ss:$24 sps:$4 sm:$0xff]   ;;  %v21169_v22 = vld [vmem:[#allocation5 + $0x1b6c] ss:$24 sps:$4 sm:$0xff]  }
 0x741   :  { %8292 = vmatmul.mubr.bf16.vlgmr.msra.gmra.mxu0 %v21829_v26 }
 0x742   :  { %8335 = vmatmul.mubr.bf16.vlgmr.msra.gmra.mxu1 %v21819_v16  ;;  %8346 = vmatpush1.bf16.xpose.msra.mxu0 %v21137_v0  ;;  %v21172_v0 = vld [vmem:[#allocation5 + $0x1b74] ss:$24 sps:$4 sm:$0xff]  }
 0x743   :  { %8389 = vmatpush1.bf16.xpose.msra.mxu1 %v21140_v37  ;;  %8347 = vmatprep.subr.bf16.mxu0 %v21145_v6  ;;  %v21167_v37 = vld [vmem:[#allocation5 + $0x1b68] ss:$24 sps:$4 sm:$0xff]  }
 0x744   :  { %8390 = vmatprep.subr.bf16.mxu1 %v21148_v39  ;;  %8377 = vmatprep.mubr.bf16.mxu0 %v21815_v31  ;;  %v21170_v6 = vld [vmem:[#allocation5 + $0x1b70] ss:$24 sps:$4 sm:$0xff]   ;;  %v21175_v39 = vld [vmem:[#allocation5 + $0x1b3c] ss:$24 sps:$4 sm:$0xff]  }
 0x745   :  { %8420 = vmatprep.mubr.bf16.mxu1 %v21823_v20 }
 0x74a   :  { %8348 = vmatpush1.bf16.xpose.msra.mxu0 %v21143_v2  ;;  %v21178_v2 = vld [vmem:[#allocation5 + $0x1b44] ss:$24 sps:$4 sm:$0xff]  }
 0x74b   :  { %8391 = vmatpush1.bf16.xpose.msra.mxu1 %v21146_v63  ;;  %8349 = vmatprep.subr.bf16.mxu0 %v21151_v25  ;;  %v21173_v63 = vld [vmem:[#allocation5 + $0x1b38] ss:$24 sps:$4 sm:$0xff]  }
 0x74c   :  { %8392 = vmatprep.subr.bf16.mxu1 %v21154_v44  ;;  %v21176_v25 = vld [vmem:[#allocation5 + $0x1b40] ss:$24 sps:$4 sm:$0xff]   ;;  %v21181_v44 = vld [vmem:[#allocation5 + $0x1b0c] ss:$24 sps:$4 sm:$0xff]  }
 0x752   :  { %8350 = vmatpush1.bf16.xpose.msra.mxu0 %v21149_v45  ;;  %v21184_v45 = vld [vmem:[#allocation5 + $0x1b14] ss:$24 sps:$4 sm:$0xff]  }
 0x753   :  { %8393 = vmatpush1.bf16.xpose.msra.mxu1 %v21152_v34  ;;  %8351 = vmatprep.subr.bf16.mxu0 %v21157_v54  ;;  %v21179_v34 = vld [vmem:[#allocation5 + $0x1b08] ss:$24 sps:$4 sm:$0xff]  }
 0x754   :  { %8394 = vmatprep.subr.bf16.mxu1 %v21160_v43  ;;  %v21182_v54 = vld [vmem:[#allocation5 + $0x1b10] ss:$24 sps:$4 sm:$0xff]   ;;  %v21187_v43 = vld [vmem:[#allocation5 + $0x1ddc] ss:$24 sps:$4 sm:$0xff]  }
 0x75a   :  { %8352 = vmatpush1.bf16.xpose.msra.mxu0 %v21155_v46  ;;  %v21190_v46 = vld [vmem:[#allocation5 + $0x1de4] ss:$24 sps:$4 sm:$0xff]  }
 0x75b   :  { %8395 = vmatpush1.bf16.xpose.msra.mxu1 %v21158_v41  ;;  %8353 = vmatprep.subr.bf16.mxu0 %v21163_v61  ;;  %v22047_v41 = vld [vmem:[#allocation7 + $0x10] sm:$0xff] }
 0x75c   :  { %8396 = vmatprep.subr.bf16.mxu1 %v21166_v42  ;;  %v1328_v61 = vrot.slane %v22047_v41, %v21838_v62  ;;  %v21185_v42 = vld [vmem:[#allocation5 + $0x1dd8] ss:$24 sps:$4 sm:$0xff]   ;;  %v21199_v62 = vld [vmem:[#allocation5 + $0x1d7c] ss:$24 sps:$4 sm:$0xff]  }
 0x762   :  { %8354 = vmatpush1.bf16.xpose.msra.mxu0 %v21161_v18  ;;  %v21188_v18 = vld [vmem:[#allocation5 + $0x1de0] ss:$24 sps:$4 sm:$0xff]  }
 0x763   :  { %8397 = vmatpush1.bf16.xpose.msra.mxu1 %v21164_v13  ;;  %8355 = vmatprep.subr.bf16.mxu0 %v21169_v22  ;;  %v22051_v13 = vpop.f32.mrf.mxu0  ;;  %v22053_v22 = vpop.f32.mrf.mxu1 }
 0x764   :  { %8398 = vmatprep.subr.bf16.mxu1 %v21172_v0  ;;  %22564 = vst [vmem:[#allocation43_spill] sm:$0xff] %v22053_v22  ;;  %v21193_v0 = vld [vmem:[#allocation5 + $0x1dac] ss:$24 sps:$4 sm:$0xff]  }
 0x765   :  { %v21394_v22 = vld [vmem:[#allocation5 + $0x2374] ss:$24 sps:$4 sm:$0xff]  }
 0x76a   :  { %8356 = vmatpush1.bf16.xpose.msra.mxu0 %v21167_v37  ;;  %v21196_v37 = vld [vmem:[#allocation5 + $0x1db4] ss:$24 sps:$4 sm:$0xff]  }
 0x76b   :  { %8399 = vmatpush1.bf16.xpose.msra.mxu1 %v21170_v6  ;;  %8357 = vmatprep.subr.bf16.mxu0 %v21175_v39 }
 0x76c   :  { %8400 = vmatprep.subr.bf16.mxu1 %v21178_v2 }
 0x772   :  { %8358 = vmatpush1.bf16.xpose.msra.mxu0 %v21173_v63 }
 0x773   :  { %8401 = vmatpush1.bf16.xpose.msra.mxu1 %v21176_v25  ;;  %8359 = vmatprep.subr.bf16.mxu0 %v21181_v44 }
 0x774   :  { %8402 = vmatprep.subr.bf16.mxu1 %v21184_v45 }
 0x77a   :  { %8360 = vmatpush1.bf16.xpose.msra.mxu0 %v21179_v34 }
 0x77b   :  { %8403 = vmatpush1.bf16.xpose.msra.mxu1 %v21182_v54  ;;  %8361 = vmatprep.subr.bf16.mxu0 %v21187_v43  ;;  %v21191_v54 = vld [vmem:[#allocation5 + $0x1da8] ss:$24 sps:$4 sm:$0xff]  }
 0x77c   :  { %8404 = vmatprep.subr.bf16.mxu1 %v21190_v46  ;;  %v21194_v43 = vld [vmem:[#allocation5 + $0x1db0] ss:$24 sps:$4 sm:$0xff]  }
 0x781   :  { %v8207_v6 = vpop.f32.mrf.mxu0 }
 0x782   :  { %v8250_v39 = vpop.f32.mrf.mxu1  ;;  %v8208_v2 = vadd.f32 %v8207_v6, %v1328_v61  ;;  %8362 = vmatpush2.bf16.xpose.msra.mxu0 %v21185_v42  ;;  %v21197_v42 = vld [vmem:[#allocation5 + $0x1d78] ss:$24 sps:$4 sm:$0xff]   ;;  %v21205_v6 = vld [vmem:[#allocation5 + $0x1d4c] ss:$24 sps:$4 sm:$0xff]  }
 0x783   :  { %8405 = vmatpush2.bf16.xpose.msra.mxu1 %v21188_v18  ;;  %v22055_v63 = vpop.f32.mrf.mxu0  ;;  %8363 = vmatprep.subr.bf16.mxu0 %v21193_v0  ;;  %v21200_v18 = vld [vmem:[#allocation5 + $0x1d80] ss:$24 sps:$4 sm:$0xff]   ;;  %v21208_v0 = vld [vmem:[#allocation5 + $0x1d54] ss:$24 sps:$4 sm:$0xff]  }
 0x784   :  { %22565 = vst [vmem:[#allocation44_spill] sm:$0xff] %v22055_v63  ;;  %v22057_v25 = vpop.f32.mrf.mxu1  ;;  %8406 = vmatprep.subr.bf16.mxu1 %v21196_v37  ;;  %v22059_v44 = vadd.f32 %v8250_v39, %v8208_v2  ;;  %v21206_v37 = vld [vmem:[#allocation5 + $0x1d50] ss:$24 sps:$4 sm:$0xff]   ;;  %v21211_v39 = vld [vmem:[#allocation5 + $0x1d1c] ss:$24 sps:$4 sm:$0xff]  }
 0x785   :  { %22566 = vst [vmem:[#allocation45_spill] sm:$0xff] %v22057_v25  ;;  %v8211_v45 = vpop.f32.mrf.mxu0  ;;  %v21214_v2 = vld [vmem:[#allocation5 + $0x1d24] ss:$24 sps:$4 sm:$0xff]  }
 0x786   :  { %v8212_v34 = vadd.f32 %v8211_v45, %v1328_v61  ;;  %v8254_v46 = vpop.f32.mrf.mxu1  ;;  %v21203_v61 = vld [vmem:[#allocation5 + $0x1d48] ss:$24 sps:$4 sm:$0xff]   ;;  %v21209_v45 = vld [vmem:[#allocation5 + $0x1d18] ss:$24 sps:$4 sm:$0xff]   ;;  %v21310_v63 = vld [vmem:[#allocation5 + $0x201c] ss:$24 sps:$4 sm:$0xff]  }
 0x788   :  { %v22061_v56 = vadd.f32 %v8254_v46, %v8212_v34  ;;  %v21212_v34 = vld [vmem:[#allocation5 + $0x1d20] ss:$24 sps:$4 sm:$0xff]   ;;  %v21223_v46 = vld [vmem:[#allocation5 + $0x1cbc] ss:$24 sps:$4 sm:$0xff]  }
 0x78a   :  { %8364 = vmatpush2.bf16.xpose.msra.mxu0 %v21191_v54  ;;  %v21215_v54 = vld [vmem:[#allocation5 + $0x1ce8] ss:$24 sps:$4 sm:$0xff]  }
 0x78b   :  { %8407 = vmatpush2.bf16.xpose.msra.mxu1 %v21194_v43  ;;  %8365 = vmatprep.subr.bf16.mxu0 %v21199_v62  ;;  %v21217_v62 = vld [vmem:[#allocation5 + $0x1cec] ss:$24 sps:$4 sm:$0xff]   ;;  %v21218_v43 = vld [vmem:[#allocation5 + $0x1cf0] ss:$24 sps:$4 sm:$0xff]  }
 0x78c   :  { %8408 = vmatprep.subr.bf16.mxu1 %v21202_v47  ;;  %v21220_v47 = vld [vmem:[#allocation5 + $0x1cf4] ss:$24 sps:$4 sm:$0xff]  }
 0x792   :  { %8366 = vmatpush2.bf16.xpose.msra.mxu0 %v21197_v42  ;;  %v21226_v42 = vld [vmem:[#allocation5 + $0x1cc4] ss:$24 sps:$4 sm:$0xff]  }
 0x793   :  { %8409 = vmatpush2.bf16.xpose.msra.mxu1 %v21200_v18  ;;  %8367 = vmatprep.subr.bf16.mxu0 %v21205_v6  ;;  %v21221_v18 = vld [vmem:[#allocation5 + $0x1cb8] ss:$24 sps:$4 sm:$0xff]  }
 0x794   :  { %8410 = vmatprep.subr.bf16.mxu1 %v21208_v0  ;;  %v21224_v6 = vld [vmem:[#allocation5 + $0x1cc0] ss:$24 sps:$4 sm:$0xff]   ;;  %v21229_v0 = vld [vmem:[#allocation5 + $0x1c8c] ss:$24 sps:$4 sm:$0xff]  }
 0x79a   :  { %8368 = vmatpush2.bf16.xpose.msra.mxu0 %v21203_v61  ;;  %v21232_v61 = vld [vmem:[#allocation5 + $0x1c94] ss:$24 sps:$4 sm:$0xff]  }
 0x79b   :  { %8411 = vmatpush2.bf16.xpose.msra.mxu1 %v21206_v37  ;;  %8369 = vmatprep.subr.bf16.mxu0 %v21211_v39  ;;  %v21227_v37 = vld [vmem:[#allocation5 + $0x1c88] ss:$24 sps:$4 sm:$0xff]  }
 0x79c   :  { %8412 = vmatprep.subr.bf16.mxu1 %v21214_v2  ;;  %v21230_v39 = vld [vmem:[#allocation5 + $0x1c90] ss:$24 sps:$4 sm:$0xff]   ;;  %v21235_v2 = vld [vmem:[#allocation5 + $0x1f54] ss:$24 sps:$4 sm:$0xff]  }
 0x7a2   :  { %8370 = vmatpush2.bf16.xpose.msra.mxu0 %v21209_v45  ;;  %v21238_v45 = vld [vmem:[#allocation5 + $0x1f5c] ss:$24 sps:$4 sm:$0xff]  }
 0x7a3   :  { %8413 = vmatpush2.bf16.xpose.msra.mxu1 %v21212_v34  ;;  %8371 = vmatprep.subr.bf16.mxu0 %v21217_v62  ;;  %v21233_v34 = vld [vmem:[#allocation5 + $0x1f50] ss:$24 sps:$4 sm:$0xff]  }
 0x7a4   :  { %8414 = vmatprep.subr.bf16.mxu1 %v21220_v47  ;;  %v21236_v62 = vld [vmem:[#allocation5 + $0x1f58] ss:$24 sps:$4 sm:$0xff]   ;;  %v21241_v47 = vld [vmem:[#allocation5 + $0x1f24] ss:$24 sps:$4 sm:$0xff]  }
 0x7aa   :  { %8372 = vmatpush2.bf16.xpose.msra.mxu0 %v21215_v54  ;;  %v21244_v54 = vld [vmem:[#allocation5 + $0x1f2c] ss:$24 sps:$4 sm:$0xff]  }
 0x7ab   :  { %8415 = vmatpush2.bf16.xpose.msra.mxu1 %v21218_v43  ;;  %8373 = vmatprep.subr.bf16.mxu0 %v21223_v46  ;;  %v21239_v43 = vld [vmem:[#allocation5 + $0x1f20] ss:$24 sps:$4 sm:$0xff]  }
 0x7ac   :  { %8416 = vmatprep.subr.bf16.mxu1 %v21226_v42  ;;  %v21242_v46 = vld [vmem:[#allocation5 + $0x1f28] ss:$24 sps:$4 sm:$0xff]   ;;  %v21247_v42 = vld [vmem:[#allocation5 + $0x1ef4] ss:$24 sps:$4 sm:$0xff]  }
 0x7b2   :  { %8374 = vmatpush2.bf16.xpose.msra.mxu0 %v21221_v18  ;;  %v21250_v18 = vld [vmem:[#allocation5 + $0x1efc] ss:$24 sps:$4 sm:$0xff]  }
 0x7b3   :  { %8417 = vmatpush2.bf16.xpose.msra.mxu1 %v21224_v6  ;;  %8375 = vmatprep.subr.bf16.mxu0 %v21229_v0  ;;  %v21245_v6 = vld [vmem:[#allocation5 + $0x1ef0] ss:$24 sps:$4 sm:$0xff]  }
 0x7b4   :  { %8418 = vmatprep.subr.bf16.mxu1 %v21232_v61  ;;  %v21248_v0 = vld [vmem:[#allocation5 + $0x1ef8] ss:$24 sps:$4 sm:$0xff]   ;;  %v21253_v61 = vld [vmem:[#allocation5 + $0x1ec4] ss:$24 sps:$4 sm:$0xff]  }
 0x7ba   :  { %8376 = vmatpush2.bf16.xpose.msra.mxu0 %v21227_v37  ;;  %v21256_v37 = vld [vmem:[#allocation5 + $0x1ecc] ss:$24 sps:$4 sm:$0xff]  }
 0x7bb   :  { %8419 = vmatpush2.bf16.xpose.msra.mxu1 %v21230_v39  ;;  %8431 = vmatprep.subr.bf16.mxu0 %v21235_v2  ;;  %v21251_v39 = vld [vmem:[#allocation5 + $0x1ec0] ss:$24 sps:$4 sm:$0xff]  }
 0x7bc   :  { %8474 = vmatprep.subr.bf16.mxu1 %v21238_v45  ;;  %v21254_v2 = vld [vmem:[#allocation5 + $0x1ec8] ss:$24 sps:$4 sm:$0xff]   ;;  %v21259_v45 = vld [vmem:[#allocation5 + $0x1e94] ss:$24 sps:$4 sm:$0xff]  }
 0x7c1   :  { %8378 = vmatmul.mubr.bf16.vlgmr.msra.gmra.mxu0 %v21821_v17 }
 0x7c2   :  { %8421 = vmatmul.mubr.bf16.vlgmr.msra.gmra.mxu1 %v21829_v26  ;;  %8432 = vmatpush1.bf16.xpose.msra.mxu0 %v21233_v34  ;;  %v21262_v34 = vld [vmem:[#allocation5 + $0x1e9c] ss:$24 sps:$4 sm:$0xff]  }
 0x7c3   :  { %8475 = vmatpush1.bf16.xpose.msra.mxu1 %v21236_v62  ;;  %8433 = vmatprep.subr.bf16.mxu0 %v21241_v47  ;;  %v21257_v62 = vld [vmem:[#allocation5 + $0x1e90] ss:$24 sps:$4 sm:$0xff]  }
 0x7c4   :  { %8476 = vmatprep.subr.bf16.mxu1 %v21244_v54  ;;  %8463 = vmatprep.mubr.bf16.mxu0 %v21813_v30  ;;  %v21260_v47 = vld [vmem:[#allocation5 + $0x1e98] ss:$24 sps:$4 sm:$0xff]   ;;  %v21265_v54 = vld [vmem:[#allocation5 + $0x1e64] ss:$24 sps:$4 sm:$0xff]  }
 0x7c5   :  { %8506 = vmatprep.mubr.bf16.mxu1 %v21815_v31 }
 0x7ca   :  { %8434 = vmatpush1.bf16.xpose.msra.mxu0 %v21239_v43  ;;  %v21268_v43 = vld [vmem:[#allocation5 + $0x1e6c] ss:$24 sps:$4 sm:$0xff]  }
 0x7cb   :  { %8477 = vmatpush1.bf16.xpose.msra.mxu1 %v21242_v46  ;;  %8435 = vmatprep.subr.bf16.mxu0 %v21247_v42  ;;  %v21263_v46 = vld [vmem:[#allocation5 + $0x1e60] ss:$24 sps:$4 sm:$0xff]  }
 0x7cc   :  { %8478 = vmatprep.subr.bf16.mxu1 %v21250_v18  ;;  %v21266_v42 = vld [vmem:[#allocation5 + $0x1e68] ss:$24 sps:$4 sm:$0xff]   ;;  %v21271_v18 = vld [vmem:[#allocation5 + $0x1e34] ss:$24 sps:$4 sm:$0xff]  }
 0x7d2   :  { %8436 = vmatpush1.bf16.xpose.msra.mxu0 %v21245_v6  ;;  %v21274_v6 = vld [vmem:[#allocation5 + $0x1e3c] ss:$24 sps:$4 sm:$0xff]  }
 0x7d3   :  { %8479 = vmatpush1.bf16.xpose.msra.mxu1 %v21248_v0  ;;  %8437 = vmatprep.subr.bf16.mxu0 %v21253_v61  ;;  %v21269_v0 = vld [vmem:[#allocation5 + $0x1e30] ss:$24 sps:$4 sm:$0xff]  }
 0x7d4   :  { %8480 = vmatprep.subr.bf16.mxu1 %v21256_v37  ;;  %v21272_v61 = vld [vmem:[#allocation5 + $0x1e38] ss:$24 sps:$4 sm:$0xff]   ;;  %v21277_v37 = vld [vmem:[#allocation5 + $0x1e04] ss:$24 sps:$4 sm:$0xff]  }
 0x7da   :  { %8438 = vmatpush1.bf16.xpose.msra.mxu0 %v21251_v39  ;;  %v21280_v39 = vld [vmem:[#allocation5 + $0x1e0c] ss:$24 sps:$4 sm:$0xff]  }
 0x7db   :  { %8481 = vmatpush1.bf16.xpose.msra.mxu1 %v21254_v2  ;;  %8439 = vmatprep.subr.bf16.mxu0 %v21259_v45  ;;  %v21275_v2 = vld [vmem:[#allocation5 + $0x1e00] ss:$24 sps:$4 sm:$0xff]  }
 0x7dc   :  { %8482 = vmatprep.subr.bf16.mxu1 %v21262_v34  ;;  %v21278_v45 = vld [vmem:[#allocation5 + $0x1e08] ss:$24 sps:$4 sm:$0xff]   ;;  %v21283_v34 = vld [vmem:[#allocation5 + $0x20d4] ss:$24 sps:$4 sm:$0xff]  }
 0x7e2   :  { %8440 = vmatpush1.bf16.xpose.msra.mxu0 %v21257_v62  ;;  %v21286_v62 = vld [vmem:[#allocation5 + $0x20dc] ss:$24 sps:$4 sm:$0xff]  }
 0x7e3   :  { %8483 = vmatpush1.bf16.xpose.msra.mxu1 %v21260_v47  ;;  %8441 = vmatprep.subr.bf16.mxu0 %v21265_v54  ;;  %v21281_v47 = vld [vmem:[#allocation5 + $0x20d0] ss:$24 sps:$4 sm:$0xff]  }
 0x7e4   :  { %8484 = vmatprep.subr.bf16.mxu1 %v21268_v43  ;;  %v21284_v54 = vld [vmem:[#allocation5 + $0x20d8] ss:$24 sps:$4 sm:$0xff]   ;;  %v22067_v43 = vpop.f32.mrf.mxu0 }
 0x7e5   :  { %22567 = vst [vmem:[#allocation46_spill] sm:$0xff] %v22067_v43  ;;  %v21311_v43 = vld [vmem:[#allocation5 + $0x1fe0] ss:$24 sps:$4 sm:$0xff]  }
 0x7ea   :  { %8442 = vmatpush1.bf16.xpose.msra.mxu0 %v21263_v46  ;;  %v21289_v46 = vld [vmem:[#allocation5 + $0x20a4] ss:$24 sps:$4 sm:$0xff]  }
 0x7eb   :  { %8485 = vmatpush1.bf16.xpose.msra.mxu1 %v21266_v42  ;;  %8443 = vmatprep.subr.bf16.mxu0 %v21271_v18  ;;  %v21292_v42 = vld [vmem:[#allocation5 + $0x20ac] ss:$24 sps:$4 sm:$0xff]  }
 0x7ec   :  { %8486 = vmatprep.subr.bf16.mxu1 %v21274_v6 }
 0x7f2   :  { %8444 = vmatpush1.bf16.xpose.msra.mxu0 %v21269_v0 }
 0x7f3   :  { %8487 = vmatpush1.bf16.xpose.msra.mxu1 %v21272_v61  ;;  %8445 = vmatprep.subr.bf16.mxu0 %v21277_v37 }
 0x7f4   :  { %8488 = vmatprep.subr.bf16.mxu1 %v21280_v39 }
 0x7fa   :  { %8446 = vmatpush1.bf16.xpose.msra.mxu0 %v21275_v2  ;;  %v21287_v2 = vld [vmem:[#allocation5 + $0x20a0] ss:$24 sps:$4 sm:$0xff]  }
 0x7fb   :  { %8489 = vmatpush1.bf16.xpose.msra.mxu1 %v21278_v45  ;;  %8447 = vmatprep.subr.bf16.mxu0 %v21283_v34  ;;  %v21290_v45 = vld [vmem:[#allocation5 + $0x20a8] ss:$24 sps:$4 sm:$0xff]   ;;  %v21295_v34 = vld [vmem:[#allocation5 + $0x2074] ss:$24 sps:$4 sm:$0xff]  }
 0x7fc   :  { %8490 = vmatprep.subr.bf16.mxu1 %v21286_v62  ;;  %v21298_v62 = vld [vmem:[#allocation5 + $0x207c] ss:$24 sps:$4 sm:$0xff]  }
 0x801   :  { %v8293_v18 = vpop.f32.mrf.mxu0 }
 0x802   :  { %v8294_v6 = vadd.f32 %v8293_v18, %v22059_v44  ;;  %8448 = vmatpush2.bf16.xpose.msra.mxu0 %v21281_v47  ;;  %v21293_v44 = vld [vmem:[#allocation5 + $0x2070] ss:$24 sps:$4 sm:$0xff]   ;;  %v21299_v18 = vld [vmem:[#allocation5 + $0x2040] ss:$24 sps:$4 sm:$0xff]  }
 0x803   :  { %8491 = vmatpush2.bf16.xpose.msra.mxu1 %v21284_v54  ;;  %v22070_v0 = vpop.f32.mrf.mxu0  ;;  %8449 = vmatprep.subr.bf16.mxu0 %v21289_v46  ;;  %v21296_v47 = vld [vmem:[#allocation5 + $0x2078] ss:$24 sps:$4 sm:$0xff]   ;;  %v21301_v54 = vld [vmem:[#allocation5 + $0x2044] ss:$24 sps:$4 sm:$0xff]  }
 0x804   :  { %22568 = vst [vmem:[#allocation47_spill] sm:$0xff] %v22070_v0  ;;  %8492 = vmatprep.subr.bf16.mxu1 %v21292_v42  ;;  %v8754_v61 = vmul.f32 0.70710677, %v8294_v6  ;;  %v21304_v46 = vld [vmem:[#allocation5 + $0x204c] ss:$24 sps:$4 sm:$0xff]  }
 0x805   :  { %v8297_v37 = vpop.f32.mrf.mxu0  ;;  %v21307_v0 = vld [vmem:[#allocation5 + $0x2014] ss:$24 sps:$4 sm:$0xff]  }
 0x806   :  { %21553 = verf.f32 %v8754_v61  ;;  %v8298_v39 = vadd.f32 %v8297_v37, %v22061_v56  ;;  %v21302_v61 = vld [vmem:[#allocation5 + $0x2048] ss:$24 sps:$4 sm:$0xff]  }
 0x808   :  { %v8778_v25 = vmul.f32 0.70710677, %v8298_v39 }
 0x80a   :  { %21555 = verf.f32 %v8778_v25  ;;  %8450 = vmatpush2.bf16.xpose.msra.mxu0 %v21287_v2  ;;  %v8705_v25 = vmul.f32 0.5, %v8294_v6  ;;  %v8729_v2 = vmul.f32 0.5, %v8298_v39  ;;  %v21314_v6 = vld [vmem:[#allocation5 + $0x1fe8] ss:$24 sps:$4 sm:$0xff]   ;;  %v21319_v39 = vld [vmem:[#allocation5 + $0x1fb4] ss:$24 sps:$4 sm:$0xff]  }
 0x80b   :  { %8493 = vmatpush2.bf16.xpose.msra.mxu1 %v21290_v45  ;;  %8451 = vmatprep.subr.bf16.mxu0 %v21295_v34 }
 0x80c   :  { %8494 = vmatprep.subr.bf16.mxu1 %v21298_v62 }
 0x812   :  { %8452 = vmatpush2.bf16.xpose.msra.mxu0 %v21293_v44 }
 0x813   :  { %8495 = vmatpush2.bf16.xpose.msra.mxu1 %v21296_v47  ;;  %v21554_v42 = vpop.eup %21553  ;;  %8453 = vmatprep.subr.bf16.mxu0 %v21301_v54  ;;  %v21305_v47 = vld [vmem:[#allocation5 + $0x2010] ss:$24 sps:$4 sm:$0xff]  }
 0x814   :  { %8496 = vmatprep.subr.bf16.mxu1 %v21304_v46  ;;  %v8850_v56 = vadd.f32 1.0, %v21554_v42  ;;  %v21308_v54 = vld [vmem:[#allocation5 + $0x2018] ss:$24 sps:$4 sm:$0xff]   ;;  %v21313_v46 = vld [vmem:[#allocation5 + $0x1fe4] ss:$24 sps:$4 sm:$0xff]  }
 0x815   :  { %v21316_v42 = vld [vmem:[#allocation5 + $0x1fec] ss:$24 sps:$4 sm:$0xff]  }
 0x816   :  { %v8898_v34 = vmul.f32 %v8850_v56, %v8705_v25  ;;  %v21325_v56 = vld [vmem:[#allocation5 + $0x1f84] ss:$24 sps:$4 sm:$0xff]   ;;  %v21326_v25 = vld [vmem:[#allocation5 + $0x1f88] ss:$24 sps:$4 sm:$0xff]  }
 0x817   :  { %v21556_v37 = vpop.eup %21555 }
 0x818   :  { %v8874_v45 = vadd.f32 1.0, %v21556_v37  ;;  %v21322_v37 = vld [vmem:[#allocation5 + $0x1fbc] ss:$24 sps:$4 sm:$0xff]  }
 0x81a   :  { %v8922_v62 = vmul.f32 %v8874_v45, %v8729_v2  ;;  %8454 = vmatpush2.bf16.xpose.msra.mxu0 %v21299_v18  ;;  %v21328_v18 = vld [vmem:[#allocation5 + $0x1f8c] ss:$24 sps:$4 sm:$0xff]  }
 0x81b   :  { %8497 = vmatpush2.bf16.xpose.msra.mxu1 %v21302_v61  ;;  %8455 = vmatprep.subr.bf16.mxu0 %v21307_v0  ;;  %v21317_v0 = vld [vmem:[#allocation5 + $0x1fb0] ss:$24 sps:$4 sm:$0xff]   ;;  %v21323_v61 = vld [vmem:[#allocation5 + $0x1f80] ss:$24 sps:$4 sm:$0xff]   ;;  %v21331_v2 = vld [vmem:[#allocation5 + $0x1f64] ss:$24 sps:$4 sm:$0xff]  }
 0x81c   :  { %8498 = vmatprep.subr.bf16.mxu1 %v21310_v63  ;;  %v22073_v44 = vpack.c.bf16 %v8922_v62, %v8898_v34  ;;  %v21320_v63 = vld [vmem:[#allocation5 + $0x1fb8] ss:$24 sps:$4 sm:$0xff]   ;;  %v21334_v45 = vld [vmem:[#allocation5 + $0x2254] ss:$24 sps:$4 sm:$0xff]  }
 0x81d   :  { %v21332_v34 = vld [vmem:[#allocation5 + $0x2250] ss:$24 sps:$4 sm:$0xff]   ;;  %v21337_v62 = vld [vmem:[#allocation5 + $0x1f34] ss:$24 sps:$4 sm:$0xff]  }
 0x81e   :  { %22569 = vst [vmem:[#allocation48_spill] sm:$0xff] %v22073_v44 }
 0x822   :  { %8456 = vmatpush2.bf16.xpose.msra.mxu0 %v21305_v47  ;;  %v21340_v47 = vld [vmem:[#allocation5 + $0x2224] ss:$24 sps:$4 sm:$0xff]  }
 0x823   :  { %8499 = vmatpush2.bf16.xpose.msra.mxu1 %v21308_v54  ;;  %8457 = vmatprep.subr.bf16.mxu0 %v21313_v46  ;;  %v21335_v54 = vld [vmem:[#allocation5 + $0x1f30] ss:$24 sps:$4 sm:$0xff]   ;;  %v21338_v46 = vld [vmem:[#allocation5 + $0x2220] ss:$24 sps:$4 sm:$0xff]  }
 0x824   :  { %8500 = vmatprep.subr.bf16.mxu1 %v21316_v42  ;;  %v21343_v42 = vld [vmem:[#allocation5 + $0x1f04] ss:$24 sps:$4 sm:$0xff]  }
 0x82a   :  { %8458 = vmatpush2.bf16.xpose.msra.mxu0 %v21311_v43  ;;  %v21329_v43 = vld [vmem:[#allocation5 + $0x1f60] ss:$24 sps:$4 sm:$0xff]  }
 0x82b   :  { %8501 = vmatpush2.bf16.xpose.msra.mxu1 %v21314_v6  ;;  %8459 = vmatprep.subr.bf16.mxu0 %v21319_v39  ;;  %v21346_v6 = vld [vmem:[#allocation5 + $0x21f4] ss:$24 sps:$4 sm:$0xff]   ;;  %v21341_v39 = vld [vmem:[#allocation5 + $0x1f00] ss:$24 sps:$4 sm:$0xff]  }
 0x82c   :  { %8502 = vmatprep.subr.bf16.mxu1 %v21322_v37  ;;  %v21344_v37 = vld [vmem:[#allocation5 + $0x21f0] ss:$24 sps:$4 sm:$0xff]  }
 0x832   :  { %8460 = vmatpush2.bf16.xpose.msra.mxu0 %v21317_v0  ;;  %v21349_v0 = vld [vmem:[#allocation5 + $0x1ed4] ss:$24 sps:$4 sm:$0xff]  }
 0x833   :  { %8503 = vmatpush2.bf16.xpose.msra.mxu1 %v21320_v63  ;;  %8461 = vmatprep.subr.bf16.mxu0 %v21325_v56  ;;  %v21352_v63 = vld [vmem:[#allocation5 + $0x21c4] ss:$24 sps:$4 sm:$0xff]   ;;  %v21347_v56 = vld [vmem:[#allocation5 + $0x1ed0] ss:$24 sps:$4 sm:$0xff]  }
 0x834   :  { %8504 = vmatprep.subr.bf16.mxu1 %v21328_v18  ;;  %v21350_v18 = vld [vmem:[#allocation5 + $0x21c0] ss:$24 sps:$4 sm:$0xff]  }
 0x83a   :  { %8462 = vmatpush2.bf16.xpose.msra.mxu0 %v21323_v61  ;;  %v21355_v61 = vld [vmem:[#allocation5 + $0x1ea4] ss:$24 sps:$4 sm:$0xff]  }
 0x83b   :  { %8505 = vmatpush2.bf16.xpose.msra.mxu1 %v21326_v25  ;;  %8517 = vmatprep.subr.bf16.mxu0 %v21331_v2  ;;  %v21353_v25 = vld [vmem:[#allocation5 + $0x1ea0] ss:$24 sps:$4 sm:$0xff]   ;;  %v21356_v2 = vld [vmem:[#allocation5 + $0x2190] ss:$24 sps:$4 sm:$0xff]  }
 0x83c   :  { %8560 = vmatprep.subr.bf16.mxu1 %v21334_v45  ;;  %v21361_v45 = vld [vmem:[#allocation5 + $0x1e74] ss:$24 sps:$4 sm:$0xff]  }
 0x841   :  { %8464 = vmatmul.mubr.bf16.vlgmr.msra.gmra.mxu0 %v21819_v16 }
 0x842   :  { %8507 = vmatmul.mubr.bf16.vlgmr.msra.gmra.mxu1 %v21821_v17  ;;  %8518 = vmatpush1.bf16.xpose.msra.mxu0 %v21329_v43  ;;  %v21364_v43 = vld [vmem:[#allocation5 + $0x2164] ss:$24 sps:$4 sm:$0xff]  }
 0x843   :  { %8561 = vmatpush1.bf16.xpose.msra.mxu1 %v21332_v34  ;;  %8519 = vmatprep.subr.bf16.mxu0 %v21337_v62  ;;  %v21359_v34 = vld [vmem:[#allocation5 + $0x1e70] ss:$24 sps:$4 sm:$0xff]   ;;  %v21362_v62 = vld [vmem:[#allocation5 + $0x2160] ss:$24 sps:$4 sm:$0xff]  }
 0x844   :  { %8562 = vmatprep.subr.bf16.mxu1 %v21340_v47  ;;  %8549 = vmatprep.mubr.bf16.mxu0 %v21823_v20  ;;  %v21367_v47 = vld [vmem:[#allocation5 + $0x1e44] ss:$24 sps:$4 sm:$0xff]  }
 0x845   :  { %8592 = vmatprep.mubr.bf16.mxu1 %v21813_v30  ;;  %v21358_v30 = vld [vmem:[#allocation5 + $0x2194] ss:$24 sps:$4 sm:$0xff]  }
 0x84a   :  { %8520 = vmatpush1.bf16.xpose.msra.mxu0 %v21335_v54  ;;  %v21370_v54 = vld [vmem:[#allocation5 + $0x2134] ss:$24 sps:$4 sm:$0xff]  }
 0x84b   :  { %8563 = vmatpush1.bf16.xpose.msra.mxu1 %v21338_v46  ;;  %8521 = vmatprep.subr.bf16.mxu0 %v21343_v42  ;;  %v21365_v46 = vld [vmem:[#allocation5 + $0x1e40] ss:$24 sps:$4 sm:$0xff]   ;;  %v21368_v42 = vld [vmem:[#allocation5 + $0x2130] ss:$24 sps:$4 sm:$0xff]  }
 0x84c   :  { %8564 = vmatprep.subr.bf16.mxu1 %v21346_v6  ;;  %v21373_v6 = vld [vmem:[#allocation5 + $0x1e14] ss:$24 sps:$4 sm:$0xff]  }
 0x852   :  { %8522 = vmatpush1.bf16.xpose.msra.mxu0 %v21341_v39  ;;  %v21376_v39 = vld [vmem:[#allocation5 + $0x2104] ss:$24 sps:$4 sm:$0xff]  }
 0x853   :  { %8565 = vmatpush1.bf16.xpose.msra.mxu1 %v21344_v37  ;;  %8523 = vmatprep.subr.bf16.mxu0 %v21349_v0  ;;  %v22079_v37 = vpop.f32.mrf.mxu1 }
 0x854   :  { %8566 = vmatprep.subr.bf16.mxu1 %v21352_v63  ;;  %22570 = vst [vmem:[#allocation49_spill] sm:$0xff] %v22079_v37  ;;  %v21371_v63 = vld [vmem:[#allocation5 + $0x1e10] ss:$24 sps:$4 sm:$0xff]  }
 0x855   :  { %v8336_v0 = vpop.f32.mrf.mxu1  ;;  %v21383_v37 = vld [vmem:[#allocation5 + $0x20b0] ss:$24 sps:$4 sm:$0xff]  }
 0x85a   :  { %8524 = vmatpush1.bf16.xpose.msra.mxu0 %v21347_v56  ;;  %v21374_v56 = vld [vmem:[#allocation5 + $0x2100] ss:$24 sps:$4 sm:$0xff]  }
 0x85b   :  { %8567 = vmatpush1.bf16.xpose.msra.mxu1 %v21350_v18  ;;  %8525 = vmatprep.subr.bf16.mxu0 %v21355_v61  ;;  %v22081_v18 = vpop.f32.mrf.mxu1  ;;  %v21379_v61 = vld [vmem:[#allocation5 + $0x20e4] ss:$24 sps:$4 sm:$0xff]  }
 0x85c   :  { %8568 = vmatprep.subr.bf16.mxu1 %v21358_v30  ;;  %22571 = vst [vmem:[#allocation50_spill] sm:$0xff] %v22081_v18  ;;  %v21382_v30 = vld [vmem:[#allocation5 + $0x23d4] ss:$24 sps:$4 sm:$0xff]   ;;  %v21386_v18 = vld [vmem:[#allocation5 + $0x23a0] ss:$24 sps:$4 sm:$0xff]  }
 0x862   :  { %8526 = vmatpush1.bf16.xpose.msra.mxu0 %v21353_v25  ;;  %v8340_v25 = vpop.f32.mrf.mxu1 }
 0x863   :  { %8569 = vmatpush1.bf16.xpose.msra.mxu1 %v21356_v2  ;;  %8527 = vmatprep.subr.bf16.mxu0 %v21361_v45  ;;  %v1336_v2 = vrot.slane %v22047_v41, %v21870_v59  ;;  %v21377_v45 = vld [vmem:[#allocation5 + $0x20e0] ss:$24 sps:$4 sm:$0xff]  }
 0x864   :  { %8570 = vmatprep.subr.bf16.mxu1 %v21364_v43  ;;  %v21380_v43 = vld [vmem:[#allocation5 + $0x23d0] ss:$24 sps:$4 sm:$0xff]  }
 0x86a   :  { %8528 = vmatpush1.bf16.xpose.msra.mxu0 %v21359_v34  ;;  %v22085_v34 = vpop.f32.mrf.mxu0 }
 0x86b   :  { %8571 = vmatpush1.bf16.xpose.msra.mxu1 %v21362_v62  ;;  %8529 = vmatprep.subr.bf16.mxu0 %v21367_v47  ;;  %22572 = vst [vmem:[#allocation51_spill] sm:$0xff] %v22085_v34  ;;  %v22087_v62 = vpop.f32.mrf.mxu1  ;;  %v21385_v47 = vld [vmem:[#allocation5 + $0x20b4] ss:$24 sps:$4 sm:$0xff]  }
 0x86c   :  { %8572 = vmatprep.subr.bf16.mxu1 %v21370_v54  ;;  %22573 = vst [vmem:[#allocation52_spill] sm:$0xff] %v22087_v62  ;;  %v21388_v54 = vld [vmem:[#allocation5 + $0x23a4] ss:$24 sps:$4 sm:$0xff]  }
 0x872   :  { %8530 = vmatpush1.bf16.xpose.msra.mxu0 %v21365_v46  ;;  %v8337_v46 = vadd.f32 %v8336_v0, %v1336_v2  ;;  %v21391_v0 = vld [vmem:[#allocation5 + $0x2084] ss:$24 sps:$4 sm:$0xff]  }
 0x873   :  { %8573 = vmatpush1.bf16.xpose.msra.mxu1 %v21368_v42  ;;  %8531 = vmatprep.subr.bf16.mxu0 %v21373_v6 }
 0x874   :  { %8574 = vmatprep.subr.bf16.mxu1 %v21376_v39 }
 0x87a   :  { %8532 = vmatpush1.bf16.xpose.msra.mxu0 %v21371_v63 }
 0x87b   :  { %8575 = vmatpush1.bf16.xpose.msra.mxu1 %v21374_v56  ;;  %8533 = vmatprep.subr.bf16.mxu0 %v21379_v61  ;;  %v8341_v61 = vadd.f32 %v8340_v25, %v1336_v2  ;;  %v21397_v25 = vld [vmem:[#allocation5 + $0x2054] ss:$24 sps:$4 sm:$0xff]   ;;  %v21400_v2 = vld [vmem:[#allocation5 + $0x2344] ss:$24 sps:$4 sm:$0xff]  }
 0x87c   :  { %8576 = vmatprep.subr.bf16.mxu1 %v21382_v30 }
 0x881   :  { %v8379_v42 = vpop.f32.mrf.mxu0 }
 0x882   :  { %v8422_v6 = vpop.f32.mrf.mxu1  ;;  %v8380_v39 = vadd.f32 %v8379_v42, %v8337_v46  ;;  %8534 = vmatpush2.bf16.xpose.msra.mxu0 %v21377_v45  ;;  %v21398_v42 = vld [vmem:[#allocation5 + $0x2340] ss:$24 sps:$4 sm:$0xff]  }
 0x883   :  { %8577 = vmatpush2.bf16.xpose.msra.mxu1 %v21380_v43  ;;  %v22089_v63 = vpop.f32.mrf.mxu0  ;;  %8535 = vmatprep.subr.bf16.mxu0 %v21385_v47  ;;  %v21389_v43 = vld [vmem:[#allocation5 + $0x2080] ss:$24 sps:$4 sm:$0xff]   ;;  %v21392_v47 = vld [vmem:[#allocation5 + $0x2370] ss:$24 sps:$4 sm:$0xff]  }
 0x884   :  { %v22091_v56 = vpop.f32.mrf.mxu1  ;;  %8578 = vmatprep.subr.bf16.mxu1 %v21388_v54  ;;  %v8423_v30 = vadd.f32 %v8422_v6, %v8380_v39  ;;  %v21395_v54 = vld [vmem:[#allocation5 + $0x2050] ss:$24 sps:$4 sm:$0xff]   ;;  %v21403_v6 = vld [vmem:[#allocation5 + $0x2024] ss:$24 sps:$4 sm:$0xff]  }
 0x885   :  { %22574 = vst [vmem:[#allocation53_spill] sm:$0xff] %v22091_v56  ;;  %v8383_v59 = vpop.f32.mrf.mxu0 }
 0x886   :  { %v8756_v44 = vmul.f32 0.70710677, %v8423_v30  ;;  %v8384_v34 = vadd.f32 %v8383_v59, %v8341_v61  ;;  %v8426_v62 = vpop.f32.mrf.mxu1 }
 0x888   :  { %21557 = verf.f32 %v8756_v44  ;;  %v8427_v46 = vadd.f32 %v8426_v62, %v8384_v34  ;;  %v21406_v44 = vld [vmem:[#allocation5 + $0x2314] ss:$24 sps:$4 sm:$0xff]  }
 0x88a   :  { %v8780_v45 = vmul.f32 0.70710677, %v8427_v46  ;;  %8536 = vmatpush2.bf16.xpose.msra.mxu0 %v21383_v37  ;;  %v8707_v37 = vmul.f32 0.5, %v8423_v30  ;;  %v21410_v30 = vld [vmem:[#allocation5 + $0x22e0] ss:$24 sps:$4 sm:$0xff]  }
 0x88b   :  { %8579 = vmatpush2.bf16.xpose.msra.mxu1 %v21386_v18  ;;  %8537 = vmatprep.subr.bf16.mxu0 %v21391_v0  ;;  %v8731_v18 = vmul.f32 0.5, %v8427_v46  ;;  %v21415_v46 = vld [vmem:[#allocation5 + $0x1fc4] ss:$24 sps:$4 sm:$0xff]  }
 0x88c   :  { %8580 = vmatprep.subr.bf16.mxu1 %v21394_v22  ;;  %21559 = verf.f32 %v8780_v45  ;;  %v21401_v45 = vld [vmem:[#allocation5 + $0x2020] ss:$24 sps:$4 sm:$0xff]  }
 0x892   :  { %8538 = vmatpush2.bf16.xpose.msra.mxu0 %v21389_v43  ;;  %v21404_v43 = vld [vmem:[#allocation5 + $0x2310] ss:$24 sps:$4 sm:$0xff]  }
 0x893   :  { %8581 = vmatpush2.bf16.xpose.msra.mxu1 %v21392_v47  ;;  %8539 = vmatprep.subr.bf16.mxu0 %v21397_v25  ;;  %v21409_v47 = vld [vmem:[#allocation5 + $0x1ff4] ss:$24 sps:$4 sm:$0xff]   ;;  %v21412_v25 = vld [vmem:[#allocation5 + $0x22e4] ss:$24 sps:$4 sm:$0xff]  }
 0x894   :  { %8582 = vmatprep.subr.bf16.mxu1 %v21400_v2  ;;  %v21407_v2 = vld [vmem:[#allocation5 + $0x1ff0] ss:$24 sps:$4 sm:$0xff]  }
 0x895   :  { %v21558_v59 = vpop.eup %21557 }
 0x896   :  { %v8852_v34 = vadd.f32 1.0, %v21558_v59  ;;  %v21418_v59 = vld [vmem:[#allocation5 + $0x22b4] ss:$24 sps:$4 sm:$0xff]  }
 0x898   :  { %v8900_v22 = vmul.f32 %v8852_v34, %v8707_v37  ;;  %v21419_v34 = vld [vmem:[#allocation5 + $0x1f90] ss:$24 sps:$4 sm:$0xff]   ;;  %v21427_v37 = vld [vmem:[#allocation5 + $0x225c] ss:$24 sps:$4 sm:$0xff]  }
 0x899   :  { %v21560_v62 = vpop.eup %21559 }
 0x89a   :  { %v8876_v39 = vadd.f32 1.0, %v21560_v62  ;;  %8540 = vmatpush2.bf16.xpose.msra.mxu0 %v21395_v54  ;;  %v21413_v54 = vld [vmem:[#allocation5 + $0x1fc0] ss:$24 sps:$4 sm:$0xff]  }
 0x89b   :  { %8583 = vmatpush2.bf16.xpose.msra.mxu1 %v21398_v42  ;;  %8541 = vmatprep.subr.bf16.mxu0 %v21403_v6  ;;  %v21416_v42 = vld [vmem:[#allocation5 + $0x22b0] ss:$24 sps:$4 sm:$0xff]   ;;  %v21421_v6 = vld [vmem:[#allocation5 + $0x1f94] ss:$24 sps:$4 sm:$0xff]   ;;  %v21422_v62 = vld [vmem:[#allocation5 + $0x2280] ss:$24 sps:$4 sm:$0xff]  }
 0x89c   :  { %8584 = vmatprep.subr.bf16.mxu1 %v21406_v44  ;;  %v8924_v61 = vmul.f32 %v8876_v39, %v8731_v18  ;;  %v21424_v44 = vld [vmem:[#allocation5 + $0x2284] ss:$24 sps:$4 sm:$0xff]   ;;  %v21425_v39 = vld [vmem:[#allocation5 + $0x2258] ss:$24 sps:$4 sm:$0xff]  }
 0x89d   :  { %v21430_v18 = vld [vmem:[#allocation5 + $0x2264] ss:$24 sps:$4 sm:$0xff]  }
 0x89e   :  { %v22093_v0 = vpack.c.bf16 %v8924_v61, %v8900_v22  ;;  %v21428_v22 = vld [vmem:[#allocation5 + $0x2260] ss:$24 sps:$4 sm:$0xff]   ;;  %v21433_v61 = vld [vmem:[#allocation5 + $0x222c] ss:$24 sps:$4 sm:$0xff]  }
 0x8a0   :  { %22575 = vst [vmem:[#allocation54_spill] sm:$0xff] %v22093_v0  ;;  %v21505_v0 = vld [vmem:[#allocation5 + $0x22ec] ss:$24 sps:$4 sm:$0xff]  }
 0x8a2   :  { %8542 = vmatpush2.bf16.xpose.msra.mxu0 %v21401_v45  ;;  %v21436_v45 = vld [vmem:[#allocation5 + $0x2234] ss:$24 sps:$4 sm:$0xff]  }
 0x8a3   :  { %8585 = vmatpush2.bf16.xpose.msra.mxu1 %v21404_v43  ;;  %8543 = vmatprep.subr.bf16.mxu0 %v21409_v47  ;;  %v21431_v43 = vld [vmem:[#allocation5 + $0x2228] ss:$24 sps:$4 sm:$0xff]  }
 0x8a4   :  { %8586 = vmatprep.subr.bf16.mxu1 %v21412_v25  ;;  %v21434_v47 = vld [vmem:[#allocation5 + $0x2230] ss:$24 sps:$4 sm:$0xff]   ;;  %v21439_v25 = vld [vmem:[#allocation5 + $0x21fc] ss:$24 sps:$4 sm:$0xff]  }
 0x8aa   :  { %8544 = vmatpush2.bf16.xpose.msra.mxu0 %v21407_v2  ;;  %v21442_v2 = vld [vmem:[#allocation5 + $0x2204] ss:$24 sps:$4 sm:$0xff]  }
 0x8ab   :  { %8587 = vmatpush2.bf16.xpose.msra.mxu1 %v21410_v30  ;;  %8545 = vmatprep.subr.bf16.mxu0 %v21415_v46  ;;  %v21437_v30 = vld [vmem:[#allocation5 + $0x21f8] ss:$24 sps:$4 sm:$0xff]  }
 0x8ac   :  { %8588 = vmatprep.subr.bf16.mxu1 %v21418_v59  ;;  %v21440_v46 = vld [vmem:[#allocation5 + $0x2200] ss:$24 sps:$4 sm:$0xff]   ;;  %v21445_v59 = vld [vmem:[#allocation5 + $0x21cc] ss:$24 sps:$4 sm:$0xff]  }
 0x8b2   :  { %8546 = vmatpush2.bf16.xpose.msra.mxu0 %v21413_v54  ;;  %v21443_v54 = vld [vmem:[#allocation5 + $0x21c8] ss:$24 sps:$4 sm:$0xff]  }
 0x8b3   :  { %8589 = vmatpush2.bf16.xpose.msra.mxu1 %v21416_v42  ;;  %8547 = vmatprep.subr.bf16.mxu0 %v21421_v6  ;;  %v21451_v42 = vld [vmem:[#allocation5 + $0x219c] ss:$24 sps:$4 sm:$0xff]   ;;  %v21449_v6 = vld [vmem:[#allocation5 + $0x2198] ss:$24 sps:$4 sm:$0xff]  }
 0x8b4   :  { %8590 = vmatprep.subr.bf16.mxu1 %v21424_v44  ;;  %v21452_v44 = vld [vmem:[#allocation5 + $0x21a0] ss:$24 sps:$4 sm:$0xff]  }
 0x8ba   :  { %8548 = vmatpush2.bf16.xpose.msra.mxu0 %v21419_v34  ;;  %v21457_v34 = vld [vmem:[#allocation5 + $0x216c] ss:$24 sps:$4 sm:$0xff]  }
 0x8bb   :  { %8591 = vmatpush2.bf16.xpose.msra.mxu1 %v21422_v62  ;;  %8603 = vmatprep.subr.bf16.mxu0 %v21427_v37  ;;  %v21460_v62 = vld [vmem:[#allocation5 + $0x2174] ss:$24 sps:$4 sm:$0xff]   ;;  %v21455_v37 = vld [vmem:[#allocation5 + $0x2168] ss:$24 sps:$4 sm:$0xff]  }
 0x8bc   :  { %8646 = vmatprep.subr.bf16.mxu1 %v21430_v18  ;;  %v21458_v18 = vld [vmem:[#allocation5 + $0x2170] ss:$24 sps:$4 sm:$0xff]  }
 0x8c1   :  { %8550 = vmatmul.mubr.bf16.vlgmr.msra.gmra.mxu0 %v21829_v26 }
 0x8c2   :  { %8593 = vmatmul.mubr.bf16.vlgmr.msra.gmra.mxu1 %v21819_v16  ;;  %8604 = vmatpush1.bf16.xpose.msra.mxu0 %v21425_v39  ;;  %v21448_v16 = vld [vmem:[#allocation5 + $0x21d4] ss:$24 sps:$4 sm:$0xff]  }
 0x8c3   :  { %8647 = vmatpush1.bf16.xpose.msra.mxu1 %v21428_v22  ;;  %8605 = vmatprep.subr.bf16.mxu0 %v21433_v61  ;;  %v21463_v39 = vld [vmem:[#allocation5 + $0x213c] ss:$24 sps:$4 sm:$0xff]   ;;  %v21461_v61 = vld [vmem:[#allocation5 + $0x2138] ss:$24 sps:$4 sm:$0xff]  }
 0x8c4   :  { %8648 = vmatprep.subr.bf16.mxu1 %v21436_v45  ;;  %8635 = vmatprep.mubr.bf16.mxu0 %v21815_v31  ;;  %v21446_v31 = vld [vmem:[#allocation5 + $0x21d0] ss:$24 sps:$4 sm:$0xff]   ;;  %v21466_v22 = vld [vmem:[#allocation5 + $0x2144] ss:$24 sps:$4 sm:$0xff]   ;;  %v21464_v45 = vld [vmem:[#allocation5 + $0x2140] ss:$24 sps:$4 sm:$0xff]  }
 0x8c5   :  { %8678 = vmatprep.mubr.bf16.mxu1 %v21823_v20  ;;  %v21454_v20 = vld [vmem:[#allocation5 + $0x21a4] ss:$24 sps:$4 sm:$0xff]  }
 0x8ca   :  { %8606 = vmatpush1.bf16.xpose.msra.mxu0 %v21431_v43  ;;  %v21469_v43 = vld [vmem:[#allocation5 + $0x210c] ss:$24 sps:$4 sm:$0xff]  }
 0x8cb   :  { %8649 = vmatpush1.bf16.xpose.msra.mxu1 %v21434_v47  ;;  %8607 = vmatprep.subr.bf16.mxu0 %v21439_v25  ;;  %v21472_v47 = vld [vmem:[#allocation5 + $0x2114] ss:$24 sps:$4 sm:$0xff]   ;;  %v21467_v25 = vld [vmem:[#allocation5 + $0x2108] ss:$24 sps:$4 sm:$0xff]  }
 0x8cc   :  { %8650 = vmatprep.subr.bf16.mxu1 %v21442_v2  ;;  %v21470_v2 = vld [vmem:[#allocation5 + $0x2110] ss:$24 sps:$4 sm:$0xff]  }
 0x8d2   :  { %8608 = vmatpush1.bf16.xpose.msra.mxu0 %v21437_v30  ;;  %v21475_v30 = vld [vmem:[#allocation5 + $0x23dc] ss:$24 sps:$4 sm:$0xff]  }
 0x8d3   :  { %8651 = vmatpush1.bf16.xpose.msra.mxu1 %v21440_v46  ;;  %8609 = vmatprep.subr.bf16.mxu0 %v21445_v59  ;;  %v21478_v46 = vld [vmem:[#allocation5 + $0x23e4] ss:$24 sps:$4 sm:$0xff]   ;;  %v1344_v59 = vrot.slane %v22047_v41, %v21891_v1 }
 0x8d4   :  { %8652 = vmatprep.subr.bf16.mxu1 %v21448_v16  ;;  %v21473_v16 = vld [vmem:[#allocation5 + $0x23d8] ss:$24 sps:$4 sm:$0xff]  }
 0x8da   :  { %8610 = vmatpush1.bf16.xpose.msra.mxu0 %v21443_v54  ;;  %v21476_v54 = vld [vmem:[#allocation5 + $0x23e0] ss:$24 sps:$4 sm:$0xff]  }
 0x8db   :  { %8653 = vmatpush1.bf16.xpose.msra.mxu1 %v21446_v31  ;;  %8611 = vmatprep.subr.bf16.mxu0 %v21451_v42  ;;  %v22101_v31 = vpop.f32.mrf.mxu0  ;;  %v22103_v42 = vpop.f32.mrf.mxu1 }
 0x8dc   :  { %8654 = vmatprep.subr.bf16.mxu1 %v21454_v20  ;;  %22576 = vst [vmem:[#allocation55_spill] sm:$0xff] %v22103_v42  ;;  %v21481_v20 = vld [vmem:[#allocation5 + $0x23ac] ss:$24 sps:$4 sm:$0xff]  }
 0x8e2   :  { %8612 = vmatpush1.bf16.xpose.msra.mxu0 %v21449_v6  ;;  %v21484_v6 = vld [vmem:[#allocation5 + $0x23b4] ss:$24 sps:$4 sm:$0xff]  }
 0x8e3   :  { %8655 = vmatpush1.bf16.xpose.msra.mxu1 %v21452_v44  ;;  %8613 = vmatprep.subr.bf16.mxu0 %v21457_v34 }
 0x8e4   :  { %8656 = vmatprep.subr.bf16.mxu1 %v21460_v62 }
 0x8ea   :  { %8614 = vmatpush1.bf16.xpose.msra.mxu0 %v21455_v37 }
 0x8eb   :  { %8657 = vmatpush1.bf16.xpose.msra.mxu1 %v21458_v18  ;;  %8615 = vmatprep.subr.bf16.mxu0 %v21463_v39 }
 0x8ec   :  { %8658 = vmatprep.subr.bf16.mxu1 %v21466_v22 }
 0x8f2   :  { %8616 = vmatpush1.bf16.xpose.msra.mxu0 %v21461_v61  ;;  %v21479_v61 = vld [vmem:[#allocation5 + $0x23a8] ss:$24 sps:$4 sm:$0xff]  }
 0x8f3   :  { %8659 = vmatpush1.bf16.xpose.msra.mxu1 %v21464_v45  ;;  %8617 = vmatprep.subr.bf16.mxu0 %v21469_v43  ;;  %v21482_v45 = vld [vmem:[#allocation5 + $0x23b0] ss:$24 sps:$4 sm:$0xff]  }
 0x8f4   :  { %8660 = vmatprep.subr.bf16.mxu1 %v21472_v47  ;;  %v21487_v47 = vld [vmem:[#allocation5 + $0x237c] ss:$24 sps:$4 sm:$0xff]  }
 0x8fa   :  { %8618 = vmatpush1.bf16.xpose.msra.mxu0 %v21467_v25  ;;  %v21490_v25 = vld [vmem:[#allocation5 + $0x2384] ss:$24 sps:$4 sm:$0xff]  }
 0x8fb   :  { %8661 = vmatpush1.bf16.xpose.msra.mxu1 %v21470_v2  ;;  %8619 = vmatprep.subr.bf16.mxu0 %v21475_v30  ;;  %v21485_v30 = vld [vmem:[#allocation5 + $0x2378] ss:$24 sps:$4 sm:$0xff]  }
 0x8fc   :  { %8662 = vmatprep.subr.bf16.mxu1 %v21478_v46  ;;  %v21488_v46 = vld [vmem:[#allocation5 + $0x2380] ss:$24 sps:$4 sm:$0xff]  }
 0x901   :  { %v8465_v44 = vpop.f32.mrf.mxu0 }
 0x902   :  { %v8508_v34 = vpop.f32.mrf.mxu1  ;;  %v8466_v62 = vadd.f32 %v8465_v44, %v1344_v59  ;;  %8620 = vmatpush2.bf16.xpose.msra.mxu0 %v21473_v16  ;;  %v21493_v16 = vld [vmem:[#allocation5 + $0x234c] ss:$24 sps:$4 sm:$0xff]   ;;  %v21494_v44 = vld [vmem:[#allocation5 + $0x2350] ss:$24 sps:$4 sm:$0xff]  }
 0x903   :  { %8663 = vmatpush2.bf16.xpose.msra.mxu1 %v21476_v54  ;;  %v22105_v37 = vpop.f32.mrf.mxu0  ;;  %8621 = vmatprep.subr.bf16.mxu0 %v21481_v20  ;;  %v21496_v54 = vld [vmem:[#allocation5 + $0x2354] ss:$24 sps:$4 sm:$0xff]   ;;  %v22117_v20 = vsub.s32 3, %v21835_v60 }
 0x904   :  { %22577 = vst [vmem:[#allocation56_spill] sm:$0xff] %v22105_v37  ;;  %v22107_v18 = vpop.f32.mrf.mxu1  ;;  %8664 = vmatprep.subr.bf16.mxu1 %v21484_v6  ;;  %v22109_v41 = vadd.f32 %v8508_v34, %v8466_v62  ;;  %v21491_v6 = vld [vmem:[#allocation5 + $0x2348] ss:$24 sps:$4 sm:$0xff]   ;;  %v21499_v34 = vld [vmem:[#allocation5 + $0x231c] ss:$24 sps:$4 sm:$0xff]  }
 0x905   :  { %22578 = vst [vmem:[#allocation57_spill] sm:$0xff] %v22107_v18  ;;  %v8469_v39 = vpop.f32.mrf.mxu0  ;;  %22579 = vst [vmem:[#allocation58_spill] sm:$0xff] %v22117_v20  ;;  %v21502_v62 = vld [vmem:[#allocation5 + $0x2324] ss:$24 sps:$4 sm:$0xff]  }
 0x906   :  { %v8470_v22 = vadd.f32 %v8469_v39, %v1344_v59  ;;  %v8512_v43 = vpop.f32.mrf.mxu1  ;;  %v22114_v59 = vsub.s32 1, %v21835_v60  ;;  %v22119_v39 = vld [vmem:[#allocation7] sm:$0xff] }
 0x907   :  { %v9099_v18 = vld [vmem:[#allocation8 + $0x488] sm:$0xff] }
 0x908   :  { %v22111_v2 = vadd.f32 %v8512_v43, %v8470_v22  ;;  %v1268_v22 = vrot.slane %v22119_v39, %v22114_v59  ;;  %v9111_v37 = vld [vmem:[#allocation8 + $0x4e8] sm:$0xff] }
 0x90a   :  { %8622 = vmatpush2.bf16.xpose.msra.mxu0 %v21479_v61  ;;  %v1276_v61 = vrot.slane %v22119_v39, %v22117_v20 }
 0x90b   :  { %8665 = vmatpush2.bf16.xpose.msra.mxu1 %v21482_v45  ;;  %8623 = vmatprep.subr.bf16.mxu0 %v21487_v47  ;;  %v7182_v45 = vadd.f32 %v21853_v32, %v1268_v22  ;;  %v7178_v47 = vadd.f32 %v21841_v7, %v1268_v22  ;;  %v21508_v32 = vld [vmem:[#allocation5 + $0x22f4] ss:$24 sps:$4 sm:$0xff]  }
 0x90c   :  { %8666 = vmatprep.subr.bf16.mxu1 %v21490_v25  ;;  %v7311_v43 = vadd.f32 %v21878_v4, %v1276_v61  ;;  %v7307_v25 = vadd.f32 %v21867_v55, %v1276_v61  ;;  %v21511_v61 = vld [vmem:[#allocation5 + $0x22bc] ss:$24 sps:$4 sm:$0xff]  }
 0x90e   :  { %v7350_v1 = vadd.f32 %v21880_v14, %v7307_v25  ;;  %v21503_v14 = vld [vmem:[#allocation5 + $0x22e8] ss:$24 sps:$4 sm:$0xff]  }
 0x910   :  { %v7393_v55 = vadd.f32 %v21882_v15, %v7350_v1  ;;  %v21517_v15 = vld [vmem:[#allocation5 + $0x228c] ss:$24 sps:$4 sm:$0xff]  }
 0x911   :  { %v21520_v1 = vld [vmem:[#allocation5 + $0x2294] ss:$24 sps:$4 sm:$0xff]  }
 0x912   :  { %8624 = vmatpush2.bf16.xpose.msra.mxu0 %v21485_v30  ;;  %v7354_v30 = vadd.f32 %v21895_v10, %v7311_v43  ;;  %v8741_v22 = vmul.f32 0.70710677, %v7393_v55  ;;  %v9135_v43 = vld [vmem:[#allocation8 + $0x5a8] sm:$0xff] }
 0x913   :  { %8667 = vmatpush2.bf16.xpose.msra.mxu1 %v21488_v46  ;;  %8625 = vmatprep.subr.bf16.mxu0 %v21493_v16  ;;  %v7225_v46 = vadd.f32 %v21865_v19, %v7182_v45  ;;  %v21497_v16 = vld [vmem:[#allocation5 + $0x2318] ss:$24 sps:$4 sm:$0xff]   ;;  %v9123_v45 = vld [vmem:[#allocation8 + $0x548] sm:$0xff] }
 0x914   :  { %8668 = vmatprep.subr.bf16.mxu1 %v21496_v54  ;;  %v21500_v54 = vld [vmem:[#allocation5 + $0x2320] ss:$24 sps:$4 sm:$0xff]  }
 0x915   :  { %v7268_v4 = vadd.f32 %v21876_v3, %v7225_v46  ;;  %v21512_v3 = vld [vmem:[#allocation5 + $0x22c0] ss:$24 sps:$4 sm:$0xff]   ;;  %v21518_v46 = vld [vmem:[#allocation5 + $0x2290] ss:$24 sps:$4 sm:$0xff]  }
 0x917   :  { %v8763_v19 = vmul.f32 0.70710677, %v7268_v4 }
 0x919   :  { %21561 = verf.f32 %v8763_v19 }
 0x91a   :  { %8626 = vmatpush2.bf16.xpose.msra.mxu0 %v21491_v6  ;;  %v7221_v6 = vadd.f32 %v21843_v8, %v7178_v47  ;;  %v21514_v8 = vld [vmem:[#allocation5 + $0x22c4] ss:$24 sps:$4 sm:$0xff]  }
 0x91b   :  { %8669 = vmatpush2.bf16.xpose.msra.mxu1 %v21494_v44  ;;  %8627 = vmatprep.subr.bf16.mxu0 %v21499_v34  ;;  %v7397_v44 = vadd.f32 %v21897_v11, %v7354_v30  ;;  %v9122_v11 = vld [vmem:[#allocation8 + $0x540] sm:$0xff]  ;;  %v21515_v30 = vld [vmem:[#allocation5 + $0x2288] ss:$24 sps:$4 sm:$0xff]  }
 0x91c   :  { %8670 = vmatprep.subr.bf16.mxu1 %v21502_v62  ;;  %v7264_v7 = vadd.f32 %v21856_v35, %v7221_v6  ;;  %v21506_v62 = vld [vmem:[#allocation5 + $0x22f0] ss:$24 sps:$4 sm:$0xff]  }
 0x91d   :  { %v8765_v10 = vmul.f32 0.70710677, %v7397_v44  ;;  %v21509_v35 = vld [vmem:[#allocation5 + $0x22b8] ss:$24 sps:$4 sm:$0xff]  }
 0x91e   :  { %v8739_v34 = vmul.f32 0.70710677, %v7264_v7 }
 0x91f   :  { %21563 = verf.f32 %v8765_v10 }
 0x920   :  { %21565 = verf.f32 %v8739_v34 }
 0x921   :  { %21567 = verf.f32 %v8741_v22  ;;  %v8716_v22 = vmul.f32 0.5, %v7397_v44 }
 0x922   :  { %8628 = vmatpush2.bf16.xpose.msra.mxu0 %v21497_v16 }
 0x923   :  { %8671 = vmatpush2.bf16.xpose.msra.mxu1 %v21500_v54  ;;  %8629 = vmatprep.subr.bf16.mxu0 %v21505_v0  ;;  %v9134_v0 = vld [vmem:[#allocation8 + $0x5a0] sm:$0xff] }
 0x924   :  { %8672 = vmatprep.subr.bf16.mxu1 %v21508_v32  ;;  %v18798_v54 = vcombine.high %v9122_v11, %v9134_v0  ;;  %v18800_v32 = vcombine.high %v9123_v45, %v9135_v43  ;;  %v18797_v42 = vcombine.low %v9122_v11, %v9134_v0  ;;  %v9087_v11 = vld [vmem:[#allocation8 + $0x428] sm:$0xff] }
 0x926   :  { %v21562_v47 = vpop.eup %21561 }
 0x927   :  { %v8859_v19 = vadd.f32 1.0, %v21562_v47 }
 0x92a   :  { %8630 = vmatpush2.bf16.xpose.msra.mxu0 %v21503_v14  ;;  %v8714_v14 = vmul.f32 0.5, %v7268_v4 }
 0x92b   :  { %8673 = vmatpush2.bf16.xpose.msra.mxu1 %v21506_v62  ;;  %8631 = vmatprep.subr.bf16.mxu0 %v21511_v61  ;;  %v8690_v61 = vmul.f32 0.5, %v7264_v7  ;;  %v9074_v7 = vld [vmem:[#allocation8 + $0x3c0] sm:$0xff] }
 0x92c   :  { %8674 = vmatprep.subr.bf16.mxu1 %v21514_v8  ;;  %v21564_v25 = vpop.eup %21563  ;;  %v8907_v8 = vmul.f32 %v8859_v19, %v8714_v14  ;;  %v9039_v14 = vld [vmem:[#allocation8 + $0x2a8] sm:$0xff] }
 0x92d   :  { %v21566_v16 = vpop.eup %21565  ;;  %v8861_v10 = vadd.f32 1.0, %v21564_v25  ;;  %v18799_v25 = vcombine.low %v9123_v45, %v9135_v43  ;;  %v18775_v45 = vcombine.low %v9099_v18, %v9111_v37 }
 0x92e   :  { %v21568_v6 = vpop.eup %21567  ;;  %v8835_v34 = vadd.f32 1.0, %v21566_v16 }
 0x92f   :  { %v8837_v62 = vadd.f32 1.0, %v21568_v6 }
 0x930   :  { %v8883_v56 = vmul.f32 %v8835_v34, %v8690_v61  ;;  %v9026_v34 = vld [vmem:[#allocation8 + $0x240] sm:$0xff] }
 0x932   :  { %8632 = vmatpush2.bf16.xpose.msra.mxu0 %v21509_v35  ;;  %v9098_v35 = vld [vmem:[#allocation8 + $0x480] sm:$0xff]  ;;  %v22137_v16 = vpack.c.bf16 %v8907_v8, %v8883_v56  ;;  %v9075_v56 = vld [vmem:[#allocation8 + $0x3c8] sm:$0xff] }
 0x933   :  { %8675 = vmatpush2.bf16.xpose.msra.mxu1 %v21512_v3  ;;  %8633 = vmatprep.subr.bf16.mxu0 %v21517_v15  ;;  %v8692_v3 = vmul.f32 0.5, %v7393_v55  ;;  %v8909_v15 = vmul.f32 %v8861_v10, %v8716_v22  ;;  %v9086_v55 = vld [vmem:[#allocation8 + $0x420] sm:$0xff]  ;;  %v18751_v6 = vcombine.low %v9075_v56, %v9087_v11 }
 0x934   :  { %8676 = vmatprep.subr.bf16.mxu1 %v21520_v1  ;;  %v9110_v1 = vld [vmem:[#allocation8 + $0x4e0] sm:$0xff]  ;;  %22580 = vst [vmem:[#allocation59_spill] sm:$0xff] %v22137_v16  ;;  %v18750_v43 = vcombine.high %v9074_v7, %v9086_v55 }
 0x935   :  { %v8885_v47 = vmul.f32 %v8837_v62, %v8692_v3  ;;  %v18774_v4 = vcombine.high %v9098_v35, %v9110_v1  ;;  %v18773_v0 = vcombine.low %v9098_v35, %v9110_v1  ;;  %v9002_v35 = vld [vmem:[#allocation8 + $0x180] sm:$0xff]  ;;  %v9015_v1 = vld [vmem:[#allocation8 + $0x1e8] sm:$0xff] }
 0x936   :  { %v9014_v3 = vld [vmem:[#allocation8 + $0x1e0] sm:$0xff] }
 0x937   :  { %v22141_v44 = vpack.c.bf16 %v8909_v15, %v8885_v47  ;;  %v9003_v15 = vld [vmem:[#allocation8 + $0x188] sm:$0xff] }
 0x939   :  { %22581 = vst [vmem:[#allocation60_spill] sm:$0xff] %v22141_v44 }
 0x93a   :  { %8634 = vmatpush2.bf16.xpose.msra.mxu0 %v21515_v30  ;;  %v18776_v30 = vcombine.high %v9099_v18, %v9111_v37  ;;  %v9038_v37 = vld [vmem:[#allocation8 + $0x2a0] sm:$0xff]  ;;  %v9027_v18 = vld [vmem:[#allocation8 + $0x248] sm:$0xff] }
 0x93b   :  { %8677 = vmatpush2.bf16.xpose.msra.mxu1 %v21518_v46  ;;  %15898 = vmatprep.subr.bf16.mxu0 %v18798_v54  ;;  %v9051_v46 = vld [vmem:[#allocation8 + $0x308] sm:$0xff]  ;;  %v18702_v61 = vcombine.high %v9026_v34, %v9038_v37  ;;  %v18704_v8 = vcombine.high %v9027_v18, %v9039_v14  ;;  %v18701_v47 = vcombine.low %v9026_v34, %v9038_v37  ;;  %v9314_v34 = vld [vmem:[#allocation8 + $0xb40] sm:$0xff] }
 0x93c   :  { %15941 = vmatprep.subr.bf16.mxu1 %v18800_v32  ;;  %v9063_v54 = vld [vmem:[#allocation8 + $0x368] sm:$0xff]  ;;  %v18749_v32 = vcombine.low %v9074_v7, %v9086_v55  ;;  %v8978_v7 = vld [vmem:[#allocation8 + $0xc0] sm:$0xff] }
 0x93d   :  { %v18728_v10 = vcombine.high %v9051_v46, %v9063_v54  ;;  %v18727_v22 = vcombine.low %v9051_v46, %v9063_v54  ;;  %v8990_v55 = vld [vmem:[#allocation8 + $0x120] sm:$0xff]  ;;  %v8955_v46 = vld [vmem:[#allocation8 + $0x8] sm:$0xff] }
 0x93e   :  { %v8967_v54 = vld [vmem:[#allocation8 + $0x68] sm:$0xff]  ;;  %v9326_v37 = vld [vmem:[#allocation8 + $0xba0] sm:$0xff] }
 0x941   :  { %8636 = vmatmul.mubr.bf16.vlgmr.msra.gmra.mxu0 %v21821_v17  ;;  %v18752_v17 = vcombine.high %v9075_v56, %v9087_v11  ;;  %v8979_v56 = vld [vmem:[#allocation8 + $0xc8] sm:$0xff] }
 0x942   :  { %8679 = vmatmul.mubr.bf16.vlgmr.msra.gmra.mxu1 %v21829_v26  ;;  %15899 = vmatpush1.bf16.xpose.msra.mxu0 %v18797_v42  ;;  %v9050_v26 = vld [vmem:[#allocation8 + $0x300] sm:$0xff]  ;;  %v8991_v11 = vld [vmem:[#allocation8 + $0x128] sm:$0xff] }
 0x943   :  { %15930 = vmatprep.mubr.bf16.mxu0 %v22137_v16  ;;  %15942 = vmatpush1.bf16.xpose.msra.mxu1 %v18799_v25  ;;  %v9062_v42 = vld [vmem:[#allocation8 + $0x360] sm:$0xff]  ;;  %v18703_v25 = vcombine.low %v9027_v18, %v9039_v14  ;;  %v9315_v18 = vld [vmem:[#allocation8 + $0xb48] sm:$0xff] }
 0x944   :  { %15973 = vmatprep.mubr.bf16.mxu1 %v22141_v44  ;;  %15900 = vmatprep.subr.bf16.mxu0 %v18774_v4  ;;  %v18726_v19 = vcombine.high %v9050_v26, %v9062_v42  ;;  %v18725_v62 = vcombine.low %v9050_v26, %v9062_v42  ;;  %v18678_v4 = vcombine.high %v9002_v35, %v9014_v3  ;;  %v8954_v26 = vld [vmem:[#allocation8] sm:$0xff]  ;;  %v9327_v14 = vld [vmem:[#allocation8 + $0xba8] sm:$0xff] }
 0x945   :  { %15943 = vmatprep.subr.bf16.mxu1 %v18776_v30  ;;  %v18680_v30 = vcombine.high %v9003_v15, %v9015_v1  ;;  %v8966_v42 = vld [vmem:[#allocation8 + $0x60] sm:$0xff] }
 0x94a   :  { %15901 = vmatpush1.bf16.xpose.msra.mxu0 %v18773_v0  ;;  %v18677_v0 = vcombine.low %v9002_v35, %v9014_v3  ;;  %v9290_v35 = vld [vmem:[#allocation8 + $0xa80] sm:$0xff] }
 0x94b   :  { %15944 = vmatpush1.bf16.xpose.msra.mxu1 %v18775_v45  ;;  %15902 = vmatprep.subr.bf16.mxu0 %v18750_v43  ;;  %v18679_v45 = vcombine.low %v9003_v15, %v9015_v1  ;;  %v18654_v43 = vcombine.high %v8978_v7, %v8990_v55  ;;  %v9302_v3 = vld [vmem:[#allocation8 + $0xae0] sm:$0xff]  ;;  %v9291_v15 = vld [vmem:[#allocation8 + $0xa88] sm:$0xff] }
 0x94c   :  { %15945 = vmatprep.subr.bf16.mxu1 %v18752_v17  ;;  %v18656_v17 = vcombine.high %v8979_v56, %v8991_v11  ;;  %v9303_v1 = vld [vmem:[#allocation8 + $0xae8] sm:$0xff] }
 0x952   :  { %15903 = vmatpush1.bf16.xpose.msra.mxu0 %v18749_v32  ;;  %v18653_v32 = vcombine.low %v8978_v7, %v8990_v55  ;;  %v18968_v7 = vcombine.high %v9291_v15, %v9303_v1 }
 0x953   :  { %15946 = vmatpush1.bf16.xpose.msra.mxu1 %v18751_v6  ;;  %15904 = vmatprep.subr.bf16.mxu0 %v18726_v19  ;;  %v18655_v6 = vcombine.low %v8979_v56, %v8991_v11  ;;  %v18630_v19 = vcombine.high %v8954_v26, %v8966_v42 }
 0x954   :  { %15947 = vmatprep.subr.bf16.mxu1 %v18728_v10  ;;  %v18632_v10 = vcombine.high %v8955_v46, %v8967_v54 }
 0x95a   :  { %15905 = vmatpush1.bf16.xpose.msra.mxu0 %v18725_v62  ;;  %v18629_v62 = vcombine.low %v8954_v26, %v8966_v42  ;;  %v9267_v26 = vld [vmem:[#allocation8 + $0x9c8] sm:$0xff] }
 0x95b   :  { %15948 = vmatpush1.bf16.xpose.msra.mxu1 %v18727_v22  ;;  %15906 = vmatprep.subr.bf16.mxu0 %v18702_v61  ;;  %v18631_v22 = vcombine.low %v8955_v46, %v8967_v54  ;;  %v18990_v61 = vcombine.high %v9314_v34, %v9326_v37  ;;  %v9279_v42 = vld [vmem:[#allocation8 + $0xa28] sm:$0xff]  ;;  %v18965_v54 = vcombine.low %v9290_v35, %v9302_v3 }
 0x95c   :  { %15949 = vmatprep.subr.bf16.mxu1 %v18704_v8  ;;  %v18992_v8 = vcombine.high %v9315_v18, %v9327_v14 }
 0x962   :  { %15907 = vmatpush1.bf16.xpose.msra.mxu0 %v18701_v47  ;;  %v18989_v47 = vcombine.low %v9314_v34, %v9326_v37  ;;  %v9254_v34 = vld [vmem:[#allocation8 + $0x960] sm:$0xff]  ;;  %v9243_v37 = vld [vmem:[#allocation8 + $0x908] sm:$0xff] }
 0x963   :  { %15950 = vmatpush1.bf16.xpose.msra.mxu1 %v18703_v25  ;;  %15908 = vmatprep.subr.bf16.mxu0 %v18678_v4  ;;  %v22145_v25 = vpop.f32.mrf.mxu0  ;;  %v18991_v4 = vcombine.low %v9315_v18, %v9327_v14  ;;  %v9255_v18 = vld [vmem:[#allocation8 + $0x968] sm:$0xff] }
 0x964   :  { %15951 = vmatprep.subr.bf16.mxu1 %v18680_v30  ;;  %v18966_v30 = vcombine.high %v9290_v35, %v9302_v3  ;;  %v9230_v35 = vld [vmem:[#allocation8 + $0x8a0] sm:$0xff]  ;;  %v22152_v3 = vsub.s32 5, %v21835_v60 }
 0x966   :  { %22582 = vst [vmem:[#allocation61_spill] sm:$0xff] %v22152_v3 }
 0x96a   :  { %15909 = vmatpush1.bf16.xpose.msra.mxu0 %v18677_v0 }
 0x96b   :  { %15952 = vmatpush1.bf16.xpose.msra.mxu1 %v18679_v45  ;;  %15910 = vmatprep.subr.bf16.mxu0 %v18654_v43  ;;  %v9266_v45 = vld [vmem:[#allocation8 + $0x9c0] sm:$0xff] }
 0x96c   :  { %15953 = vmatprep.subr.bf16.mxu1 %v18656_v17  ;;  %v9278_v43 = vld [vmem:[#allocation8 + $0xa20] sm:$0xff] }
 0x96d   :  { %v18941_v14 = vcombine.low %v9266_v45, %v9278_v43 }
 0x972   :  { %15911 = vmatpush1.bf16.xpose.msra.mxu0 %v18653_v32  ;;  %v18967_v32 = vcombine.low %v9291_v15, %v9303_v1  ;;  %v9219_v15 = vld [vmem:[#allocation8 + $0x848] sm:$0xff] }
 0x973   :  { %15954 = vmatpush1.bf16.xpose.msra.mxu1 %v18655_v6  ;;  %15912 = vmatprep.subr.bf16.mxu0 %v18630_v19  ;;  %v18942_v6 = vcombine.high %v9266_v45, %v9278_v43  ;;  %v9231_v1 = vld [vmem:[#allocation8 + $0x8a8] sm:$0xff] }
 0x974   :  { %15955 = vmatprep.subr.bf16.mxu1 %v18632_v10  ;;  %v9242_v10 = vld [vmem:[#allocation8 + $0x900] sm:$0xff] }
 0x97a   :  { %15913 = vmatpush1.bf16.xpose.msra.mxu0 %v18629_v62  ;;  %v18943_v62 = vcombine.low %v9267_v26, %v9279_v42 }
 0x97b   :  { %15956 = vmatpush1.bf16.xpose.msra.mxu1 %v18631_v22  ;;  %15914 = vmatprep.subr.bf16.mxu0 %v18990_v61  ;;  %v18918_v22 = vcombine.high %v9242_v10, %v9254_v34  ;;  %v18920_v61 = vcombine.high %v9243_v37, %v9255_v18 }
 0x97c   :  { %15957 = vmatprep.subr.bf16.mxu1 %v18992_v8  ;;  %v9218_v8 = vld [vmem:[#allocation8 + $0x840] sm:$0xff] }
 0x981   :  { %v8551_v55 = vpop.f32.mrf.mxu0 }
 0x982   :  { %v8552_v56 = vadd.f32 %v8551_v55, %v22109_v41  ;;  %15915 = vmatpush2.bf16.xpose.msra.mxu0 %v18989_v47  ;;  %v18944_v41 = vcombine.high %v9267_v26, %v9279_v42  ;;  %v22155_v47 = vsub.s32 7, %v21835_v60  ;;  %v18919_v55 = vcombine.low %v9243_v37, %v9255_v18  ;;  %v9207_v37 = vld [vmem:[#allocation8 + $0x7e8] sm:$0xff] }
 0x983   :  { %15958 = vmatpush2.bf16.xpose.msra.mxu1 %v18991_v4  ;;  %v22148_v11 = vpop.f32.mrf.mxu0  ;;  %15916 = vmatprep.subr.bf16.mxu0 %v18966_v30  ;;  %v18917_v30 = vcombine.low %v9242_v10, %v9254_v34  ;;  %v18896_v26 = vcombine.high %v9219_v15, %v9231_v1  ;;  %v1284_v42 = vrot.slane %v22119_v39, %v22152_v3  ;;  %v9195_v34 = vld [vmem:[#allocation8 + $0x788] sm:$0xff] }
 0x984   :  { %v8758_v0 = vmul.f32 0.70710677, %v8552_v56  ;;  %15959 = vmatprep.subr.bf16.mxu1 %v18968_v7  ;;  %v8709_v45 = vmul.f32 0.5, %v8552_v56  ;;  %v9194_v56 = vld [vmem:[#allocation8 + $0x780] sm:$0xff] }
 0x985   :  { %v8555_v17 = vpop.f32.mrf.mxu0  ;;  %v7440_v60 = vadd.f32 %v21911_v12, %v1284_v42  ;;  %v7436_v10 = vadd.f32 %v21899_v23, %v1284_v42 }
 0x986   :  { %21569 = verf.f32 %v8758_v0  ;;  %v8556_v46 = vadd.f32 %v8555_v17, %v22111_v2  ;;  %v18894_v0 = vcombine.high %v9218_v8, %v9230_v35 }
 0x987   :  { %v7483_v12 = vadd.f32 %v21923_v28, %v7440_v60  ;;  %v9170_v28 = vld [vmem:[#allocation8 + $0x6c0] sm:$0xff]  ;;  %v9137_v60 = vld [vmem:[#allocation8 + $0x5b8] sm:$0xff] }
 0x988   :  { %v8782_v19 = vmul.f32 0.70710677, %v8556_v46  ;;  %v8733_v43 = vmul.f32 0.5, %v8556_v46  ;;  %v9206_v46 = vld [vmem:[#allocation8 + $0x7e0] sm:$0xff] }
 0x98a   :  { %21571 = verf.f32 %v8782_v19  ;;  %15917 = vmatpush2.bf16.xpose.msra.mxu0 %v18965_v54  ;;  %v1292_v54 = vrot.slane %v22119_v39, %v22155_v47 }
 0x98b   :  { %15960 = vmatpush2.bf16.xpose.msra.mxu1 %v18967_v32  ;;  %15918 = vmatprep.subr.bf16.mxu0 %v18942_v6 }
 0x98c   :  { %15961 = vmatprep.subr.bf16.mxu1 %v18944_v41  ;;  %v7569_v19 = vadd.f32 %v21934_v38, %v1292_v54  ;;  %v7565_v39 = vadd.f32 %v21925_v36, %v1292_v54  ;;  %v9124_v54 = vld [vmem:[#allocation8 + $0x550] sm:$0xff] }
 0x98e   :  { %v7612_v18 = vadd.f32 %v21950_v48, %v7569_v19  ;;  %v7608_v38 = vadd.f32 %v21936_v50, %v7565_v39  ;;  %v9182_v48 = vld [vmem:[#allocation8 + $0x720] sm:$0xff]  ;;  %v9183_v50 = vld [vmem:[#allocation8 + $0x728] sm:$0xff] }
 0x990   :  { %v7655_v23 = vadd.f32 %v21952_v49, %v7612_v18  ;;  %v7651_v36 = vadd.f32 %v21938_v51, %v7608_v38  ;;  %v9158_v51 = vld [vmem:[#allocation8 + $0x660] sm:$0xff] }
 0x992   :  { %15919 = vmatpush2.bf16.xpose.msra.mxu0 %v18941_v14  ;;  %v18893_v14 = vcombine.low %v9218_v8, %v9230_v35  ;;  %v9171_v35 = vld [vmem:[#allocation8 + $0x6c8] sm:$0xff] }
 0x993   :  { %v21570_v2 = vpop.eup %21569  ;;  %15962 = vmatpush2.bf16.xpose.msra.mxu1 %v18943_v62  ;;  %15920 = vmatprep.subr.bf16.mxu0 %v18918_v22  ;;  %v18895_v62 = vcombine.low %v9219_v15, %v9231_v1  ;;  %v18870_v22 = vcombine.high %v9194_v56, %v9206_v46  ;;  %v8769_v15 = vmul.f32 0.70710677, %v7655_v23  ;;  %v18869_v1 = vcombine.low %v9194_v56, %v9206_v46 }
 0x994   :  { %15963 = vmatprep.subr.bf16.mxu1 %v18920_v61  ;;  %v8854_v4 = vadd.f32 1.0, %v21570_v2  ;;  %v18872_v61 = vcombine.high %v9195_v34, %v9207_v37  ;;  %v7479_v2 = vadd.f32 %v21901_v24, %v7436_v10  ;;  %v18848_v49 = vcombine.high %v9171_v35, %v9183_v50 }
 0x996   :  { %v8902_v32 = vmul.f32 %v8854_v4, %v8709_v45  ;;  %v7526_v4 = vadd.f32 %v21932_v9, %v7483_v12  ;;  %v18846_v9 = vcombine.high %v9170_v28, %v9182_v48  ;;  %v9159_v45 = vld [vmem:[#allocation8 + $0x668] sm:$0xff] }
 0x997   :  { %v21572_v7 = vpop.eup %21571 }
 0x998   :  { %v8878_v17 = vadd.f32 1.0, %v21572_v7  ;;  %v8767_v8 = vmul.f32 0.70710677, %v7526_v4  ;;  %v18871_v7 = vcombine.low %v9195_v34, %v9207_v37 }
 0x99a   :  { %v8926_v6 = vmul.f32 %v8878_v17, %v8733_v43  ;;  %15921 = vmatpush2.bf16.xpose.msra.mxu0 %v18917_v30  ;;  %v7522_v30 = vadd.f32 %v21914_v27, %v7479_v2  ;;  %21573 = verf.f32 %v8767_v8  ;;  %v9146_v27 = vld [vmem:[#allocation8 + $0x600] sm:$0xff]  ;;  %v18845_v43 = vcombine.low %v9170_v28, %v9182_v48  ;;  %v9100_v48 = vld [vmem:[#allocation8 + $0x490] sm:$0xff] }
 0x99b   :  { %15964 = vmatpush2.bf16.xpose.msra.mxu1 %v18919_v55  ;;  %15922 = vmatprep.subr.bf16.mxu0 %v18894_v0  ;;  %v8745_v55 = vmul.f32 0.70710677, %v7651_v36  ;;  %21575 = verf.f32 %v8769_v15  ;;  %v9147_v0 = vld [vmem:[#allocation8 + $0x608] sm:$0xff]  ;;  %v18847_v17 = vcombine.low %v9171_v35, %v9183_v50  ;;  %v18821_v56 = vcombine.low %v9146_v27, %v9158_v51  ;;  %v9112_v8 = vld [vmem:[#allocation8 + $0x4f0] sm:$0xff] }
 0x99c   :  { %v22163_v41 = vpack.c.bf16 %v8926_v6, %v8902_v32  ;;  %15965 = vmatprep.subr.bf16.mxu1 %v18896_v26  ;;  %v8743_v24 = vmul.f32 0.70710677, %v7522_v30  ;;  %v18822_v26 = vcombine.high %v9146_v27, %v9158_v51  ;;  %v18824_v42 = vcombine.high %v9147_v0, %v9159_v45  ;;  %v9136_v32 = vld [vmem:[#allocation8 + $0x5b0] sm:$0xff]  ;;  %v9125_v6 = vld [vmem:[#allocation8 + $0x558] sm:$0xff] }
 0x99d   :  { %v18823_v10 = vcombine.low %v9147_v0, %v9159_v45  ;;  %v18802_v34 = vcombine.high %v9124_v54, %v9136_v32  ;;  %v18804_v39 = vcombine.high %v9125_v6, %v9137_v60  ;;  %v8694_v2 = vmul.f32 0.5, %v7522_v30  ;;  %v9076_v30 = vld [vmem:[#allocation8 + $0x3d0] sm:$0xff]  ;;  %v9077_v51 = vld [vmem:[#allocation8 + $0x3d8] sm:$0xff] }
 0x99e   :  { %22583 = vst [vmem:[#allocation62_spill] sm:$0xff] %v22163_v41  ;;  %21577 = verf.f32 %v8743_v24  ;;  %v8696_v35 = vmul.f32 0.5, %v7651_v36  ;;  %v18801_v15 = vcombine.low %v9124_v54, %v9136_v32  ;;  %v9113_v24 = vld [vmem:[#allocation8 + $0x4f8] sm:$0xff]  ;;  %v9088_v36 = vld [vmem:[#allocation8 + $0x430] sm:$0xff]  ;;  %v18777_v45 = vcombine.low %v9100_v48, %v9112_v8 }
 0x99f   :  { %21579 = verf.f32 %v8745_v55  ;;  %v9089_v0 = vld [vmem:[#allocation8 + $0x438] sm:$0xff]  ;;  %v9064_v54 = vld [vmem:[#allocation8 + $0x370] sm:$0xff] }
 0x9a0   :  { %v9053_v32 = vld [vmem:[#allocation8 + $0x318] sm:$0xff] }
 0x9a2   :  { %15923 = vmatpush2.bf16.xpose.msra.mxu0 %v18893_v14 }
 0x9a3   :  { %15966 = vmatpush2.bf16.xpose.msra.mxu1 %v18895_v62  ;;  %15924 = vmatprep.subr.bf16.mxu0 %v18870_v22  ;;  %v8718_v22 = vmul.f32 0.5, %v7526_v4 }
 0x9a4   :  { %15967 = vmatprep.subr.bf16.mxu1 %v18872_v61  ;;  %v8720_v61 = vmul.f32 0.5, %v7655_v23 }
 0x9a7   :  { %v21574_v19 = vpop.eup %21573 }
 0x9a8   :  { %v21576_v46 = vpop.eup %21575  ;;  %v8863_v14 = vadd.f32 1.0, %v21574_v19  ;;  %v18755_v19 = vcombine.low %v9077_v51, %v9089_v0 }
 0x9a9   :  { %v8865_v12 = vadd.f32 1.0, %v21576_v46 }
 0x9aa   :  { %15925 = vmatpush2.bf16.xpose.msra.mxu0 %v18869_v1  ;;  %v8911_v28 = vmul.f32 %v8863_v14, %v8718_v22  ;;  %v9101_v1 = vld [vmem:[#allocation8 + $0x498] sm:$0xff]  ;;  %v9004_v22 = vld [vmem:[#allocation8 + $0x190] sm:$0xff] }
 0x9ab   :  { %15968 = vmatpush2.bf16.xpose.msra.mxu1 %v18871_v7  ;;  %15926 = vmatprep.subr.bf16.mxu0 %v18846_v9  ;;  %v21578_v37 = vpop.eup %21577  ;;  %v8913_v50 = vmul.f32 %v8865_v12, %v8720_v61  ;;  %v18803_v9 = vcombine.low %v9125_v6, %v9137_v60  ;;  %v18780_v27 = vcombine.high %v9101_v1, %v9113_v24  ;;  %v9065_v6 = vld [vmem:[#allocation8 + $0x378] sm:$0xff] }
 0x9ac   :  { %15969 = vmatprep.subr.bf16.mxu1 %v18848_v49  ;;  %v21580_v18 = vpop.eup %21579  ;;  %v8839_v62 = vadd.f32 1.0, %v21578_v37  ;;  %v18778_v49 = vcombine.high %v9100_v48, %v9112_v8  ;;  %v18753_v60 = vcombine.low %v9076_v30, %v9088_v36  ;;  %v18732_v46 = vcombine.high %v9053_v32, %v9065_v6  ;;  %v9029_v37 = vld [vmem:[#allocation8 + $0x258] sm:$0xff] }
 0x9ad   :  { %v8841_v38 = vadd.f32 1.0, %v21580_v18  ;;  %v18731_v14 = vcombine.low %v9053_v32, %v9065_v6  ;;  %v9005_v61 = vld [vmem:[#allocation8 + $0x198] sm:$0xff]  ;;  %v9328_v32 = vld [vmem:[#allocation8 + $0xbb0] sm:$0xff] }
 0x9ae   :  { %v8887_v7 = vmul.f32 %v8839_v62, %v8694_v2  ;;  %v9017_v2 = vld [vmem:[#allocation8 + $0x1f8] sm:$0xff] }
 0x9af   :  { %v8889_v55 = vmul.f32 %v8841_v38, %v8696_v35  ;;  %v9016_v38 = vld [vmem:[#allocation8 + $0x1f0] sm:$0xff]  ;;  %v18684_v35 = vcombine.high %v9005_v61, %v9017_v2  ;;  %v9317_v6 = vld [vmem:[#allocation8 + $0xb58] sm:$0xff] }
 0x9b0   :  { %v22176_v4 = vpack.c.bf16 %v8911_v28, %v8887_v7  ;;  %v18682_v8 = vcombine.high %v9004_v22, %v9016_v38  ;;  %v18681_v7 = vcombine.low %v9004_v22, %v9016_v38  ;;  %v9305_v22 = vld [vmem:[#allocation8 + $0xaf8] sm:$0xff] }
 0x9b1   :  { %v22179_v23 = vpack.c.bf16 %v8913_v50, %v8889_v55  ;;  %v8980_v50 = vld [vmem:[#allocation8 + $0xd0] sm:$0xff] }
 0x9b2   :  { %15927 = vmatpush2.bf16.xpose.msra.mxu0 %v18845_v43  ;;  %22584 = vst [vmem:[#allocation63_spill] sm:$0xff] %v22176_v4  ;;  %v18779_v43 = vcombine.low %v9101_v1, %v9113_v24  ;;  %v8981_v1 = vld [vmem:[#allocation8 + $0xd8] sm:$0xff] }
 0x9b3   :  { %15970 = vmatpush2.bf16.xpose.msra.mxu1 %v18847_v17  ;;  %15928 = vmatprep.subr.bf16.mxu0 %v18822_v26  ;;  %22585 = vst [vmem:[#allocation64_spill] sm:$0xff] %v22179_v23  ;;  %v18754_v17 = vcombine.high %v9076_v30, %v9088_v36  ;;  %v18756_v26 = vcombine.high %v9077_v51, %v9089_v0  ;;  %v8993_v24 = vld [vmem:[#allocation8 + $0x138] sm:$0xff]  ;;  %v8968_v30 = vld [vmem:[#allocation8 + $0x70] sm:$0xff] }
 0x9b4   :  { %15971 = vmatprep.subr.bf16.mxu1 %v18824_v42  ;;  %v9052_v42 = vld [vmem:[#allocation8 + $0x310] sm:$0xff]  ;;  %v8957_v36 = vld [vmem:[#allocation8 + $0x18] sm:$0xff] }
 0x9b5   :  { %v18729_v18 = vcombine.low %v9052_v42, %v9064_v54  ;;  %v8969_v51 = vld [vmem:[#allocation8 + $0x78] sm:$0xff] }
 0x9ba   :  { %15929 = vmatpush2.bf16.xpose.msra.mxu0 %v18821_v56  ;;  %v18730_v56 = vcombine.high %v9052_v42, %v9064_v54  ;;  %v9316_v54 = vld [vmem:[#allocation8 + $0xb50] sm:$0xff] }
 0x9bb   :  { %15972 = vmatpush2.bf16.xpose.msra.mxu1 %v18823_v10  ;;  %15984 = vmatprep.subr.bf16.mxu0 %v18802_v34  ;;  %v9028_v10 = vld [vmem:[#allocation8 + $0x250] sm:$0xff]  ;;  %v18993_v38 = vcombine.low %v9316_v54, %v9328_v32 }
 0x9bc   :  { %16027 = vmatprep.subr.bf16.mxu1 %v18804_v39  ;;  %v9040_v34 = vld [vmem:[#allocation8 + $0x2b0] sm:$0xff]  ;;  %v9041_v39 = vld [vmem:[#allocation8 + $0x2b8] sm:$0xff] }
 0x9bd   :  { %v18706_v12 = vcombine.high %v9028_v10, %v9040_v34  ;;  %v18708_v62 = vcombine.high %v9029_v37, %v9041_v39  ;;  %v18705_v28 = vcombine.low %v9028_v10, %v9040_v34  ;;  %v18707_v48 = vcombine.low %v9029_v37, %v9041_v39  ;;  %v21620_v39 = vld [vmem:[#allocation7 + $0x10] sm:$0xff] }
 0x9be   :  { %v18994_v10 = vcombine.high %v9316_v54, %v9328_v32 }
 0x9c1   :  { %15931 = vmatmul.mubr.bf16.vlgmr.msra.gmra.mxu0 %v21859_v58 }
 0x9c2   :  { %15974 = vmatmul.mubr.bf16.vlgmr.msra.gmra.mxu1 %v21884_v52  ;;  %15985 = vmatpush1.bf16.xpose.msra.mxu0 %v18801_v15  ;;  %v8992_v15 = vld [vmem:[#allocation8 + $0x130] sm:$0xff] }
 0x9c3   :  { %16016 = vmatprep.mubr.bf16.mxu0 %v22176_v4  ;;  %16028 = vmatpush1.bf16.xpose.msra.mxu1 %v18803_v9  ;;  %v18683_v9 = vcombine.low %v9005_v61, %v9017_v2  ;;  %v18658_v55 = vcombine.high %v8980_v50, %v8992_v15  ;;  %v18657_v0 = vcombine.low %v8980_v50, %v8992_v15  ;;  %v22188_v61 = vpop.f32.mrf.mxu0 }
 0x9c4   :  { %16059 = vmatprep.mubr.bf16.mxu1 %v22179_v23  ;;  %15986 = vmatprep.subr.bf16.mxu0 %v18778_v49  ;;  %v18660_v49 = vcombine.high %v8981_v1, %v8993_v24 }
 0x9c5   :  { %16029 = vmatprep.subr.bf16.mxu1 %v18780_v27  ;;  %v8956_v27 = vld [vmem:[#allocation8 + $0x10] sm:$0xff] }
 0x9ca   :  { %15987 = vmatpush1.bf16.xpose.msra.mxu0 %v18777_v45  ;;  %v18659_v45 = vcombine.low %v8981_v1, %v8993_v24 }
 0x9cb   :  { %16030 = vmatpush1.bf16.xpose.msra.mxu1 %v18779_v43  ;;  %15988 = vmatprep.subr.bf16.mxu0 %v18754_v17  ;;  %v18634_v43 = vcombine.high %v8956_v27, %v8968_v30  ;;  %v18636_v17 = vcombine.high %v8957_v36, %v8969_v51 }
 0x9cc   :  { %16031 = vmatprep.subr.bf16.mxu1 %v18756_v26  ;;  %v22183_v26 = vpop.f32.mrf.mxu1 }
 0x9ce   :  { %v8594_v42 = vpop.f32.mrf.mxu1 }
 0x9d2   :  { %15989 = vmatpush1.bf16.xpose.msra.mxu0 %v18753_v60  ;;  %v9329_v60 = vld [vmem:[#allocation8 + $0xbb8] sm:$0xff] }
 0x9d3   :  { %16032 = vmatpush1.bf16.xpose.msra.mxu1 %v18755_v19  ;;  %15990 = vmatprep.subr.bf16.mxu0 %v18730_v56  ;;  %v18633_v19 = vcombine.low %v8956_v27, %v8968_v30  ;;  %v22185_v56 = vpop.f32.mrf.mxu1  ;;  %v18996_v34 = vcombine.high %v9317_v6, %v9329_v60  ;;  %v9269_v30 = vld [vmem:[#allocation8 + $0x9d8] sm:$0xff] }
 0x9d4   :  { %16033 = vmatprep.subr.bf16.mxu1 %v18732_v46  ;;  %v18635_v46 = vcombine.low %v8957_v36, %v8969_v51  ;;  %v9281_v36 = vld [vmem:[#allocation8 + $0xa38] sm:$0xff] }
 0x9d5   :  { %v8598_v37 = vpop.f32.mrf.mxu1  ;;  %v18948_v32 = vcombine.high %v9269_v30, %v9281_v36 }
 0x9d7   :  { %v22190_v2 = vpop.f32.mrf.mxu1 }
 0x9da   :  { %15991 = vmatpush1.bf16.xpose.msra.mxu0 %v18729_v18  ;;  %v1352_v18 = vrot.slane %v21620_v39, %v21928_v40 }
 0x9db   :  { %16034 = vmatpush1.bf16.xpose.msra.mxu1 %v18731_v14  ;;  %15992 = vmatprep.subr.bf16.mxu0 %v18706_v12  ;;  %v9292_v14 = vld [vmem:[#allocation8 + $0xa90] sm:$0xff] }
 0x9dc   :  { %16035 = vmatprep.subr.bf16.mxu1 %v18708_v62  ;;  %v9304_v12 = vld [vmem:[#allocation8 + $0xaf0] sm:$0xff]  ;;  %v9293_v62 = vld [vmem:[#allocation8 + $0xa98] sm:$0xff] }
 0x9e2   :  { %15993 = vmatpush1.bf16.xpose.msra.mxu0 %v18705_v28  ;;  %v18995_v28 = vcombine.low %v9317_v6, %v9329_v60  ;;  %v9244_v60 = vld [vmem:[#allocation8 + $0x910] sm:$0xff] }
 0x9e3   :  { %16036 = vmatpush1.bf16.xpose.msra.mxu1 %v18707_v48  ;;  %15994 = vmatprep.subr.bf16.mxu0 %v18682_v8  ;;  %v18970_v48 = vcombine.high %v9292_v14, %v9304_v12  ;;  %v8595_v8 = vadd.f32 %v8594_v42, %v1352_v18 }
 0x9e4   :  { %16037 = vmatprep.subr.bf16.mxu1 %v18684_v35  ;;  %v18972_v35 = vcombine.high %v9293_v62, %v9305_v22 }
 0x9ea   :  { %15995 = vmatpush1.bf16.xpose.msra.mxu0 %v18681_v7  ;;  %v8599_v7 = vadd.f32 %v8598_v37, %v1352_v18  ;;  %v18947_v37 = vcombine.low %v9269_v30, %v9281_v36 }
 0x9eb   :  { %16038 = vmatpush1.bf16.xpose.msra.mxu1 %v18683_v9  ;;  %15996 = vmatprep.subr.bf16.mxu0 %v18658_v55  ;;  %v9268_v55 = vld [vmem:[#allocation8 + $0x9d0] sm:$0xff] }
 0x9ec   :  { %16039 = vmatprep.subr.bf16.mxu1 %v18660_v49  ;;  %v9280_v49 = vld [vmem:[#allocation8 + $0xa30] sm:$0xff] }
 0x9ed   :  { %v18946_v42 = vcombine.high %v9268_v55, %v9280_v49 }
 0x9f2   :  { %15997 = vmatpush1.bf16.xpose.msra.mxu0 %v18657_v0 }
 0x9f3   :  { %16040 = vmatpush1.bf16.xpose.msra.mxu1 %v18659_v45  ;;  %15998 = vmatprep.subr.bf16.mxu0 %v18634_v43  ;;  %v18969_v45 = vcombine.low %v9292_v14, %v9304_v12  ;;  %v9220_v14 = vld [vmem:[#allocation8 + $0x850] sm:$0xff] }
 0x9f4   :  { %16041 = vmatprep.subr.bf16.mxu1 %v18636_v17  ;;  %v18971_v17 = vcombine.low %v9293_v62, %v9305_v22  ;;  %v9232_v12 = vld [vmem:[#allocation8 + $0x8b0] sm:$0xff]  ;;  %v9221_v22 = vld [vmem:[#allocation8 + $0x858] sm:$0xff] }
 0x9fa   :  { %15999 = vmatpush1.bf16.xpose.msra.mxu0 %v18633_v19  ;;  %v9256_v19 = vld [vmem:[#allocation8 + $0x970] sm:$0xff] }
 0x9fb   :  { %16042 = vmatpush1.bf16.xpose.msra.mxu1 %v18635_v46  ;;  %16000 = vmatprep.subr.bf16.mxu0 %v18994_v10  ;;  %v9245_v46 = vld [vmem:[#allocation8 + $0x918] sm:$0xff]  ;;  %v18922_v39 = vcombine.high %v9244_v60, %v9256_v19 }
 0x9fc   :  { %16043 = vmatprep.subr.bf16.mxu1 %v18996_v34  ;;  %v9257_v10 = vld [vmem:[#allocation8 + $0x978] sm:$0xff]  ;;  %v18945_v34 = vcombine.low %v9268_v55, %v9280_v49 }
 0x9fd   :  { %v18924_v18 = vcombine.high %v9245_v46, %v9257_v10 }
 0xa01   :  { %v8637_v50 = vpop.f32.mrf.mxu0 }
 0xa02   :  { %v8680_v15 = vpop.f32.mrf.mxu1  ;;  %v8638_v1 = vadd.f32 %v8637_v50, %v8595_v8  ;;  %16001 = vmatpush2.bf16.xpose.msra.mxu0 %v18993_v38  ;;  %v9233_v38 = vld [vmem:[#allocation8 + $0x8b8] sm:$0xff]  ;;  %v18898_v8 = vcombine.high %v9220_v14, %v9232_v12 }
 0xa03   :  { %16044 = vmatpush2.bf16.xpose.msra.mxu1 %v18995_v28  ;;  %v22192_v40 = vpop.f32.mrf.mxu0  ;;  %16002 = vmatprep.subr.bf16.mxu0 %v18970_v48  ;;  %v18921_v28 = vcombine.low %v9244_v60, %v9256_v19  ;;  %v18923_v48 = vcombine.low %v9245_v46, %v9257_v10  ;;  %v18900_v50 = vcombine.high %v9221_v22, %v9233_v38  ;;  %v22587_v19 = vld [vmem:[#allocation26_spill] sm:$0xff] }
 0xa04   :  { %v22194_v24 = vpop.f32.mrf.mxu1  ;;  %v8681_v9 = vadd.f32 %v8680_v15, %v8638_v1  ;;  %16045 = vmatprep.subr.bf16.mxu1 %v18972_v35  ;;  %v22196_v1 = vld [vmem:[#allocation7 + $0x8] sm:$0xff]  ;;  %v18899_v10 = vcombine.low %v9221_v22, %v9233_v38 }
 0xa05   :  { %v8641_v27 = vpop.f32.mrf.mxu0  ;;  %v1308_v55 = vrot.slane %v22196_v1, %v22117_v20  ;;  %v9184_v22 = vld [vmem:[#allocation8 + $0x730] sm:$0xff] }
 0xa06   :  { %v8760_v51 = vmul.f32 0.70710677, %v8681_v9  ;;  %v8642_v0 = vadd.f32 %v8641_v27, %v8599_v7  ;;  %v8684_v43 = vpop.f32.mrf.mxu1  ;;  %v1300_v7 = vrot.slane %v22196_v1, %v22114_v59  ;;  %v8711_v49 = vmul.f32 0.5, %v8681_v9 }
 0xa07   :  { %v7823_v9 = vadd.f32 %v21980_v29, %v1308_v55  ;;  %v22592_v29 = vld [vmem:[#allocation24_spill] sm:$0xff] }
 0xa08   :  { %21581 = verf.f32 %v8760_v51  ;;  %v8685_v54 = vadd.f32 %v8684_v43, %v8642_v0  ;;  %v7698_v36 = vadd.f32 %v21966_v33, %v1300_v7  ;;  %v7827_v51 = vadd.f32 %v21986_v57, %v1308_v55  ;;  %v9196_v43 = vld [vmem:[#allocation8 + $0x790] sm:$0xff] }
 0xa09   :  { %v18897_v33 = vcombine.low %v9220_v14, %v9232_v12  ;;  %v9172_v12 = vld [vmem:[#allocation8 + $0x6d0] sm:$0xff] }
 0xa0a   :  { %v8784_v6 = vmul.f32 0.70710677, %v8685_v54  ;;  %16003 = vmatpush2.bf16.xpose.msra.mxu0 %v18969_v45  ;;  %v8735_v27 = vmul.f32 0.5, %v8685_v54  ;;  %v7870_v54 = vadd.f32 %v22000_v5, %v7827_v51  ;;  %v7741_v46 = vadd.f32 %v22587_v19, %v7698_v36  ;;  %v22593_v5 = vld [vmem:[#allocation29_spill] sm:$0xff] }
 0xa0b   :  { %16046 = vmatpush2.bf16.xpose.msra.mxu1 %v18971_v17  ;;  %16004 = vmatprep.subr.bf16.mxu0 %v18946_v42  ;;  %v9208_v17 = vld [vmem:[#allocation8 + $0x7f0] sm:$0xff]  ;;  %v7694_v42 = vadd.f32 %v21954_v53, %v1300_v7  ;;  %v9127_v19 = vld [vmem:[#allocation8 + $0x568] sm:$0xff] }
 0xa0c   :  { %21583 = verf.f32 %v8784_v6  ;;  %16047 = vmatprep.subr.bf16.mxu1 %v18948_v32  ;;  %v9197_v32 = vld [vmem:[#allocation8 + $0x798] sm:$0xff]  ;;  %v18874_v57 = vcombine.high %v9196_v43, %v9208_v17  ;;  %v18873_v55 = vcombine.low %v9196_v43, %v9208_v17 }
 0xa0d   :  { %v9209_v6 = vld [vmem:[#allocation8 + $0x7f8] sm:$0xff] }
 0xa12   :  { %16005 = vmatpush2.bf16.xpose.msra.mxu0 %v18945_v34  ;;  %v22588_v34 = vld [vmem:[#allocation28_spill] sm:$0xff] }
 0xa13   :  { %16048 = vmatpush2.bf16.xpose.msra.mxu1 %v18947_v37  ;;  %16006 = vmatprep.subr.bf16.mxu0 %v18922_v39  ;;  %v7866_v37 = vadd.f32 %v22588_v34, %v7823_v9  ;;  %v18876_v39 = vcombine.high %v9197_v32, %v9209_v6  ;;  %v9161_v9 = vld [vmem:[#allocation8 + $0x678] sm:$0xff] }
 0xa14   :  { %16049 = vmatprep.subr.bf16.mxu1 %v18924_v18  ;;  %v22589_v18 = vld [vmem:[#allocation23_spill] sm:$0xff] }
 0xa15   :  { %v21582_v62 = vpop.eup %21581  ;;  %v7909_v14 = vadd.f32 %v22593_v5, %v7866_v37 }
 0xa16   :  { %v8856_v35 = vadd.f32 1.0, %v21582_v62  ;;  %v7737_v62 = vadd.f32 %v22589_v18, %v7694_v42  ;;  %v9149_v42 = vld [vmem:[#allocation8 + $0x618] sm:$0xff] }
 0xa17   :  { %v8749_v36 = vmul.f32 0.70710677, %v7909_v14  ;;  %v18828_v17 = vcombine.high %v9149_v42, %v9161_v9  ;;  %v18827_v37 = vcombine.low %v9149_v42, %v9161_v9 }
 0xa18   :  { %v8904_v0 = vmul.f32 %v8856_v35, %v8711_v49  ;;  %v7780_v35 = vadd.f32 %v22592_v29, %v7737_v62 }
 0xa19   :  { %v21584_v15 = vpop.eup %21583 }
 0xa1a   :  { %v8880_v30 = vadd.f32 1.0, %v21584_v15  ;;  %16007 = vmatpush2.bf16.xpose.msra.mxu0 %v18921_v28  ;;  %v22590_v28 = vld [vmem:[#allocation27_spill] sm:$0xff]  ;;  %v8747_v49 = vmul.f32 0.70710677, %v7780_v35 }
 0xa1b   :  { %16050 = vmatpush2.bf16.xpose.msra.mxu1 %v18923_v48  ;;  %16008 = vmatprep.subr.bf16.mxu0 %v18898_v8  ;;  %v7784_v53 = vadd.f32 %v22590_v28, %v7741_v46  ;;  %v22591_v48 = vld [vmem:[#allocation31_spill] sm:$0xff]  ;;  %v9139_v46 = vld [vmem:[#allocation8 + $0x5c8] sm:$0xff] }
 0xa1c   :  { %v8928_v45 = vmul.f32 %v8880_v30, %v8735_v27  ;;  %16051 = vmatprep.subr.bf16.mxu1 %v18900_v50  ;;  %v7913_v8 = vadd.f32 %v22591_v48, %v7870_v54  ;;  %v9173_v50 = vld [vmem:[#allocation8 + $0x6d8] sm:$0xff]  ;;  %v18875_v27 = vcombine.low %v9197_v32, %v9209_v6  ;;  %v18850_v30 = vcombine.high %v9172_v12, %v9184_v22  ;;  %v9126_v32 = vld [vmem:[#allocation8 + $0x560] sm:$0xff] }
 0xa1d   :  { %v8771_v38 = vmul.f32 0.70710677, %v7784_v53  ;;  %v9185_v15 = vld [vmem:[#allocation8 + $0x738] sm:$0xff]  ;;  %v18849_v54 = vcombine.low %v9172_v12, %v9184_v22  ;;  %v9138_v6 = vld [vmem:[#allocation8 + $0x5c0] sm:$0xff]  ;;  %v18808_v62 = vcombine.high %v9127_v19, %v9139_v46  ;;  %v8722_v12 = vmul.f32 0.5, %v7784_v53 }
 0xa1e   :  { %v22207_v60 = vpack.c.bf16 %v8928_v45, %v8904_v0  ;;  %v8773_v7 = vmul.f32 0.70710677, %v7913_v8  ;;  %v18852_v51 = vcombine.high %v9173_v50, %v9185_v15  ;;  %v9148_v0 = vld [vmem:[#allocation8 + $0x610] sm:$0xff] }
 0xa1f   :  { %21585 = verf.f32 %v8771_v38  ;;  %v9160_v45 = vld [vmem:[#allocation8 + $0x670] sm:$0xff]  ;;  %v8724_v38 = vmul.f32 0.5, %v7913_v8 }
 0xa20   :  { %22586 = vst [vmem:[#allocation65_spill] sm:$0xff] %v22207_v60  ;;  %21587 = verf.f32 %v8773_v7  ;;  %v18826_v43 = vcombine.high %v9148_v0, %v9160_v45  ;;  %v9102_v7 = vld [vmem:[#allocation8 + $0x4a0] sm:$0xff]  ;;  %v22595_v8 = vld [vmem:[#allocation22_spill] sm:$0xff] }
 0xa21   :  { %21589 = verf.f32 %v8747_v49  ;;  %v8700_v49 = vmul.f32 0.5, %v7909_v14  ;;  %v9078_v14 = vld [vmem:[#allocation8 + $0x3e0] sm:$0xff] }
 0xa22   :  { %16009 = vmatpush2.bf16.xpose.msra.mxu0 %v18897_v33  ;;  %21591 = verf.f32 %v8749_v36  ;;  %v18851_v33 = vcombine.low %v9173_v50, %v9185_v15  ;;  %v8698_v50 = vmul.f32 0.5, %v7780_v35  ;;  %v9103_v36 = vld [vmem:[#allocation8 + $0x4a8] sm:$0xff] }
 0xa23   :  { %16052 = vmatpush2.bf16.xpose.msra.mxu1 %v18899_v10  ;;  %16010 = vmatprep.subr.bf16.mxu0 %v18874_v57  ;;  %v18825_v57 = vcombine.low %v9148_v0, %v9160_v45  ;;  %v18807_v45 = vcombine.low %v9127_v19, %v9139_v46 }
 0xa24   :  { %16053 = vmatprep.subr.bf16.mxu1 %v18876_v39  ;;  %v18806_v39 = vcombine.high %v9126_v32, %v9138_v6 }
 0xa2a   :  { %16011 = vmatpush2.bf16.xpose.msra.mxu0 %v18873_v55  ;;  %v9114_v55 = vld [vmem:[#allocation8 + $0x500] sm:$0xff] }
 0xa2b   :  { %16054 = vmatpush2.bf16.xpose.msra.mxu1 %v18875_v27  ;;  %16012 = vmatprep.subr.bf16.mxu0 %v18850_v30  ;;  %v18805_v30 = vcombine.low %v9126_v32, %v9138_v6  ;;  %v18782_v9 = vcombine.high %v9102_v7, %v9114_v55  ;;  %v9091_v32 = vld [vmem:[#allocation8 + $0x448] sm:$0xff]  ;;  %v18781_v6 = vcombine.low %v9102_v7, %v9114_v55  ;;  %v9006_v55 = vld [vmem:[#allocation8 + $0x1a0] sm:$0xff] }
 0xa2c   :  { %16055 = vmatprep.subr.bf16.mxu1 %v18852_v51  ;;  %v21586_v10 = vpop.eup %21585  ;;  %v9115_v51 = vld [vmem:[#allocation8 + $0x508] sm:$0xff] }
 0xa2d   :  { %v21588_v34 = vpop.eup %21587  ;;  %v8867_v48 = vadd.f32 1.0, %v21586_v10  ;;  %v18783_v19 = vcombine.low %v9103_v36, %v9115_v51 }
 0xa2e   :  { %v21590_v18 = vpop.eup %21589  ;;  %v8869_v29 = vadd.f32 1.0, %v21588_v34  ;;  %v9066_v34 = vld [vmem:[#allocation8 + $0x380] sm:$0xff] }
 0xa2f   :  { %v21592_v28 = vpop.eup %21591  ;;  %v8843_v5 = vadd.f32 1.0, %v21590_v18  ;;  %v8915_v15 = vmul.f32 %v8867_v48, %v8722_v12  ;;  %v9031_v12 = vld [vmem:[#allocation8 + $0x268] sm:$0xff] }
 0xa30   :  { %v8845_v22 = vadd.f32 1.0, %v21592_v28  ;;  %v8917_v27 = vmul.f32 %v8869_v29, %v8724_v38  ;;  %v9030_v29 = vld [vmem:[#allocation8 + $0x260] sm:$0xff] }
 0xa31   :  { %v8891_v0 = vmul.f32 %v8843_v5, %v8698_v50  ;;  %v9042_v5 = vld [vmem:[#allocation8 + $0x2c0] sm:$0xff] }
 0xa32   :  { %16013 = vmatpush2.bf16.xpose.msra.mxu0 %v18849_v54  ;;  %v8893_v42 = vmul.f32 %v8845_v22, %v8700_v49  ;;  %v22594_v54 = vld [vmem:[#allocation21_spill] sm:$0xff]  ;;  %v9018_v49 = vld [vmem:[#allocation8 + $0x200] sm:$0xff] }
 0xa33   :  { %16056 = vmatpush2.bf16.xpose.msra.mxu1 %v18851_v33  ;;  %16014 = vmatprep.subr.bf16.mxu0 %v18826_v43  ;;  %v22217_v53 = vpack.c.bf16 %v8915_v15, %v8891_v0  ;;  %v18784_v33 = vcombine.high %v9103_v36, %v9115_v51  ;;  %v9090_v43 = vld [vmem:[#allocation8 + $0x440] sm:$0xff]  ;;  %v9043_v22 = vld [vmem:[#allocation8 + $0x2c8] sm:$0xff]  ;;  %v18710_v15 = vcombine.high %v9030_v29, %v9042_v5 }
 0xa34   :  { %16057 = vmatprep.subr.bf16.mxu1 %v18828_v17  ;;  %v22220_v35 = vpack.c.bf16 %v8917_v27, %v8893_v42  ;;  %v9079_v17 = vld [vmem:[#allocation8 + $0x3e8] sm:$0xff]  ;;  %v18758_v46 = vcombine.high %v9078_v14, %v9090_v43  ;;  %v18757_v18 = vcombine.low %v9078_v14, %v9090_v43  ;;  %v18712_v7 = vcombine.high %v9031_v12, %v9043_v22  ;;  %v8982_v42 = vld [vmem:[#allocation8 + $0xe0] sm:$0xff] }
 0xa35   :  { %v18760_v10 = vcombine.high %v9079_v17, %v9091_v32  ;;  %v9007_v27 = vld [vmem:[#allocation8 + $0x1a8] sm:$0xff]  ;;  %v18709_v36 = vcombine.low %v9030_v29, %v9042_v5  ;;  %v18711_v51 = vcombine.low %v9031_v12, %v9043_v22  ;;  %v18686_v0 = vcombine.high %v9006_v55, %v9018_v49 }
 0xa36   :  { %v8995_v14 = vld [vmem:[#allocation8 + $0x148] sm:$0xff]  ;;  %v18685_v43 = vcombine.low %v9006_v55, %v9018_v49 }
 0xa37   :  { %v9331_v29 = vld [vmem:[#allocation8 + $0xbc8] sm:$0xff] }
 0xa38   :  { %v9307_v55 = vld [vmem:[#allocation8 + $0xb08] sm:$0xff] }
 0xa3a   :  { %16015 = vmatpush2.bf16.xpose.msra.mxu0 %v18825_v57  ;;  %v9054_v57 = vld [vmem:[#allocation8 + $0x320] sm:$0xff] }
 0xa3b   :  { %16058 = vmatpush2.bf16.xpose.msra.mxu1 %v18827_v37  ;;  %16070 = vmatprep.subr.bf16.mxu0 %v18806_v39  ;;  %v9055_v37 = vld [vmem:[#allocation8 + $0x328] sm:$0xff]  ;;  %v18734_v28 = vcombine.high %v9054_v57, %v9066_v34  ;;  %v18733_v38 = vcombine.low %v9054_v57, %v9066_v34 }
 0xa3c   :  { %16113 = vmatprep.subr.bf16.mxu1 %v18808_v62  ;;  %v9067_v39 = vld [vmem:[#allocation8 + $0x388] sm:$0xff]  ;;  %v18759_v62 = vcombine.low %v9079_v17, %v9091_v32 }
 0xa3d   :  { %v18736_v48 = vcombine.high %v9055_v37, %v9067_v39  ;;  %v18735_v50 = vcombine.low %v9055_v37, %v9067_v39  ;;  %v8971_v57 = vld [vmem:[#allocation8 + $0x88] sm:$0xff] }
 0xa41   :  { %16017 = vmatmul.mubr.bf16.vlgmr.msra.gmra.mxu0 %v22594_v54 }
 0xa42   :  { %16060 = vmatmul.mubr.bf16.vlgmr.msra.gmra.mxu1 %v22595_v8  ;;  %16071 = vmatpush1.bf16.xpose.msra.mxu0 %v18805_v30  ;;  %v9019_v30 = vld [vmem:[#allocation8 + $0x208] sm:$0xff] }
 0xa43   :  { %16102 = vmatprep.mubr.bf16.mxu0 %v22217_v53  ;;  %16114 = vmatpush1.bf16.xpose.msra.mxu1 %v18807_v45  ;;  %v18688_v45 = vcombine.high %v9007_v27, %v9019_v30  ;;  %v18687_v17 = vcombine.low %v9007_v27, %v9019_v30 }
 0xa44   :  { %16145 = vmatprep.mubr.bf16.mxu1 %v22220_v35  ;;  %16072 = vmatprep.subr.bf16.mxu0 %v18782_v9  ;;  %v8994_v9 = vld [vmem:[#allocation8 + $0x140] sm:$0xff] }
 0xa45   :  { %16115 = vmatprep.subr.bf16.mxu1 %v18784_v33  ;;  %v8983_v33 = vld [vmem:[#allocation8 + $0xe8] sm:$0xff]  ;;  %v18662_v32 = vcombine.high %v8982_v42, %v8994_v9  ;;  %v18661_v34 = vcombine.low %v8982_v42, %v8994_v9 }
 0xa46   :  { %v18663_v37 = vcombine.low %v8983_v33, %v8995_v14  ;;  %v9283_v42 = vld [vmem:[#allocation8 + $0xa48] sm:$0xff] }
 0xa4a   :  { %16073 = vmatpush1.bf16.xpose.msra.mxu0 %v18781_v6  ;;  %v18664_v6 = vcombine.high %v8983_v33, %v8995_v14 }
 0xa4b   :  { %16116 = vmatpush1.bf16.xpose.msra.mxu1 %v18783_v19  ;;  %16074 = vmatprep.subr.bf16.mxu0 %v18758_v46  ;;  %v8958_v19 = vld [vmem:[#allocation8 + $0x20] sm:$0xff] }
 0xa4c   :  { %16117 = vmatprep.subr.bf16.mxu1 %v18760_v10  ;;  %v8970_v46 = vld [vmem:[#allocation8 + $0x80] sm:$0xff]  ;;  %v8959_v10 = vld [vmem:[#allocation8 + $0x28] sm:$0xff] }
 0xa4d   :  { %v18638_v39 = vcombine.high %v8958_v19, %v8970_v46  ;;  %v18637_v5 = vcombine.low %v8958_v19, %v8970_v46  ;;  %v18639_v12 = vcombine.low %v8959_v10, %v8971_v57  ;;  %v9259_v19 = vld [vmem:[#allocation8 + $0x988] sm:$0xff] }
 0xa52   :  { %16075 = vmatpush1.bf16.xpose.msra.mxu0 %v18757_v18  ;;  %v18640_v18 = vcombine.high %v8959_v10, %v8971_v57 }
 0xa53   :  { %16118 = vmatpush1.bf16.xpose.msra.mxu1 %v18759_v62  ;;  %16076 = vmatprep.subr.bf16.mxu0 %v18734_v28  ;;  %v9318_v62 = vld [vmem:[#allocation8 + $0xb60] sm:$0xff] }
 0xa54   :  { %16119 = vmatprep.subr.bf16.mxu1 %v18736_v48  ;;  %v9330_v28 = vld [vmem:[#allocation8 + $0xbc0] sm:$0xff]  ;;  %v9319_v48 = vld [vmem:[#allocation8 + $0xb68] sm:$0xff] }
 0xa55   :  { %v18998_v22 = vcombine.high %v9318_v62, %v9330_v28  ;;  %v18997_v49 = vcombine.low %v9318_v62, %v9330_v28  ;;  %v18999_v27 = vcombine.low %v9319_v48, %v9331_v29  ;;  %v9235_v62 = vld [vmem:[#allocation8 + $0x8c8] sm:$0xff] }
 0xa5a   :  { %16077 = vmatpush1.bf16.xpose.msra.mxu0 %v18733_v38  ;;  %v19000_v38 = vcombine.high %v9319_v48, %v9331_v29 }
 0xa5b   :  { %16120 = vmatpush1.bf16.xpose.msra.mxu1 %v18735_v50  ;;  %16078 = vmatprep.subr.bf16.mxu0 %v18710_v15  ;;  %v9294_v50 = vld [vmem:[#allocation8 + $0xaa0] sm:$0xff] }
 0xa5c   :  { %16121 = vmatprep.subr.bf16.mxu1 %v18712_v7  ;;  %v9306_v15 = vld [vmem:[#allocation8 + $0xb00] sm:$0xff]  ;;  %v9295_v7 = vld [vmem:[#allocation8 + $0xaa8] sm:$0xff] }
 0xa5d   :  { %v18974_v30 = vcombine.high %v9294_v50, %v9306_v15  ;;  %v18973_v9 = vcombine.low %v9294_v50, %v9306_v15  ;;  %v18975_v33 = vcombine.low %v9295_v7, %v9307_v55  ;;  %v22597_v15 = vld [vmem:[#allocation40_spill] sm:$0xff] }
 0xa62   :  { %16079 = vmatpush1.bf16.xpose.msra.mxu0 %v18709_v36  ;;  %v18976_v36 = vcombine.high %v9295_v7, %v9307_v55  ;;  %v9198_v55 = vld [vmem:[#allocation8 + $0x7a0] sm:$0xff] }
 0xa63   :  { %16122 = vmatpush1.bf16.xpose.msra.mxu1 %v18711_v51  ;;  %16080 = vmatprep.subr.bf16.mxu0 %v18686_v0  ;;  %v9270_v51 = vld [vmem:[#allocation8 + $0x9e0] sm:$0xff] }
 0xa64   :  { %16123 = vmatprep.subr.bf16.mxu1 %v18688_v45  ;;  %v9282_v0 = vld [vmem:[#allocation8 + $0xa40] sm:$0xff]  ;;  %v9271_v45 = vld [vmem:[#allocation8 + $0x9e8] sm:$0xff] }
 0xa65   :  { %v18950_v14 = vcombine.high %v9270_v51, %v9282_v0  ;;  %v18949_v46 = vcombine.low %v9270_v51, %v9282_v0  ;;  %v18951_v10 = vcombine.low %v9271_v45, %v9283_v42  ;;  %v9211_v51 = vld [vmem:[#allocation8 + $0x808] sm:$0xff]  ;;  %v22599_v0 = vld [vmem:[#allocation38_spill] sm:$0xff] }
 0xa6a   :  { %16081 = vmatpush1.bf16.xpose.msra.mxu0 %v18685_v43  ;;  %v18952_v43 = vcombine.high %v9271_v45, %v9283_v42 }
 0xa6b   :  { %16124 = vmatpush1.bf16.xpose.msra.mxu1 %v18687_v17  ;;  %16082 = vmatprep.subr.bf16.mxu0 %v18662_v32  ;;  %v9246_v17 = vld [vmem:[#allocation8 + $0x920] sm:$0xff] }
 0xa6c   :  { %16125 = vmatprep.subr.bf16.mxu1 %v18664_v6  ;;  %v9258_v32 = vld [vmem:[#allocation8 + $0x980] sm:$0xff]  ;;  %v9247_v6 = vld [vmem:[#allocation8 + $0x928] sm:$0xff] }
 0xa6d   :  { %v18926_v57 = vcombine.high %v9246_v17, %v9258_v32  ;;  %v18925_v28 = vcombine.low %v9246_v17, %v9258_v32  ;;  %v18927_v48 = vcombine.low %v9247_v6, %v9259_v19 }
 0xa72   :  { %16083 = vmatpush1.bf16.xpose.msra.mxu0 %v18661_v34  ;;  %v18928_v34 = vcombine.high %v9247_v6, %v9259_v19  ;;  %v22601_v6 = vld [vmem:[#allocation33_spill] sm:$0xff] }
 0xa73   :  { %16126 = vmatpush1.bf16.xpose.msra.mxu1 %v18663_v37  ;;  %16084 = vmatprep.subr.bf16.mxu0 %v18638_v39  ;;  %v9222_v37 = vld [vmem:[#allocation8 + $0x860] sm:$0xff] }
 0xa74   :  { %16127 = vmatprep.subr.bf16.mxu1 %v18640_v18  ;;  %v9234_v39 = vld [vmem:[#allocation8 + $0x8c0] sm:$0xff]  ;;  %v9223_v18 = vld [vmem:[#allocation8 + $0x868] sm:$0xff] }
 0xa75   :  { %v18902_v29 = vcombine.high %v9222_v37, %v9234_v39 }
 0xa7a   :  { %16085 = vmatpush1.bf16.xpose.msra.mxu0 %v18637_v5  ;;  %v18904_v5 = vcombine.high %v9223_v18, %v9235_v62 }
 0xa7b   :  { %16128 = vmatpush1.bf16.xpose.msra.mxu1 %v18639_v12  ;;  %16086 = vmatprep.subr.bf16.mxu0 %v18998_v22  ;;  %v1316_v12 = vrot.slane %v22196_v1, %v22152_v3  ;;  %v1324_v22 = vrot.slane %v22196_v1, %v22155_v47  ;;  %v22600_v1 = vld [vmem:[#allocation37_spill] sm:$0xff] }
 0xa7c   :  { %16129 = vmatprep.subr.bf16.mxu1 %v19000_v38  ;;  %v22596_v38 = vld [vmem:[#allocation34_spill] sm:$0xff] }
 0xa7d   :  { %v7956_v50 = vadd.f32 %v22596_v38, %v1316_v12  ;;  %v8085_v7 = vadd.f32 %v22597_v15, %v1324_v22  ;;  %v8081_v45 = vadd.f32 %v22599_v0, %v1324_v22  ;;  %v9151_v0 = vld [vmem:[#allocation8 + $0x628] sm:$0xff] }
 0xa7f   :  { %v8128_v42 = vadd.f32 %v22051_v13, %v8085_v7  ;;  %v8124_v17 = vadd.f32 %v22037_v21, %v8081_v45  ;;  %v22605_v13 = vld [vmem:[#allocation41_spill] sm:$0xff] }
 0xa80   :  { %v9187_v21 = vld [vmem:[#allocation8 + $0x748] sm:$0xff] }
 0xa81   :  { %v9163_v45 = vld [vmem:[#allocation8 + $0x688] sm:$0xff] }
 0xa82   :  { %16087 = vmatpush2.bf16.xpose.msra.mxu0 %v18997_v49  ;;  %v9210_v49 = vld [vmem:[#allocation8 + $0x800] sm:$0xff] }
 0xa83   :  { %16130 = vmatpush2.bf16.xpose.msra.mxu1 %v18999_v27  ;;  %16088 = vmatprep.subr.bf16.mxu0 %v18974_v30  ;;  %v22598_v27 = vld [vmem:[#allocation32_spill] sm:$0xff] }
 0xa84   :  { %16131 = vmatprep.subr.bf16.mxu1 %v18976_v36  ;;  %v7952_v30 = vadd.f32 %v22598_v27, %v1316_v12  ;;  %v9199_v36 = vld [vmem:[#allocation8 + $0x7a8] sm:$0xff]  ;;  %v18877_v12 = vcombine.low %v9198_v55, %v9210_v49  ;;  %v9150_v27 = vld [vmem:[#allocation8 + $0x620] sm:$0xff] }
 0xa85   :  { %v18880_v32 = vcombine.high %v9199_v36, %v9211_v51  ;;  %v18879_v38 = vcombine.low %v9199_v36, %v9211_v51  ;;  %v9128_v36 = vld [vmem:[#allocation8 + $0x570] sm:$0xff] }
 0xa86   :  { %v7995_v19 = vadd.f32 %v22601_v6, %v7952_v30  ;;  %v9162_v30 = vld [vmem:[#allocation8 + $0x680] sm:$0xff]  ;;  %v9140_v51 = vld [vmem:[#allocation8 + $0x5d0] sm:$0xff] }
 0xa87   :  { %v18810_v6 = vcombine.high %v9128_v36, %v9140_v51 }
 0xa8a   :  { %16089 = vmatpush2.bf16.xpose.msra.mxu0 %v18973_v9  ;;  %v18901_v9 = vcombine.low %v9222_v37, %v9234_v39  ;;  %v8167_v37 = vadd.f32 %v22605_v13, %v8124_v17  ;;  %v9174_v39 = vld [vmem:[#allocation8 + $0x6e0] sm:$0xff] }
 0xa8b   :  { %16132 = vmatpush2.bf16.xpose.msra.mxu1 %v18975_v33  ;;  %16090 = vmatprep.subr.bf16.mxu0 %v18950_v14  ;;  %v7999_v33 = vadd.f32 %v22600_v1, %v7956_v50  ;;  %v18903_v14 = vcombine.low %v9223_v18, %v9235_v62  ;;  %v9186_v18 = vld [vmem:[#allocation8 + $0x740] sm:$0xff]  ;;  %v9129_v1 = vld [vmem:[#allocation8 + $0x578] sm:$0xff] }
 0xa8c   :  { %16133 = vmatprep.subr.bf16.mxu1 %v18952_v43  ;;  %v18878_v43 = vcombine.high %v9198_v55, %v9210_v49  ;;  %v18854_v50 = vcombine.high %v9174_v39, %v9186_v18  ;;  %v8753_v15 = vmul.f32 0.70710677, %v8167_v37  ;;  %v18830_v55 = vcombine.high %v9150_v27, %v9162_v30 }
 0xa8d   :  { %v18832_v49 = vcombine.high %v9151_v0, %v9163_v45 }
 0xa92   :  { %16091 = vmatpush2.bf16.xpose.msra.mxu0 %v18949_v46  ;;  %v22602_v46 = vld [vmem:[#allocation39_spill] sm:$0xff] }
 0xa93   :  { %16134 = vmatpush2.bf16.xpose.msra.mxu1 %v18951_v10  ;;  %16092 = vmatprep.subr.bf16.mxu0 %v18926_v57  ;;  %v8042_v10 = vadd.f32 %v22602_v46, %v7999_v33  ;;  %v22603_v57 = vld [vmem:[#allocation43_spill] sm:$0xff] }
 0xa94   :  { %16135 = vmatprep.subr.bf16.mxu1 %v18928_v34  ;;  %v8171_v34 = vadd.f32 %v22603_v57, %v8128_v42  ;;  %v18853_v42 = vcombine.low %v9174_v39, %v9186_v18  ;;  %v9141_v33 = vld [vmem:[#allocation8 + $0x5d8] sm:$0xff] }
 0xa95   :  { %v8775_v62 = vmul.f32 0.70710677, %v8042_v10  ;;  %v18812_v46 = vcombine.high %v9129_v1, %v9141_v33  ;;  %v8726_v18 = vmul.f32 0.5, %v8042_v10 }
 0xa97   :  { %21593 = verf.f32 %v8775_v62 }
 0xa9a   :  { %16093 = vmatpush2.bf16.xpose.msra.mxu0 %v18925_v28  ;;  %v22604_v28 = vld [vmem:[#allocation35_spill] sm:$0xff] }
 0xa9b   :  { %16136 = vmatpush2.bf16.xpose.msra.mxu1 %v18927_v48  ;;  %16094 = vmatprep.subr.bf16.mxu0 %v18902_v29  ;;  %v8038_v48 = vadd.f32 %v22604_v28, %v7995_v19  ;;  %v9175_v29 = vld [vmem:[#allocation8 + $0x6e8] sm:$0xff] }
 0xa9c   :  { %16137 = vmatprep.subr.bf16.mxu1 %v18904_v5  ;;  %v8777_v5 = vmul.f32 0.70710677, %v8171_v34  ;;  %v18856_v7 = vcombine.high %v9175_v29, %v9187_v21 }
 0xa9d   :  { %v8751_v22 = vmul.f32 0.70710677, %v8038_v48 }
 0xa9e   :  { %21595 = verf.f32 %v8777_v5 }
 0xa9f   :  { %21597 = verf.f32 %v8751_v22  ;;  %v9116_v22 = vld [vmem:[#allocation8 + $0x510] sm:$0xff] }
 0xaa0   :  { %21599 = verf.f32 %v8753_v15  ;;  %v18809_v15 = vcombine.low %v9128_v36, %v9140_v51  ;;  %v9081_v36 = vld [vmem:[#allocation8 + $0x3f8] sm:$0xff] }
 0xaa1   :  { %v9093_v51 = vld [vmem:[#allocation8 + $0x458] sm:$0xff] }
 0xaa2   :  { %16095 = vmatpush2.bf16.xpose.msra.mxu0 %v18901_v9  ;;  %v18855_v9 = vcombine.low %v9175_v29, %v9187_v21  ;;  %v8728_v29 = vmul.f32 0.5, %v8171_v34  ;;  %v8702_v21 = vmul.f32 0.5, %v8038_v48  ;;  %v22607_v34 = vld [vmem:[#allocation30_spill] sm:$0xff] }
 0xaa3   :  { %16138 = vmatpush2.bf16.xpose.msra.mxu1 %v18903_v14  ;;  %16096 = vmatprep.subr.bf16.mxu0 %v18878_v43  ;;  %v18829_v43 = vcombine.low %v9150_v27, %v9162_v30  ;;  %v9117_v27 = vld [vmem:[#allocation8 + $0x518] sm:$0xff] }
 0xaa4   :  { %16139 = vmatprep.subr.bf16.mxu1 %v18880_v32  ;;  %v21594_v14 = vpop.eup %21593  ;;  %v18831_v32 = vcombine.low %v9151_v0, %v9163_v45  ;;  %v18811_v0 = vcombine.low %v9129_v1, %v9141_v33 }
 0xaa5   :  { %v8871_v28 = vadd.f32 1.0, %v21594_v14 }
 0xaa7   :  { %v8919_v5 = vmul.f32 %v8871_v28, %v8726_v18  ;;  %v9044_v18 = vld [vmem:[#allocation8 + $0x2d0] sm:$0xff] }
 0xaaa   :  { %16097 = vmatpush2.bf16.xpose.msra.mxu0 %v18877_v12  ;;  %v9104_v12 = vld [vmem:[#allocation8 + $0x4b0] sm:$0xff] }
 0xaab   :  { %16140 = vmatpush2.bf16.xpose.msra.mxu1 %v18879_v38  ;;  %16098 = vmatprep.subr.bf16.mxu0 %v18854_v50  ;;  %v21596_v17 = vpop.eup %21595  ;;  %v8704_v38 = vmul.f32 0.5, %v8167_v37  ;;  %v9080_v37 = vld [vmem:[#allocation8 + $0x3f0] sm:$0xff]  ;;  %v18785_v1 = vcombine.low %v9104_v12, %v9116_v22 }
 0xaac   :  { %16141 = vmatprep.subr.bf16.mxu1 %v18856_v7  ;;  %v21598_v19 = vpop.eup %21597  ;;  %v8873_v13 = vadd.f32 1.0, %v21596_v17  ;;  %v9105_v7 = vld [vmem:[#allocation8 + $0x4b8] sm:$0xff]  ;;  %v9056_v17 = vld [vmem:[#allocation8 + $0x330] sm:$0xff] }
 0xaad   :  { %v21600_v57 = vpop.eup %21599  ;;  %v8847_v39 = vadd.f32 1.0, %v21598_v19  ;;  %v18787_v33 = vcombine.low %v9105_v7, %v9117_v27  ;;  %v9069_v19 = vld [vmem:[#allocation8 + $0x398] sm:$0xff] }
 0xaae   :  { %v8849_v62 = vadd.f32 1.0, %v21600_v57  ;;  %v8921_v50 = vmul.f32 %v8873_v13, %v8728_v29  ;;  %v18763_v57 = vcombine.low %v9081_v36, %v9093_v51  ;;  %v9045_v29 = vld [vmem:[#allocation8 + $0x2d8] sm:$0xff] }
 0xaaf   :  { %v8895_v30 = vmul.f32 %v8847_v39, %v8702_v21  ;;  %v9032_v39 = vld [vmem:[#allocation8 + $0x270] sm:$0xff] }
 0xab0   :  { %v8897_v45 = vmul.f32 %v8849_v62, %v8704_v38  ;;  %v9033_v62 = vld [vmem:[#allocation8 + $0x278] sm:$0xff]  ;;  %v9008_v38 = vld [vmem:[#allocation8 + $0x1b0] sm:$0xff] }
 0xab1   :  { %v22241_v10 = vpack.c.bf16 %v8919_v5, %v8895_v30  ;;  %v18715_v30 = vcombine.low %v9033_v62, %v9045_v29 }
 0xab2   :  { %16099 = vmatpush2.bf16.xpose.msra.mxu0 %v18853_v42  ;;  %v18786_v42 = vcombine.high %v9104_v12, %v9116_v22  ;;  %v22244_v48 = vpack.c.bf16 %v8921_v50, %v8897_v45  ;;  %v18714_v12 = vcombine.high %v9032_v39, %v9044_v18  ;;  %v18716_v22 = vcombine.high %v9033_v62, %v9045_v29  ;;  %v9020_v50 = vld [vmem:[#allocation8 + $0x210] sm:$0xff] }
 0xab3   :  { %16142 = vmatpush2.bf16.xpose.msra.mxu1 %v18855_v9  ;;  %16100 = vmatprep.subr.bf16.mxu0 %v18830_v55  ;;  %v22606_v9 = vld [vmem:[#allocation25_spill] sm:$0xff]  ;;  %v18788_v55 = vcombine.high %v9105_v7, %v9117_v27  ;;  %v9021_v7 = vld [vmem:[#allocation8 + $0x218] sm:$0xff]  ;;  %v18713_v27 = vcombine.low %v9032_v39, %v9044_v18 }
 0xab4   :  { %16143 = vmatprep.subr.bf16.mxu1 %v18832_v49  ;;  %v9092_v49 = vld [vmem:[#allocation8 + $0x450] sm:$0xff]  ;;  %v9321_v39 = vld [vmem:[#allocation8 + $0xb78] sm:$0xff] }
 0xab5   :  { %v18762_v14 = vcombine.high %v9080_v37, %v9092_v49  ;;  %v9333_v18 = vld [vmem:[#allocation8 + $0xbd8] sm:$0xff] }
 0xaba   :  { %16101 = vmatpush2.bf16.xpose.msra.mxu0 %v18829_v43  ;;  %v18764_v43 = vcombine.high %v9081_v36, %v9093_v51  ;;  %v18689_v36 = vcombine.low %v9008_v38, %v9020_v50 }
 0xabb   :  { %16144 = vmatpush2.bf16.xpose.msra.mxu1 %v18831_v32  ;;  %16156 = vmatprep.subr.bf16.mxu0 %v18810_v6  ;;  %v9068_v32 = vld [vmem:[#allocation8 + $0x390] sm:$0xff]  ;;  %v9057_v6 = vld [vmem:[#allocation8 + $0x338] sm:$0xff] }
 0xabc   :  { %16199 = vmatprep.subr.bf16.mxu1 %v18812_v46  ;;  %v18761_v46 = vcombine.low %v9080_v37, %v9092_v49  ;;  %v18738_v28 = vcombine.high %v9056_v17, %v9068_v32  ;;  %v18740_v13 = vcombine.high %v9057_v6, %v9069_v19  ;;  %v18737_v21 = vcombine.low %v9056_v17, %v9068_v32  ;;  %v8985_v37 = vld [vmem:[#allocation8 + $0xf8] sm:$0xff] }
 0xabd   :  { %v18739_v5 = vcombine.low %v9057_v6, %v9069_v19  ;;  %v8997_v49 = vld [vmem:[#allocation8 + $0x158] sm:$0xff] }
 0xabe   :  { %v8961_v17 = vld [vmem:[#allocation8 + $0x38] sm:$0xff]  ;;  %v18667_v19 = vcombine.low %v8985_v37, %v8997_v49 }
 0xabf   :  { %v8973_v32 = vld [vmem:[#allocation8 + $0x98] sm:$0xff] }
 0xac0   :  { %v18643_v29 = vcombine.low %v8961_v17, %v8973_v32 }
 0xac1   :  { %16103 = vmatmul.mubr.bf16.vlgmr.msra.gmra.mxu0 %v22606_v9 }
 0xac2   :  { %16146 = vmatmul.mubr.bf16.vlgmr.msra.gmra.mxu1 %v22607_v34  ;;  %16157 = vmatpush1.bf16.xpose.msra.mxu0 %v18809_v15  ;;  %v9009_v15 = vld [vmem:[#allocation8 + $0x1b8] sm:$0xff] }
 0xac3   :  { %16188 = vmatprep.mubr.bf16.mxu0 %v22241_v10  ;;  %16200 = vmatpush1.bf16.xpose.msra.mxu1 %v18811_v0  ;;  %v18690_v0 = vcombine.high %v9008_v38, %v9020_v50  ;;  %v18692_v45 = vcombine.high %v9009_v15, %v9021_v7  ;;  %v18691_v51 = vcombine.low %v9009_v15, %v9021_v7  ;;  %v9297_v38 = vld [vmem:[#allocation8 + $0xab8] sm:$0xff] }
 0xac4   :  { %16231 = vmatprep.mubr.bf16.mxu1 %v22244_v48  ;;  %16158 = vmatprep.subr.bf16.mxu0 %v18786_v42  ;;  %v8984_v42 = vld [vmem:[#allocation8 + $0xf0] sm:$0xff]  ;;  %v9309_v50 = vld [vmem:[#allocation8 + $0xb18] sm:$0xff]  ;;  %v19003_v7 = vcombine.low %v9321_v39, %v9333_v18 }
 0xac5   :  { %16201 = vmatprep.subr.bf16.mxu1 %v18788_v55  ;;  %v8996_v55 = vld [vmem:[#allocation8 + $0x150] sm:$0xff] }
 0xac6   :  { %v18665_v6 = vcombine.low %v8984_v42, %v8996_v55 }
 0xaca   :  { %16159 = vmatpush1.bf16.xpose.msra.mxu0 %v18785_v1  ;;  %v18666_v1 = vcombine.high %v8984_v42, %v8996_v55  ;;  %v9273_v42 = vld [vmem:[#allocation8 + $0x9f8] sm:$0xff] }
 0xacb   :  { %16202 = vmatpush1.bf16.xpose.msra.mxu1 %v18787_v33  ;;  %16160 = vmatprep.subr.bf16.mxu0 %v18762_v14  ;;  %v18668_v33 = vcombine.high %v8985_v37, %v8997_v49  ;;  %v8960_v14 = vld [vmem:[#allocation8 + $0x30] sm:$0xff]  ;;  %v9285_v55 = vld [vmem:[#allocation8 + $0xa58] sm:$0xff]  ;;  %v18979_v49 = vcombine.low %v9297_v38, %v9309_v50 }
 0xacc   :  { %16203 = vmatprep.subr.bf16.mxu1 %v18764_v43  ;;  %v8972_v43 = vld [vmem:[#allocation8 + $0x90] sm:$0xff] }
 0xacd   :  { %v18641_v62 = vcombine.low %v8960_v14, %v8972_v43 }
 0xad2   :  { %16161 = vmatpush1.bf16.xpose.msra.mxu0 %v18761_v46  ;;  %v18642_v46 = vcombine.high %v8960_v14, %v8972_v43  ;;  %v9249_v14 = vld [vmem:[#allocation8 + $0x938] sm:$0xff] }
 0xad3   :  { %16204 = vmatpush1.bf16.xpose.msra.mxu1 %v18763_v57  ;;  %16162 = vmatprep.subr.bf16.mxu0 %v18738_v28  ;;  %v18644_v57 = vcombine.high %v8961_v17, %v8973_v32  ;;  %v9320_v28 = vld [vmem:[#allocation8 + $0xb70] sm:$0xff]  ;;  %v9261_v43 = vld [vmem:[#allocation8 + $0x998] sm:$0xff]  ;;  %v18955_v32 = vcombine.low %v9273_v42, %v9285_v55 }
 0xad4   :  { %16205 = vmatprep.subr.bf16.mxu1 %v18740_v13  ;;  %v9332_v13 = vld [vmem:[#allocation8 + $0xbd0] sm:$0xff] }
 0xad5   :  { %v19001_v15 = vcombine.low %v9320_v28, %v9332_v13 }
 0xada   :  { %16163 = vmatpush1.bf16.xpose.msra.mxu0 %v18737_v21  ;;  %v19002_v21 = vcombine.high %v9320_v28, %v9332_v13  ;;  %v9225_v28 = vld [vmem:[#allocation8 + $0x878] sm:$0xff] }
 0xadb   :  { %16206 = vmatpush1.bf16.xpose.msra.mxu1 %v18739_v5  ;;  %16164 = vmatprep.subr.bf16.mxu0 %v18714_v12  ;;  %v19004_v5 = vcombine.high %v9321_v39, %v9333_v18  ;;  %v9296_v12 = vld [vmem:[#allocation8 + $0xab0] sm:$0xff]  ;;  %v9237_v13 = vld [vmem:[#allocation8 + $0x8d8] sm:$0xff]  ;;  %v18931_v18 = vcombine.low %v9249_v14, %v9261_v43 }
 0xadc   :  { %16207 = vmatprep.subr.bf16.mxu1 %v18716_v22  ;;  %v9308_v22 = vld [vmem:[#allocation8 + $0xb10] sm:$0xff] }
 0xadd   :  { %v18977_v37 = vcombine.low %v9296_v12, %v9308_v22 }
 0xae2   :  { %16165 = vmatpush1.bf16.xpose.msra.mxu0 %v18713_v27  ;;  %v18978_v27 = vcombine.high %v9296_v12, %v9308_v22  ;;  %v22608_v22 = vld [vmem:[#allocation46_spill] sm:$0xff] }
 0xae3   :  { %16208 = vmatpush1.bf16.xpose.msra.mxu1 %v18715_v30  ;;  %16166 = vmatprep.subr.bf16.mxu0 %v18690_v0  ;;  %v18980_v30 = vcombine.high %v9297_v38, %v9309_v50  ;;  %v9272_v0 = vld [vmem:[#allocation8 + $0x9f0] sm:$0xff]  ;;  %v22609_v50 = vld [vmem:[#allocation52_spill] sm:$0xff] }
 0xae4   :  { %16209 = vmatprep.subr.bf16.mxu1 %v18692_v45  ;;  %v9284_v45 = vld [vmem:[#allocation8 + $0xa50] sm:$0xff] }
 0xae5   :  { %v18953_v17 = vcombine.low %v9272_v0, %v9284_v45 }
 0xaea   :  { %16167 = vmatpush1.bf16.xpose.msra.mxu0 %v18689_v36  ;;  %v18954_v36 = vcombine.high %v9272_v0, %v9284_v45  ;;  %v9201_v45 = vld [vmem:[#allocation8 + $0x7b8] sm:$0xff] }
 0xaeb   :  { %16210 = vmatpush1.bf16.xpose.msra.mxu1 %v18691_v51  ;;  %16168 = vmatprep.subr.bf16.mxu0 %v18666_v1  ;;  %v18956_v51 = vcombine.high %v9273_v42, %v9285_v55  ;;  %v9248_v1 = vld [vmem:[#allocation8 + $0x930] sm:$0xff]  ;;  %v9213_v42 = vld [vmem:[#allocation8 + $0x818] sm:$0xff] }
 0xaec   :  { %16211 = vmatprep.subr.bf16.mxu1 %v18668_v33  ;;  %v9260_v33 = vld [vmem:[#allocation8 + $0x990] sm:$0xff] }
 0xaed   :  { %v18929_v39 = vcombine.low %v9248_v1, %v9260_v33  ;;  %v22611_v55 = vld [vmem:[#allocation50_spill] sm:$0xff] }
 0xaf2   :  { %16169 = vmatpush1.bf16.xpose.msra.mxu0 %v18665_v6  ;;  %v18930_v6 = vcombine.high %v9248_v1, %v9260_v33  ;;  %v18907_v33 = vcombine.low %v9225_v28, %v9237_v13 }
 0xaf3   :  { %16212 = vmatpush1.bf16.xpose.msra.mxu1 %v18667_v19  ;;  %16170 = vmatprep.subr.bf16.mxu0 %v18642_v46  ;;  %v18932_v19 = vcombine.high %v9249_v14, %v9261_v43  ;;  %v9224_v46 = vld [vmem:[#allocation8 + $0x870] sm:$0xff] }
 0xaf4   :  { %16213 = vmatprep.subr.bf16.mxu1 %v18644_v57  ;;  %v9236_v57 = vld [vmem:[#allocation8 + $0x8d0] sm:$0xff] }
 0xafa   :  { %16171 = vmatpush1.bf16.xpose.msra.mxu0 %v18641_v62  ;;  %v18906_v62 = vcombine.high %v9224_v46, %v9236_v57 }
 0xafb   :  { %16214 = vmatpush1.bf16.xpose.msra.mxu1 %v18643_v29  ;;  %16172 = vmatprep.subr.bf16.mxu0 %v19002_v21  ;;  %v18908_v29 = vcombine.high %v9225_v28, %v9237_v13  ;;  %v22248_v21 = vld [vmem:[#allocation7 + $0x10] sm:$0xff]  ;;  %v9188_v28 = vld [vmem:[#allocation8 + $0x750] sm:$0xff] }
 0xafc   :  { %16215 = vmatprep.subr.bf16.mxu1 %v19004_v5  ;;  %v1332_v5 = vrot.slane %v22248_v21, %v22114_v59  ;;  %v1340_v12 = vrot.slane %v22248_v21, %v22117_v20 }
 0xafe   :  { %v8214_v38 = vadd.f32 %v22608_v22, %v1332_v5 }
 0xb02   :  { %16173 = vmatpush2.bf16.xpose.msra.mxu0 %v19001_v15  ;;  %v8343_v15 = vadd.f32 %v22609_v50, %v1340_v12 }
 0xb03   :  { %16216 = vmatpush2.bf16.xpose.msra.mxu1 %v19003_v7  ;;  %16174 = vmatprep.subr.bf16.mxu0 %v18978_v27  ;;  %v9200_v7 = vld [vmem:[#allocation8 + $0x7b0] sm:$0xff] }
 0xb04   :  { %16217 = vmatprep.subr.bf16.mxu1 %v18980_v30  ;;  %v9212_v27 = vld [vmem:[#allocation8 + $0x810] sm:$0xff]  ;;  %v22610_v30 = vld [vmem:[#allocation44_spill] sm:$0xff] }
 0xb05   :  { %v8210_v0 = vadd.f32 %v22610_v30, %v1332_v5  ;;  %v18882_v14 = vcombine.high %v9200_v7, %v9212_v27 }
 0xb0a   :  { %16175 = vmatpush2.bf16.xpose.msra.mxu0 %v18977_v37  ;;  %v8339_v37 = vadd.f32 %v22611_v55, %v1340_v12  ;;  %v9177_v12 = vld [vmem:[#allocation8 + $0x6f8] sm:$0xff] }
 0xb0b   :  { %16218 = vmatpush2.bf16.xpose.msra.mxu1 %v18979_v49  ;;  %16176 = vmatprep.subr.bf16.mxu0 %v18954_v36  ;;  %v8386_v49 = vadd.f32 %v22101_v31, %v8343_v15  ;;  %v18905_v36 = vcombine.low %v9224_v46, %v9236_v57  ;;  %v22617_v31 = vld [vmem:[#allocation53_spill] sm:$0xff]  ;;  %v18883_v15 = vcombine.low %v9201_v45, %v9213_v42 }
 0xb0c   :  { %16219 = vmatprep.subr.bf16.mxu1 %v18956_v51  ;;  %v22612_v51 = vld [vmem:[#allocation49_spill] sm:$0xff]  ;;  %v8382_v43 = vadd.f32 %v22089_v63, %v8339_v37  ;;  %v9189_v63 = vld [vmem:[#allocation8 + $0x758] sm:$0xff] }
 0xb0d   :  { %v8257_v1 = vadd.f32 %v22612_v51, %v8214_v38  ;;  %v9176_v57 = vld [vmem:[#allocation8 + $0x6f0] sm:$0xff]  ;;  %v18881_v38 = vcombine.low %v9200_v7, %v9212_v27  ;;  %v18860_v55 = vcombine.high %v9177_v12, %v9189_v63  ;;  %v9165_v51 = vld [vmem:[#allocation8 + $0x698] sm:$0xff] }
 0xb0e   :  { %v8425_v46 = vadd.f32 %v22617_v31, %v8382_v43  ;;  %v18858_v30 = vcombine.high %v9176_v57, %v9188_v28  ;;  %v9152_v37 = vld [vmem:[#allocation8 + $0x630] sm:$0xff]  ;;  %v9143_v43 = vld [vmem:[#allocation8 + $0x5e8] sm:$0xff] }
 0xb12   :  { %16177 = vmatpush2.bf16.xpose.msra.mxu0 %v18953_v17  ;;  %v18884_v17 = vcombine.high %v9201_v45, %v9213_v42  ;;  %v9130_v45 = vld [vmem:[#allocation8 + $0x580] sm:$0xff] }
 0xb13   :  { %16220 = vmatpush2.bf16.xpose.msra.mxu1 %v18955_v32  ;;  %16178 = vmatprep.subr.bf16.mxu0 %v18930_v6  ;;  %v22613_v32 = vld [vmem:[#allocation45_spill] sm:$0xff]  ;;  %v9142_v42 = vld [vmem:[#allocation8 + $0x5e0] sm:$0xff] }
 0xb14   :  { %16221 = vmatprep.subr.bf16.mxu1 %v18932_v19  ;;  %v8253_v6 = vadd.f32 %v22613_v32, %v8210_v0  ;;  %v22614_v19 = vld [vmem:[#allocation51_spill] sm:$0xff]  ;;  %v8757_v0 = vmul.f32 0.70710677, %v8425_v46 }
 0xb1a   :  { %16179 = vmatpush2.bf16.xpose.msra.mxu0 %v18929_v39  ;;  %v8300_v39 = vadd.f32 %v22614_v19, %v8257_v1  ;;  %v18857_v1 = vcombine.low %v9176_v57, %v9188_v28 }
 0xb1b   :  { %16222 = vmatpush2.bf16.xpose.msra.mxu1 %v18931_v18  ;;  %16180 = vmatprep.subr.bf16.mxu0 %v18906_v62  ;;  %v22615_v18 = vld [vmem:[#allocation55_spill] sm:$0xff] }
 0xb1c   :  { %16223 = vmatprep.subr.bf16.mxu1 %v18908_v29  ;;  %v8429_v62 = vadd.f32 %v22615_v18, %v8386_v49  ;;  %v22616_v29 = vld [vmem:[#allocation47_spill] sm:$0xff]  ;;  %v8779_v13 = vmul.f32 0.70710677, %v8300_v39  ;;  %v9164_v49 = vld [vmem:[#allocation8 + $0x690] sm:$0xff]  ;;  %v18814_v18 = vcombine.high %v9130_v45, %v9142_v42 }
 0xb1d   :  { %v8296_v5 = vadd.f32 %v22616_v29, %v8253_v6  ;;  %v18834_v7 = vcombine.high %v9152_v37, %v9164_v49  ;;  %v18833_v32 = vcombine.low %v9152_v37, %v9164_v49  ;;  %v18813_v49 = vcombine.low %v9130_v45, %v9142_v42  ;;  %v9094_v45 = vld [vmem:[#allocation8 + $0x460] sm:$0xff]  ;;  %v9083_v42 = vld [vmem:[#allocation8 + $0x408] sm:$0xff] }
 0xb1e   :  { %v8781_v22 = vmul.f32 0.70710677, %v8429_v62  ;;  %21601 = verf.f32 %v8779_v13 }
 0xb1f   :  { %v8755_v50 = vmul.f32 0.70710677, %v8296_v5 }
 0xb20   :  { %21603 = verf.f32 %v8781_v22 }
 0xb21   :  { %21605 = verf.f32 %v8755_v50  ;;  %v8706_v50 = vmul.f32 0.5, %v8296_v5 }
 0xb22   :  { %16181 = vmatpush2.bf16.xpose.msra.mxu0 %v18905_v36  ;;  %21607 = verf.f32 %v8757_v0  ;;  %v9153_v36 = vld [vmem:[#allocation8 + $0x638] sm:$0xff]  ;;  %v9118_v0 = vld [vmem:[#allocation8 + $0x520] sm:$0xff] }
 0xb23   :  { %16224 = vmatpush2.bf16.xpose.msra.mxu1 %v18907_v33  ;;  %16182 = vmatprep.subr.bf16.mxu0 %v18882_v14  ;;  %v18859_v33 = vcombine.low %v9177_v12, %v9189_v63  ;;  %v18836_v27 = vcombine.high %v9153_v36, %v9165_v51  ;;  %v9131_v14 = vld [vmem:[#allocation8 + $0x588] sm:$0xff]  ;;  %v18835_v19 = vcombine.low %v9153_v36, %v9165_v51  ;;  %v8730_v63 = vmul.f32 0.5, %v8300_v39 }
 0xb24   :  { %16225 = vmatprep.subr.bf16.mxu1 %v18884_v17  ;;  %v18816_v31 = vcombine.high %v9131_v14, %v9143_v43  ;;  %v9107_v36 = vld [vmem:[#allocation8 + $0x4c8] sm:$0xff] }
 0xb25   :  { %v9119_v51 = vld [vmem:[#allocation8 + $0x528] sm:$0xff] }
 0xb2a   :  { %16183 = vmatpush2.bf16.xpose.msra.mxu0 %v18881_v38  ;;  %v8732_v38 = vmul.f32 0.5, %v8429_v62  ;;  %v22619_v62 = vld [vmem:[#allocation42_spill] sm:$0xff] }
 0xb2b   :  { %16226 = vmatpush2.bf16.xpose.msra.mxu1 %v18883_v15  ;;  %16184 = vmatprep.subr.bf16.mxu0 %v18858_v30  ;;  %v21602_v17 = vpop.eup %21601  ;;  %v9106_v30 = vld [vmem:[#allocation8 + $0x4c0] sm:$0xff] }
 0xb2c   :  { %16227 = vmatprep.subr.bf16.mxu1 %v18860_v55  ;;  %v8875_v57 = vadd.f32 1.0, %v21602_v17  ;;  %v8708_v55 = vmul.f32 0.5, %v8425_v46  ;;  %v22618_v17 = vld [vmem:[#allocation36_spill] sm:$0xff] }
 0xb2d   :  { %v21604_v6 = vpop.eup %21603  ;;  %v9082_v46 = vld [vmem:[#allocation8 + $0x400] sm:$0xff] }
 0xb2e   :  { %v21606_v29 = vpop.eup %21605  ;;  %v8877_v28 = vadd.f32 1.0, %v21604_v6  ;;  %v8923_v15 = vmul.f32 %v8875_v57, %v8730_v63  ;;  %v18791_v6 = vcombine.low %v9107_v36, %v9119_v51  ;;  %v9071_v57 = vld [vmem:[#allocation8 + $0x3a8] sm:$0xff] }
 0xb2f   :  { %v21608_v13 = vpop.eup %21607  ;;  %v8851_v12 = vadd.f32 1.0, %v21606_v29  ;;  %v9058_v29 = vld [vmem:[#allocation8 + $0x340] sm:$0xff] }
 0xb30   :  { %v8853_v22 = vadd.f32 1.0, %v21608_v13  ;;  %v8925_v37 = vmul.f32 %v8877_v28, %v8732_v38  ;;  %v9059_v13 = vld [vmem:[#allocation8 + $0x348] sm:$0xff]  ;;  %v18765_v28 = vcombine.low %v9082_v46, %v9094_v45  ;;  %v9034_v38 = vld [vmem:[#allocation8 + $0x280] sm:$0xff] }
 0xb32   :  { %16185 = vmatpush2.bf16.xpose.msra.mxu0 %v18857_v1  ;;  %v8899_v1 = vmul.f32 %v8851_v12, %v8706_v50  ;;  %v9046_v50 = vld [vmem:[#allocation8 + $0x2e0] sm:$0xff] }
 0xb33   :  { %16228 = vmatpush2.bf16.xpose.msra.mxu1 %v18859_v33  ;;  %16186 = vmatprep.subr.bf16.mxu0 %v18834_v7  ;;  %v18815_v33 = vcombine.low %v9131_v14, %v9143_v43  ;;  %v8901_v7 = vmul.f32 %v8853_v22, %v8708_v55  ;;  %v9095_v14 = vld [vmem:[#allocation8 + $0x468] sm:$0xff]  ;;  %v18789_v43 = vcombine.low %v9106_v30, %v9118_v0 }
 0xb34   :  { %16229 = vmatprep.subr.bf16.mxu1 %v18836_v27  ;;  %v18790_v27 = vcombine.high %v9106_v30, %v9118_v0  ;;  %v22267_v39 = vpack.c.bf16 %v8923_v15, %v8899_v1  ;;  %v18767_v12 = vcombine.low %v9083_v42, %v9095_v14  ;;  %v18744_v22 = vcombine.high %v9059_v13, %v9071_v57  ;;  %v9035_v15 = vld [vmem:[#allocation8 + $0x288] sm:$0xff] }
 0xb35   :  { %v22270_v5 = vpack.c.bf16 %v8925_v37, %v8901_v7  ;;  %v9047_v30 = vld [vmem:[#allocation8 + $0x2e8] sm:$0xff]  ;;  %v18743_v55 = vcombine.low %v9059_v13, %v9071_v57  ;;  %v18718_v37 = vcombine.high %v9034_v38, %v9046_v50  ;;  %v18717_v7 = vcombine.low %v9034_v38, %v9046_v50  ;;  %v8974_v13 = vld [vmem:[#allocation8 + $0xa0] sm:$0xff] }
 0xb36   :  { %v9011_v1 = vld [vmem:[#allocation8 + $0x1c8] sm:$0xff]  ;;  %v9322_v50 = vld [vmem:[#allocation8 + $0xb80] sm:$0xff] }
 0xb37   :  { %v8963_v57 = vld [vmem:[#allocation8 + $0x48] sm:$0xff] }
 0xb3a   :  { %16187 = vmatpush2.bf16.xpose.msra.mxu0 %v18833_v32  ;;  %v18792_v32 = vcombine.high %v9107_v36, %v9119_v51  ;;  %v9010_v36 = vld [vmem:[#allocation8 + $0x1c0] sm:$0xff] }
 0xb3b   :  { %16230 = vmatpush2.bf16.xpose.msra.mxu1 %v18835_v19  ;;  %16242 = vmatprep.subr.bf16.mxu0 %v18814_v18  ;;  %v18766_v19 = vcombine.high %v9082_v46, %v9094_v45  ;;  %v18768_v18 = vcombine.high %v9083_v42, %v9095_v14  ;;  %v9022_v51 = vld [vmem:[#allocation8 + $0x220] sm:$0xff]  ;;  %v8987_v14 = vld [vmem:[#allocation8 + $0x108] sm:$0xff] }
 0xb3c   :  { %16285 = vmatprep.subr.bf16.mxu1 %v18816_v31  ;;  %v9070_v31 = vld [vmem:[#allocation8 + $0x3a0] sm:$0xff] }
 0xb3d   :  { %v18742_v63 = vcombine.high %v9058_v29, %v9070_v31  ;;  %v18741_v0 = vcombine.low %v9058_v29, %v9070_v31  ;;  %v8986_v45 = vld [vmem:[#allocation8 + $0x100] sm:$0xff] }
 0xb3e   :  { %v8998_v42 = vld [vmem:[#allocation8 + $0x160] sm:$0xff] }
 0xb3f   :  { %v8962_v31 = vld [vmem:[#allocation8 + $0x40] sm:$0xff] }
 0xb41   :  { %16189 = vmatmul.mubr.bf16.vlgmr.msra.gmra.mxu0 %v22618_v17 }
 0xb42   :  { %16232 = vmatmul.mubr.bf16.vlgmr.msra.gmra.mxu1 %v22619_v62  ;;  %16243 = vmatpush1.bf16.xpose.msra.mxu0 %v18813_v49  ;;  %v18720_v49 = vcombine.high %v9035_v15, %v9047_v30 }
 0xb43   :  { %16274 = vmatprep.mubr.bf16.mxu0 %v22267_v39  ;;  %16286 = vmatpush1.bf16.xpose.msra.mxu1 %v18815_v33  ;;  %v9023_v33 = vld [vmem:[#allocation8 + $0x228] sm:$0xff] }
 0xb44   :  { %16317 = vmatprep.mubr.bf16.mxu1 %v22270_v5  ;;  %16244 = vmatprep.subr.bf16.mxu0 %v18790_v27  ;;  %v18719_v27 = vcombine.low %v9035_v15, %v9047_v30  ;;  %v18696_v46 = vcombine.high %v9011_v1, %v9023_v33  ;;  %v9334_v15 = vld [vmem:[#allocation8 + $0xbe0] sm:$0xff]  ;;  %v9323_v30 = vld [vmem:[#allocation8 + $0xb88] sm:$0xff] }
 0xb45   :  { %16287 = vmatprep.subr.bf16.mxu1 %v18792_v32  ;;  %v18694_v32 = vcombine.high %v9010_v36, %v9022_v51 }
 0xb4a   :  { %16245 = vmatpush1.bf16.xpose.msra.mxu0 %v18789_v43  ;;  %v8999_v43 = vld [vmem:[#allocation8 + $0x168] sm:$0xff] }
 0xb4b   :  { %16288 = vmatpush1.bf16.xpose.msra.mxu1 %v18791_v6  ;;  %16246 = vmatprep.subr.bf16.mxu0 %v18766_v19  ;;  %v18693_v6 = vcombine.low %v9010_v36, %v9022_v51  ;;  %v18695_v19 = vcombine.low %v9011_v1, %v9023_v33  ;;  %v18672_v29 = vcombine.high %v8987_v14, %v8999_v43  ;;  %v9298_v51 = vld [vmem:[#allocation8 + $0xac0] sm:$0xff]  ;;  %v9299_v33 = vld [vmem:[#allocation8 + $0xac8] sm:$0xff] }
 0xb4c   :  { %16289 = vmatprep.subr.bf16.mxu1 %v18768_v18  ;;  %v18670_v18 = vcombine.high %v8986_v45, %v8998_v42  ;;  %v9310_v1 = vld [vmem:[#allocation8 + $0xb20] sm:$0xff] }
 0xb52   :  { %16247 = vmatpush1.bf16.xpose.msra.mxu0 %v18765_v28  ;;  %v8975_v28 = vld [vmem:[#allocation8 + $0xa8] sm:$0xff] }
 0xb53   :  { %16290 = vmatpush1.bf16.xpose.msra.mxu1 %v18767_v12  ;;  %16248 = vmatprep.subr.bf16.mxu0 %v18742_v63  ;;  %v18669_v12 = vcombine.low %v8986_v45, %v8998_v42  ;;  %v18671_v63 = vcombine.low %v8987_v14, %v8999_v43  ;;  %v18648_v38 = vcombine.high %v8963_v57, %v8975_v28  ;;  %v9274_v42 = vld [vmem:[#allocation8 + $0xa00] sm:$0xff]  ;;  %v9275_v43 = vld [vmem:[#allocation8 + $0xa08] sm:$0xff] }
 0xb54   :  { %16291 = vmatprep.subr.bf16.mxu1 %v18744_v22  ;;  %v18646_v22 = vcombine.high %v8962_v31, %v8974_v13  ;;  %v9286_v14 = vld [vmem:[#allocation8 + $0xa60] sm:$0xff] }
 0xb5a   :  { %16249 = vmatpush1.bf16.xpose.msra.mxu0 %v18741_v0  ;;  %v9335_v0 = vld [vmem:[#allocation8 + $0xbe8] sm:$0xff] }
 0xb5b   :  { %16292 = vmatpush1.bf16.xpose.msra.mxu1 %v18743_v55  ;;  %16250 = vmatprep.subr.bf16.mxu0 %v18718_v37  ;;  %v18645_v55 = vcombine.low %v8962_v31, %v8974_v13  ;;  %v18647_v37 = vcombine.low %v8963_v57, %v8975_v28  ;;  %v19008_v36 = vcombine.high %v9323_v30, %v9335_v0  ;;  %v9250_v13 = vld [vmem:[#allocation8 + $0x940] sm:$0xff]  ;;  %v9251_v28 = vld [vmem:[#allocation8 + $0x948] sm:$0xff] }
 0xb5c   :  { %16293 = vmatprep.subr.bf16.mxu1 %v18720_v49  ;;  %v19006_v49 = vcombine.high %v9322_v50, %v9334_v15  ;;  %v9262_v57 = vld [vmem:[#allocation8 + $0x9a0] sm:$0xff] }
 0xb62   :  { %16251 = vmatpush1.bf16.xpose.msra.mxu0 %v18717_v7  ;;  %v9311_v7 = vld [vmem:[#allocation8 + $0xb28] sm:$0xff] }
 0xb63   :  { %16294 = vmatpush1.bf16.xpose.msra.mxu1 %v18719_v27  ;;  %16252 = vmatprep.subr.bf16.mxu0 %v18694_v32  ;;  %v19005_v27 = vcombine.low %v9322_v50, %v9334_v15  ;;  %v19007_v32 = vcombine.low %v9323_v30, %v9335_v0  ;;  %v18984_v45 = vcombine.high %v9299_v33, %v9311_v7  ;;  %v9226_v15 = vld [vmem:[#allocation8 + $0x880] sm:$0xff]  ;;  %v9227_v0 = vld [vmem:[#allocation8 + $0x888] sm:$0xff] }
 0xb64   :  { %16295 = vmatprep.subr.bf16.mxu1 %v18696_v46  ;;  %v18982_v46 = vcombine.high %v9298_v51, %v9310_v1  ;;  %v9238_v30 = vld [vmem:[#allocation8 + $0x8e0] sm:$0xff] }
 0xb6a   :  { %16253 = vmatpush1.bf16.xpose.msra.mxu0 %v18693_v6  ;;  %v9287_v6 = vld [vmem:[#allocation8 + $0xa68] sm:$0xff] }
 0xb6b   :  { %16296 = vmatpush1.bf16.xpose.msra.mxu1 %v18695_v19  ;;  %16254 = vmatprep.subr.bf16.mxu0 %v18670_v18  ;;  %v18981_v19 = vcombine.low %v9298_v51, %v9310_v1  ;;  %v18983_v18 = vcombine.low %v9299_v33, %v9311_v7  ;;  %v18960_v31 = vcombine.high %v9275_v43, %v9287_v6 }
 0xb6c   :  { %16297 = vmatprep.subr.bf16.mxu1 %v18672_v29  ;;  %v18958_v29 = vcombine.high %v9274_v42, %v9286_v14  ;;  %v1348_v1 = vrot.slane %v22248_v21, %v22152_v3  ;;  %v1356_v33 = vrot.slane %v22248_v21, %v22155_v47  ;;  %v22624_v3 = vld [vmem:[#allocation16_spill] sm:$0xff] }
 0xb6e   :  { %v8472_v7 = vadd.f32 %v22145_v25, %v1348_v1 }
 0xb70   :  { %v8515_v47 = vadd.f32 %v22183_v26, %v8472_v7  ;;  %v9178_v26 = vld [vmem:[#allocation8 + $0x700] sm:$0xff] }
 0xb72   :  { %16255 = vmatpush1.bf16.xpose.msra.mxu0 %v18669_v12  ;;  %v9263_v12 = vld [vmem:[#allocation8 + $0x9a8] sm:$0xff] }
 0xb73   :  { %16298 = vmatpush1.bf16.xpose.msra.mxu1 %v18671_v63  ;;  %16256 = vmatprep.subr.bf16.mxu0 %v18646_v22  ;;  %v18957_v63 = vcombine.low %v9274_v42, %v9286_v14  ;;  %v18959_v22 = vcombine.low %v9275_v43, %v9287_v6  ;;  %v18936_v50 = vcombine.high %v9251_v28, %v9263_v12  ;;  %v22620_v42 = vld [vmem:[#allocation56_spill] sm:$0xff] }
 0xb74   :  { %16299 = vmatprep.subr.bf16.mxu1 %v18648_v38  ;;  %v18934_v38 = vcombine.high %v9250_v13, %v9262_v57  ;;  %v8468_v14 = vadd.f32 %v22620_v42, %v1348_v1  ;;  %v9203_v43 = vld [vmem:[#allocation8 + $0x7c8] sm:$0xff]  ;;  %v9133_v42 = vld [vmem:[#allocation8 + $0x598] sm:$0xff] }
 0xb75   :  { %v9215_v6 = vld [vmem:[#allocation8 + $0x828] sm:$0xff] }
 0xb76   :  { %v9167_v1 = vld [vmem:[#allocation8 + $0x6a8] sm:$0xff] }
 0xb7a   :  { %16257 = vmatpush1.bf16.xpose.msra.mxu0 %v18645_v55  ;;  %v9239_v55 = vld [vmem:[#allocation8 + $0x8e8] sm:$0xff] }
 0xb7b   :  { %16300 = vmatpush1.bf16.xpose.msra.mxu1 %v18647_v37  ;;  %16258 = vmatprep.subr.bf16.mxu0 %v19006_v49  ;;  %v18933_v37 = vcombine.low %v9250_v13, %v9262_v57  ;;  %v18935_v49 = vcombine.low %v9251_v28, %v9263_v12  ;;  %v18912_v51 = vcombine.high %v9227_v0, %v9239_v55  ;;  %v22621_v57 = vld [vmem:[#allocation57_spill] sm:$0xff]  ;;  %v8686_v12 = vpop.f32.mrf.mxu1 }
 0xb7c   :  { %16301 = vmatprep.subr.bf16.mxu1 %v19008_v36  ;;  %v18910_v36 = vcombine.high %v9226_v15, %v9238_v30  ;;  %v18911_v21 = vcombine.low %v9227_v0, %v9239_v55  ;;  %v18888_v13 = vcombine.high %v9203_v43, %v9215_v6  ;;  %v8558_v28 = vadd.f32 %v22188_v61, %v8515_v47 }
 0xb82   :  { %16259 = vmatpush2.bf16.xpose.msra.mxu0 %v19005_v27  ;;  %v8643_v27 = vpop.f32.mrf.mxu0 }
 0xb83   :  { %16302 = vmatpush2.bf16.xpose.msra.mxu1 %v19007_v32  ;;  %16260 = vmatprep.subr.bf16.mxu0 %v18982_v46  ;;  %v8601_v32 = vadd.f32 %v22190_v2, %v1356_v33  ;;  %v9202_v46 = vld [vmem:[#allocation8 + $0x7c0] sm:$0xff]  ;;  %v8511_v2 = vadd.f32 %v22621_v57, %v8468_v14  ;;  %v9145_v14 = vld [vmem:[#allocation8 + $0x5f8] sm:$0xff] }
 0xb84   :  { %16303 = vmatprep.subr.bf16.mxu1 %v18984_v45  ;;  %v9214_v45 = vld [vmem:[#allocation8 + $0x820] sm:$0xff] }
 0xb85   :  { %v18886_v25 = vcombine.high %v9202_v46, %v9214_v45  ;;  %v18885_v0 = vcombine.low %v9202_v46, %v9214_v45  ;;  %v9132_v46 = vld [vmem:[#allocation8 + $0x590] sm:$0xff] }
 0xb86   :  { %v9144_v45 = vld [vmem:[#allocation8 + $0x5f0] sm:$0xff] }
 0xb8a   :  { %16261 = vmatpush2.bf16.xpose.msra.mxu0 %v18981_v19  ;;  %v8597_v19 = vadd.f32 %v22185_v56, %v1356_v33 }
 0xb8b   :  { %16304 = vmatpush2.bf16.xpose.msra.mxu1 %v18983_v18  ;;  %16262 = vmatprep.subr.bf16.mxu0 %v18958_v29  ;;  %v8644_v18 = vadd.f32 %v8643_v27, %v8601_v32  ;;  %v18909_v29 = vcombine.low %v9226_v15, %v9238_v30  ;;  %v9179_v15 = vld [vmem:[#allocation8 + $0x708] sm:$0xff] }
 0xb8c   :  { %16305 = vmatprep.subr.bf16.mxu1 %v18960_v31  ;;  %v8640_v31 = vadd.f32 %v22192_v40, %v8597_v19  ;;  %v9191_v40 = vld [vmem:[#allocation8 + $0x768] sm:$0xff] }
 0xb8d   :  { %v18863_v7 = vcombine.low %v9179_v15, %v9191_v40 }
 0xb8e   :  { %v8683_v56 = vadd.f32 %v22194_v24, %v8640_v31  ;;  %v9166_v24 = vld [vmem:[#allocation8 + $0x6a0] sm:$0xff] }
 0xb92   :  { %16263 = vmatpush2.bf16.xpose.msra.mxu0 %v18957_v63  ;;  %v8687_v63 = vadd.f32 %v8686_v12, %v8644_v18 }
 0xb93   :  { %16306 = vmatpush2.bf16.xpose.msra.mxu1 %v18959_v22  ;;  %16264 = vmatprep.subr.bf16.mxu0 %v18934_v38  ;;  %v8554_v22 = vadd.f32 %v22148_v11, %v8511_v2  ;;  %v9190_v38 = vld [vmem:[#allocation8 + $0x760] sm:$0xff]  ;;  %v8734_v2 = vmul.f32 0.5, %v8558_v28 }
 0xb94   :  { %16307 = vmatprep.subr.bf16.mxu1 %v18936_v50  ;;  %v8783_v50 = vmul.f32 0.70710677, %v8558_v28  ;;  %v8785_v30 = vmul.f32 0.70710677, %v8687_v63  ;;  %v18862_v61 = vcombine.high %v9178_v26, %v9190_v38  ;;  %v9154_v11 = vld [vmem:[#allocation8 + $0x640] sm:$0xff]  ;;  %v18861_v33 = vcombine.low %v9178_v26, %v9190_v38 }
 0xb95   :  { %v8759_v55 = vmul.f32 0.70710677, %v8554_v22  ;;  %v18838_v27 = vcombine.high %v9154_v11, %v9166_v24  ;;  %v8736_v26 = vmul.f32 0.5, %v8687_v63  ;;  %v8710_v38 = vmul.f32 0.5, %v8554_v22  ;;  %v22623_v63 = vld [vmem:[#allocation54_spill] sm:$0xff] }
 0xb96   :  { %21609 = verf.f32 %v8783_v50 }
 0xb97   :  { %21611 = verf.f32 %v8785_v30  ;;  %v8712_v30 = vmul.f32 0.5, %v8683_v56 }
 0xb98   :  { %21613 = verf.f32 %v8759_v55  ;;  %v18817_v55 = vcombine.low %v9132_v46, %v9144_v45 }
 0xb9a   :  { %16265 = vmatpush2.bf16.xpose.msra.mxu0 %v18933_v37  ;;  %v18887_v37 = vcombine.low %v9203_v43, %v9215_v6  ;;  %v18837_v6 = vcombine.low %v9154_v11, %v9166_v24 }
 0xb9b   :  { %16308 = vmatpush2.bf16.xpose.msra.mxu1 %v18935_v49  ;;  %16266 = vmatprep.subr.bf16.mxu0 %v18910_v36  ;;  %v8761_v49 = vmul.f32 0.70710677, %v8683_v56  ;;  %v18864_v36 = vcombine.high %v9179_v15, %v9191_v40  ;;  %v9108_v15 = vld [vmem:[#allocation8 + $0x4d0] sm:$0xff] }
 0xb9c   :  { %16309 = vmatprep.subr.bf16.mxu1 %v18912_v51  ;;  %v9155_v51 = vld [vmem:[#allocation8 + $0x648] sm:$0xff]  ;;  %v9120_v40 = vld [vmem:[#allocation8 + $0x530] sm:$0xff] }
 0xb9d   :  { %21615 = verf.f32 %v8761_v49  ;;  %v18840_v32 = vcombine.high %v9155_v51, %v9167_v1  ;;  %v18839_v18 = vcombine.low %v9155_v51, %v9167_v1  ;;  %v18794_v24 = vcombine.high %v9108_v15, %v9120_v40  ;;  %v22622_v51 = vld [vmem:[#allocation48_spill] sm:$0xff]  ;;  %v9084_v56 = vld [vmem:[#allocation8 + $0x410] sm:$0xff] }
 0xba2   :  { %16267 = vmatpush2.bf16.xpose.msra.mxu0 %v18909_v29  ;;  %v18818_v29 = vcombine.high %v9132_v46, %v9144_v45 }
 0xba3   :  { %16310 = vmatpush2.bf16.xpose.msra.mxu1 %v18911_v21  ;;  %16268 = vmatprep.subr.bf16.mxu0 %v18886_v25  ;;  %v21610_v43 = vpop.eup %21609  ;;  %v18820_v21 = vcombine.high %v9133_v42, %v9145_v14 }
 0xba4   :  { %16311 = vmatprep.subr.bf16.mxu1 %v18888_v13  ;;  %v21612_v19 = vpop.eup %21611  ;;  %v8879_v31 = vadd.f32 1.0, %v21610_v43  ;;  %v9072_v43 = vld [vmem:[#allocation8 + $0x3b0] sm:$0xff] }
 0xba5   :  { %v21614_v47 = vpop.eup %21613  ;;  %v8881_v13 = vadd.f32 1.0, %v21612_v19  ;;  %v9073_v19 = vld [vmem:[#allocation8 + $0x3b8] sm:$0xff] }
 0xba6   :  { %v8855_v57 = vadd.f32 1.0, %v21614_v47  ;;  %v8927_v50 = vmul.f32 %v8879_v31, %v8734_v2  ;;  %v9048_v31 = vld [vmem:[#allocation8 + $0x2f0] sm:$0xff] }
 0xba8   :  { %v8903_v49 = vmul.f32 %v8855_v57, %v8710_v38  ;;  %v9049_v57 = vld [vmem:[#allocation8 + $0x2f8] sm:$0xff] }
 0xbaa   :  { %16269 = vmatpush2.bf16.xpose.msra.mxu0 %v18885_v0  ;;  %v21616_v25 = vpop.eup %21615  ;;  %v8929_v0 = vmul.f32 %v8881_v13, %v8736_v26  ;;  %v22289_v28 = vpack.c.bf16 %v8927_v50, %v8903_v49  ;;  %v9037_v13 = vld [vmem:[#allocation8 + $0x298] sm:$0xff]  ;;  %v9012_v50 = vld [vmem:[#allocation8 + $0x1d0] sm:$0xff] }
 0xbab   :  { %16312 = vmatpush2.bf16.xpose.msra.mxu1 %v18887_v37  ;;  %16270 = vmatprep.subr.bf16.mxu0 %v18862_v61  ;;  %v8857_v12 = vadd.f32 1.0, %v21616_v25  ;;  %v9109_v37 = vld [vmem:[#allocation8 + $0x4d8] sm:$0xff]  ;;  %v9036_v25 = vld [vmem:[#allocation8 + $0x290] sm:$0xff]  ;;  %v18724_v38 = vcombine.high %v9037_v13, %v9049_v57 }
 0xbac   :  { %16313 = vmatprep.subr.bf16.mxu1 %v18864_v36  ;;  %v9121_v61 = vld [vmem:[#allocation8 + $0x538] sm:$0xff]  ;;  %v18819_v36 = vcombine.low %v9133_v42, %v9145_v14  ;;  %v9060_v14 = vld [vmem:[#allocation8 + $0x350] sm:$0xff]  ;;  %v18722_v26 = vcombine.high %v9036_v25, %v9048_v31 }
 0xbad   :  { %v8905_v11 = vmul.f32 %v8857_v12, %v8712_v30  ;;  %v18796_v1 = vcombine.high %v9109_v37, %v9121_v61  ;;  %v18795_v46 = vcombine.low %v9109_v37, %v9121_v61  ;;  %v18746_v47 = vcombine.high %v9060_v14, %v9072_v43  ;;  %v9025_v30 = vld [vmem:[#allocation8 + $0x238] sm:$0xff]  ;;  %v8988_v49 = vld [vmem:[#allocation8 + $0x110] sm:$0xff] }
 0xbae   :  { %v18745_v2 = vcombine.low %v9060_v14, %v9072_v43 }
 0xbaf   :  { %v22292_v22 = vpack.c.bf16 %v8929_v0, %v8905_v11  ;;  %v18721_v0 = vcombine.low %v9036_v25, %v9048_v31  ;;  %v8989_v11 = vld [vmem:[#allocation8 + $0x118] sm:$0xff] }
 0xbb2   :  { %16271 = vmatpush2.bf16.xpose.msra.mxu0 %v18861_v33  ;;  %v9096_v33 = vld [vmem:[#allocation8 + $0x470] sm:$0xff] }
 0xbb3   :  { %16314 = vmatpush2.bf16.xpose.msra.mxu1 %v18863_v7  ;;  %16272 = vmatprep.subr.bf16.mxu0 %v18838_v27  ;;  %v9085_v7 = vld [vmem:[#allocation8 + $0x418] sm:$0xff]  ;;  %v18770_v45 = vcombine.high %v9084_v56, %v9096_v33 }
 0xbb4   :  { %16315 = vmatprep.subr.bf16.mxu1 %v18840_v32  ;;  %v9097_v27 = vld [vmem:[#allocation8 + $0x478] sm:$0xff]  ;;  %v18793_v32 = vcombine.low %v9108_v15, %v9120_v40  ;;  %v9024_v15 = vld [vmem:[#allocation8 + $0x230] sm:$0xff] }
 0xbb5   :  { %v18772_v42 = vcombine.high %v9085_v7, %v9097_v27  ;;  %v9013_v40 = vld [vmem:[#allocation8 + $0x1d8] sm:$0xff]  ;;  %v18698_v37 = vcombine.high %v9012_v50, %v9024_v15 }
 0xbb6   :  { %v18700_v61 = vcombine.high %v9013_v40, %v9025_v30 }
 0xbba   :  { %16273 = vmatpush2.bf16.xpose.msra.mxu0 %v18837_v6  ;;  %v9061_v6 = vld [vmem:[#allocation8 + $0x358] sm:$0xff] }
 0xbbb   :  { %16316 = vmatpush2.bf16.xpose.msra.mxu1 %v18839_v18  ;;  %16328 = vmatprep.subr.bf16.mxu0 %v18818_v29  ;;  %v18769_v18 = vcombine.low %v9084_v56, %v9096_v33  ;;  %v18771_v29 = vcombine.low %v9085_v7, %v9097_v27  ;;  %v18747_v12 = vcombine.low %v9061_v6, %v9073_v19  ;;  %v8964_v27 = vld [vmem:[#allocation8 + $0x50] sm:$0xff] }
 0xbbc   :  { %16371 = vmatprep.subr.bf16.mxu1 %v18820_v21  ;;  %v18748_v21 = vcombine.high %v9061_v6, %v9073_v19  ;;  %v18699_v56 = vcombine.low %v9013_v40, %v9025_v30  ;;  %v9324_v19 = vld [vmem:[#allocation8 + $0xb90] sm:$0xff] }
 0xbbd   :  { %v9276_v30 = vld [vmem:[#allocation8 + $0xa10] sm:$0xff] }
 0xbc1   :  { %16275 = vmatmul.mubr.bf16.vlgmr.msra.gmra.mxu0 %v22622_v51 }
 0xbc2   :  { %16318 = vmatmul.mubr.bf16.vlgmr.msra.gmra.mxu1 %v22623_v63  ;;  %16329 = vmatpush1.bf16.xpose.msra.mxu0 %v18817_v55  ;;  %v18723_v55 = vcombine.low %v9037_v13, %v9049_v57  ;;  %v9300_v57 = vld [vmem:[#allocation8 + $0xad0] sm:$0xff] }
 0xbc3   :  { %16360 = vmatprep.mubr.bf16.mxu0 %v22289_v28  ;;  %16372 = vmatpush1.bf16.xpose.msra.mxu1 %v18819_v36  ;;  %v9000_v36 = vld [vmem:[#allocation8 + $0x170] sm:$0xff] }
 0xbc4   :  { %16403 = vmatprep.mubr.bf16.mxu1 %v22292_v22  ;;  %16330 = vmatprep.subr.bf16.mxu0 %v18794_v24  ;;  %v9001_v24 = vld [vmem:[#allocation8 + $0x178] sm:$0xff]  ;;  %v18674_v33 = vcombine.high %v8988_v49, %v9000_v36 }
 0xbc5   :  { %16373 = vmatprep.subr.bf16.mxu1 %v18796_v1  ;;  %v18697_v1 = vcombine.low %v9012_v50, %v9024_v15  ;;  %v18676_v7 = vcombine.high %v8989_v11, %v9001_v24  ;;  %v18675_v14 = vcombine.low %v8989_v11, %v9001_v24  ;;  %v9252_v24 = vld [vmem:[#allocation8 + $0x950] sm:$0xff] }
 0xbca   :  { %16331 = vmatpush1.bf16.xpose.msra.mxu0 %v18793_v32  ;;  %v8976_v32 = vld [vmem:[#allocation8 + $0xb0] sm:$0xff] }
 0xbcb   :  { %16374 = vmatpush1.bf16.xpose.msra.mxu1 %v18795_v46  ;;  %16332 = vmatprep.subr.bf16.mxu0 %v18770_v45  ;;  %v8965_v46 = vld [vmem:[#allocation8 + $0x58] sm:$0xff]  ;;  %v18650_v43 = vcombine.high %v8964_v27, %v8976_v32 }
 0xbcc   :  { %16375 = vmatprep.subr.bf16.mxu1 %v18772_v42  ;;  %v8977_v45 = vld [vmem:[#allocation8 + $0xb8] sm:$0xff]  ;;  %v18673_v42 = vcombine.low %v8988_v49, %v9000_v36 }
 0xbcd   :  { %v18652_v6 = vcombine.high %v8965_v46, %v8977_v45  ;;  %v18651_v25 = vcombine.low %v8965_v46, %v8977_v45  ;;  %v9228_v45 = vld [vmem:[#allocation8 + $0x890] sm:$0xff] }
 0xbd2   :  { %16333 = vmatpush1.bf16.xpose.msra.mxu0 %v18769_v18  ;;  %v9336_v18 = vld [vmem:[#allocation8 + $0xbf0] sm:$0xff] }
 0xbd3   :  { %16376 = vmatpush1.bf16.xpose.msra.mxu1 %v18771_v29  ;;  %16334 = vmatprep.subr.bf16.mxu0 %v18746_v47  ;;  %v9325_v29 = vld [vmem:[#allocation8 + $0xb98] sm:$0xff]  ;;  %v19010_v31 = vcombine.high %v9324_v19, %v9336_v18 }
 0xbd4   :  { %16377 = vmatprep.subr.bf16.mxu1 %v18748_v21  ;;  %v9337_v47 = vld [vmem:[#allocation8 + $0xbf8] sm:$0xff]  ;;  %v18649_v21 = vcombine.low %v8964_v27, %v8976_v32 }
 0xbd5   :  { %v19012_v13 = vcombine.high %v9325_v29, %v9337_v47  ;;  %v19011_v50 = vcombine.low %v9325_v29, %v9337_v47  ;;  %v9204_v47 = vld [vmem:[#allocation8 + $0x7d0] sm:$0xff] }
 0xbda   :  { %16335 = vmatpush1.bf16.xpose.msra.mxu0 %v18745_v2  ;;  %v9312_v2 = vld [vmem:[#allocation8 + $0xb30] sm:$0xff] }
 0xbdb   :  { %16378 = vmatpush1.bf16.xpose.msra.mxu1 %v18747_v12  ;;  %16336 = vmatprep.subr.bf16.mxu0 %v18722_v26  ;;  %v9301_v12 = vld [vmem:[#allocation8 + $0xad8] sm:$0xff]  ;;  %v18986_v15 = vcombine.high %v9300_v57, %v9312_v2 }
 0xbdc   :  { %16379 = vmatprep.subr.bf16.mxu1 %v18724_v38  ;;  %v9313_v26 = vld [vmem:[#allocation8 + $0xb38] sm:$0xff]  ;;  %v19009_v38 = vcombine.low %v9324_v19, %v9336_v18 }
 0xbdd   :  { %v18988_v40 = vcombine.high %v9301_v12, %v9313_v26  ;;  %v18987_v49 = vcombine.low %v9301_v12, %v9313_v26  ;;  %v9180_v26 = vld [vmem:[#allocation8 + $0x710] sm:$0xff] }
 0xbe2   :  { %16337 = vmatpush1.bf16.xpose.msra.mxu0 %v18721_v0  ;;  %v9288_v0 = vld [vmem:[#allocation8 + $0xa70] sm:$0xff] }
 0xbe3   :  { %16380 = vmatpush1.bf16.xpose.msra.mxu1 %v18723_v55  ;;  %16338 = vmatprep.subr.bf16.mxu0 %v18698_v37  ;;  %v9277_v55 = vld [vmem:[#allocation8 + $0xa18] sm:$0xff]  ;;  %v18962_v36 = vcombine.high %v9276_v30, %v9288_v0 }
 0xbe4   :  { %16381 = vmatprep.subr.bf16.mxu1 %v18700_v61  ;;  %v9289_v37 = vld [vmem:[#allocation8 + $0xa78] sm:$0xff]  ;;  %v18985_v61 = vcombine.low %v9300_v57, %v9312_v2 }
 0xbe5   :  { %v18964_v11 = vcombine.high %v9277_v55, %v9289_v37  ;;  %v18963_v27 = vcombine.low %v9277_v55, %v9289_v37  ;;  %v9156_v37 = vld [vmem:[#allocation8 + $0x650] sm:$0xff] }
 0xbea   :  { %16339 = vmatpush1.bf16.xpose.msra.mxu0 %v18697_v1  ;;  %v9264_v1 = vld [vmem:[#allocation8 + $0x9b0] sm:$0xff] }
 0xbeb   :  { %16382 = vmatpush1.bf16.xpose.msra.mxu1 %v18699_v56  ;;  %16340 = vmatprep.subr.bf16.mxu0 %v18674_v33  ;;  %v9253_v56 = vld [vmem:[#allocation8 + $0x958] sm:$0xff]  ;;  %v18938_v32 = vcombine.high %v9252_v24, %v9264_v1 }
 0xbec   :  { %16383 = vmatprep.subr.bf16.mxu1 %v18676_v7  ;;  %v9265_v33 = vld [vmem:[#allocation8 + $0x9b8] sm:$0xff]  ;;  %v18961_v7 = vcombine.low %v9276_v30, %v9288_v0 }
 0xbed   :  { %v18940_v46 = vcombine.high %v9253_v56, %v9265_v33  ;;  %v18939_v19 = vcombine.low %v9253_v56, %v9265_v33  ;;  %v9506_v33 = vld [vmem:[#allocation8 + $0x1140] sm:$0xff] }
 0xbf2   :  { %16341 = vmatpush1.bf16.xpose.msra.mxu0 %v18673_v42  ;;  %v9240_v42 = vld [vmem:[#allocation8 + $0x8f0] sm:$0xff] }
 0xbf3   :  { %16384 = vmatpush1.bf16.xpose.msra.mxu1 %v18675_v14  ;;  %16342 = vmatprep.subr.bf16.mxu0 %v18650_v43  ;;  %v9229_v14 = vld [vmem:[#allocation8 + $0x898] sm:$0xff]  ;;  %v18914_v18 = vcombine.high %v9228_v45, %v9240_v42 }
 0xbf4   :  { %16385 = vmatprep.subr.bf16.mxu1 %v18652_v6  ;;  %v9241_v43 = vld [vmem:[#allocation8 + $0x8f8] sm:$0xff]  ;;  %v18937_v6 = vcombine.low %v9252_v24, %v9264_v1 }
 0xbf5   :  { %v18916_v29 = vcombine.high %v9229_v14, %v9241_v43  ;;  %v18915_v57 = vcombine.low %v9229_v14, %v9241_v43  ;;  %v9482_v43 = vld [vmem:[#allocation8 + $0x1080] sm:$0xff] }
 0xbfa   :  { %16343 = vmatpush1.bf16.xpose.msra.mxu0 %v18649_v21  ;;  %v9216_v21 = vld [vmem:[#allocation8 + $0x830] sm:$0xff] }
 0xbfb   :  { %16386 = vmatpush1.bf16.xpose.msra.mxu1 %v18651_v25  ;;  %16344 = vmatprep.subr.bf16.mxu0 %v19010_v31  ;;  %v9205_v25 = vld [vmem:[#allocation8 + $0x7d8] sm:$0xff]  ;;  %v18890_v2 = vcombine.high %v9204_v47, %v9216_v21 }
 0xbfc   :  { %16387 = vmatprep.subr.bf16.mxu1 %v19012_v13  ;;  %v9217_v31 = vld [vmem:[#allocation8 + $0x838] sm:$0xff]  ;;  %v18913_v13 = vcombine.low %v9228_v45, %v9240_v42 }
 0xbfd   :  { %v18892_v12 = vcombine.high %v9205_v25, %v9217_v31  ;;  %v18891_v30 = vcombine.low %v9205_v25, %v9217_v31  ;;  %v9458_v31 = vld [vmem:[#allocation8 + $0xfc0] sm:$0xff] }
 0xc02   :  { %16345 = vmatpush2.bf16.xpose.msra.mxu0 %v19009_v38  ;;  %v9192_v38 = vld [vmem:[#allocation8 + $0x770] sm:$0xff] }
 0xc03   :  { %16388 = vmatpush2.bf16.xpose.msra.mxu1 %v19011_v50  ;;  %16346 = vmatprep.subr.bf16.mxu0 %v18986_v15  ;;  %v9181_v50 = vld [vmem:[#allocation8 + $0x718] sm:$0xff]  ;;  %v18866_v0 = vcombine.high %v9180_v26, %v9192_v38 }
 0xc04   :  { %16389 = vmatprep.subr.bf16.mxu1 %v18988_v40  ;;  %v9193_v15 = vld [vmem:[#allocation8 + $0x778] sm:$0xff]  ;;  %v18889_v40 = vcombine.low %v9204_v47, %v9216_v21 }
 0xc05   :  { %v18868_v55 = vcombine.high %v9181_v50, %v9193_v15  ;;  %v18867_v24 = vcombine.low %v9181_v50, %v9193_v15  ;;  %v9434_v15 = vld [vmem:[#allocation8 + $0xf00] sm:$0xff] }
 0xc0a   :  { %16347 = vmatpush2.bf16.xpose.msra.mxu0 %v18985_v61  ;;  %v9168_v61 = vld [vmem:[#allocation8 + $0x6b0] sm:$0xff] }
 0xc0b   :  { %16390 = vmatpush2.bf16.xpose.msra.mxu1 %v18987_v49  ;;  %16348 = vmatprep.subr.bf16.mxu0 %v18962_v36  ;;  %v9157_v49 = vld [vmem:[#allocation8 + $0x658] sm:$0xff]  ;;  %v18842_v1 = vcombine.high %v9156_v37, %v9168_v61 }
 0xc0c   :  { %16391 = vmatprep.subr.bf16.mxu1 %v18964_v11  ;;  %v9169_v36 = vld [vmem:[#allocation8 + $0x6b8] sm:$0xff]  ;;  %v18865_v11 = vcombine.low %v9180_v26, %v9192_v38 }
 0xc0d   :  { %v18844_v56 = vcombine.high %v9157_v49, %v9169_v36  ;;  %v18843_v45 = vcombine.low %v9157_v49, %v9169_v36  ;;  %v9410_v36 = vld [vmem:[#allocation8 + $0xe40] sm:$0xff] }
 0xc12   :  { %16349 = vmatpush2.bf16.xpose.msra.mxu0 %v18961_v7  ;;  %v9518_v7 = vld [vmem:[#allocation8 + $0x11a0] sm:$0xff] }
 0xc13   :  { %16392 = vmatpush2.bf16.xpose.msra.mxu1 %v18963_v27  ;;  %16350 = vmatprep.subr.bf16.mxu0 %v18938_v32  ;;  %v9507_v27 = vld [vmem:[#allocation8 + $0x1148] sm:$0xff]  ;;  %v19182_v42 = vcombine.high %v9506_v33, %v9518_v7 }
 0xc14   :  { %16393 = vmatprep.subr.bf16.mxu1 %v18940_v46  ;;  %v9519_v32 = vld [vmem:[#allocation8 + $0x11a8] sm:$0xff]  ;;  %v18841_v46 = vcombine.low %v9156_v37, %v9168_v61 }
 0xc15   :  { %v19184_v14 = vcombine.high %v9507_v27, %v9519_v32  ;;  %v19183_v47 = vcombine.low %v9507_v27, %v9519_v32  ;;  %v9386_v32 = vld [vmem:[#allocation8 + $0xd80] sm:$0xff] }
 0xc1a   :  { %16351 = vmatpush2.bf16.xpose.msra.mxu0 %v18937_v6  ;;  %v9494_v6 = vld [vmem:[#allocation8 + $0x10e0] sm:$0xff] }
 0xc1b   :  { %16394 = vmatpush2.bf16.xpose.msra.mxu1 %v18939_v19  ;;  %16352 = vmatprep.subr.bf16.mxu0 %v18914_v18  ;;  %v19181_v19 = vcombine.low %v9506_v33, %v9518_v7  ;;  %v9483_v18 = vld [vmem:[#allocation8 + $0x1088] sm:$0xff]  ;;  %v19158_v21 = vcombine.high %v9482_v43, %v9494_v6 }
 0xc1c   :  { %16395 = vmatprep.subr.bf16.mxu1 %v18916_v29  ;;  %v9495_v29 = vld [vmem:[#allocation8 + $0x10e8] sm:$0xff] }
 0xc1d   :  { %v19160_v25 = vcombine.high %v9483_v18, %v9495_v29  ;;  %v19159_v26 = vcombine.low %v9483_v18, %v9495_v29  ;;  %v9362_v18 = vld [vmem:[#allocation8 + $0xcc0] sm:$0xff] }
 0xc1e   :  { %v9374_v29 = vld [vmem:[#allocation8 + $0xd20] sm:$0xff] }
 0xc22   :  { %16353 = vmatpush2.bf16.xpose.msra.mxu0 %v18913_v13  ;;  %v9470_v13 = vld [vmem:[#allocation8 + $0x1020] sm:$0xff] }
 0xc23   :  { %16396 = vmatpush2.bf16.xpose.msra.mxu1 %v18915_v57  ;;  %16354 = vmatprep.subr.bf16.mxu0 %v18890_v2  ;;  %v9459_v57 = vld [vmem:[#allocation8 + $0xfc8] sm:$0xff]  ;;  %v19134_v38 = vcombine.high %v9458_v31, %v9470_v13 }
 0xc24   :  { %16397 = vmatprep.subr.bf16.mxu1 %v18892_v12  ;;  %v9471_v2 = vld [vmem:[#allocation8 + $0x1028] sm:$0xff]  ;;  %v19157_v12 = vcombine.low %v9482_v43, %v9494_v6 }
 0xc25   :  { %v19136_v50 = vcombine.high %v9459_v57, %v9471_v2  ;;  %v19135_v37 = vcombine.low %v9459_v57, %v9471_v2  ;;  %v9338_v2 = vld [vmem:[#allocation8 + $0xc00] sm:$0xff] }
 0xc2a   :  { %16355 = vmatpush2.bf16.xpose.msra.mxu0 %v18889_v40  ;;  %v9446_v40 = vld [vmem:[#allocation8 + $0xf60] sm:$0xff] }
 0xc2b   :  { %16398 = vmatpush2.bf16.xpose.msra.mxu1 %v18891_v30  ;;  %16356 = vmatprep.subr.bf16.mxu0 %v18866_v0  ;;  %v9435_v30 = vld [vmem:[#allocation8 + $0xf08] sm:$0xff]  ;;  %v19110_v61 = vcombine.high %v9434_v15, %v9446_v40 }
 0xc2c   :  { %16399 = vmatprep.subr.bf16.mxu1 %v18868_v55  ;;  %v9447_v0 = vld [vmem:[#allocation8 + $0xf68] sm:$0xff]  ;;  %v19133_v55 = vcombine.low %v9458_v31, %v9470_v13  ;;  %v19038_v13 = vcombine.high %v9362_v18, %v9374_v29 }
 0xc2d   :  { %v19112_v49 = vcombine.high %v9435_v30, %v9447_v0  ;;  %v19111_v33 = vcombine.low %v9435_v30, %v9447_v0  ;;  %v9698_v0 = vld [vmem:[#allocation8 + $0x1740] sm:$0xff] }
 0xc32   :  { %16357 = vmatpush2.bf16.xpose.msra.mxu0 %v18865_v11  ;;  %v9422_v11 = vld [vmem:[#allocation8 + $0xea0] sm:$0xff] }
 0xc33   :  { %16400 = vmatpush2.bf16.xpose.msra.mxu1 %v18867_v24  ;;  %16358 = vmatprep.subr.bf16.mxu0 %v18842_v1  ;;  %v9411_v24 = vld [vmem:[#allocation8 + $0xe48] sm:$0xff]  ;;  %v19086_v7 = vcombine.high %v9410_v36, %v9422_v11 }
 0xc34   :  { %16401 = vmatprep.subr.bf16.mxu1 %v18844_v56  ;;  %v9423_v1 = vld [vmem:[#allocation8 + $0xea8] sm:$0xff]  ;;  %v19109_v56 = vcombine.low %v9434_v15, %v9446_v40 }
 0xc35   :  { %v19088_v27 = vcombine.high %v9411_v24, %v9423_v1  ;;  %v19087_v43 = vcombine.low %v9411_v24, %v9423_v1  ;;  %v9674_v1 = vld [vmem:[#allocation8 + $0x1680] sm:$0xff] }
 0xc3a   :  { %16359 = vmatpush2.bf16.xpose.msra.mxu0 %v18841_v46  ;;  %v9398_v46 = vld [vmem:[#allocation8 + $0xde0] sm:$0xff] }
 0xc3b   :  { %16402 = vmatpush2.bf16.xpose.msra.mxu1 %v18843_v45  ;;  %16414 = vmatprep.subr.bf16.mxu0 %v19182_v42  ;;  %v9387_v45 = vld [vmem:[#allocation8 + $0xd88] sm:$0xff]  ;;  %v19062_v6 = vcombine.high %v9386_v32, %v9398_v46 }
 0xc3c   :  { %16457 = vmatprep.subr.bf16.mxu1 %v19184_v14  ;;  %v9399_v42 = vld [vmem:[#allocation8 + $0xde8] sm:$0xff]  ;;  %v19085_v14 = vcombine.low %v9410_v36, %v9422_v11 }
 0xc3d   :  { %v19063_v31 = vcombine.low %v9387_v45, %v9399_v42 }
 0xc41   :  { %16361 = vmatmul.mubr.bf16.vlgmr.msra.gmra.mxu0 %v22163_v41 }
 0xc42   :  { %16404 = vmatmul.mubr.bf16.vlgmr.msra.gmra.mxu1 %v22207_v60  ;;  %16415 = vmatpush1.bf16.xpose.msra.mxu0 %v19181_v19  ;;  %v19064_v19 = vcombine.high %v9387_v45, %v9399_v42  ;;  %v9650_v42 = vld [vmem:[#allocation8 + $0x15c0] sm:$0xff] }
 0xc43   :  { %16446 = vmatprep.mubr.bf16.mxu0 %v22137_v16  ;;  %16458 = vmatpush1.bf16.xpose.msra.mxu1 %v19183_v47  ;;  %v9363_v47 = vld [vmem:[#allocation8 + $0xcc8] sm:$0xff] }
 0xc44   :  { %16489 = vmatprep.mubr.bf16.mxu1 %v22141_v44  ;;  %16416 = vmatprep.subr.bf16.mxu0 %v19158_v21  ;;  %v9375_v21 = vld [vmem:[#allocation8 + $0xd28] sm:$0xff] }
 0xc45   :  { %16459 = vmatprep.subr.bf16.mxu1 %v19160_v25  ;;  %v19061_v25 = vcombine.low %v9386_v32, %v9398_v46  ;;  %v19040_v57 = vcombine.high %v9363_v47, %v9375_v21  ;;  %v19039_v15 = vcombine.low %v9363_v47, %v9375_v21  ;;  %v9626_v21 = vld [vmem:[#allocation8 + $0x1500] sm:$0xff] }
 0xc4a   :  { %16417 = vmatpush1.bf16.xpose.msra.mxu0 %v19157_v12  ;;  %v9350_v12 = vld [vmem:[#allocation8 + $0xc60] sm:$0xff] }
 0xc4b   :  { %16460 = vmatpush1.bf16.xpose.msra.mxu1 %v19159_v26  ;;  %16418 = vmatprep.subr.bf16.mxu0 %v19134_v38  ;;  %v9339_v26 = vld [vmem:[#allocation8 + $0xc08] sm:$0xff]  ;;  %v19014_v40 = vcombine.high %v9338_v2, %v9350_v12 }
 0xc4c   :  { %16461 = vmatprep.subr.bf16.mxu1 %v19136_v50  ;;  %v9351_v38 = vld [vmem:[#allocation8 + $0xc68] sm:$0xff]  ;;  %v19037_v50 = vcombine.low %v9362_v18, %v9374_v29 }
 0xc4d   :  { %v19016_v30 = vcombine.high %v9339_v26, %v9351_v38  ;;  %v19015_v36 = vcombine.low %v9339_v26, %v9351_v38  ;;  %v9602_v38 = vld [vmem:[#allocation8 + $0x1440] sm:$0xff] }
 0xc52   :  { %16419 = vmatpush1.bf16.xpose.msra.mxu0 %v19133_v55  ;;  %v9710_v55 = vld [vmem:[#allocation8 + $0x17a0] sm:$0xff] }
 0xc53   :  { %16462 = vmatpush1.bf16.xpose.msra.mxu1 %v19135_v37  ;;  %16420 = vmatprep.subr.bf16.mxu0 %v19110_v61  ;;  %v9699_v37 = vld [vmem:[#allocation8 + $0x1748] sm:$0xff]  ;;  %v19374_v11 = vcombine.high %v9698_v0, %v9710_v55 }
 0xc54   :  { %16463 = vmatprep.subr.bf16.mxu1 %v19112_v49  ;;  %v9711_v61 = vld [vmem:[#allocation8 + $0x17a8] sm:$0xff]  ;;  %v19013_v49 = vcombine.low %v9338_v2, %v9350_v12 }
 0xc55   :  { %v19376_v24 = vcombine.high %v9699_v37, %v9711_v61  ;;  %v19375_v32 = vcombine.low %v9699_v37, %v9711_v61  ;;  %v9578_v61 = vld [vmem:[#allocation8 + $0x1380] sm:$0xff] }
 0xc5a   :  { %16421 = vmatpush1.bf16.xpose.msra.mxu0 %v19109_v56  ;;  %v9686_v56 = vld [vmem:[#allocation8 + $0x16e0] sm:$0xff] }
 0xc5b   :  { %16464 = vmatpush1.bf16.xpose.msra.mxu1 %v19111_v33  ;;  %16422 = vmatprep.subr.bf16.mxu0 %v19086_v7  ;;  %v9675_v33 = vld [vmem:[#allocation8 + $0x1688] sm:$0xff]  ;;  %v19350_v46 = vcombine.high %v9674_v1, %v9686_v56 }
 0xc5c   :  { %16465 = vmatprep.subr.bf16.mxu1 %v19088_v27  ;;  %v9687_v7 = vld [vmem:[#allocation8 + $0x16e8] sm:$0xff]  ;;  %v19373_v27 = vcombine.low %v9698_v0, %v9710_v55 }
 0xc5d   :  { %v19352_v45 = vcombine.high %v9675_v33, %v9687_v7  ;;  %v19351_v18 = vcombine.low %v9675_v33, %v9687_v7  ;;  %v9554_v7 = vld [vmem:[#allocation8 + $0x12c0] sm:$0xff] }
 0xc62   :  { %16423 = vmatpush1.bf16.xpose.msra.mxu0 %v19085_v14  ;;  %v9662_v14 = vld [vmem:[#allocation8 + $0x1620] sm:$0xff] }
 0xc63   :  { %16466 = vmatpush1.bf16.xpose.msra.mxu1 %v19087_v43  ;;  %16424 = vmatprep.subr.bf16.mxu0 %v19062_v6  ;;  %v9651_v43 = vld [vmem:[#allocation8 + $0x15c8] sm:$0xff]  ;;  %v19326_v29 = vcombine.high %v9650_v42, %v9662_v14 }
 0xc64   :  { %16467 = vmatprep.subr.bf16.mxu1 %v19064_v19  ;;  %v9663_v6 = vld [vmem:[#allocation8 + $0x1628] sm:$0xff]  ;;  %v19349_v19 = vcombine.low %v9674_v1, %v9686_v56 }
 0xc65   :  { %v19328_v47 = vcombine.high %v9651_v43, %v9663_v6  ;;  %v19327_v2 = vcombine.low %v9651_v43, %v9663_v6  ;;  %v9530_v6 = vld [vmem:[#allocation8 + $0x1200] sm:$0xff] }
 0xc6a   :  { %16425 = vmatpush1.bf16.xpose.msra.mxu0 %v19061_v25  ;;  %v9638_v25 = vld [vmem:[#allocation8 + $0x1560] sm:$0xff] }
 0xc6b   :  { %16468 = vmatpush1.bf16.xpose.msra.mxu1 %v19063_v31  ;;  %16426 = vmatprep.subr.bf16.mxu0 %v19038_v13  ;;  %v9627_v31 = vld [vmem:[#allocation8 + $0x1508] sm:$0xff]  ;;  %v19302_v12 = vcombine.high %v9626_v21, %v9638_v25 }
 0xc6c   :  { %16469 = vmatprep.subr.bf16.mxu1 %v19040_v57  ;;  %v9639_v13 = vld [vmem:[#allocation8 + $0x1568] sm:$0xff]  ;;  %v19325_v57 = vcombine.low %v9650_v42, %v9662_v14 }
 0xc6d   :  { %v19304_v26 = vcombine.high %v9627_v31, %v9639_v13  ;;  %v19303_v0 = vcombine.low %v9627_v31, %v9639_v13  ;;  %v9508_v13 = vld [vmem:[#allocation8 + $0x1150] sm:$0xff] }
 0xc72   :  { %16427 = vmatpush1.bf16.xpose.msra.mxu0 %v19037_v50  ;;  %v9614_v50 = vld [vmem:[#allocation8 + $0x14a0] sm:$0xff] }
 0xc73   :  { %16470 = vmatpush1.bf16.xpose.msra.mxu1 %v19039_v15  ;;  %16428 = vmatprep.subr.bf16.mxu0 %v19014_v40  ;;  %v9603_v15 = vld [vmem:[#allocation8 + $0x1448] sm:$0xff]  ;;  %v19278_v55 = vcombine.high %v9602_v38, %v9614_v50 }
 0xc74   :  { %16471 = vmatprep.subr.bf16.mxu1 %v19016_v30  ;;  %v9615_v40 = vld [vmem:[#allocation8 + $0x14a8] sm:$0xff]  ;;  %v19301_v30 = vcombine.low %v9626_v21, %v9638_v25 }
 0xc75   :  { %v19280_v37 = vcombine.high %v9603_v15, %v9615_v40  ;;  %v19279_v1 = vcombine.low %v9603_v15, %v9615_v40  ;;  %v22300_v40 = vpop.f32.mrf.mxu0 }
 0xc7a   :  { %16429 = vmatpush1.bf16.xpose.msra.mxu0 %v19013_v49  ;;  %v9590_v49 = vld [vmem:[#allocation8 + $0x13e0] sm:$0xff] }
 0xc7b   :  { %16472 = vmatpush1.bf16.xpose.msra.mxu1 %v19015_v36  ;;  %16430 = vmatprep.subr.bf16.mxu0 %v19374_v11  ;;  %v9579_v36 = vld [vmem:[#allocation8 + $0x1388] sm:$0xff]  ;;  %v19254_v56 = vcombine.high %v9578_v61, %v9590_v49 }
 0xc7c   :  { %16473 = vmatprep.subr.bf16.mxu1 %v19376_v24  ;;  %v9591_v11 = vld [vmem:[#allocation8 + $0x13e8] sm:$0xff]  ;;  %v19277_v24 = vcombine.low %v9602_v38, %v9614_v50 }
 0xc7d   :  { %v19256_v33 = vcombine.high %v9579_v36, %v9591_v11  ;;  %v19255_v42 = vcombine.low %v9579_v36, %v9591_v11  ;;  %v22304_v36 = vpop.f32.mrf.mxu0 }
 0xc82   :  { %16431 = vmatpush2.bf16.xpose.msra.mxu0 %v19373_v27  ;;  %v9566_v27 = vld [vmem:[#allocation8 + $0x1320] sm:$0xff] }
 0xc83   :  { %16474 = vmatpush2.bf16.xpose.msra.mxu1 %v19375_v32  ;;  %16432 = vmatprep.subr.bf16.mxu0 %v19350_v46  ;;  %v9555_v32 = vld [vmem:[#allocation8 + $0x12c8] sm:$0xff]  ;;  %v19230_v14 = vcombine.high %v9554_v7, %v9566_v27 }
 0xc84   :  { %16475 = vmatprep.subr.bf16.mxu1 %v19352_v45  ;;  %v9567_v46 = vld [vmem:[#allocation8 + $0x1328] sm:$0xff]  ;;  %v19253_v45 = vcombine.low %v9578_v61, %v9590_v49  ;;  %v9485_v61 = vld [vmem:[#allocation8 + $0x1098] sm:$0xff] }
 0xc85   :  { %v19232_v43 = vcombine.high %v9555_v32, %v9567_v46  ;;  %v19231_v21 = vcombine.low %v9555_v32, %v9567_v46  ;;  %v9497_v49 = vld [vmem:[#allocation8 + $0x10f8] sm:$0xff]  ;;  %v9472_v32 = vld [vmem:[#allocation8 + $0x1030] sm:$0xff] }
 0xc86   :  { %v9461_v46 = vld [vmem:[#allocation8 + $0xfd8] sm:$0xff] }
 0xc8a   :  { %16433 = vmatpush2.bf16.xpose.msra.mxu0 %v19349_v19  ;;  %v9542_v19 = vld [vmem:[#allocation8 + $0x1260] sm:$0xff] }
 0xc8b   :  { %16476 = vmatpush2.bf16.xpose.msra.mxu1 %v19351_v18  ;;  %16434 = vmatprep.subr.bf16.mxu0 %v19326_v29  ;;  %v9531_v18 = vld [vmem:[#allocation8 + $0x1208] sm:$0xff]  ;;  %v19206_v25 = vcombine.high %v9530_v6, %v9542_v19 }
 0xc8c   :  { %16477 = vmatprep.subr.bf16.mxu1 %v19328_v47  ;;  %v9543_v29 = vld [vmem:[#allocation8 + $0x1268] sm:$0xff]  ;;  %v19229_v47 = vcombine.low %v9554_v7, %v9566_v27  ;;  %v9460_v27 = vld [vmem:[#allocation8 + $0xfd0] sm:$0xff] }
 0xc8d   :  { %v19208_v31 = vcombine.high %v9531_v18, %v9543_v29  ;;  %v19207_v38 = vcombine.low %v9531_v18, %v9543_v29 }
 0xc92   :  { %16435 = vmatpush2.bf16.xpose.msra.mxu0 %v19325_v57  ;;  %v9520_v57 = vld [vmem:[#allocation8 + $0x11b0] sm:$0xff] }
 0xc93   :  { %16478 = vmatpush2.bf16.xpose.msra.mxu1 %v19327_v2  ;;  %16436 = vmatprep.subr.bf16.mxu0 %v19302_v12  ;;  %v9509_v2 = vld [vmem:[#allocation8 + $0x1158] sm:$0xff]  ;;  %v19186_v50 = vcombine.high %v9508_v13, %v9520_v57 }
 0xc94   :  { %16479 = vmatprep.subr.bf16.mxu1 %v19304_v26  ;;  %v9521_v12 = vld [vmem:[#allocation8 + $0x11b8] sm:$0xff]  ;;  %v19205_v26 = vcombine.low %v9530_v6, %v9542_v19  ;;  %v19138_v6 = vcombine.high %v9460_v27, %v9472_v32 }
 0xc95   :  { %v19188_v15 = vcombine.high %v9509_v2, %v9521_v12  ;;  %v19187_v11 = vcombine.low %v9509_v2, %v9521_v12  ;;  %v19137_v12 = vcombine.low %v9460_v27, %v9472_v32 }
 0xc9a   :  { %16437 = vmatpush2.bf16.xpose.msra.mxu0 %v19301_v30  ;;  %v22302_v30 = vpop.f32.mrf.mxu1 }
 0xc9b   :  { %16480 = vmatpush2.bf16.xpose.msra.mxu1 %v19303_v0  ;;  %16438 = vmatprep.subr.bf16.mxu0 %v19278_v55  ;;  %v9484_v0 = vld [vmem:[#allocation8 + $0x1090] sm:$0xff] }
 0xc9c   :  { %16481 = vmatprep.subr.bf16.mxu1 %v19280_v37  ;;  %v9496_v55 = vld [vmem:[#allocation8 + $0x10f0] sm:$0xff]  ;;  %v19185_v37 = vcombine.low %v9508_v13, %v9520_v57  ;;  %v9437_v13 = vld [vmem:[#allocation8 + $0xf18] sm:$0xff] }
 0xc9d   :  { %v9449_v57 = vld [vmem:[#allocation8 + $0xf78] sm:$0xff] }
 0xc9e   :  { %v19115_v32 = vcombine.low %v9437_v13, %v9449_v57 }
 0xca2   :  { %16439 = vmatpush2.bf16.xpose.msra.mxu0 %v19277_v24  ;;  %v22306_v24 = vpop.f32.mrf.mxu1 }
 0xca3   :  { %16482 = vmatpush2.bf16.xpose.msra.mxu1 %v19279_v1  ;;  %16440 = vmatprep.subr.bf16.mxu0 %v19254_v56  ;;  %v19162_v1 = vcombine.high %v9484_v0, %v9496_v55  ;;  %v19164_v56 = vcombine.high %v9485_v61, %v9497_v49 }
 0xca4   :  { %16483 = vmatprep.subr.bf16.mxu1 %v19256_v33  ;;  %v22310_v33 = vpop.f32.mrf.mxu0  ;;  %v22313_v7 = vpop.f32.mrf.mxu1 }
 0xca6   :  { %v22318_v19 = vpop.f32.mrf.mxu1 }
 0xcaa   :  { %16441 = vmatpush2.bf16.xpose.msra.mxu0 %v19253_v45  ;;  %v9473_v45 = vld [vmem:[#allocation8 + $0x1038] sm:$0xff] }
 0xcab   :  { %16484 = vmatpush2.bf16.xpose.msra.mxu1 %v19255_v42  ;;  %16442 = vmatprep.subr.bf16.mxu0 %v19230_v14  ;;  %v19161_v42 = vcombine.low %v9484_v0, %v9496_v55  ;;  %v22316_v14 = vpop.f32.mrf.mxu0  ;;  %v19140_v18 = vcombine.high %v9461_v46, %v9473_v45  ;;  %v9412_v55 = vld [vmem:[#allocation8 + $0xe50] sm:$0xff] }
 0xcac   :  { %16485 = vmatprep.subr.bf16.mxu1 %v19232_v43  ;;  %v19163_v43 = vcombine.low %v9485_v61, %v9497_v49  ;;  %v9413_v49 = vld [vmem:[#allocation8 + $0xe58] sm:$0xff] }
 0xcad   :  { %v22320_v29 = vpop.f32.mrf.mxu0 }
 0xcb2   :  { %16443 = vmatpush2.bf16.xpose.msra.mxu0 %v19229_v47  ;;  %v22322_v47 = vpop.f32.mrf.mxu1 }
 0xcb3   :  { %16486 = vmatpush2.bf16.xpose.msra.mxu1 %v19231_v21  ;;  %16444 = vmatprep.subr.bf16.mxu0 %v19206_v25  ;;  %v9436_v21 = vld [vmem:[#allocation8 + $0xf10] sm:$0xff] }
 0xcb4   :  { %16487 = vmatprep.subr.bf16.mxu1 %v19208_v31  ;;  %v9448_v25 = vld [vmem:[#allocation8 + $0xf70] sm:$0xff]  ;;  %v22324_v31 = vpop.f32.mrf.mxu0  ;;  %v22326_v2 = vpop.f32.mrf.mxu1 }
 0xcb6   :  { %v22330_v0 = vpop.f32.mrf.mxu1 }
 0xcba   :  { %16445 = vmatpush2.bf16.xpose.msra.mxu0 %v19205_v26  ;;  %v19139_v26 = vcombine.low %v9461_v46, %v9473_v45 }
 0xcbb   :  { %16488 = vmatpush2.bf16.xpose.msra.mxu1 %v19207_v38  ;;  %16500 = vmatprep.subr.bf16.mxu0 %v19186_v50  ;;  %v19114_v38 = vcombine.high %v9436_v21, %v9448_v25  ;;  %v19116_v50 = vcombine.high %v9437_v13, %v9449_v57 }
 0xcbc   :  { %16543 = vmatprep.subr.bf16.mxu1 %v19188_v15  ;;  %v22328_v15 = vpop.f32.mrf.mxu0 }
 0xcbe   :  { %v22332_v61 = vpop.f32.mrf.mxu0 }
 0xcc0   :  { %v22336_v27 = vpop.f32.mrf.mxu0 }
 0xcc1   :  { %16447 = vmatmul.mubr.bf16.vlgmr.msra.gmra.mxu0 %v21859_v58 }
 0xcc2   :  { %16490 = vmatmul.mubr.bf16.vlgmr.msra.gmra.mxu1 %v21884_v52  ;;  %16501 = vmatpush1.bf16.xpose.msra.mxu0 %v19185_v37  ;;  %v9424_v37 = vld [vmem:[#allocation8 + $0xeb0] sm:$0xff] }
 0xcc3   :  { %16532 = vmatprep.mubr.bf16.mxu0 %v22176_v4  ;;  %16544 = vmatpush1.bf16.xpose.msra.mxu1 %v19187_v11  ;;  %v9425_v11 = vld [vmem:[#allocation8 + $0xeb8] sm:$0xff]  ;;  %v19090_v46 = vcombine.high %v9412_v55, %v9424_v37 }
 0xcc4   :  { %16575 = vmatprep.mubr.bf16.mxu1 %v22179_v23  ;;  %16502 = vmatprep.subr.bf16.mxu0 %v19162_v1  ;;  %v22334_v1 = vpop.f32.mrf.mxu1  ;;  %v19091_v13 = vcombine.low %v9413_v49, %v9425_v11 }
 0xcc5   :  { %16545 = vmatprep.subr.bf16.mxu1 %v19164_v56  ;;  %v19113_v56 = vcombine.low %v9436_v21, %v9448_v25  ;;  %v9401_v21 = vld [vmem:[#allocation8 + $0xdf8] sm:$0xff]  ;;  %v19089_v25 = vcombine.low %v9412_v55, %v9424_v37  ;;  %v9364_v55 = vld [vmem:[#allocation8 + $0xcd0] sm:$0xff] }
 0xcc6   :  { %v22338_v45 = vpop.f32.mrf.mxu1  ;;  %v9376_v37 = vld [vmem:[#allocation8 + $0xd30] sm:$0xff] }
 0xcca   :  { %16503 = vmatpush1.bf16.xpose.msra.mxu0 %v19161_v42  ;;  %v19092_v42 = vcombine.high %v9413_v49, %v9425_v11  ;;  %v9365_v11 = vld [vmem:[#allocation8 + $0xcd8] sm:$0xff] }
 0xccb   :  { %16546 = vmatpush1.bf16.xpose.msra.mxu1 %v19163_v43  ;;  %16504 = vmatprep.subr.bf16.mxu0 %v19138_v6  ;;  %v22340_v43 = vpop.f32.mrf.mxu0  ;;  %v22342_v6 = vpop.f32.mrf.mxu1 }
 0xccc   :  { %16547 = vmatprep.subr.bf16.mxu1 %v19140_v18  ;;  %v9388_v18 = vld [vmem:[#allocation8 + $0xd90] sm:$0xff] }
 0xcd2   :  { %16505 = vmatpush1.bf16.xpose.msra.mxu0 %v19137_v12  ;;  %v9400_v12 = vld [vmem:[#allocation8 + $0xdf0] sm:$0xff] }
 0xcd3   :  { %16548 = vmatpush1.bf16.xpose.msra.mxu1 %v19139_v26  ;;  %16506 = vmatprep.subr.bf16.mxu0 %v19114_v38  ;;  %v10106_v26 = vld [vmem:[#allocation10] sm:$0x3f]  ;;  %v9389_v38 = vld [vmem:[#allocation8 + $0xd98] sm:$0xff]  ;;  %v19066_v57 = vcombine.high %v9388_v18, %v9400_v12 }
 0xcd4   :  { %16549 = vmatprep.subr.bf16.mxu1 %v19116_v50  ;;  %v22344_v50 = vpop.f32.mrf.mxu0  ;;  %v10111_v20 = vrot.slane %v10106_v26, %v22624_v3  ;;  %v19068_v23 = vcombine.high %v9389_v38, %v9401_v21  ;;  %v9377_v3 = vld [vmem:[#allocation8 + $0xd38] sm:$0xff] }
 0xcda   :  { %16507 = vmatpush1.bf16.xpose.msra.mxu0 %v19113_v56  ;;  %v22347_v56 = vpop.f32.mrf.mxu1 }
 0xcdb   :  { %16550 = vmatpush1.bf16.xpose.msra.mxu1 %v19115_v32  ;;  %16508 = vmatprep.subr.bf16.mxu0 %v19090_v46  ;;  %v10115_v32 = vrot.slane %v10106_v26, %v22114_v59  ;;  %v22350_v46 = vpop.f32.mrf.mxu0  ;;  %v19065_v59 = vcombine.low %v9388_v18, %v9400_v12  ;;  %v19067_v26 = vcombine.low %v9389_v38, %v9401_v21  ;;  %v9352_v12 = vld [vmem:[#allocation8 + $0xc70] sm:$0xff]  ;;  %v9353_v38 = vld [vmem:[#allocation8 + $0xc78] sm:$0xff] }
 0xcdc   :  { %16551 = vmatprep.subr.bf16.mxu1 %v19092_v42  ;;  %v15933_v42 = vadd.f32 %v22300_v40, %v10111_v20  ;;  %v22353_v4 = vpop.f32.mrf.mxu1  ;;  %v19044_v40 = vcombine.high %v9365_v11, %v9377_v3  ;;  %v19041_v21 = vcombine.low %v9364_v55, %v9376_v37 }
 0xcdd   :  { %v16190_v49 = vpop.f32.mrf.mxu0  ;;  %v15935_v52 = vadd.f32 %v22304_v36, %v10115_v32  ;;  %v15939_v16 = vadd.f32 %v22316_v14, %v10115_v32  ;;  %v19043_v32 = vcombine.low %v9365_v11, %v9377_v3  ;;  %v9713_v11 = vld [vmem:[#allocation8 + $0x17b8] sm:$0xff] }
 0xcde   :  { %v22356_v58 = vpop.f32.mrf.mxu1 }
 0xcdf   :  { %v16192_v44 = vpop.f32.mrf.mxu0 }
 0xce0   :  { %v16235_v41 = vpop.f32.mrf.mxu1 }
 0xce2   :  { %16509 = vmatpush1.bf16.xpose.msra.mxu0 %v19089_v25  ;;  %v19042_v25 = vcombine.high %v9364_v55, %v9376_v37  ;;  %v9712_v55 = vld [vmem:[#allocation8 + $0x17b0] sm:$0xff]  ;;  %v9701_v37 = vld [vmem:[#allocation8 + $0x1758] sm:$0xff] }
 0xce3   :  { %16552 = vmatpush1.bf16.xpose.msra.mxu1 %v19091_v13  ;;  %16510 = vmatprep.subr.bf16.mxu0 %v19066_v57  ;;  %v15976_v13 = vadd.f32 %v22302_v30, %v15933_v42  ;;  %v15937_v57 = vadd.f32 %v22310_v33, %v10111_v20  ;;  %v9340_v30 = vld [vmem:[#allocation8 + $0xc10] sm:$0xff]  ;;  %v16194_v20 = vpop.f32.mrf.mxu0  ;;  %v9341_v33 = vld [vmem:[#allocation8 + $0xc18] sm:$0xff] }
 0xce4   :  { %16553 = vmatprep.subr.bf16.mxu1 %v19068_v23  ;;  %v15978_v23 = vadd.f32 %v22306_v24, %v15935_v52  ;;  %v15982_v52 = vadd.f32 %v22318_v19, %v15939_v16  ;;  %v19018_v42 = vcombine.high %v9340_v30, %v9352_v12 }
 0xce5   :  { %v16019_v60 = vadd.f32 %v22320_v29, %v15976_v13  ;;  %v15980_v36 = vadd.f32 %v22313_v7, %v15937_v57  ;;  %v16237_v29 = vpop.f32.mrf.mxu1  ;;  %v19017_v57 = vcombine.low %v9340_v30, %v9352_v12  ;;  %v9676_v12 = vld [vmem:[#allocation8 + $0x1690] sm:$0xff] }
 0xce6   :  { %v16021_v18 = vadd.f32 %v22324_v31, %v15978_v23  ;;  %v16025_v31 = vadd.f32 %v22332_v61, %v15982_v52  ;;  %v19019_v23 = vcombine.low %v9341_v33, %v9353_v38 }
 0xce7   :  { %v16062_v24 = vadd.f32 %v22322_v47, %v16019_v60  ;;  %v16023_v14 = vadd.f32 %v22328_v15, %v15980_v36  ;;  %v16239_v19 = vpop.f32.mrf.mxu1 }
 0xce8   :  { %v16064_v7 = vadd.f32 %v22326_v2, %v16021_v18  ;;  %v16068_v47 = vadd.f32 %v22334_v1, %v16025_v31 }
 0xce9   :  { %v16066_v13 = vadd.f32 %v22330_v0, %v16023_v14  ;;  %v16319_v61 = vpop.f32.mrf.mxu1 }
 0xcea   :  { %16511 = vmatpush1.bf16.xpose.msra.mxu0 %v19065_v59  ;;  %v16105_v59 = vadd.f32 %v22336_v27, %v16062_v24  ;;  %v16107_v16 = vadd.f32 %v22340_v43, %v16064_v7  ;;  %v9700_v27 = vld [vmem:[#allocation8 + $0x1750] sm:$0xff]  ;;  %v16111_v43 = vadd.f32 %v22350_v46, %v16068_v47  ;;  %v19379_v7 = vcombine.low %v9701_v37, %v9713_v11 }
 0xceb   :  { %16554 = vmatpush1.bf16.xpose.msra.mxu1 %v19067_v26  ;;  %16512 = vmatprep.subr.bf16.mxu0 %v19042_v25  ;;  %v19020_v26 = vcombine.high %v9341_v33, %v9353_v38  ;;  %v16196_v25 = vpop.f32.mrf.mxu0  ;;  %v16109_v2 = vadd.f32 %v22344_v50, %v16066_v13  ;;  %v19378_v36 = vcombine.high %v9700_v27, %v9712_v55  ;;  %v16321_v18 = vpop.f32.mrf.mxu1  ;;  %v9688_v33 = vld [vmem:[#allocation8 + $0x16f0] sm:$0xff] }
 0xcec   :  { %16555 = vmatprep.subr.bf16.mxu1 %v19044_v40  ;;  %v16148_v15 = vadd.f32 %v22338_v45, %v16105_v59  ;;  %v16150_v0 = vadd.f32 %v22342_v6, %v16107_v16  ;;  %v19380_v50 = vcombine.high %v9701_v37, %v9713_v11  ;;  %v16154_v52 = vadd.f32 %v22353_v4, %v16111_v43  ;;  %v9652_v37 = vld [vmem:[#allocation8 + $0x15d0] sm:$0xff]  ;;  %v9653_v11 = vld [vmem:[#allocation8 + $0x15d8] sm:$0xff] }
 0xced   :  { %v16276_v60 = vpop.f32.mrf.mxu0  ;;  %v16152_v1 = vadd.f32 %v22347_v56, %v16109_v2  ;;  %v16323_v30 = vpop.f32.mrf.mxu1  ;;  %v9677_v56 = vld [vmem:[#allocation8 + $0x1698] sm:$0xff] }
 0xcee   :  { %v16191_v3 = vadd.f32 %v16190_v49, %v16148_v15  ;;  %v16193_v45 = vadd.f32 %v16192_v44, %v16150_v0  ;;  %v16197_v46 = vadd.f32 %v16196_v25, %v16154_v52  ;;  %v9689_v44 = vld [vmem:[#allocation8 + $0x16f8] sm:$0xff] }
 0xcef   :  { %v16278_v40 = vpop.f32.mrf.mxu0  ;;  %v16195_v14 = vadd.f32 %v16194_v20, %v16152_v1  ;;  %v19356_v13 = vcombine.high %v9677_v56, %v9689_v44  ;;  %v9665_v0 = vld [vmem:[#allocation8 + $0x1638] sm:$0xff]  ;;  %v19355_v1 = vcombine.low %v9677_v56, %v9689_v44  ;;  %v9604_v44 = vld [vmem:[#allocation8 + $0x1450] sm:$0xff] }
 0xcf0   :  { %v16234_v24 = vadd.f32 %v22356_v58, %v16191_v3  ;;  %v16236_v6 = vadd.f32 %v16235_v41, %v16193_v45  ;;  %v19354_v58 = vcombine.high %v9676_v12, %v9688_v33  ;;  %v16240_v20 = vadd.f32 %v16239_v19, %v16197_v46  ;;  %v9664_v19 = vld [vmem:[#allocation8 + $0x1630] sm:$0xff]  ;;  %v9629_v46 = vld [vmem:[#allocation8 + $0x1518] sm:$0xff] }
 0xcf1   :  { %v16238_v38 = vadd.f32 %v16237_v29, %v16195_v14  ;;  %v19330_v45 = vcombine.high %v9652_v37, %v9664_v19  ;;  %v19332_v52 = vcombine.high %v9653_v11, %v9665_v0 }
 0xcf2   :  { %16513 = vmatpush1.bf16.xpose.msra.mxu0 %v19041_v21  ;;  %v16280_v21 = vpop.f32.mrf.mxu0  ;;  %v16277_v49 = vadd.f32 %v16276_v60, %v16234_v24 }
 0xcf3   :  { %16556 = vmatpush1.bf16.xpose.msra.mxu1 %v19043_v32  ;;  %16514 = vmatprep.subr.bf16.mxu0 %v19018_v42  ;;  %v16279_v32 = vadd.f32 %v16278_v40, %v16236_v6  ;;  %v19377_v42 = vcombine.low %v9700_v27, %v9712_v55  ;;  %v16281_v59 = vadd.f32 %v16280_v21, %v16238_v38  ;;  %v9628_v21 = vld [vmem:[#allocation8 + $0x1510] sm:$0xff] }
 0xcf4   :  { %16557 = vmatprep.subr.bf16.mxu1 %v19020_v26  ;;  %v16282_v4 = vpop.f32.mrf.mxu0  ;;  %v16320_v31 = vadd.f32 %v16319_v61, %v16277_v49  ;;  %v16325_v26 = vpop.f32.mrf.mxu1  ;;  %v9640_v6 = vld [vmem:[#allocation8 + $0x1570] sm:$0xff]  ;;  %v9641_v49 = vld [vmem:[#allocation8 + $0x1578] sm:$0xff] }
 0xcf5   :  { %v16322_v25 = vadd.f32 %v16321_v18, %v16279_v32  ;;  %v16283_v16 = vadd.f32 %v16282_v4, %v16240_v20  ;;  %v16324_v29 = vadd.f32 %v16323_v30, %v16281_v59  ;;  %v19329_v30 = vcombine.low %v9652_v37, %v9664_v19  ;;  %v9616_v38 = vld [vmem:[#allocation8 + $0x14b0] sm:$0xff]  ;;  %v9605_v32 = vld [vmem:[#allocation8 + $0x1458] sm:$0xff] }
 0xcf6   :  { %v19308_v56 = vcombine.high %v9629_v46, %v9641_v49  ;;  %v19305_v4 = vcombine.low %v9628_v21, %v9640_v6  ;;  %v9592_v59 = vld [vmem:[#allocation8 + $0x13f0] sm:$0xff] }
 0xcf7   :  { %v16326_v43 = vadd.f32 %v16325_v26, %v16283_v16  ;;  %v9581_v26 = vld [vmem:[#allocation8 + $0x1398] sm:$0xff] }
 0xcfa   :  { %16515 = vmatpush1.bf16.xpose.msra.mxu0 %v19017_v57 }
 0xcfb   :  { %16558 = vmatpush1.bf16.xpose.msra.mxu1 %v19019_v23  ;;  %16516 = vmatprep.subr.bf16.mxu0 %v19378_v36  ;;  %v19353_v23 = vcombine.low %v9676_v12, %v9688_v33  ;;  %v19331_v12 = vcombine.low %v9653_v11, %v9665_v0  ;;  %v19306_v33 = vcombine.high %v9628_v21, %v9640_v6  ;;  %v9544_v11 = vld [vmem:[#allocation8 + $0x1270] sm:$0xff]  ;;  %v9533_v0 = vld [vmem:[#allocation8 + $0x1218] sm:$0xff]  ;;  %v9486_v21 = vld [vmem:[#allocation8 + $0x10a0] sm:$0xff] }
 0xcfc   :  { %16559 = vmatprep.subr.bf16.mxu1 %v19380_v50  ;;  %v9498_v6 = vld [vmem:[#allocation8 + $0x1100] sm:$0xff] }
 0xd01   :  { %v16362_v41 = vpop.f32.mrf.mxu0 }
 0xd02   :  { %v16363_v60 = vadd.f32 %v16362_v41, %v16320_v31  ;;  %v16405_v47 = vpop.f32.mrf.mxu1  ;;  %16517 = vmatpush2.bf16.xpose.msra.mxu0 %v19377_v42  ;;  %v9617_v42 = vld [vmem:[#allocation8 + $0x14b8] sm:$0xff]  ;;  %v9580_v31 = vld [vmem:[#allocation8 + $0x1390] sm:$0xff]  ;;  %v19281_v41 = vcombine.low %v9604_v44, %v9616_v38 }
 0xd03   :  { %16560 = vmatpush2.bf16.xpose.msra.mxu1 %v19379_v7  ;;  %v16364_v15 = vpop.f32.mrf.mxu0  ;;  %16518 = vmatprep.subr.bf16.mxu0 %v19354_v58  ;;  %v19307_v7 = vcombine.low %v9629_v46, %v9641_v49  ;;  %v19282_v58 = vcombine.high %v9604_v44, %v9616_v38  ;;  %v19284_v20 = vcombine.high %v9605_v32, %v9617_v42  ;;  %v9487_v49 = vld [vmem:[#allocation8 + $0x10a8] sm:$0xff]  ;;  %v9462_v44 = vld [vmem:[#allocation8 + $0xfe0] sm:$0xff] }
 0xd04   :  { %v16406_v2 = vadd.f32 %v16405_v47, %v16363_v60  ;;  %v16365_v27 = vadd.f32 %v16364_v15, %v16322_v25  ;;  %v16407_v55 = vpop.f32.mrf.mxu1  ;;  %16561 = vmatprep.subr.bf16.mxu1 %v19356_v13  ;;  %v9593_v13 = vld [vmem:[#allocation8 + $0x13f8] sm:$0xff]  ;;  %v19283_v25 = vcombine.low %v9605_v32, %v9617_v42  ;;  %v19258_v16 = vcombine.high %v9580_v31, %v9592_v59  ;;  %v9556_v47 = vld [vmem:[#allocation8 + $0x12d0] sm:$0xff]  ;;  %v9474_v38 = vld [vmem:[#allocation8 + $0x1040] sm:$0xff] }
 0xd05   :  { %v16366_v61 = vpop.f32.mrf.mxu0  ;;  %v19260_v60 = vcombine.high %v9581_v26, %v9593_v13  ;;  %v9568_v15 = vld [vmem:[#allocation8 + $0x1330] sm:$0xff]  ;;  %v9463_v32 = vld [vmem:[#allocation8 + $0xfe8] sm:$0xff] }
 0xd06   :  { %17446 = vst [vmem:[#allocation11] sm:$0xff] %v16406_v2  ;;  %v16408_v3 = vadd.f32 %v16407_v55, %v16365_v27  ;;  %v16367_v57 = vadd.f32 %v16366_v61, %v16324_v29  ;;  %v16409_v40 = vpop.f32.mrf.mxu1  ;;  %v9557_v29 = vld [vmem:[#allocation8 + $0x12d8] sm:$0xff]  ;;  %v19257_v27 = vcombine.low %v9580_v31, %v9592_v59  ;;  %v19259_v55 = vcombine.low %v9581_v26, %v9593_v13  ;;  %v9532_v61 = vld [vmem:[#allocation8 + $0x1210] sm:$0xff]  ;;  %v9475_v42 = vld [vmem:[#allocation8 + $0x1048] sm:$0xff] }
 0xd07   :  { %v16368_v36 = vpop.f32.mrf.mxu0  ;;  %v9569_v2 = vld [vmem:[#allocation8 + $0x1338] sm:$0xff]  ;;  %v19234_v37 = vcombine.high %v9556_v47, %v9568_v15  ;;  %v9438_v31 = vld [vmem:[#allocation8 + $0xf20] sm:$0xff]  ;;  %v9439_v26 = vld [vmem:[#allocation8 + $0xf28] sm:$0xff] }
 0xd08   :  { %17447 = vst [vmem:[#allocation11 + $0x8] sm:$0xff] %v16408_v3  ;;  %v16410_v18 = vadd.f32 %v16409_v40, %v16367_v57  ;;  %v16369_v50 = vadd.f32 %v16368_v36, %v16326_v43  ;;  %v16411_v24 = vpop.f32.mrf.mxu1  ;;  %v19236_v19 = vcombine.high %v9557_v29, %v9569_v2  ;;  %v9545_v43 = vld [vmem:[#allocation8 + $0x1278] sm:$0xff]  ;;  %v19233_v3 = vcombine.low %v9556_v47, %v9568_v15  ;;  %v9510_v36 = vld [vmem:[#allocation8 + $0x1160] sm:$0xff]  ;;  %v9451_v13 = vld [vmem:[#allocation8 + $0xf88] sm:$0xff] }
 0xd09   :  { %v19235_v57 = vcombine.low %v9557_v29, %v9569_v2  ;;  %v19210_v40 = vcombine.high %v9532_v61, %v9544_v11  ;;  %v9450_v59 = vld [vmem:[#allocation8 + $0xf80] sm:$0xff]  ;;  %v9415_v29 = vld [vmem:[#allocation8 + $0xe68] sm:$0xff] }
 0xd0a   :  { %17452 = vst [vmem:[#allocation11 + $0x30] sm:$0xff] %v16410_v18  ;;  %v16412_v14 = vadd.f32 %v16411_v24, %v16369_v50  ;;  %16519 = vmatpush2.bf16.xpose.msra.mxu0 %v19353_v23  ;;  %v19212_v23 = vcombine.high %v9533_v0, %v9545_v43  ;;  %v9523_v18 = vld [vmem:[#allocation8 + $0x11c8] sm:$0xff]  ;;  %v19209_v50 = vcombine.low %v9532_v61, %v9544_v11  ;;  %v9414_v47 = vld [vmem:[#allocation8 + $0xe60] sm:$0xff] }
 0xd0b   :  { %16562 = vmatpush2.bf16.xpose.msra.mxu1 %v19355_v1  ;;  %16520 = vmatprep.subr.bf16.mxu0 %v19330_v45  ;;  %v9522_v1 = vld [vmem:[#allocation8 + $0x11c0] sm:$0xff]  ;;  %v9511_v45 = vld [vmem:[#allocation8 + $0x1168] sm:$0xff] }
 0xd0c   :  { %17453 = vst [vmem:[#allocation11 + $0x38] sm:$0xff] %v16412_v14  ;;  %16563 = vmatprep.subr.bf16.mxu1 %v19332_v52  ;;  %v19211_v52 = vcombine.low %v9533_v0, %v9545_v43  ;;  %v19190_v24 = vcombine.high %v9510_v36, %v9522_v1  ;;  %v19192_v14 = vcombine.high %v9511_v45, %v9523_v18  ;;  %v9426_v15 = vld [vmem:[#allocation8 + $0xec0] sm:$0xff]  ;;  %v9427_v2 = vld [vmem:[#allocation8 + $0xec8] sm:$0xff] }
 0xd0d   :  { %v19189_v46 = vcombine.low %v9510_v36, %v9522_v1  ;;  %v9390_v61 = vld [vmem:[#allocation8 + $0xda0] sm:$0xff]  ;;  %v9391_v0 = vld [vmem:[#allocation8 + $0xda8] sm:$0xff] }
 0xd0e   :  { %v9402_v11 = vld [vmem:[#allocation8 + $0xe00] sm:$0xff]  ;;  %v9403_v43 = vld [vmem:[#allocation8 + $0xe08] sm:$0xff] }
 0xd0f   :  { %v9366_v36 = vld [vmem:[#allocation8 + $0xce0] sm:$0xff] }
 0xd10   :  { %v9378_v1 = vld [vmem:[#allocation8 + $0xd40] sm:$0xff] }
 0xd12   :  { %16521 = vmatpush2.bf16.xpose.msra.mxu0 %v19329_v30  ;;  %v9499_v30 = vld [vmem:[#allocation8 + $0x1108] sm:$0xff] }
 0xd13   :  { %16564 = vmatpush2.bf16.xpose.msra.mxu1 %v19331_v12  ;;  %16522 = vmatprep.subr.bf16.mxu0 %v19306_v33  ;;  %v19191_v12 = vcombine.low %v9511_v45, %v9523_v18  ;;  %v19166_v33 = vcombine.high %v9486_v21, %v9498_v6  ;;  %v9367_v45 = vld [vmem:[#allocation8 + $0xce8] sm:$0xff] }
 0xd14   :  { %16565 = vmatprep.subr.bf16.mxu1 %v19308_v56  ;;  %v19168_v56 = vcombine.high %v9487_v49, %v9499_v30  ;;  %v9379_v18 = vld [vmem:[#allocation8 + $0xd48] sm:$0xff] }
 0xd1a   :  { %16523 = vmatpush2.bf16.xpose.msra.mxu0 %v19305_v4  ;;  %v19165_v4 = vcombine.low %v9486_v21, %v9498_v6  ;;  %v9342_v21 = vld [vmem:[#allocation8 + $0xc20] sm:$0xff] }
 0xd1b   :  { %16566 = vmatpush2.bf16.xpose.msra.mxu1 %v19307_v7  ;;  %16524 = vmatprep.subr.bf16.mxu0 %v19282_v58  ;;  %v19167_v7 = vcombine.low %v9487_v49, %v9499_v30  ;;  %v19142_v58 = vcombine.high %v9462_v44, %v9474_v38  ;;  %v9354_v6 = vld [vmem:[#allocation8 + $0xc80] sm:$0xff]  ;;  %v9355_v49 = vld [vmem:[#allocation8 + $0xc88] sm:$0xff]  ;;  %v19045_v30 = vcombine.low %v9366_v36, %v9378_v1 }
 0xd1c   :  { %16567 = vmatprep.subr.bf16.mxu1 %v19284_v20  ;;  %v19144_v20 = vcombine.high %v9463_v32, %v9475_v42 }
 0xd22   :  { %16525 = vmatpush2.bf16.xpose.msra.mxu0 %v19281_v41  ;;  %v19141_v41 = vcombine.low %v9462_v44, %v9474_v38  ;;  %v9702_v44 = vld [vmem:[#allocation8 + $0x1760] sm:$0xff] }
 0xd23   :  { %16568 = vmatpush2.bf16.xpose.msra.mxu1 %v19283_v25  ;;  %16526 = vmatprep.subr.bf16.mxu0 %v19258_v16  ;;  %v19143_v25 = vcombine.low %v9463_v32, %v9475_v42  ;;  %v19118_v16 = vcombine.high %v9438_v31, %v9450_v59  ;;  %v9714_v38 = vld [vmem:[#allocation8 + $0x17c0] sm:$0xff]  ;;  %v9703_v32 = vld [vmem:[#allocation8 + $0x1768] sm:$0xff] }
 0xd24   :  { %16569 = vmatprep.subr.bf16.mxu1 %v19260_v60  ;;  %v19120_v60 = vcombine.high %v9439_v26, %v9451_v13  ;;  %v9715_v42 = vld [vmem:[#allocation8 + $0x17c8] sm:$0xff] }
 0xd2a   :  { %16527 = vmatpush2.bf16.xpose.msra.mxu0 %v19257_v27  ;;  %v19117_v27 = vcombine.low %v9438_v31, %v9450_v59  ;;  %v9678_v31 = vld [vmem:[#allocation8 + $0x16a0] sm:$0xff] }
 0xd2b   :  { %16570 = vmatpush2.bf16.xpose.msra.mxu1 %v19259_v55  ;;  %16528 = vmatprep.subr.bf16.mxu0 %v19234_v37  ;;  %v19119_v55 = vcombine.low %v9439_v26, %v9451_v13  ;;  %v19094_v37 = vcombine.high %v9414_v47, %v9426_v15  ;;  %v9690_v59 = vld [vmem:[#allocation8 + $0x1700] sm:$0xff]  ;;  %v9679_v26 = vld [vmem:[#allocation8 + $0x16a8] sm:$0xff] }
 0xd2c   :  { %16571 = vmatprep.subr.bf16.mxu1 %v19236_v19  ;;  %v19096_v19 = vcombine.high %v9415_v29, %v9427_v2  ;;  %v9691_v13 = vld [vmem:[#allocation8 + $0x1708] sm:$0xff] }
 0xd32   :  { %16529 = vmatpush2.bf16.xpose.msra.mxu0 %v19233_v3  ;;  %v19093_v3 = vcombine.low %v9414_v47, %v9426_v15  ;;  %v9654_v47 = vld [vmem:[#allocation8 + $0x15e0] sm:$0xff] }
 0xd33   :  { %16572 = vmatpush2.bf16.xpose.msra.mxu1 %v19235_v57  ;;  %16530 = vmatprep.subr.bf16.mxu0 %v19210_v40  ;;  %v19095_v57 = vcombine.low %v9415_v29, %v9427_v2  ;;  %v19070_v40 = vcombine.high %v9390_v61, %v9402_v11  ;;  %v9666_v15 = vld [vmem:[#allocation8 + $0x1640] sm:$0xff]  ;;  %v9655_v29 = vld [vmem:[#allocation8 + $0x15e8] sm:$0xff] }
 0xd34   :  { %16573 = vmatprep.subr.bf16.mxu1 %v19212_v23  ;;  %v19072_v23 = vcombine.high %v9391_v0, %v9403_v43  ;;  %v9667_v2 = vld [vmem:[#allocation8 + $0x1648] sm:$0xff] }
 0xd3a   :  { %16531 = vmatpush2.bf16.xpose.msra.mxu0 %v19209_v50  ;;  %v19069_v50 = vcombine.low %v9390_v61, %v9402_v11  ;;  %v9630_v61 = vld [vmem:[#allocation8 + $0x1520] sm:$0xff] }
 0xd3b   :  { %16574 = vmatpush2.bf16.xpose.msra.mxu1 %v19211_v52  ;;  %16586 = vmatprep.subr.bf16.mxu0 %v19190_v24  ;;  %v19071_v52 = vcombine.low %v9391_v0, %v9403_v43  ;;  %v19046_v24 = vcombine.high %v9366_v36, %v9378_v1  ;;  %v9642_v11 = vld [vmem:[#allocation8 + $0x1580] sm:$0xff]  ;;  %v9631_v0 = vld [vmem:[#allocation8 + $0x1528] sm:$0xff] }
 0xd3c   :  { %16629 = vmatprep.subr.bf16.mxu1 %v19192_v14  ;;  %v19048_v14 = vcombine.high %v9367_v45, %v9379_v18  ;;  %v9643_v43 = vld [vmem:[#allocation8 + $0x1588] sm:$0xff]  ;;  %v9606_v36 = vld [vmem:[#allocation8 + $0x1460] sm:$0xff] }
 0xd3d   :  { %v9618_v1 = vld [vmem:[#allocation8 + $0x14c0] sm:$0xff] }
 0xd41   :  { %16533 = vmatmul.mubr.bf16.vlgmr.msra.gmra.mxu0 %v22594_v54 }
 0xd42   :  { %16576 = vmatmul.mubr.bf16.vlgmr.msra.gmra.mxu1 %v22595_v8  ;;  %16587 = vmatpush1.bf16.xpose.msra.mxu0 %v19189_v46  ;;  %v9343_v46 = vld [vmem:[#allocation8 + $0xc28] sm:$0xff] }
 0xd43   :  { %16618 = vmatprep.mubr.bf16.mxu0 %v22217_v53  ;;  %16630 = vmatpush1.bf16.xpose.msra.mxu1 %v19191_v12  ;;  %v19047_v12 = vcombine.low %v9367_v45, %v9379_v18  ;;  %v9607_v45 = vld [vmem:[#allocation8 + $0x1468] sm:$0xff] }
 0xd44   :  { %16661 = vmatprep.mubr.bf16.mxu1 %v22220_v35  ;;  %16588 = vmatprep.subr.bf16.mxu0 %v19166_v33  ;;  %v19022_v33 = vcombine.high %v9342_v21, %v9354_v6  ;;  %v9619_v18 = vld [vmem:[#allocation8 + $0x14c8] sm:$0xff] }
 0xd45   :  { %16631 = vmatprep.subr.bf16.mxu1 %v19168_v56  ;;  %v19024_v56 = vcombine.high %v9343_v46, %v9355_v49 }
 0xd4a   :  { %16589 = vmatpush1.bf16.xpose.msra.mxu0 %v19165_v4  ;;  %v19021_v4 = vcombine.low %v9342_v21, %v9354_v6  ;;  %v9582_v21 = vld [vmem:[#allocation8 + $0x13a0] sm:$0xff] }
 0xd4b   :  { %16632 = vmatpush1.bf16.xpose.msra.mxu1 %v19167_v7  ;;  %16590 = vmatprep.subr.bf16.mxu0 %v19142_v58  ;;  %v19023_v7 = vcombine.low %v9343_v46, %v9355_v49  ;;  %v19382_v58 = vcombine.high %v9702_v44, %v9714_v38  ;;  %v9594_v6 = vld [vmem:[#allocation8 + $0x1400] sm:$0xff]  ;;  %v9583_v46 = vld [vmem:[#allocation8 + $0x13a8] sm:$0xff] }
 0xd4c   :  { %16633 = vmatprep.subr.bf16.mxu1 %v19144_v20  ;;  %v19384_v20 = vcombine.high %v9703_v32, %v9715_v42  ;;  %v9595_v49 = vld [vmem:[#allocation8 + $0x1408] sm:$0xff] }
 0xd52   :  { %16591 = vmatpush1.bf16.xpose.msra.mxu0 %v19141_v41  ;;  %v19381_v41 = vcombine.low %v9702_v44, %v9714_v38  ;;  %v9558_v44 = vld [vmem:[#allocation8 + $0x12e0] sm:$0xff] }
 0xd53   :  { %16634 = vmatpush1.bf16.xpose.msra.mxu1 %v19143_v25  ;;  %16592 = vmatprep.subr.bf16.mxu0 %v19118_v16  ;;  %v19383_v25 = vcombine.low %v9703_v32, %v9715_v42  ;;  %v19358_v16 = vcombine.high %v9678_v31, %v9690_v59  ;;  %v9570_v38 = vld [vmem:[#allocation8 + $0x1340] sm:$0xff]  ;;  %v9559_v32 = vld [vmem:[#allocation8 + $0x12e8] sm:$0xff] }
 0xd54   :  { %16635 = vmatprep.subr.bf16.mxu1 %v19120_v60  ;;  %v19360_v60 = vcombine.high %v9679_v26, %v9691_v13  ;;  %v9571_v42 = vld [vmem:[#allocation8 + $0x1348] sm:$0xff] }
 0xd5a   :  { %16593 = vmatpush1.bf16.xpose.msra.mxu0 %v19117_v27  ;;  %v19357_v27 = vcombine.low %v9678_v31, %v9690_v59  ;;  %v9534_v31 = vld [vmem:[#allocation8 + $0x1220] sm:$0xff] }
 0xd5b   :  { %16636 = vmatpush1.bf16.xpose.msra.mxu1 %v19119_v55  ;;  %16594 = vmatprep.subr.bf16.mxu0 %v19094_v37  ;;  %v19359_v55 = vcombine.low %v9679_v26, %v9691_v13  ;;  %v19334_v37 = vcombine.high %v9654_v47, %v9666_v15  ;;  %v9546_v59 = vld [vmem:[#allocation8 + $0x1280] sm:$0xff]  ;;  %v9535_v26 = vld [vmem:[#allocation8 + $0x1228] sm:$0xff] }
 0xd5c   :  { %16637 = vmatprep.subr.bf16.mxu1 %v19096_v19  ;;  %v19336_v19 = vcombine.high %v9655_v29, %v9667_v2  ;;  %v9547_v13 = vld [vmem:[#allocation8 + $0x1288] sm:$0xff] }
 0xd62   :  { %16595 = vmatpush1.bf16.xpose.msra.mxu0 %v19093_v3  ;;  %v19333_v3 = vcombine.low %v9654_v47, %v9666_v15  ;;  %v9512_v47 = vld [vmem:[#allocation8 + $0x1170] sm:$0xff] }
 0xd63   :  { %16638 = vmatpush1.bf16.xpose.msra.mxu1 %v19095_v57  ;;  %16596 = vmatprep.subr.bf16.mxu0 %v19070_v40  ;;  %v19335_v57 = vcombine.low %v9655_v29, %v9667_v2  ;;  %v19310_v40 = vcombine.high %v9630_v61, %v9642_v11  ;;  %v9524_v15 = vld [vmem:[#allocation8 + $0x11d0] sm:$0xff]  ;;  %v9513_v29 = vld [vmem:[#allocation8 + $0x1178] sm:$0xff] }
 0xd64   :  { %16639 = vmatprep.subr.bf16.mxu1 %v19072_v23  ;;  %v19312_v23 = vcombine.high %v9631_v0, %v9643_v43  ;;  %v9525_v2 = vld [vmem:[#allocation8 + $0x11d8] sm:$0xff] }
 0xd6a   :  { %16597 = vmatpush1.bf16.xpose.msra.mxu0 %v19069_v50  ;;  %v19309_v50 = vcombine.low %v9630_v61, %v9642_v11  ;;  %v9488_v61 = vld [vmem:[#allocation8 + $0x10b0] sm:$0xff] }
 0xd6b   :  { %16640 = vmatpush1.bf16.xpose.msra.mxu1 %v19071_v52  ;;  %16598 = vmatprep.subr.bf16.mxu0 %v19046_v24  ;;  %v19311_v52 = vcombine.low %v9631_v0, %v9643_v43  ;;  %v19286_v24 = vcombine.high %v9606_v36, %v9618_v1  ;;  %v9500_v11 = vld [vmem:[#allocation8 + $0x1110] sm:$0xff]  ;;  %v19193_v0 = vcombine.low %v9512_v47, %v9524_v15  ;;  %v9489_v43 = vld [vmem:[#allocation8 + $0x10b8] sm:$0xff] }
 0xd6c   :  { %16641 = vmatprep.subr.bf16.mxu1 %v19048_v14  ;;  %v19288_v14 = vcombine.high %v9607_v45, %v9619_v18 }
 0xd72   :  { %16599 = vmatpush1.bf16.xpose.msra.mxu0 %v19045_v30  ;;  %v19285_v30 = vcombine.low %v9606_v36, %v9618_v1  ;;  %v9464_v36 = vld [vmem:[#allocation8 + $0xff0] sm:$0xff] }
 0xd73   :  { %16642 = vmatpush1.bf16.xpose.msra.mxu1 %v19047_v12  ;;  %16600 = vmatprep.subr.bf16.mxu0 %v19022_v33  ;;  %v19287_v12 = vcombine.low %v9607_v45, %v9619_v18  ;;  %v19262_v33 = vcombine.high %v9582_v21, %v9594_v6  ;;  %v9476_v1 = vld [vmem:[#allocation8 + $0x1050] sm:$0xff]  ;;  %v9465_v45 = vld [vmem:[#allocation8 + $0xff8] sm:$0xff] }
 0xd74   :  { %16643 = vmatprep.subr.bf16.mxu1 %v19024_v56  ;;  %v19264_v56 = vcombine.high %v9583_v46, %v9595_v49  ;;  %v9477_v18 = vld [vmem:[#allocation8 + $0x1058] sm:$0xff] }
 0xd7a   :  { %16601 = vmatpush1.bf16.xpose.msra.mxu0 %v19021_v4  ;;  %v19261_v4 = vcombine.low %v9582_v21, %v9594_v6  ;;  %v9440_v21 = vld [vmem:[#allocation8 + $0xf30] sm:$0xff] }
 0xd7b   :  { %16644 = vmatpush1.bf16.xpose.msra.mxu1 %v19023_v7  ;;  %16602 = vmatprep.subr.bf16.mxu0 %v19382_v58  ;;  %v19263_v7 = vcombine.low %v9583_v46, %v9595_v49  ;;  %v19238_v58 = vcombine.high %v9558_v44, %v9570_v38  ;;  %v9452_v6 = vld [vmem:[#allocation8 + $0xf90] sm:$0xff]  ;;  %v9441_v46 = vld [vmem:[#allocation8 + $0xf38] sm:$0xff] }
 0xd7c   :  { %16645 = vmatprep.subr.bf16.mxu1 %v19384_v20  ;;  %v19240_v20 = vcombine.high %v9559_v32, %v9571_v42  ;;  %v9453_v49 = vld [vmem:[#allocation8 + $0xf98] sm:$0xff] }
 0xd82   :  { %16603 = vmatpush2.bf16.xpose.msra.mxu0 %v19381_v41  ;;  %v19237_v41 = vcombine.low %v9558_v44, %v9570_v38  ;;  %v9416_v44 = vld [vmem:[#allocation8 + $0xe70] sm:$0xff] }
 0xd83   :  { %16646 = vmatpush2.bf16.xpose.msra.mxu1 %v19383_v25  ;;  %16604 = vmatprep.subr.bf16.mxu0 %v19358_v16  ;;  %v19239_v25 = vcombine.low %v9559_v32, %v9571_v42  ;;  %v19214_v16 = vcombine.high %v9534_v31, %v9546_v59  ;;  %v9428_v38 = vld [vmem:[#allocation8 + $0xed0] sm:$0xff]  ;;  %v9417_v32 = vld [vmem:[#allocation8 + $0xe78] sm:$0xff] }
 0xd84   :  { %16647 = vmatprep.subr.bf16.mxu1 %v19360_v60  ;;  %v19216_v60 = vcombine.high %v9535_v26, %v9547_v13  ;;  %v9429_v42 = vld [vmem:[#allocation8 + $0xed8] sm:$0xff] }
 0xd8a   :  { %16605 = vmatpush2.bf16.xpose.msra.mxu0 %v19357_v27  ;;  %v19213_v27 = vcombine.low %v9534_v31, %v9546_v59  ;;  %v9392_v31 = vld [vmem:[#allocation8 + $0xdb0] sm:$0xff] }
 0xd8b   :  { %16648 = vmatpush2.bf16.xpose.msra.mxu1 %v19359_v55  ;;  %16606 = vmatprep.subr.bf16.mxu0 %v19334_v37  ;;  %v19215_v55 = vcombine.low %v9535_v26, %v9547_v13  ;;  %v19194_v37 = vcombine.high %v9512_v47, %v9524_v15  ;;  %v9404_v59 = vld [vmem:[#allocation8 + $0xe10] sm:$0xff]  ;;  %v9393_v26 = vld [vmem:[#allocation8 + $0xdb8] sm:$0xff] }
 0xd8c   :  { %16649 = vmatprep.subr.bf16.mxu1 %v19336_v19  ;;  %v19196_v19 = vcombine.high %v9513_v29, %v9525_v2  ;;  %v9405_v13 = vld [vmem:[#allocation8 + $0xe18] sm:$0xff]  ;;  %v9368_v47 = vld [vmem:[#allocation8 + $0xcf0] sm:$0xff] }
 0xd8d   :  { %v9380_v15 = vld [vmem:[#allocation8 + $0xd50] sm:$0xff] }
 0xd92   :  { %16607 = vmatpush2.bf16.xpose.msra.mxu0 %v19333_v3  ;;  %v9501_v3 = vld [vmem:[#allocation8 + $0x1118] sm:$0xff] }
 0xd93   :  { %16650 = vmatpush2.bf16.xpose.msra.mxu1 %v19335_v57  ;;  %16608 = vmatprep.subr.bf16.mxu0 %v19310_v40  ;;  %v19195_v57 = vcombine.low %v9513_v29, %v9525_v2  ;;  %v19170_v40 = vcombine.high %v9488_v61, %v9500_v11  ;;  %v9369_v29 = vld [vmem:[#allocation8 + $0xcf8] sm:$0xff] }
 0xd94   :  { %16651 = vmatprep.subr.bf16.mxu1 %v19312_v23  ;;  %v19172_v23 = vcombine.high %v9489_v43, %v9501_v3  ;;  %v9381_v2 = vld [vmem:[#allocation8 + $0xd58] sm:$0xff] }
 0xd9a   :  { %16609 = vmatpush2.bf16.xpose.msra.mxu0 %v19309_v50  ;;  %v19169_v50 = vcombine.low %v9488_v61, %v9500_v11  ;;  %v9344_v61 = vld [vmem:[#allocation8 + $0xc30] sm:$0xff] }
 0xd9b   :  { %16652 = vmatpush2.bf16.xpose.msra.mxu1 %v19311_v52  ;;  %16610 = vmatprep.subr.bf16.mxu0 %v19286_v24  ;;  %v19171_v52 = vcombine.low %v9489_v43, %v9501_v3  ;;  %v19146_v24 = vcombine.high %v9464_v36, %v9476_v1  ;;  %v9356_v11 = vld [vmem:[#allocation8 + $0xc90] sm:$0xff]  ;;  %v9357_v43 = vld [vmem:[#allocation8 + $0xc98] sm:$0xff]  ;;  %v19049_v3 = vcombine.low %v9368_v47, %v9380_v15 }
 0xd9c   :  { %16653 = vmatprep.subr.bf16.mxu1 %v19288_v14  ;;  %v19148_v14 = vcombine.high %v9465_v45, %v9477_v18 }
 0xda2   :  { %16611 = vmatpush2.bf16.xpose.msra.mxu0 %v19285_v30  ;;  %v19145_v30 = vcombine.low %v9464_v36, %v9476_v1  ;;  %v9704_v36 = vld [vmem:[#allocation8 + $0x1770] sm:$0xff] }
 0xda3   :  { %16654 = vmatpush2.bf16.xpose.msra.mxu1 %v19287_v12  ;;  %16612 = vmatprep.subr.bf16.mxu0 %v19262_v33  ;;  %v19147_v12 = vcombine.low %v9465_v45, %v9477_v18  ;;  %v19122_v33 = vcombine.high %v9440_v21, %v9452_v6  ;;  %v9716_v1 = vld [vmem:[#allocation8 + $0x17d0] sm:$0xff]  ;;  %v9705_v45 = vld [vmem:[#allocation8 + $0x1778] sm:$0xff] }
 0xda4   :  { %16655 = vmatprep.subr.bf16.mxu1 %v19264_v56  ;;  %v19124_v56 = vcombine.high %v9441_v46, %v9453_v49  ;;  %v9717_v18 = vld [vmem:[#allocation8 + $0x17d8] sm:$0xff] }
 0xdaa   :  { %16613 = vmatpush2.bf16.xpose.msra.mxu0 %v19261_v4  ;;  %v19121_v4 = vcombine.low %v9440_v21, %v9452_v6  ;;  %v9680_v21 = vld [vmem:[#allocation8 + $0x16b0] sm:$0xff] }
 0xdab   :  { %16656 = vmatpush2.bf16.xpose.msra.mxu1 %v19263_v7  ;;  %16614 = vmatprep.subr.bf16.mxu0 %v19238_v58  ;;  %v19123_v7 = vcombine.low %v9441_v46, %v9453_v49  ;;  %v19098_v58 = vcombine.high %v9416_v44, %v9428_v38  ;;  %v9692_v6 = vld [vmem:[#allocation8 + $0x1710] sm:$0xff]  ;;  %v9681_v46 = vld [vmem:[#allocation8 + $0x16b8] sm:$0xff] }
 0xdac   :  { %16657 = vmatprep.subr.bf16.mxu1 %v19240_v20  ;;  %v19100_v20 = vcombine.high %v9417_v32, %v9429_v42  ;;  %v9693_v49 = vld [vmem:[#allocation8 + $0x1718] sm:$0xff] }
 0xdb2   :  { %16615 = vmatpush2.bf16.xpose.msra.mxu0 %v19237_v41  ;;  %v19097_v41 = vcombine.low %v9416_v44, %v9428_v38  ;;  %v9656_v44 = vld [vmem:[#allocation8 + $0x15f0] sm:$0xff] }
 0xdb3   :  { %16658 = vmatpush2.bf16.xpose.msra.mxu1 %v19239_v25  ;;  %16616 = vmatprep.subr.bf16.mxu0 %v19214_v16  ;;  %v19099_v25 = vcombine.low %v9417_v32, %v9429_v42  ;;  %v19074_v16 = vcombine.high %v9392_v31, %v9404_v59  ;;  %v9668_v38 = vld [vmem:[#allocation8 + $0x1650] sm:$0xff]  ;;  %v9657_v32 = vld [vmem:[#allocation8 + $0x15f8] sm:$0xff] }
 0xdb4   :  { %16659 = vmatprep.subr.bf16.mxu1 %v19216_v60  ;;  %v19076_v60 = vcombine.high %v9393_v26, %v9405_v13  ;;  %v9669_v42 = vld [vmem:[#allocation8 + $0x1658] sm:$0xff] }
 0xdba   :  { %16617 = vmatpush2.bf16.xpose.msra.mxu0 %v19213_v27  ;;  %v19073_v27 = vcombine.low %v9392_v31, %v9404_v59  ;;  %v9632_v31 = vld [vmem:[#allocation8 + $0x1530] sm:$0xff] }
 0xdbb   :  { %16660 = vmatpush2.bf16.xpose.msra.mxu1 %v19215_v55  ;;  %16672 = vmatprep.subr.bf16.mxu0 %v19194_v37  ;;  %v19075_v55 = vcombine.low %v9393_v26, %v9405_v13  ;;  %v19050_v37 = vcombine.high %v9368_v47, %v9380_v15  ;;  %v9644_v59 = vld [vmem:[#allocation8 + $0x1590] sm:$0xff]  ;;  %v9633_v26 = vld [vmem:[#allocation8 + $0x1538] sm:$0xff] }
 0xdbc   :  { %16715 = vmatprep.subr.bf16.mxu1 %v19196_v19  ;;  %v19052_v19 = vcombine.high %v9369_v29, %v9381_v2  ;;  %v9645_v13 = vld [vmem:[#allocation8 + $0x1598] sm:$0xff]  ;;  %v9608_v47 = vld [vmem:[#allocation8 + $0x1470] sm:$0xff] }
 0xdbd   :  { %v9620_v15 = vld [vmem:[#allocation8 + $0x14d0] sm:$0xff] }
 0xdc1   :  { %16619 = vmatmul.mubr.bf16.vlgmr.msra.gmra.mxu0 %v22606_v9 }
 0xdc2   :  { %16662 = vmatmul.mubr.bf16.vlgmr.msra.gmra.mxu1 %v22607_v34  ;;  %16673 = vmatpush1.bf16.xpose.msra.mxu0 %v19193_v0  ;;  %v9345_v0 = vld [vmem:[#allocation8 + $0xc38] sm:$0xff] }
 0xdc3   :  { %16704 = vmatprep.mubr.bf16.mxu0 %v22241_v10  ;;  %16716 = vmatpush1.bf16.xpose.msra.mxu1 %v19195_v57  ;;  %v19051_v57 = vcombine.low %v9369_v29, %v9381_v2  ;;  %v9609_v29 = vld [vmem:[#allocation8 + $0x1478] sm:$0xff] }
 0xdc4   :  { %16747 = vmatprep.mubr.bf16.mxu1 %v22244_v48  ;;  %16674 = vmatprep.subr.bf16.mxu0 %v19170_v40  ;;  %v19026_v40 = vcombine.high %v9344_v61, %v9356_v11  ;;  %v9621_v2 = vld [vmem:[#allocation8 + $0x14d8] sm:$0xff] }
 0xdc5   :  { %16717 = vmatprep.subr.bf16.mxu1 %v19172_v23  ;;  %v19028_v23 = vcombine.high %v9345_v0, %v9357_v43 }
 0xdca   :  { %16675 = vmatpush1.bf16.xpose.msra.mxu0 %v19169_v50  ;;  %v19025_v50 = vcombine.low %v9344_v61, %v9356_v11  ;;  %v9584_v61 = vld [vmem:[#allocation8 + $0x13b0] sm:$0xff] }
 0xdcb   :  { %16718 = vmatpush1.bf16.xpose.msra.mxu1 %v19171_v52  ;;  %16676 = vmatprep.subr.bf16.mxu0 %v19146_v24  ;;  %v19027_v52 = vcombine.low %v9345_v0, %v9357_v43  ;;  %v19386_v24 = vcombine.high %v9704_v36, %v9716_v1  ;;  %v9596_v11 = vld [vmem:[#allocation8 + $0x1410] sm:$0xff]  ;;  %v9585_v0 = vld [vmem:[#allocation8 + $0x13b8] sm:$0xff] }
 0xdcc   :  { %16719 = vmatprep.subr.bf16.mxu1 %v19148_v14  ;;  %v19388_v14 = vcombine.high %v9705_v45, %v9717_v18  ;;  %v9597_v43 = vld [vmem:[#allocation8 + $0x1418] sm:$0xff] }
 0xdd2   :  { %16677 = vmatpush1.bf16.xpose.msra.mxu0 %v19145_v30  ;;  %v19385_v30 = vcombine.low %v9704_v36, %v9716_v1  ;;  %v9560_v36 = vld [vmem:[#allocation8 + $0x12f0] sm:$0xff] }
 0xdd3   :  { %16720 = vmatpush1.bf16.xpose.msra.mxu1 %v19147_v12  ;;  %16678 = vmatprep.subr.bf16.mxu0 %v19122_v33  ;;  %v19387_v12 = vcombine.low %v9705_v45, %v9717_v18  ;;  %v19362_v33 = vcombine.high %v9680_v21, %v9692_v6  ;;  %v9572_v1 = vld [vmem:[#allocation8 + $0x1350] sm:$0xff]  ;;  %v9561_v45 = vld [vmem:[#allocation8 + $0x12f8] sm:$0xff] }
 0xdd4   :  { %16721 = vmatprep.subr.bf16.mxu1 %v19124_v56  ;;  %v19364_v56 = vcombine.high %v9681_v46, %v9693_v49  ;;  %v9573_v18 = vld [vmem:[#allocation8 + $0x1358] sm:$0xff] }
 0xdda   :  { %16679 = vmatpush1.bf16.xpose.msra.mxu0 %v19121_v4  ;;  %v19361_v4 = vcombine.low %v9680_v21, %v9692_v6  ;;  %v9536_v21 = vld [vmem:[#allocation8 + $0x1230] sm:$0xff] }
 0xddb   :  { %16722 = vmatpush1.bf16.xpose.msra.mxu1 %v19123_v7  ;;  %16680 = vmatprep.subr.bf16.mxu0 %v19098_v58  ;;  %v19363_v7 = vcombine.low %v9681_v46, %v9693_v49  ;;  %v19338_v58 = vcombine.high %v9656_v44, %v9668_v38  ;;  %v9548_v6 = vld [vmem:[#allocation8 + $0x1290] sm:$0xff]  ;;  %v9537_v46 = vld [vmem:[#allocation8 + $0x1238] sm:$0xff] }
 0xddc   :  { %16723 = vmatprep.subr.bf16.mxu1 %v19100_v20  ;;  %v19340_v20 = vcombine.high %v9657_v32, %v9669_v42  ;;  %v9549_v49 = vld [vmem:[#allocation8 + $0x1298] sm:$0xff] }
 0xde2   :  { %16681 = vmatpush1.bf16.xpose.msra.mxu0 %v19097_v41  ;;  %v19337_v41 = vcombine.low %v9656_v44, %v9668_v38  ;;  %v9514_v44 = vld [vmem:[#allocation8 + $0x1180] sm:$0xff] }
 0xde3   :  { %16724 = vmatpush1.bf16.xpose.msra.mxu1 %v19099_v25  ;;  %16682 = vmatprep.subr.bf16.mxu0 %v19074_v16  ;;  %v19339_v25 = vcombine.low %v9657_v32, %v9669_v42  ;;  %v19314_v16 = vcombine.high %v9632_v31, %v9644_v59  ;;  %v9526_v38 = vld [vmem:[#allocation8 + $0x11e0] sm:$0xff]  ;;  %v9515_v32 = vld [vmem:[#allocation8 + $0x1188] sm:$0xff] }
 0xde4   :  { %16725 = vmatprep.subr.bf16.mxu1 %v19076_v60  ;;  %v19316_v60 = vcombine.high %v9633_v26, %v9645_v13  ;;  %v9527_v42 = vld [vmem:[#allocation8 + $0x11e8] sm:$0xff] }
 0xdea   :  { %16683 = vmatpush1.bf16.xpose.msra.mxu0 %v19073_v27  ;;  %v19313_v27 = vcombine.low %v9632_v31, %v9644_v59  ;;  %v9490_v31 = vld [vmem:[#allocation8 + $0x10c0] sm:$0xff] }
 0xdeb   :  { %16726 = vmatpush1.bf16.xpose.msra.mxu1 %v19075_v55  ;;  %16684 = vmatprep.subr.bf16.mxu0 %v19050_v37  ;;  %v19315_v55 = vcombine.low %v9633_v26, %v9645_v13  ;;  %v19290_v37 = vcombine.high %v9608_v47, %v9620_v15  ;;  %v9502_v59 = vld [vmem:[#allocation8 + $0x1120] sm:$0xff]  ;;  %v19197_v26 = vcombine.low %v9514_v44, %v9526_v38  ;;  %v9491_v13 = vld [vmem:[#allocation8 + $0x10c8] sm:$0xff] }
 0xdec   :  { %16727 = vmatprep.subr.bf16.mxu1 %v19052_v19  ;;  %v19292_v19 = vcombine.high %v9609_v29, %v9621_v2 }
 0xdf2   :  { %16685 = vmatpush1.bf16.xpose.msra.mxu0 %v19049_v3  ;;  %v19289_v3 = vcombine.low %v9608_v47, %v9620_v15  ;;  %v9466_v47 = vld [vmem:[#allocation8 + $0x1000] sm:$0xff] }
 0xdf3   :  { %16728 = vmatpush1.bf16.xpose.msra.mxu1 %v19051_v57  ;;  %16686 = vmatprep.subr.bf16.mxu0 %v19026_v40  ;;  %v19291_v57 = vcombine.low %v9609_v29, %v9621_v2  ;;  %v19266_v40 = vcombine.high %v9584_v61, %v9596_v11  ;;  %v9478_v15 = vld [vmem:[#allocation8 + $0x1060] sm:$0xff]  ;;  %v9467_v29 = vld [vmem:[#allocation8 + $0x1008] sm:$0xff] }
 0xdf4   :  { %16729 = vmatprep.subr.bf16.mxu1 %v19028_v23  ;;  %v19268_v23 = vcombine.high %v9585_v0, %v9597_v43  ;;  %v9479_v2 = vld [vmem:[#allocation8 + $0x1068] sm:$0xff] }
 0xdfa   :  { %16687 = vmatpush1.bf16.xpose.msra.mxu0 %v19025_v50  ;;  %v19265_v50 = vcombine.low %v9584_v61, %v9596_v11  ;;  %v9442_v61 = vld [vmem:[#allocation8 + $0xf40] sm:$0xff] }
 0xdfb   :  { %16730 = vmatpush1.bf16.xpose.msra.mxu1 %v19027_v52  ;;  %16688 = vmatprep.subr.bf16.mxu0 %v19386_v24  ;;  %v19267_v52 = vcombine.low %v9585_v0, %v9597_v43  ;;  %v19242_v24 = vcombine.high %v9560_v36, %v9572_v1  ;;  %v9454_v11 = vld [vmem:[#allocation8 + $0xfa0] sm:$0xff]  ;;  %v9443_v0 = vld [vmem:[#allocation8 + $0xf48] sm:$0xff] }
 0xdfc   :  { %16731 = vmatprep.subr.bf16.mxu1 %v19388_v14  ;;  %v19244_v14 = vcombine.high %v9561_v45, %v9573_v18  ;;  %v9455_v43 = vld [vmem:[#allocation8 + $0xfa8] sm:$0xff] }
 0xe02   :  { %16689 = vmatpush2.bf16.xpose.msra.mxu0 %v19385_v30  ;;  %v19241_v30 = vcombine.low %v9560_v36, %v9572_v1  ;;  %v9418_v36 = vld [vmem:[#allocation8 + $0xe80] sm:$0xff] }
 0xe03   :  { %16732 = vmatpush2.bf16.xpose.msra.mxu1 %v19387_v12  ;;  %16690 = vmatprep.subr.bf16.mxu0 %v19362_v33  ;;  %v19243_v12 = vcombine.low %v9561_v45, %v9573_v18  ;;  %v19218_v33 = vcombine.high %v9536_v21, %v9548_v6  ;;  %v9430_v1 = vld [vmem:[#allocation8 + $0xee0] sm:$0xff]  ;;  %v9419_v45 = vld [vmem:[#allocation8 + $0xe88] sm:$0xff] }
 0xe04   :  { %16733 = vmatprep.subr.bf16.mxu1 %v19364_v56  ;;  %v19220_v56 = vcombine.high %v9537_v46, %v9549_v49  ;;  %v9431_v18 = vld [vmem:[#allocation8 + $0xee8] sm:$0xff] }
 0xe0a   :  { %16691 = vmatpush2.bf16.xpose.msra.mxu0 %v19361_v4  ;;  %v19217_v4 = vcombine.low %v9536_v21, %v9548_v6  ;;  %v9394_v21 = vld [vmem:[#allocation8 + $0xdc0] sm:$0xff] }
 0xe0b   :  { %16734 = vmatpush2.bf16.xpose.msra.mxu1 %v19363_v7  ;;  %16692 = vmatprep.subr.bf16.mxu0 %v19338_v58  ;;  %v19219_v7 = vcombine.low %v9537_v46, %v9549_v49  ;;  %v19198_v58 = vcombine.high %v9514_v44, %v9526_v38  ;;  %v9406_v6 = vld [vmem:[#allocation8 + $0xe20] sm:$0xff]  ;;  %v9395_v46 = vld [vmem:[#allocation8 + $0xdc8] sm:$0xff] }
 0xe0c   :  { %16735 = vmatprep.subr.bf16.mxu1 %v19340_v20  ;;  %v19200_v20 = vcombine.high %v9515_v32, %v9527_v42  ;;  %v9407_v49 = vld [vmem:[#allocation8 + $0xe28] sm:$0xff]  ;;  %v9370_v44 = vld [vmem:[#allocation8 + $0xd00] sm:$0xff] }
 0xe0d   :  { %v9382_v38 = vld [vmem:[#allocation8 + $0xd60] sm:$0xff] }
 0xe12   :  { %16693 = vmatpush2.bf16.xpose.msra.mxu0 %v19337_v41  ;;  %v9503_v41 = vld [vmem:[#allocation8 + $0x1128] sm:$0xff] }
 0xe13   :  { %16736 = vmatpush2.bf16.xpose.msra.mxu1 %v19339_v25  ;;  %16694 = vmatprep.subr.bf16.mxu0 %v19314_v16  ;;  %v19199_v25 = vcombine.low %v9515_v32, %v9527_v42  ;;  %v19174_v16 = vcombine.high %v9490_v31, %v9502_v59  ;;  %v9371_v32 = vld [vmem:[#allocation8 + $0xd08] sm:$0xff] }
 0xe14   :  { %16737 = vmatprep.subr.bf16.mxu1 %v19316_v60  ;;  %v19176_v60 = vcombine.high %v9491_v13, %v9503_v41  ;;  %v9383_v42 = vld [vmem:[#allocation8 + $0xd68] sm:$0xff] }
 0xe1a   :  { %16695 = vmatpush2.bf16.xpose.msra.mxu0 %v19313_v27  ;;  %v19173_v27 = vcombine.low %v9490_v31, %v9502_v59  ;;  %v9346_v31 = vld [vmem:[#allocation8 + $0xc40] sm:$0xff] }
 0xe1b   :  { %16738 = vmatpush2.bf16.xpose.msra.mxu1 %v19315_v55  ;;  %16696 = vmatprep.subr.bf16.mxu0 %v19290_v37  ;;  %v19175_v55 = vcombine.low %v9491_v13, %v9503_v41  ;;  %v19150_v37 = vcombine.high %v9466_v47, %v9478_v15  ;;  %v9358_v59 = vld [vmem:[#allocation8 + $0xca0] sm:$0xff]  ;;  %v9359_v13 = vld [vmem:[#allocation8 + $0xca8] sm:$0xff]  ;;  %v19053_v41 = vcombine.low %v9370_v44, %v9382_v38 }
 0xe1c   :  { %16739 = vmatprep.subr.bf16.mxu1 %v19292_v19  ;;  %v19152_v19 = vcombine.high %v9467_v29, %v9479_v2 }
 0xe22   :  { %16697 = vmatpush2.bf16.xpose.msra.mxu0 %v19289_v3  ;;  %v19149_v3 = vcombine.low %v9466_v47, %v9478_v15  ;;  %v9706_v47 = vld [vmem:[#allocation8 + $0x1780] sm:$0xff] }
 0xe23   :  { %16740 = vmatpush2.bf16.xpose.msra.mxu1 %v19291_v57  ;;  %16698 = vmatprep.subr.bf16.mxu0 %v19266_v40  ;;  %v19151_v57 = vcombine.low %v9467_v29, %v9479_v2  ;;  %v19126_v40 = vcombine.high %v9442_v61, %v9454_v11  ;;  %v9718_v15 = vld [vmem:[#allocation8 + $0x17e0] sm:$0xff]  ;;  %v9707_v29 = vld [vmem:[#allocation8 + $0x1788] sm:$0xff] }
 0xe24   :  { %16741 = vmatprep.subr.bf16.mxu1 %v19268_v23  ;;  %v19128_v23 = vcombine.high %v9443_v0, %v9455_v43  ;;  %v9719_v2 = vld [vmem:[#allocation8 + $0x17e8] sm:$0xff] }
 0xe2a   :  { %16699 = vmatpush2.bf16.xpose.msra.mxu0 %v19265_v50  ;;  %v19125_v50 = vcombine.low %v9442_v61, %v9454_v11  ;;  %v9682_v61 = vld [vmem:[#allocation8 + $0x16c0] sm:$0xff] }
 0xe2b   :  { %16742 = vmatpush2.bf16.xpose.msra.mxu1 %v19267_v52  ;;  %16700 = vmatprep.subr.bf16.mxu0 %v19242_v24  ;;  %v19127_v52 = vcombine.low %v9443_v0, %v9455_v43  ;;  %v19102_v24 = vcombine.high %v9418_v36, %v9430_v1  ;;  %v9694_v11 = vld [vmem:[#allocation8 + $0x1720] sm:$0xff]  ;;  %v9683_v0 = vld [vmem:[#allocation8 + $0x16c8] sm:$0xff] }
 0xe2c   :  { %16743 = vmatprep.subr.bf16.mxu1 %v19244_v14  ;;  %v19104_v14 = vcombine.high %v9419_v45, %v9431_v18  ;;  %v9695_v43 = vld [vmem:[#allocation8 + $0x1728] sm:$0xff] }
 0xe32   :  { %16701 = vmatpush2.bf16.xpose.msra.mxu0 %v19241_v30  ;;  %v19101_v30 = vcombine.low %v9418_v36, %v9430_v1  ;;  %v9658_v36 = vld [vmem:[#allocation8 + $0x1600] sm:$0xff] }
 0xe33   :  { %16744 = vmatpush2.bf16.xpose.msra.mxu1 %v19243_v12  ;;  %16702 = vmatprep.subr.bf16.mxu0 %v19218_v33  ;;  %v19103_v12 = vcombine.low %v9419_v45, %v9431_v18  ;;  %v19078_v33 = vcombine.high %v9394_v21, %v9406_v6  ;;  %v9670_v1 = vld [vmem:[#allocation8 + $0x1660] sm:$0xff]  ;;  %v9659_v45 = vld [vmem:[#allocation8 + $0x1608] sm:$0xff] }
 0xe34   :  { %16745 = vmatprep.subr.bf16.mxu1 %v19220_v56  ;;  %v19080_v56 = vcombine.high %v9395_v46, %v9407_v49  ;;  %v9671_v18 = vld [vmem:[#allocation8 + $0x1668] sm:$0xff] }
 0xe3a   :  { %16703 = vmatpush2.bf16.xpose.msra.mxu0 %v19217_v4  ;;  %v19077_v4 = vcombine.low %v9394_v21, %v9406_v6  ;;  %v9634_v21 = vld [vmem:[#allocation8 + $0x1540] sm:$0xff] }
 0xe3b   :  { %16746 = vmatpush2.bf16.xpose.msra.mxu1 %v19219_v7  ;;  %16758 = vmatprep.subr.bf16.mxu0 %v19198_v58  ;;  %v19079_v7 = vcombine.low %v9395_v46, %v9407_v49  ;;  %v19054_v58 = vcombine.high %v9370_v44, %v9382_v38  ;;  %v9646_v6 = vld [vmem:[#allocation8 + $0x15a0] sm:$0xff]  ;;  %v9635_v46 = vld [vmem:[#allocation8 + $0x1548] sm:$0xff] }
 0xe3c   :  { %16801 = vmatprep.subr.bf16.mxu1 %v19200_v20  ;;  %v19056_v20 = vcombine.high %v9371_v32, %v9383_v42  ;;  %v9647_v49 = vld [vmem:[#allocation8 + $0x15a8] sm:$0xff]  ;;  %v9610_v44 = vld [vmem:[#allocation8 + $0x1480] sm:$0xff] }
 0xe3d   :  { %v9622_v38 = vld [vmem:[#allocation8 + $0x14e0] sm:$0xff] }
 0xe41   :  { %16705 = vmatmul.mubr.bf16.vlgmr.msra.gmra.mxu0 %v22618_v17 }
 0xe42   :  { %16748 = vmatmul.mubr.bf16.vlgmr.msra.gmra.mxu1 %v22619_v62  ;;  %16759 = vmatpush1.bf16.xpose.msra.mxu0 %v19197_v26  ;;  %v9347_v26 = vld [vmem:[#allocation8 + $0xc48] sm:$0xff] }
 0xe43   :  { %16790 = vmatprep.mubr.bf16.mxu0 %v22267_v39  ;;  %16802 = vmatpush1.bf16.xpose.msra.mxu1 %v19199_v25  ;;  %v19055_v25 = vcombine.low %v9371_v32, %v9383_v42  ;;  %v9611_v32 = vld [vmem:[#allocation8 + $0x1488] sm:$0xff] }
 0xe44   :  { %16833 = vmatprep.mubr.bf16.mxu1 %v22270_v5  ;;  %16760 = vmatprep.subr.bf16.mxu0 %v19174_v16  ;;  %v19030_v16 = vcombine.high %v9346_v31, %v9358_v59  ;;  %v9623_v42 = vld [vmem:[#allocation8 + $0x14e8] sm:$0xff] }
 0xe45   :  { %16803 = vmatprep.subr.bf16.mxu1 %v19176_v60  ;;  %v19032_v60 = vcombine.high %v9347_v26, %v9359_v13 }
 0xe4a   :  { %16761 = vmatpush1.bf16.xpose.msra.mxu0 %v19173_v27  ;;  %v19029_v27 = vcombine.low %v9346_v31, %v9358_v59  ;;  %v9586_v31 = vld [vmem:[#allocation8 + $0x13c0] sm:$0xff] }
 0xe4b   :  { %16804 = vmatpush1.bf16.xpose.msra.mxu1 %v19175_v55  ;;  %16762 = vmatprep.subr.bf16.mxu0 %v19150_v37  ;;  %v19031_v55 = vcombine.low %v9347_v26, %v9359_v13  ;;  %v19390_v37 = vcombine.high %v9706_v47, %v9718_v15  ;;  %v9598_v59 = vld [vmem:[#allocation8 + $0x1420] sm:$0xff]  ;;  %v9587_v26 = vld [vmem:[#allocation8 + $0x13c8] sm:$0xff] }
 0xe4c   :  { %16805 = vmatprep.subr.bf16.mxu1 %v19152_v19  ;;  %v19392_v19 = vcombine.high %v9707_v29, %v9719_v2  ;;  %v9599_v13 = vld [vmem:[#allocation8 + $0x1428] sm:$0xff] }
 0xe52   :  { %16763 = vmatpush1.bf16.xpose.msra.mxu0 %v19149_v3  ;;  %v19389_v3 = vcombine.low %v9706_v47, %v9718_v15  ;;  %v9562_v47 = vld [vmem:[#allocation8 + $0x1300] sm:$0xff] }
 0xe53   :  { %16806 = vmatpush1.bf16.xpose.msra.mxu1 %v19151_v57  ;;  %16764 = vmatprep.subr.bf16.mxu0 %v19126_v40  ;;  %v19391_v57 = vcombine.low %v9707_v29, %v9719_v2  ;;  %v19366_v40 = vcombine.high %v9682_v61, %v9694_v11  ;;  %v9574_v15 = vld [vmem:[#allocation8 + $0x1360] sm:$0xff]  ;;  %v9563_v29 = vld [vmem:[#allocation8 + $0x1308] sm:$0xff] }
 0xe54   :  { %16807 = vmatprep.subr.bf16.mxu1 %v19128_v23  ;;  %v19368_v23 = vcombine.high %v9683_v0, %v9695_v43  ;;  %v9575_v2 = vld [vmem:[#allocation8 + $0x1368] sm:$0xff] }
 0xe5a   :  { %16765 = vmatpush1.bf16.xpose.msra.mxu0 %v19125_v50  ;;  %v19365_v50 = vcombine.low %v9682_v61, %v9694_v11  ;;  %v9538_v61 = vld [vmem:[#allocation8 + $0x1240] sm:$0xff] }
 0xe5b   :  { %16808 = vmatpush1.bf16.xpose.msra.mxu1 %v19127_v52  ;;  %16766 = vmatprep.subr.bf16.mxu0 %v19102_v24  ;;  %v19367_v52 = vcombine.low %v9683_v0, %v9695_v43  ;;  %v19342_v24 = vcombine.high %v9658_v36, %v9670_v1  ;;  %v9550_v11 = vld [vmem:[#allocation8 + $0x12a0] sm:$0xff]  ;;  %v9539_v0 = vld [vmem:[#allocation8 + $0x1248] sm:$0xff] }
 0xe5c   :  { %16809 = vmatprep.subr.bf16.mxu1 %v19104_v14  ;;  %v19344_v14 = vcombine.high %v9659_v45, %v9671_v18  ;;  %v9551_v43 = vld [vmem:[#allocation8 + $0x12a8] sm:$0xff] }
 0xe62   :  { %16767 = vmatpush1.bf16.xpose.msra.mxu0 %v19101_v30  ;;  %v19341_v30 = vcombine.low %v9658_v36, %v9670_v1  ;;  %v9516_v36 = vld [vmem:[#allocation8 + $0x1190] sm:$0xff] }
 0xe63   :  { %16810 = vmatpush1.bf16.xpose.msra.mxu1 %v19103_v12  ;;  %16768 = vmatprep.subr.bf16.mxu0 %v19078_v33  ;;  %v19343_v12 = vcombine.low %v9659_v45, %v9671_v18  ;;  %v19318_v33 = vcombine.high %v9634_v21, %v9646_v6  ;;  %v9528_v1 = vld [vmem:[#allocation8 + $0x11f0] sm:$0xff]  ;;  %v9517_v45 = vld [vmem:[#allocation8 + $0x1198] sm:$0xff] }
 0xe64   :  { %16811 = vmatprep.subr.bf16.mxu1 %v19080_v56  ;;  %v19320_v56 = vcombine.high %v9635_v46, %v9647_v49  ;;  %v9529_v18 = vld [vmem:[#allocation8 + $0x11f8] sm:$0xff] }
 0xe6a   :  { %16769 = vmatpush1.bf16.xpose.msra.mxu0 %v19077_v4  ;;  %v19317_v4 = vcombine.low %v9634_v21, %v9646_v6  ;;  %v9492_v21 = vld [vmem:[#allocation8 + $0x10d0] sm:$0xff] }
 0xe6b   :  { %16812 = vmatpush1.bf16.xpose.msra.mxu1 %v19079_v7  ;;  %16770 = vmatprep.subr.bf16.mxu0 %v19054_v58  ;;  %v19319_v7 = vcombine.low %v9635_v46, %v9647_v49  ;;  %v19294_v58 = vcombine.high %v9610_v44, %v9622_v38  ;;  %v9504_v6 = vld [vmem:[#allocation8 + $0x1130] sm:$0xff]  ;;  %v19201_v46 = vcombine.low %v9516_v36, %v9528_v1  ;;  %v9493_v49 = vld [vmem:[#allocation8 + $0x10d8] sm:$0xff] }
 0xe6c   :  { %16813 = vmatprep.subr.bf16.mxu1 %v19056_v20  ;;  %v19296_v20 = vcombine.high %v9611_v32, %v9623_v42 }
 0xe72   :  { %16771 = vmatpush1.bf16.xpose.msra.mxu0 %v19053_v41  ;;  %v19293_v41 = vcombine.low %v9610_v44, %v9622_v38  ;;  %v9468_v44 = vld [vmem:[#allocation8 + $0x1010] sm:$0xff] }
 0xe73   :  { %16814 = vmatpush1.bf16.xpose.msra.mxu1 %v19055_v25  ;;  %16772 = vmatprep.subr.bf16.mxu0 %v19030_v16  ;;  %v19295_v25 = vcombine.low %v9611_v32, %v9623_v42  ;;  %v19270_v16 = vcombine.high %v9586_v31, %v9598_v59  ;;  %v9480_v38 = vld [vmem:[#allocation8 + $0x1070] sm:$0xff]  ;;  %v9469_v32 = vld [vmem:[#allocation8 + $0x1018] sm:$0xff] }
 0xe74   :  { %16815 = vmatprep.subr.bf16.mxu1 %v19032_v60  ;;  %v19272_v60 = vcombine.high %v9587_v26, %v9599_v13  ;;  %v9481_v42 = vld [vmem:[#allocation8 + $0x1078] sm:$0xff] }
 0xe7a   :  { %16773 = vmatpush1.bf16.xpose.msra.mxu0 %v19029_v27  ;;  %v19269_v27 = vcombine.low %v9586_v31, %v9598_v59  ;;  %v9444_v31 = vld [vmem:[#allocation8 + $0xf50] sm:$0xff] }
 0xe7b   :  { %16816 = vmatpush1.bf16.xpose.msra.mxu1 %v19031_v55  ;;  %16774 = vmatprep.subr.bf16.mxu0 %v19390_v37  ;;  %v19271_v55 = vcombine.low %v9587_v26, %v9599_v13  ;;  %v19246_v37 = vcombine.high %v9562_v47, %v9574_v15  ;;  %v9456_v59 = vld [vmem:[#allocation8 + $0xfb0] sm:$0xff]  ;;  %v9445_v26 = vld [vmem:[#allocation8 + $0xf58] sm:$0xff] }
 0xe7c   :  { %16817 = vmatprep.subr.bf16.mxu1 %v19392_v19  ;;  %v19248_v19 = vcombine.high %v9563_v29, %v9575_v2  ;;  %v9457_v13 = vld [vmem:[#allocation8 + $0xfb8] sm:$0xff] }
 0xe82   :  { %16775 = vmatpush2.bf16.xpose.msra.mxu0 %v19389_v3  ;;  %v19245_v3 = vcombine.low %v9562_v47, %v9574_v15  ;;  %v9420_v47 = vld [vmem:[#allocation8 + $0xe90] sm:$0xff] }
 0xe83   :  { %16818 = vmatpush2.bf16.xpose.msra.mxu1 %v19391_v57  ;;  %16776 = vmatprep.subr.bf16.mxu0 %v19366_v40  ;;  %v19247_v57 = vcombine.low %v9563_v29, %v9575_v2  ;;  %v19222_v40 = vcombine.high %v9538_v61, %v9550_v11  ;;  %v9432_v15 = vld [vmem:[#allocation8 + $0xef0] sm:$0xff]  ;;  %v9421_v29 = vld [vmem:[#allocation8 + $0xe98] sm:$0xff] }
 0xe84   :  { %16819 = vmatprep.subr.bf16.mxu1 %v19368_v23  ;;  %v19224_v23 = vcombine.high %v9539_v0, %v9551_v43  ;;  %v9433_v2 = vld [vmem:[#allocation8 + $0xef8] sm:$0xff] }
 0xe8a   :  { %16777 = vmatpush2.bf16.xpose.msra.mxu0 %v19365_v50  ;;  %v19221_v50 = vcombine.low %v9538_v61, %v9550_v11  ;;  %v9396_v61 = vld [vmem:[#allocation8 + $0xdd0] sm:$0xff] }
 0xe8b   :  { %16820 = vmatpush2.bf16.xpose.msra.mxu1 %v19367_v52  ;;  %16778 = vmatprep.subr.bf16.mxu0 %v19342_v24  ;;  %v19223_v52 = vcombine.low %v9539_v0, %v9551_v43  ;;  %v19202_v24 = vcombine.high %v9516_v36, %v9528_v1  ;;  %v9408_v11 = vld [vmem:[#allocation8 + $0xe30] sm:$0xff]  ;;  %v9397_v0 = vld [vmem:[#allocation8 + $0xdd8] sm:$0xff] }
 0xe8c   :  { %16821 = vmatprep.subr.bf16.mxu1 %v19344_v14  ;;  %v19204_v14 = vcombine.high %v9517_v45, %v9529_v18  ;;  %v9409_v43 = vld [vmem:[#allocation8 + $0xe38] sm:$0xff]  ;;  %v9372_v36 = vld [vmem:[#allocation8 + $0xd10] sm:$0xff] }
 0xe8d   :  { %v9384_v1 = vld [vmem:[#allocation8 + $0xd70] sm:$0xff] }
 0xe92   :  { %16779 = vmatpush2.bf16.xpose.msra.mxu0 %v19341_v30  ;;  %v9505_v30 = vld [vmem:[#allocation8 + $0x1138] sm:$0xff] }
 0xe93   :  { %16822 = vmatpush2.bf16.xpose.msra.mxu1 %v19343_v12  ;;  %16780 = vmatprep.subr.bf16.mxu0 %v19318_v33  ;;  %v19203_v12 = vcombine.low %v9517_v45, %v9529_v18  ;;  %v19178_v33 = vcombine.high %v9492_v21, %v9504_v6  ;;  %v9373_v45 = vld [vmem:[#allocation8 + $0xd18] sm:$0xff] }
 0xe94   :  { %16823 = vmatprep.subr.bf16.mxu1 %v19320_v56  ;;  %v19180_v56 = vcombine.high %v9493_v49, %v9505_v30  ;;  %v9385_v18 = vld [vmem:[#allocation8 + $0xd78] sm:$0xff] }
 0xe9a   :  { %16781 = vmatpush2.bf16.xpose.msra.mxu0 %v19317_v4  ;;  %v19177_v4 = vcombine.low %v9492_v21, %v9504_v6  ;;  %v9348_v21 = vld [vmem:[#allocation8 + $0xc50] sm:$0xff] }
 0xe9b   :  { %16824 = vmatpush2.bf16.xpose.msra.mxu1 %v19319_v7  ;;  %16782 = vmatprep.subr.bf16.mxu0 %v19294_v58  ;;  %v19179_v7 = vcombine.low %v9493_v49, %v9505_v30  ;;  %v19154_v58 = vcombine.high %v9468_v44, %v9480_v38  ;;  %v9360_v6 = vld [vmem:[#allocation8 + $0xcb0] sm:$0xff]  ;;  %v9361_v49 = vld [vmem:[#allocation8 + $0xcb8] sm:$0xff]  ;;  %v19057_v30 = vcombine.low %v9372_v36, %v9384_v1 }
 0xe9c   :  { %16825 = vmatprep.subr.bf16.mxu1 %v19296_v20  ;;  %v19156_v20 = vcombine.high %v9469_v32, %v9481_v42 }
 0xea2   :  { %16783 = vmatpush2.bf16.xpose.msra.mxu0 %v19293_v41  ;;  %v19153_v41 = vcombine.low %v9468_v44, %v9480_v38  ;;  %v9708_v44 = vld [vmem:[#allocation8 + $0x1790] sm:$0xff] }
 0xea3   :  { %16826 = vmatpush2.bf16.xpose.msra.mxu1 %v19295_v25  ;;  %16784 = vmatprep.subr.bf16.mxu0 %v19270_v16  ;;  %v19155_v25 = vcombine.low %v9469_v32, %v9481_v42  ;;  %v19130_v16 = vcombine.high %v9444_v31, %v9456_v59  ;;  %v9720_v38 = vld [vmem:[#allocation8 + $0x17f0] sm:$0xff]  ;;  %v9709_v32 = vld [vmem:[#allocation8 + $0x1798] sm:$0xff] }
 0xea4   :  { %16827 = vmatprep.subr.bf16.mxu1 %v19272_v60  ;;  %v19132_v60 = vcombine.high %v9445_v26, %v9457_v13  ;;  %v9721_v42 = vld [vmem:[#allocation8 + $0x17f8] sm:$0xff] }
 0xeaa   :  { %16785 = vmatpush2.bf16.xpose.msra.mxu0 %v19269_v27  ;;  %v19129_v27 = vcombine.low %v9444_v31, %v9456_v59  ;;  %v9684_v31 = vld [vmem:[#allocation8 + $0x16d0] sm:$0xff] }
 0xeab   :  { %16828 = vmatpush2.bf16.xpose.msra.mxu1 %v19271_v55  ;;  %16786 = vmatprep.subr.bf16.mxu0 %v19246_v37  ;;  %v19131_v55 = vcombine.low %v9445_v26, %v9457_v13  ;;  %v19106_v37 = vcombine.high %v9420_v47, %v9432_v15  ;;  %v9696_v59 = vld [vmem:[#allocation8 + $0x1730] sm:$0xff]  ;;  %v9685_v26 = vld [vmem:[#allocation8 + $0x16d8] sm:$0xff] }
 0xeac   :  { %16829 = vmatprep.subr.bf16.mxu1 %v19248_v19  ;;  %v19108_v19 = vcombine.high %v9421_v29, %v9433_v2  ;;  %v9697_v13 = vld [vmem:[#allocation8 + $0x1738] sm:$0xff] }
 0xeb2   :  { %16787 = vmatpush2.bf16.xpose.msra.mxu0 %v19245_v3  ;;  %v19105_v3 = vcombine.low %v9420_v47, %v9432_v15  ;;  %v9660_v47 = vld [vmem:[#allocation8 + $0x1610] sm:$0xff] }
 0xeb3   :  { %16830 = vmatpush2.bf16.xpose.msra.mxu1 %v19247_v57  ;;  %16788 = vmatprep.subr.bf16.mxu0 %v19222_v40  ;;  %v19107_v57 = vcombine.low %v9421_v29, %v9433_v2  ;;  %v19082_v40 = vcombine.high %v9396_v61, %v9408_v11  ;;  %v9672_v15 = vld [vmem:[#allocation8 + $0x1670] sm:$0xff]  ;;  %v9661_v29 = vld [vmem:[#allocation8 + $0x1618] sm:$0xff] }
 0xeb4   :  { %16831 = vmatprep.subr.bf16.mxu1 %v19224_v23  ;;  %v19084_v23 = vcombine.high %v9397_v0, %v9409_v43  ;;  %v9673_v2 = vld [vmem:[#allocation8 + $0x1678] sm:$0xff] }
 0xeba   :  { %16789 = vmatpush2.bf16.xpose.msra.mxu0 %v19221_v50  ;;  %v19081_v50 = vcombine.low %v9396_v61, %v9408_v11  ;;  %v9636_v61 = vld [vmem:[#allocation8 + $0x1550] sm:$0xff] }
 0xebb   :  { %16832 = vmatpush2.bf16.xpose.msra.mxu1 %v19223_v52  ;;  %16844 = vmatprep.subr.bf16.mxu0 %v19202_v24  ;;  %v19083_v52 = vcombine.low %v9397_v0, %v9409_v43  ;;  %v19058_v24 = vcombine.high %v9372_v36, %v9384_v1  ;;  %v9648_v11 = vld [vmem:[#allocation8 + $0x15b0] sm:$0xff]  ;;  %v9637_v0 = vld [vmem:[#allocation8 + $0x1558] sm:$0xff] }
 0xebc   :  { %16887 = vmatprep.subr.bf16.mxu1 %v19204_v14  ;;  %v19060_v14 = vcombine.high %v9373_v45, %v9385_v18  ;;  %v9649_v43 = vld [vmem:[#allocation8 + $0x15b8] sm:$0xff]  ;;  %v9612_v36 = vld [vmem:[#allocation8 + $0x1490] sm:$0xff] }
 0xebd   :  { %v9624_v1 = vld [vmem:[#allocation8 + $0x14f0] sm:$0xff] }
 0xec1   :  { %16791 = vmatmul.mubr.bf16.vlgmr.msra.gmra.mxu0 %v22622_v51 }
 0xec2   :  { %16834 = vmatmul.mubr.bf16.vlgmr.msra.gmra.mxu1 %v22623_v63  ;;  %16845 = vmatpush1.bf16.xpose.msra.mxu0 %v19201_v46  ;;  %v9349_v46 = vld [vmem:[#allocation8 + $0xc58] sm:$0xff] }
 0xec3   :  { %16876 = vmatprep.mubr.bf16.mxu0 %v22289_v28  ;;  %16888 = vmatpush1.bf16.xpose.msra.mxu1 %v19203_v12  ;;  %v19059_v12 = vcombine.low %v9373_v45, %v9385_v18  ;;  %v9613_v45 = vld [vmem:[#allocation8 + $0x1498] sm:$0xff] }
 0xec4   :  { %16919 = vmatprep.mubr.bf16.mxu1 %v22292_v22  ;;  %16846 = vmatprep.subr.bf16.mxu0 %v19178_v33  ;;  %v19034_v33 = vcombine.high %v9348_v21, %v9360_v6  ;;  %v9625_v18 = vld [vmem:[#allocation8 + $0x14f8] sm:$0xff] }
 0xec5   :  { %16889 = vmatprep.subr.bf16.mxu1 %v19180_v56  ;;  %v19036_v56 = vcombine.high %v9349_v46, %v9361_v49 }
 0xeca   :  { %16847 = vmatpush1.bf16.xpose.msra.mxu0 %v19177_v4  ;;  %v19033_v4 = vcombine.low %v9348_v21, %v9360_v6  ;;  %v9588_v21 = vld [vmem:[#allocation8 + $0x13d0] sm:$0xff] }
 0xecb   :  { %16890 = vmatpush1.bf16.xpose.msra.mxu1 %v19179_v7  ;;  %16848 = vmatprep.subr.bf16.mxu0 %v19154_v58  ;;  %v19035_v7 = vcombine.low %v9349_v46, %v9361_v49  ;;  %v19394_v58 = vcombine.high %v9708_v44, %v9720_v38  ;;  %v9600_v6 = vld [vmem:[#allocation8 + $0x1430] sm:$0xff]  ;;  %v9589_v46 = vld [vmem:[#allocation8 + $0x13d8] sm:$0xff] }
 0xecc   :  { %16891 = vmatprep.subr.bf16.mxu1 %v19156_v20  ;;  %v19396_v20 = vcombine.high %v9709_v32, %v9721_v42  ;;  %v9601_v49 = vld [vmem:[#allocation8 + $0x1438] sm:$0xff] }
 0xed2   :  { %16849 = vmatpush1.bf16.xpose.msra.mxu0 %v19153_v41  ;;  %v19393_v41 = vcombine.low %v9708_v44, %v9720_v38  ;;  %v9564_v44 = vld [vmem:[#allocation8 + $0x1310] sm:$0xff] }
 0xed3   :  { %16892 = vmatpush1.bf16.xpose.msra.mxu1 %v19155_v25  ;;  %16850 = vmatprep.subr.bf16.mxu0 %v19130_v16  ;;  %v19395_v25 = vcombine.low %v9709_v32, %v9721_v42  ;;  %v19370_v16 = vcombine.high %v9684_v31, %v9696_v59  ;;  %v9576_v38 = vld [vmem:[#allocation8 + $0x1370] sm:$0xff]  ;;  %v9565_v32 = vld [vmem:[#allocation8 + $0x1318] sm:$0xff] }
 0xed4   :  { %16893 = vmatprep.subr.bf16.mxu1 %v19132_v60  ;;  %v19372_v60 = vcombine.high %v9685_v26, %v9697_v13  ;;  %v9577_v42 = vld [vmem:[#allocation8 + $0x1378] sm:$0xff] }
 0xeda   :  { %16851 = vmatpush1.bf16.xpose.msra.mxu0 %v19129_v27  ;;  %v19369_v27 = vcombine.low %v9684_v31, %v9696_v59  ;;  %v9540_v31 = vld [vmem:[#allocation8 + $0x1250] sm:$0xff] }
 0xedb   :  { %16894 = vmatpush1.bf16.xpose.msra.mxu1 %v19131_v55  ;;  %16852 = vmatprep.subr.bf16.mxu0 %v19106_v37  ;;  %v19371_v55 = vcombine.low %v9685_v26, %v9697_v13  ;;  %v19346_v37 = vcombine.high %v9660_v47, %v9672_v15  ;;  %v9552_v59 = vld [vmem:[#allocation8 + $0x12b0] sm:$0xff]  ;;  %v9541_v26 = vld [vmem:[#allocation8 + $0x1258] sm:$0xff] }
 0xedc   :  { %16895 = vmatprep.subr.bf16.mxu1 %v19108_v19  ;;  %v19348_v19 = vcombine.high %v9661_v29, %v9673_v2  ;;  %v9553_v13 = vld [vmem:[#allocation8 + $0x12b8] sm:$0xff] }
 0xee2   :  { %16853 = vmatpush1.bf16.xpose.msra.mxu0 %v19105_v3  ;;  %v19345_v3 = vcombine.low %v9660_v47, %v9672_v15  ;;  %v9890_v47 = vld [vmem:[#allocation8 + $0x1d40] sm:$0xff] }
 0xee3   :  { %16896 = vmatpush1.bf16.xpose.msra.mxu1 %v19107_v57  ;;  %16854 = vmatprep.subr.bf16.mxu0 %v19082_v40  ;;  %v19347_v57 = vcombine.low %v9661_v29, %v9673_v2  ;;  %v19322_v40 = vcombine.high %v9636_v61, %v9648_v11  ;;  %v9902_v15 = vld [vmem:[#allocation8 + $0x1da0] sm:$0xff]  ;;  %v9891_v29 = vld [vmem:[#allocation8 + $0x1d48] sm:$0xff] }
 0xee4   :  { %16897 = vmatprep.subr.bf16.mxu1 %v19084_v23  ;;  %v19324_v23 = vcombine.high %v9637_v0, %v9649_v43  ;;  %v9903_v2 = vld [vmem:[#allocation8 + $0x1da8] sm:$0xff] }
 0xeea   :  { %16855 = vmatpush1.bf16.xpose.msra.mxu0 %v19081_v50  ;;  %v19321_v50 = vcombine.low %v9636_v61, %v9648_v11  ;;  %v9866_v61 = vld [vmem:[#allocation8 + $0x1c80] sm:$0xff] }
 0xeeb   :  { %16898 = vmatpush1.bf16.xpose.msra.mxu1 %v19083_v52  ;;  %16856 = vmatprep.subr.bf16.mxu0 %v19058_v24  ;;  %v19323_v52 = vcombine.low %v9637_v0, %v9649_v43  ;;  %v19298_v24 = vcombine.high %v9612_v36, %v9624_v1  ;;  %v9878_v11 = vld [vmem:[#allocation8 + $0x1ce0] sm:$0xff]  ;;  %v19565_v0 = vcombine.low %v9890_v47, %v9902_v15  ;;  %v9867_v43 = vld [vmem:[#allocation8 + $0x1c88] sm:$0xff] }
 0xeec   :  { %16899 = vmatprep.subr.bf16.mxu1 %v19060_v14  ;;  %v19300_v14 = vcombine.high %v9613_v45, %v9625_v18 }
 0xef2   :  { %16857 = vmatpush1.bf16.xpose.msra.mxu0 %v19057_v30  ;;  %v19297_v30 = vcombine.low %v9612_v36, %v9624_v1  ;;  %v22626_v1 = vld [vmem:[#allocation65_spill] sm:$0xff] }
 0xef3   :  { %16900 = vmatpush1.bf16.xpose.msra.mxu1 %v19059_v12  ;;  %16858 = vmatprep.subr.bf16.mxu0 %v19034_v33  ;;  %v19299_v12 = vcombine.low %v9613_v45, %v9625_v18  ;;  %v19274_v33 = vcombine.high %v9588_v21, %v9600_v6  ;;  %v22627_v45 = vld [vmem:[#allocation59_spill] sm:$0xff]  ;;  %v22628_v18 = vld [vmem:[#allocation60_spill] sm:$0xff] }
 0xef4   :  { %16901 = vmatprep.subr.bf16.mxu1 %v19036_v56  ;;  %v19276_v56 = vcombine.high %v9589_v46, %v9601_v49 }
 0xefa   :  { %16859 = vmatpush1.bf16.xpose.msra.mxu0 %v19033_v4  ;;  %v19273_v4 = vcombine.low %v9588_v21, %v9600_v6  ;;  %v19541_v21 = vcombine.low %v9866_v61, %v9878_v11 }
 0xefb   :  { %16902 = vmatpush1.bf16.xpose.msra.mxu1 %v19035_v7  ;;  %16860 = vmatprep.subr.bf16.mxu0 %v19394_v58  ;;  %v19275_v7 = vcombine.low %v9589_v46, %v9601_v49  ;;  %v19250_v58 = vcombine.high %v9564_v44, %v9576_v38 }
 0xefc   :  { %16903 = vmatprep.subr.bf16.mxu1 %v19396_v20  ;;  %v19252_v20 = vcombine.high %v9565_v32, %v9577_v42 }
 0xf02   :  { %16861 = vmatpush2.bf16.xpose.msra.mxu0 %v19393_v41  ;;  %v19249_v41 = vcombine.low %v9564_v44, %v9576_v38 }
 0xf03   :  { %16904 = vmatpush2.bf16.xpose.msra.mxu1 %v19395_v25  ;;  %16862 = vmatprep.subr.bf16.mxu0 %v19370_v16  ;;  %v19251_v25 = vcombine.low %v9565_v32, %v9577_v42  ;;  %v19226_v16 = vcombine.high %v9540_v31, %v9552_v59 }
 0xf04   :  { %16905 = vmatprep.subr.bf16.mxu1 %v19372_v60  ;;  %v19228_v60 = vcombine.high %v9541_v26, %v9553_v13 }
 0xf0a   :  { %16863 = vmatpush2.bf16.xpose.msra.mxu0 %v19369_v27  ;;  %v19225_v27 = vcombine.low %v9540_v31, %v9552_v59 }
 0xf0b   :  { %16906 = vmatpush2.bf16.xpose.msra.mxu1 %v19371_v55  ;;  %16864 = vmatprep.subr.bf16.mxu0 %v19346_v37  ;;  %v19227_v55 = vcombine.low %v9541_v26, %v9553_v13  ;;  %v19566_v37 = vcombine.high %v9890_v47, %v9902_v15 }
 0xf0c   :  { %16907 = vmatprep.subr.bf16.mxu1 %v19348_v19  ;;  %v19568_v19 = vcombine.high %v9891_v29, %v9903_v2 }
 0xf12   :  { %16865 = vmatpush2.bf16.xpose.msra.mxu0 %v19345_v3  ;;  %v9879_v3 = vld [vmem:[#allocation8 + $0x1ce8] sm:$0xff] }
 0xf13   :  { %16908 = vmatpush2.bf16.xpose.msra.mxu1 %v19347_v57  ;;  %16866 = vmatprep.subr.bf16.mxu0 %v19322_v40  ;;  %v19567_v57 = vcombine.low %v9891_v29, %v9903_v2  ;;  %v19542_v40 = vcombine.high %v9866_v61, %v9878_v11  ;;  %v19544_v36 = vcombine.high %v9867_v43, %v9879_v3 }
 0xf14   :  { %16909 = vmatprep.subr.bf16.mxu1 %v19324_v23  ;;  %v22625_v23 = vld [vmem:[#allocation62_spill] sm:$0xff]  ;;  %v19543_v6 = vcombine.low %v9867_v43, %v9879_v3  ;;  %v9722_v3 = vld [vmem:[#allocation8 + $0x1800] sm:$0xff] }
 0xf1a   :  { %16867 = vmatpush2.bf16.xpose.msra.mxu0 %v19321_v50  ;;  %v9842_v50 = vld [vmem:[#allocation8 + $0x1bc0] sm:$0xff] }
 0xf1b   :  { %16910 = vmatpush2.bf16.xpose.msra.mxu1 %v19323_v52  ;;  %16868 = vmatprep.subr.bf16.mxu0 %v19298_v24  ;;  %v9854_v52 = vld [vmem:[#allocation8 + $0x1c20] sm:$0xff]  ;;  %v9843_v24 = vld [vmem:[#allocation8 + $0x1bc8] sm:$0xff] }
 0xf1c   :  { %16911 = vmatprep.subr.bf16.mxu1 %v19300_v14  ;;  %v9855_v14 = vld [vmem:[#allocation8 + $0x1c28] sm:$0xff]  ;;  %v19518_v46 = vcombine.high %v9842_v50, %v9854_v52  ;;  %v19517_v44 = vcombine.low %v9842_v50, %v9854_v52 }
 0xf1d   :  { %v19520_v49 = vcombine.high %v9843_v24, %v9855_v14  ;;  %v19519_v38 = vcombine.low %v9843_v24, %v9855_v14  ;;  %v10082_v24 = vld [vmem:[#allocation8 + $0x2340] sm:$0xff] }
 0xf1e   :  { %v10094_v14 = vld [vmem:[#allocation8 + $0x23a0] sm:$0xff] }
 0xf22   :  { %16869 = vmatpush2.bf16.xpose.msra.mxu0 %v19297_v30  ;;  %v9818_v30 = vld [vmem:[#allocation8 + $0x1b00] sm:$0xff] }
 0xf23   :  { %16912 = vmatpush2.bf16.xpose.msra.mxu1 %v19299_v12  ;;  %16870 = vmatprep.subr.bf16.mxu0 %v19274_v33  ;;  %v9830_v12 = vld [vmem:[#allocation8 + $0x1b60] sm:$0xff]  ;;  %v9819_v33 = vld [vmem:[#allocation8 + $0x1b08] sm:$0xff] }
 0xf24   :  { %16913 = vmatprep.subr.bf16.mxu1 %v19276_v56  ;;  %v9831_v56 = vld [vmem:[#allocation8 + $0x1b68] sm:$0xff]  ;;  %v19494_v32 = vcombine.high %v9818_v30, %v9830_v12  ;;  %v19493_v31 = vcombine.low %v9818_v30, %v9830_v12  ;;  %v19758_v30 = vcombine.high %v10082_v24, %v10094_v14 }
 0xf25   :  { %v19496_v42 = vcombine.high %v9819_v33, %v9831_v56  ;;  %v19495_v59 = vcombine.low %v9819_v33, %v9831_v56  ;;  %v10058_v33 = vld [vmem:[#allocation8 + $0x2280] sm:$0xff] }
 0xf26   :  { %v10070_v56 = vld [vmem:[#allocation8 + $0x22e0] sm:$0xff] }
 0xf2a   :  { %16871 = vmatpush2.bf16.xpose.msra.mxu0 %v19273_v4  ;;  %v9794_v4 = vld [vmem:[#allocation8 + $0x1a40] sm:$0xff] }
 0xf2b   :  { %16914 = vmatpush2.bf16.xpose.msra.mxu1 %v19275_v7  ;;  %16872 = vmatprep.subr.bf16.mxu0 %v19250_v58  ;;  %v9806_v7 = vld [vmem:[#allocation8 + $0x1aa0] sm:$0xff]  ;;  %v9795_v58 = vld [vmem:[#allocation8 + $0x1a48] sm:$0xff] }
 0xf2c   :  { %16915 = vmatprep.subr.bf16.mxu1 %v19252_v20  ;;  %v9807_v20 = vld [vmem:[#allocation8 + $0x1aa8] sm:$0xff]  ;;  %v19470_v26 = vcombine.high %v9794_v4, %v9806_v7  ;;  %v19469_v47 = vcombine.low %v9794_v4, %v9806_v7  ;;  %v19734_v4 = vcombine.high %v10058_v33, %v10070_v56 }
 0xf2d   :  { %v19472_v13 = vcombine.high %v9795_v58, %v9807_v20  ;;  %v19471_v15 = vcombine.low %v9795_v58, %v9807_v20  ;;  %v10034_v58 = vld [vmem:[#allocation8 + $0x21c0] sm:$0xff] }
 0xf2e   :  { %v10046_v20 = vld [vmem:[#allocation8 + $0x2220] sm:$0xff] }
 0xf32   :  { %16873 = vmatpush2.bf16.xpose.msra.mxu0 %v19249_v41  ;;  %v9770_v41 = vld [vmem:[#allocation8 + $0x1980] sm:$0xff] }
 0xf33   :  { %16916 = vmatpush2.bf16.xpose.msra.mxu1 %v19251_v25  ;;  %16874 = vmatprep.subr.bf16.mxu0 %v19226_v16  ;;  %v9782_v25 = vld [vmem:[#allocation8 + $0x19e0] sm:$0xff]  ;;  %v9771_v16 = vld [vmem:[#allocation8 + $0x1988] sm:$0xff] }
 0xf34   :  { %16917 = vmatprep.subr.bf16.mxu1 %v19228_v60  ;;  %v9783_v60 = vld [vmem:[#allocation8 + $0x19e8] sm:$0xff]  ;;  %v19446_v29 = vcombine.high %v9770_v41, %v9782_v25  ;;  %v19445_v61 = vcombine.low %v9770_v41, %v9782_v25  ;;  %v19710_v41 = vcombine.high %v10034_v58, %v10046_v20 }
 0xf35   :  { %v19448_v2 = vcombine.high %v9771_v16, %v9783_v60  ;;  %v19447_v11 = vcombine.low %v9771_v16, %v9783_v60  ;;  %v10010_v16 = vld [vmem:[#allocation8 + $0x2100] sm:$0xff] }
 0xf36   :  { %v10022_v60 = vld [vmem:[#allocation8 + $0x2160] sm:$0xff] }
 0xf3a   :  { %16875 = vmatpush2.bf16.xpose.msra.mxu0 %v19225_v27  ;;  %v9746_v27 = vld [vmem:[#allocation8 + $0x18c0] sm:$0xff] }
 0xf3b   :  { %16918 = vmatpush2.bf16.xpose.msra.mxu1 %v19227_v55  ;;  %16930 = vmatprep.subr.bf16.mxu0 %v19566_v37  ;;  %v9758_v55 = vld [vmem:[#allocation8 + $0x1920] sm:$0xff]  ;;  %v9747_v37 = vld [vmem:[#allocation8 + $0x18c8] sm:$0xff] }
 0xf3c   :  { %16973 = vmatprep.subr.bf16.mxu1 %v19568_v19  ;;  %v9759_v19 = vld [vmem:[#allocation8 + $0x1928] sm:$0xff] }
 0xf3d   :  { %v19424_v43 = vcombine.high %v9747_v37, %v9759_v19 }
 0xf41   :  { %16877 = vmatmul.mubr.bf16.vlgmr.msra.gmra.mxu0 %v22625_v23 }
 0xf42   :  { %16920 = vmatmul.mubr.bf16.vlgmr.msra.gmra.mxu1 %v22626_v1  ;;  %16931 = vmatpush1.bf16.xpose.msra.mxu0 %v19565_v0  ;;  %v19422_v0 = vcombine.high %v9746_v27, %v9758_v55 }
 0xf43   :  { %16962 = vmatprep.mubr.bf16.mxu0 %v22627_v45  ;;  %16974 = vmatpush1.bf16.xpose.msra.mxu1 %v19567_v57  ;;  %v9734_v57 = vld [vmem:[#allocation8 + $0x1860] sm:$0xff]  ;;  %v19421_v45 = vcombine.low %v9746_v27, %v9758_v55  ;;  %v19686_v27 = vcombine.high %v10010_v16, %v10022_v60 }
 0xf44   :  { %17005 = vmatprep.mubr.bf16.mxu1 %v22628_v18  ;;  %16932 = vmatprep.subr.bf16.mxu0 %v19542_v40  ;;  %v9723_v40 = vld [vmem:[#allocation8 + $0x1808] sm:$0xff]  ;;  %v19423_v18 = vcombine.low %v9747_v37, %v9759_v19  ;;  %v19398_v50 = vcombine.high %v9722_v3, %v9734_v57  ;;  %v9986_v37 = vld [vmem:[#allocation8 + $0x2040] sm:$0xff] }
 0xf45   :  { %16975 = vmatprep.subr.bf16.mxu1 %v19544_v36  ;;  %v9735_v36 = vld [vmem:[#allocation8 + $0x1868] sm:$0xff]  ;;  %v9998_v19 = vld [vmem:[#allocation8 + $0x20a0] sm:$0xff] }
 0xf46   :  { %v19400_v52 = vcombine.high %v9723_v40, %v9735_v36 }
 0xf4a   :  { %16933 = vmatpush1.bf16.xpose.msra.mxu0 %v19541_v21  ;;  %v10083_v21 = vld [vmem:[#allocation8 + $0x2348] sm:$0xff] }
 0xf4b   :  { %16976 = vmatpush1.bf16.xpose.msra.mxu1 %v19543_v6  ;;  %16934 = vmatprep.subr.bf16.mxu0 %v19518_v46  ;;  %v10095_v6 = vld [vmem:[#allocation8 + $0x23a8] sm:$0xff]  ;;  %v19397_v46 = vcombine.low %v9722_v3, %v9734_v57  ;;  %v19662_v3 = vcombine.high %v9986_v37, %v9998_v19 }
 0xf4c   :  { %16977 = vmatprep.subr.bf16.mxu1 %v19520_v49  ;;  %v19399_v49 = vcombine.low %v9723_v40, %v9735_v36  ;;  %v19760_v12 = vcombine.high %v10083_v21, %v10095_v6  ;;  %v9962_v40 = vld [vmem:[#allocation8 + $0x1f80] sm:$0xff] }
 0xf4d   :  { %v9974_v36 = vld [vmem:[#allocation8 + $0x1fe0] sm:$0xff] }
 0xf52   :  { %16935 = vmatpush1.bf16.xpose.msra.mxu0 %v19517_v44  ;;  %v10059_v44 = vld [vmem:[#allocation8 + $0x2288] sm:$0xff] }
 0xf53   :  { %16978 = vmatpush1.bf16.xpose.msra.mxu1 %v19519_v38  ;;  %16936 = vmatprep.subr.bf16.mxu0 %v19494_v32  ;;  %v10071_v38 = vld [vmem:[#allocation8 + $0x22e8] sm:$0xff]  ;;  %v19757_v32 = vcombine.low %v10082_v24, %v10094_v14  ;;  %v19638_v24 = vcombine.high %v9962_v40, %v9974_v36 }
 0xf54   :  { %16979 = vmatprep.subr.bf16.mxu1 %v19496_v42  ;;  %v19759_v42 = vcombine.low %v10083_v21, %v10095_v6  ;;  %v19736_v7 = vcombine.high %v10059_v44, %v10071_v38  ;;  %v9938_v21 = vld [vmem:[#allocation8 + $0x1ec0] sm:$0xff] }
 0xf55   :  { %v9950_v6 = vld [vmem:[#allocation8 + $0x1f20] sm:$0xff] }
 0xf5a   :  { %16937 = vmatpush1.bf16.xpose.msra.mxu0 %v19493_v31  ;;  %v10035_v31 = vld [vmem:[#allocation8 + $0x21c8] sm:$0xff] }
 0xf5b   :  { %16980 = vmatpush1.bf16.xpose.msra.mxu1 %v19495_v59  ;;  %16938 = vmatprep.subr.bf16.mxu0 %v19470_v26  ;;  %v10047_v59 = vld [vmem:[#allocation8 + $0x2228] sm:$0xff]  ;;  %v19733_v26 = vcombine.low %v10058_v33, %v10070_v56  ;;  %v19614_v33 = vcombine.high %v9938_v21, %v9950_v6 }
 0xf5c   :  { %16981 = vmatprep.subr.bf16.mxu1 %v19472_v13  ;;  %v19735_v13 = vcombine.low %v10059_v44, %v10071_v38  ;;  %v19712_v25 = vcombine.high %v10035_v31, %v10047_v59  ;;  %v9914_v44 = vld [vmem:[#allocation8 + $0x1e00] sm:$0xff] }
 0xf5d   :  { %v9926_v38 = vld [vmem:[#allocation8 + $0x1e60] sm:$0xff] }
 0xf62   :  { %16939 = vmatpush1.bf16.xpose.msra.mxu0 %v19469_v47  ;;  %v10011_v47 = vld [vmem:[#allocation8 + $0x2108] sm:$0xff] }
 0xf63   :  { %16982 = vmatpush1.bf16.xpose.msra.mxu1 %v19471_v15  ;;  %16940 = vmatprep.subr.bf16.mxu0 %v19446_v29  ;;  %v10023_v15 = vld [vmem:[#allocation8 + $0x2168] sm:$0xff]  ;;  %v19709_v29 = vcombine.low %v10034_v58, %v10046_v20  ;;  %v19590_v58 = vcombine.high %v9914_v44, %v9926_v38 }
 0xf64   :  { %16983 = vmatprep.subr.bf16.mxu1 %v19448_v2  ;;  %v19711_v2 = vcombine.low %v10035_v31, %v10047_v59  ;;  %v19688_v55 = vcombine.high %v10011_v47, %v10023_v15  ;;  %v9892_v31 = vld [vmem:[#allocation8 + $0x1d50] sm:$0xff] }
 0xf65   :  { %v9904_v59 = vld [vmem:[#allocation8 + $0x1db0] sm:$0xff] }
 0xf6a   :  { %16941 = vmatpush1.bf16.xpose.msra.mxu0 %v19445_v61  ;;  %v9987_v61 = vld [vmem:[#allocation8 + $0x2048] sm:$0xff] }
 0xf6b   :  { %16984 = vmatpush1.bf16.xpose.msra.mxu1 %v19447_v11  ;;  %16942 = vmatprep.subr.bf16.mxu0 %v19422_v0  ;;  %v9999_v11 = vld [vmem:[#allocation8 + $0x20a8] sm:$0xff]  ;;  %v19685_v0 = vcombine.low %v10010_v16, %v10022_v60  ;;  %v19570_v16 = vcombine.high %v9892_v31, %v9904_v59 }
 0xf6c   :  { %16985 = vmatprep.subr.bf16.mxu1 %v19424_v43  ;;  %v19687_v43 = vcombine.low %v10011_v47, %v10023_v15  ;;  %v19664_v57 = vcombine.high %v9987_v61, %v9999_v11  ;;  %v22401_v47 = vpop.f32.mrf.mxu0  ;;  %v22403_v15 = vpop.f32.mrf.mxu1 }
 0xf72   :  { %16943 = vmatpush1.bf16.xpose.msra.mxu0 %v19421_v45  ;;  %v9963_v45 = vld [vmem:[#allocation8 + $0x1f88] sm:$0xff] }
 0xf73   :  { %16986 = vmatpush1.bf16.xpose.msra.mxu1 %v19423_v18  ;;  %16944 = vmatprep.subr.bf16.mxu0 %v19398_v50  ;;  %v9975_v18 = vld [vmem:[#allocation8 + $0x1fe8] sm:$0xff]  ;;  %v19661_v50 = vcombine.low %v9986_v37, %v9998_v19  ;;  %v9881_v37 = vld [vmem:[#allocation8 + $0x1cf8] sm:$0xff]  ;;  %v22405_v19 = vpop.f32.mrf.mxu0 }
 0xf74   :  { %16987 = vmatprep.subr.bf16.mxu1 %v19400_v52  ;;  %v19663_v52 = vcombine.low %v9987_v61, %v9999_v11  ;;  %v19640_v14 = vcombine.high %v9963_v45, %v9975_v18  ;;  %v22407_v11 = vpop.f32.mrf.mxu1 }
 0xf7a   :  { %16945 = vmatpush1.bf16.xpose.msra.mxu0 %v19397_v46  ;;  %v9939_v46 = vld [vmem:[#allocation8 + $0x1ec8] sm:$0xff] }
 0xf7b   :  { %16988 = vmatpush1.bf16.xpose.msra.mxu1 %v19399_v49  ;;  %16946 = vmatprep.subr.bf16.mxu0 %v19758_v30  ;;  %v9951_v49 = vld [vmem:[#allocation8 + $0x1f28] sm:$0xff]  ;;  %v19637_v30 = vcombine.low %v9962_v40, %v9974_v36  ;;  %v22411_v40 = vpop.f32.mrf.mxu0  ;;  %v22631_v36 = vld [vmem:[#allocation63_spill] sm:$0xff] }
 0xf7c   :  { %16989 = vmatprep.subr.bf16.mxu1 %v19760_v12  ;;  %v19639_v12 = vcombine.low %v9963_v45, %v9975_v18  ;;  %v19616_v56 = vcombine.high %v9939_v46, %v9951_v49  ;;  %v22414_v45 = vpop.f32.mrf.mxu1  ;;  %v22632_v18 = vld [vmem:[#allocation64_spill] sm:$0xff] }
 0xf82   :  { %16947 = vmatpush2.bf16.xpose.msra.mxu0 %v19757_v32  ;;  %v9915_v32 = vld [vmem:[#allocation8 + $0x1e08] sm:$0xff] }
 0xf83   :  { %16990 = vmatpush2.bf16.xpose.msra.mxu1 %v19759_v42  ;;  %16948 = vmatprep.subr.bf16.mxu0 %v19734_v4  ;;  %v9927_v42 = vld [vmem:[#allocation8 + $0x1e68] sm:$0xff]  ;;  %v19613_v4 = vcombine.low %v9938_v21, %v9950_v6  ;;  %v22417_v6 = vpop.f32.mrf.mxu0 }
 0xf84   :  { %16991 = vmatprep.subr.bf16.mxu1 %v19736_v7  ;;  %v19615_v7 = vcombine.low %v9939_v46, %v9951_v49  ;;  %v19592_v20 = vcombine.high %v9915_v32, %v9927_v42 }
 0xf8a   :  { %16949 = vmatpush2.bf16.xpose.msra.mxu0 %v19733_v26  ;;  %v9893_v26 = vld [vmem:[#allocation8 + $0x1d58] sm:$0xff] }
 0xf8b   :  { %16992 = vmatpush2.bf16.xpose.msra.mxu1 %v19735_v13  ;;  %16950 = vmatprep.subr.bf16.mxu0 %v19710_v41  ;;  %v9905_v13 = vld [vmem:[#allocation8 + $0x1db8] sm:$0xff]  ;;  %v19589_v41 = vcombine.low %v9914_v44, %v9926_v38  ;;  %v9820_v44 = vld [vmem:[#allocation8 + $0x1b10] sm:$0xff] }
 0xf8c   :  { %16993 = vmatprep.subr.bf16.mxu1 %v19712_v25  ;;  %v19591_v25 = vcombine.low %v9915_v32, %v9927_v42  ;;  %v19572_v60 = vcombine.high %v9893_v26, %v9905_v13  ;;  %v19571_v61 = vcombine.low %v9893_v26, %v9905_v13  ;;  %v9832_v38 = vld [vmem:[#allocation8 + $0x1b70] sm:$0xff]  ;;  %v9821_v42 = vld [vmem:[#allocation8 + $0x1b18] sm:$0xff] }
 0xf92   :  { %16951 = vmatpush2.bf16.xpose.msra.mxu0 %v19709_v29  ;;  %v9868_v29 = vld [vmem:[#allocation8 + $0x1c90] sm:$0xff] }
 0xf93   :  { %16994 = vmatpush2.bf16.xpose.msra.mxu1 %v19711_v2  ;;  %16952 = vmatprep.subr.bf16.mxu0 %v19686_v27  ;;  %v9880_v2 = vld [vmem:[#allocation8 + $0x1cf0] sm:$0xff]  ;;  %v19569_v27 = vcombine.low %v9892_v31, %v9904_v59  ;;  %v19498_v31 = vcombine.high %v9820_v44, %v9832_v38 }
 0xf94   :  { %16995 = vmatprep.subr.bf16.mxu1 %v19688_v55  ;;  %v9869_v55 = vld [vmem:[#allocation8 + $0x1c98] sm:$0xff]  ;;  %v19545_v21 = vcombine.low %v9868_v29, %v9880_v2 }
 0xf95   :  { %v19547_v46 = vcombine.low %v9869_v55, %v9881_v37 }
 0xf9a   :  { %16953 = vmatpush2.bf16.xpose.msra.mxu0 %v19685_v0  ;;  %v19546_v0 = vcombine.high %v9868_v29, %v9880_v2  ;;  %v9809_v29 = vld [vmem:[#allocation8 + $0x1ab8] sm:$0xff] }
 0xf9b   :  { %16996 = vmatpush2.bf16.xpose.msra.mxu1 %v19687_v43  ;;  %16954 = vmatprep.subr.bf16.mxu0 %v19662_v3  ;;  %v22629_v43 = vld [vmem:[#allocation17_spill] sm:$0xff]  ;;  %v19548_v3 = vcombine.high %v9869_v55, %v9881_v37 }
 0xf9c   :  { %16997 = vmatprep.subr.bf16.mxu1 %v19664_v57  ;;  %v22630_v57 = vld [vmem:[#allocation19_spill] sm:$0xff] }
 0xfa2   :  { %16955 = vmatpush2.bf16.xpose.msra.mxu0 %v19661_v50  ;;  %v9844_v50 = vld [vmem:[#allocation8 + $0x1bd0] sm:$0xff] }
 0xfa3   :  { %16998 = vmatpush2.bf16.xpose.msra.mxu1 %v19663_v52  ;;  %16956 = vmatprep.subr.bf16.mxu0 %v19638_v24  ;;  %v9856_v52 = vld [vmem:[#allocation8 + $0x1c30] sm:$0xff]  ;;  %v9845_v24 = vld [vmem:[#allocation8 + $0x1bd8] sm:$0xff] }
 0xfa4   :  { %16999 = vmatprep.subr.bf16.mxu1 %v19640_v14  ;;  %v9857_v14 = vld [vmem:[#allocation8 + $0x1c38] sm:$0xff]  ;;  %v19522_v49 = vcombine.high %v9844_v50, %v9856_v52 }
 0xfaa   :  { %16957 = vmatpush2.bf16.xpose.msra.mxu0 %v19637_v30  ;;  %v22419_v30 = vpop.f32.mrf.mxu1 }
 0xfab   :  { %17000 = vmatpush2.bf16.xpose.msra.mxu1 %v19639_v12  ;;  %16958 = vmatprep.subr.bf16.mxu0 %v19614_v33  ;;  %v19524_v12 = vcombine.high %v9845_v24, %v9857_v14  ;;  %v22421_v33 = vpop.f32.mrf.mxu0 }
 0xfac   :  { %17001 = vmatprep.subr.bf16.mxu1 %v19616_v56  ;;  %v22423_v56 = vpop.f32.mrf.mxu1 }
 0xfad   :  { %v22425_v32 = vpop.f32.mrf.mxu0 }
 0xfaf   :  { %v22429_v26 = vpop.f32.mrf.mxu0 }
 0xfb2   :  { %16959 = vmatpush2.bf16.xpose.msra.mxu0 %v19613_v4  ;;  %v9833_v4 = vld [vmem:[#allocation8 + $0x1b78] sm:$0xff] }
 0xfb3   :  { %17002 = vmatpush2.bf16.xpose.msra.mxu1 %v19615_v7  ;;  %16960 = vmatprep.subr.bf16.mxu0 %v19590_v58  ;;  %v22427_v7 = vpop.f32.mrf.mxu1  ;;  %v19521_v58 = vcombine.low %v9844_v50, %v9856_v52  ;;  %v19500_v59 = vcombine.high %v9821_v42, %v9833_v4  ;;  %v19499_v37 = vcombine.low %v9821_v42, %v9833_v4  ;;  %v9773_v50 = vld [vmem:[#allocation8 + $0x1998] sm:$0xff] }
 0xfb4   :  { %17003 = vmatprep.subr.bf16.mxu1 %v19592_v20  ;;  %v19523_v20 = vcombine.low %v9845_v24, %v9857_v14  ;;  %v9785_v52 = vld [vmem:[#allocation8 + $0x19f8] sm:$0xff] }
 0xfb5   :  { %v22431_v13 = vpop.f32.mrf.mxu1  ;;  %v19452_v42 = vcombine.high %v9773_v50, %v9785_v52  ;;  %v22634_v4 = vld [vmem:[#allocation58_spill] sm:$0xff] }
 0xfb7   :  { %v22435_v2 = vpop.f32.mrf.mxu1 }
 0xfba   :  { %16961 = vmatpush2.bf16.xpose.msra.mxu0 %v19589_v41  ;;  %v9796_v41 = vld [vmem:[#allocation8 + $0x1a50] sm:$0xff] }
 0xfbb   :  { %17004 = vmatpush2.bf16.xpose.msra.mxu1 %v19591_v25  ;;  %17016 = vmatprep.subr.bf16.mxu0 %v19570_v16  ;;  %v9808_v25 = vld [vmem:[#allocation8 + $0x1ab0] sm:$0xff]  ;;  %v22433_v16 = vpop.f32.mrf.mxu0 }
 0xfbc   :  { %17059 = vmatprep.subr.bf16.mxu1 %v19572_v60  ;;  %v9797_v60 = vld [vmem:[#allocation8 + $0x1a58] sm:$0xff]  ;;  %v19473_v24 = vcombine.low %v9796_v41, %v9808_v25 }
 0xfbd   :  { %v22437_v55 = vpop.f32.mrf.mxu0 }
 0xfc1   :  { %16963 = vmatmul.mubr.bf16.vlgmr.msra.gmra.mxu0 %v22629_v43  ;;  %v19476_v43 = vcombine.high %v9797_v60, %v9809_v29 }
 0xfc2   :  { %17006 = vmatmul.mubr.bf16.vlgmr.msra.gmra.mxu1 %v22630_v57  ;;  %17017 = vmatpush1.bf16.xpose.msra.mxu0 %v19569_v27  ;;  %v19497_v27 = vcombine.low %v9820_v44, %v9832_v38 }
 0xfc3   :  { %17048 = vmatprep.mubr.bf16.mxu0 %v22631_v36  ;;  %17060 = vmatpush1.bf16.xpose.msra.mxu1 %v19571_v61  ;;  %v19474_v61 = vcombine.high %v9796_v41, %v9808_v25  ;;  %v9772_v36 = vld [vmem:[#allocation8 + $0x1990] sm:$0xff] }
 0xfc4   :  { %17091 = vmatprep.mubr.bf16.mxu1 %v22632_v18  ;;  %17018 = vmatprep.subr.bf16.mxu0 %v19546_v0  ;;  %v22439_v0 = vpop.f32.mrf.mxu1  ;;  %v9784_v18 = vld [vmem:[#allocation8 + $0x19f0] sm:$0xff] }
 0xfc5   :  { %17061 = vmatprep.subr.bf16.mxu1 %v19548_v3  ;;  %v22441_v3 = vpop.f32.mrf.mxu0  ;;  %v9748_v41 = vld [vmem:[#allocation8 + $0x18d0] sm:$0xff] }
 0xfc6   :  { %v22443_v57 = vpop.f32.mrf.mxu1  ;;  %v9760_v25 = vld [vmem:[#allocation8 + $0x1930] sm:$0xff] }
 0xfc7   :  { %v22445_v14 = vpop.f32.mrf.mxu0 }
 0xfc8   :  { %v22448_v38 = vpop.f32.mrf.mxu1 }
 0xfca   :  { %17019 = vmatpush1.bf16.xpose.msra.mxu0 %v19545_v21  ;;  %v19475_v21 = vcombine.low %v9797_v60, %v9809_v29  ;;  %v9749_v29 = vld [vmem:[#allocation8 + $0x18d8] sm:$0xff] }
 0xfcb   :  { %17062 = vmatpush1.bf16.xpose.msra.mxu1 %v19547_v46  ;;  %17020 = vmatprep.subr.bf16.mxu0 %v19522_v49  ;;  %v19450_v46 = vcombine.high %v9772_v36, %v9784_v18  ;;  %v21623_v49 = vld [vmem:[#allocation10] sm:$0x3f] }
 0xfcc   :  { %17063 = vmatprep.subr.bf16.mxu1 %v19524_v12  ;;  %v22633_v12 = vld [vmem:[#allocation18_spill] sm:$0xff] }
 0xfcd   :  { %v10119_v44 = vrot.slane %v21623_v49, %v22633_v12 }
 0xfd2   :  { %17021 = vmatpush1.bf16.xpose.msra.mxu0 %v19521_v58  ;;  %v10123_v58 = vrot.slane %v21623_v49, %v22634_v4  ;;  %v19426_v49 = vcombine.high %v9748_v41, %v9760_v25 }
 0xfd3   :  { %17064 = vmatpush1.bf16.xpose.msra.mxu1 %v19523_v20  ;;  %17022 = vmatprep.subr.bf16.mxu0 %v19498_v31  ;;  %v22451_v20 = vpop.f32.mrf.mxu0  ;;  %v16449_v31 = vadd.f32 %v22401_v47, %v10119_v44 }
 0xfd4   :  { %17065 = vmatprep.subr.bf16.mxu1 %v19500_v59  ;;  %v22454_v59 = vpop.f32.mrf.mxu1  ;;  %v16455_v4 = vadd.f32 %v22417_v6, %v10123_v58 }
 0xfd5   :  { %v16706_v60 = vpop.f32.mrf.mxu0 }
 0xfd7   :  { %v16708_v12 = vpop.f32.mrf.mxu0 }
 0xfda   :  { %17023 = vmatpush1.bf16.xpose.msra.mxu0 %v19497_v27  ;;  %v9761_v27 = vld [vmem:[#allocation8 + $0x1938] sm:$0xff] }
 0xfdb   :  { %17066 = vmatpush1.bf16.xpose.msra.mxu1 %v19499_v37  ;;  %17024 = vmatprep.subr.bf16.mxu0 %v19474_v61  ;;  %v16451_v37 = vadd.f32 %v22405_v19, %v10123_v58  ;;  %v22457_v61 = vpop.f32.mrf.mxu1  ;;  %v19428_v47 = vcombine.high %v9749_v29, %v9761_v27  ;;  %v19425_v58 = vcombine.low %v9748_v41, %v9760_v25  ;;  %v10096_v41 = vld [vmem:[#allocation8 + $0x23b0] sm:$0xff]  ;;  %v10085_v25 = vld [vmem:[#allocation8 + $0x2358] sm:$0xff] }
 0xfdc   :  { %17067 = vmatprep.subr.bf16.mxu1 %v19476_v43  ;;  %v19449_v43 = vcombine.low %v9772_v36, %v9784_v18  ;;  %v9736_v18 = vld [vmem:[#allocation8 + $0x1870] sm:$0xff] }
 0xfdd   :  { %v16751_v23 = vpop.f32.mrf.mxu1 }
 0xfe2   :  { %17025 = vmatpush1.bf16.xpose.msra.mxu0 %v19473_v24  ;;  %v19451_v24 = vcombine.low %v9773_v50, %v9785_v52  ;;  %v9725_v50 = vld [vmem:[#allocation8 + $0x1818] sm:$0xff] }
 0xfe3   :  { %17068 = vmatpush1.bf16.xpose.msra.mxu1 %v19475_v21  ;;  %17026 = vmatprep.subr.bf16.mxu0 %v19450_v46  ;;  %v16492_v21 = vadd.f32 %v22403_v15, %v16449_v31  ;;  %v16453_v46 = vadd.f32 %v22411_v40, %v10119_v44  ;;  %v9724_v15 = vld [vmem:[#allocation8 + $0x1810] sm:$0xff]  ;;  %v16710_v40 = vpop.f32.mrf.mxu0  ;;  %v9737_v52 = vld [vmem:[#allocation8 + $0x1878] sm:$0xff]  ;;  %v16753_v44 = vpop.f32.mrf.mxu1  ;;  %v19427_v31 = vcombine.low %v9749_v29, %v9761_v27 }
 0xfe4   :  { %17069 = vmatprep.subr.bf16.mxu1 %v19452_v42  ;;  %v16494_v42 = vadd.f32 %v22407_v11, %v16451_v37  ;;  %v16498_v11 = vadd.f32 %v22419_v30, %v16455_v4  ;;  %v19402_v37 = vcombine.high %v9724_v15, %v9736_v18  ;;  %v10097_v29 = vld [vmem:[#allocation8 + $0x23b8] sm:$0xff]  ;;  %v19403_v4 = vcombine.low %v9725_v50, %v9737_v52 }
 0xfe5   :  { %v16535_v1 = vadd.f32 %v22421_v33, %v16492_v21  ;;  %v16496_v19 = vadd.f32 %v22414_v45, %v16453_v46  ;;  %v16755_v46 = vpop.f32.mrf.mxu1 }
 0xfe6   :  { %v16537_v36 = vadd.f32 %v22425_v32, %v16494_v42  ;;  %v16541_v32 = vadd.f32 %v22433_v16, %v16498_v11 }
 0xfe7   :  { %v16578_v6 = vadd.f32 %v22423_v56, %v16535_v1  ;;  %v16539_v33 = vadd.f32 %v22429_v26, %v16496_v19  ;;  %v16835_v16 = vpop.f32.mrf.mxu1 }
 0xfe8   :  { %v16580_v45 = vadd.f32 %v22427_v7, %v16537_v36  ;;  %v16584_v56 = vadd.f32 %v22435_v2, %v16541_v32 }
 0xfe9   :  { %v16582_v21 = vadd.f32 %v22431_v13, %v16539_v33  ;;  %v16837_v36 = vpop.f32.mrf.mxu1 }
 0xfea   :  { %17027 = vmatpush1.bf16.xpose.msra.mxu0 %v19449_v43  ;;  %v16621_v43 = vadd.f32 %v22437_v55, %v16578_v6  ;;  %v16623_v30 = vadd.f32 %v22441_v3, %v16580_v45  ;;  %v10084_v55 = vld [vmem:[#allocation8 + $0x2350] sm:$0xff]  ;;  %v16627_v3 = vadd.f32 %v22451_v20, %v16584_v56  ;;  %v19763_v45 = vcombine.low %v10085_v25, %v10097_v29 }
 0xfeb   :  { %17070 = vmatpush1.bf16.xpose.msra.mxu1 %v19451_v24  ;;  %17028 = vmatprep.subr.bf16.mxu0 %v19426_v49  ;;  %v19404_v24 = vcombine.high %v9725_v50, %v9737_v52  ;;  %v16712_v49 = vpop.f32.mrf.mxu0  ;;  %v16625_v7 = vadd.f32 %v22445_v14, %v16582_v21  ;;  %v19762_v19 = vcombine.high %v10084_v55, %v10096_v41  ;;  %v10072_v50 = vld [vmem:[#allocation8 + $0x22f0] sm:$0xff] }
 0xfec   :  { %17071 = vmatprep.subr.bf16.mxu1 %v19428_v47  ;;  %v16664_v26 = vadd.f32 %v22439_v0, %v16621_v43  ;;  %v16666_v13 = vadd.f32 %v22443_v57, %v16623_v30  ;;  %v19401_v47 = vcombine.low %v9724_v15, %v9736_v18  ;;  %v19764_v14 = vcombine.high %v10085_v25, %v10097_v29  ;;  %v16839_v15 = vpop.f32.mrf.mxu1  ;;  %v10060_v18 = vld [vmem:[#allocation8 + $0x2290] sm:$0xff]  ;;  %v10037_v29 = vld [vmem:[#allocation8 + $0x21d8] sm:$0xff] }
 0xfed   :  { %v16792_v1 = vpop.f32.mrf.mxu0  ;;  %v16668_v2 = vadd.f32 %v22448_v38, %v16625_v7  ;;  %v16670_v11 = vadd.f32 %v22454_v59, %v16627_v3  ;;  %v10061_v38 = vld [vmem:[#allocation8 + $0x2298] sm:$0xff]  ;;  %v10036_v25 = vld [vmem:[#allocation8 + $0x21d0] sm:$0xff] }
 0xfee   :  { %v16707_v27 = vadd.f32 %v16706_v60, %v16664_v26  ;;  %v16709_v0 = vadd.f32 %v16708_v12, %v16666_v13  ;;  %v10073_v12 = vld [vmem:[#allocation8 + $0x22f8] sm:$0xff] }
 0xfef   :  { %v16794_v42 = vpop.f32.mrf.mxu0  ;;  %v16711_v33 = vadd.f32 %v16710_v40, %v16668_v2  ;;  %v16713_v20 = vadd.f32 %v16712_v49, %v16670_v11  ;;  %v19740_v21 = vcombine.high %v10061_v38, %v10073_v12  ;;  %v10049_v13 = vld [vmem:[#allocation8 + $0x2238] sm:$0xff]  ;;  %v19739_v2 = vcombine.low %v10061_v38, %v10073_v12  ;;  %v9988_v12 = vld [vmem:[#allocation8 + $0x2050] sm:$0xff] }
 0xff0   :  { %v16750_v6 = vadd.f32 %v22457_v61, %v16707_v27  ;;  %v16752_v57 = vadd.f32 %v16751_v23, %v16709_v0  ;;  %v19738_v61 = vcombine.high %v10060_v18, %v10072_v50  ;;  %v19716_v11 = vcombine.high %v10037_v29, %v10049_v13 }
 0xff1   :  { %v16754_v52 = vadd.f32 %v16753_v44, %v16711_v33  ;;  %v16756_v40 = vadd.f32 %v16755_v46, %v16713_v20  ;;  %v10048_v46 = vld [vmem:[#allocation8 + $0x2230] sm:$0xff]  ;;  %v10013_v20 = vld [vmem:[#allocation8 + $0x2118] sm:$0xff] }
 0xff2   :  { %17029 = vmatpush1.bf16.xpose.msra.mxu0 %v19425_v58  ;;  %v16796_v58 = vpop.f32.mrf.mxu0  ;;  %v16793_v60 = vadd.f32 %v16792_v1, %v16750_v6  ;;  %v19714_v0 = vcombine.high %v10036_v25, %v10048_v46 }
 0xff3   :  { %17072 = vmatpush1.bf16.xpose.msra.mxu1 %v19427_v31  ;;  %17030 = vmatprep.subr.bf16.mxu0 %v19402_v37  ;;  %v16795_v31 = vadd.f32 %v16794_v42, %v16752_v57  ;;  %v19761_v37 = vcombine.low %v10084_v55, %v10096_v41  ;;  %v16797_v43 = vadd.f32 %v16796_v58, %v16754_v52  ;;  %v10012_v58 = vld [vmem:[#allocation8 + $0x2110] sm:$0xff] }
 0xff4   :  { %17073 = vmatprep.subr.bf16.mxu1 %v19404_v24  ;;  %v16798_v59 = vpop.f32.mrf.mxu0  ;;  %v16836_v32 = vadd.f32 %v16835_v16, %v16793_v60  ;;  %v16841_v24 = vpop.f32.mrf.mxu1  ;;  %v10024_v57 = vld [vmem:[#allocation8 + $0x2170] sm:$0xff]  ;;  %v10025_v60 = vld [vmem:[#allocation8 + $0x2178] sm:$0xff] }
 0xff5   :  { %v16838_v49 = vadd.f32 %v16837_v36, %v16795_v31  ;;  %v16799_v30 = vadd.f32 %v16798_v59, %v16756_v40  ;;  %v16840_v44 = vadd.f32 %v16839_v15, %v16797_v43  ;;  %v19713_v15 = vcombine.low %v10036_v25, %v10048_v46  ;;  %v10000_v52 = vld [vmem:[#allocation8 + $0x20b0] sm:$0xff]  ;;  %v9989_v31 = vld [vmem:[#allocation8 + $0x2058] sm:$0xff] }
 0xff6   :  { %v19692_v38 = vcombine.high %v10013_v20, %v10025_v60  ;;  %v19689_v59 = vcombine.low %v10012_v58, %v10024_v57  ;;  %v9976_v43 = vld [vmem:[#allocation8 + $0x1ff0] sm:$0xff] }
 0xff7   :  { %v16842_v3 = vadd.f32 %v16841_v24, %v16799_v30  ;;  %v9965_v24 = vld [vmem:[#allocation8 + $0x1f98] sm:$0xff] }
 0xffa   :  { %17031 = vmatpush1.bf16.xpose.msra.mxu0 %v19401_v47 }
 0xffb   :  { %17074 = vmatpush1.bf16.xpose.msra.mxu1 %v19403_v4  ;;  %17032 = vmatprep.subr.bf16.mxu0 %v19762_v19  ;;  %v19737_v4 = vcombine.low %v10060_v18, %v10072_v50  ;;  %v19715_v18 = vcombine.low %v10037_v29, %v10049_v13  ;;  %v19690_v50 = vcombine.high %v10012_v58, %v10024_v57  ;;  %v9928_v29 = vld [vmem:[#allocation8 + $0x1e70] sm:$0xff]  ;;  %v9917_v13 = vld [vmem:[#allocation8 + $0x1e18] sm:$0xff]  ;;  %v9870_v58 = vld [vmem:[#allocation8 + $0x1ca0] sm:$0xff] }
 0xffc   :  { %17075 = vmatprep.subr.bf16.mxu1 %v19764_v14  ;;  %v9882_v57 = vld [vmem:[#allocation8 + $0x1d00] sm:$0xff] }
0x1001   :  { %v16878_v23 = vpop.f32.mrf.mxu0 }
0x1002   :  { %v16879_v1 = vadd.f32 %v16878_v23, %v16836_v32  ;;  %v16921_v56 = vpop.f32.mrf.mxu1  ;;  %17033 = vmatpush2.bf16.xpose.msra.mxu0 %v19761_v37  ;;  %v10001_v37 = vld [vmem:[#allocation8 + $0x20b8] sm:$0xff]  ;;  %v9964_v32 = vld [vmem:[#allocation8 + $0x1f90] sm:$0xff]  ;;  %v19665_v23 = vcombine.low %v9988_v12, %v10000_v52 }
0x1003   :  { %17076 = vmatpush2.bf16.xpose.msra.mxu1 %v19763_v45  ;;  %v16880_v26 = vpop.f32.mrf.mxu0  ;;  %17034 = vmatprep.subr.bf16.mxu0 %v19738_v61  ;;  %v19691_v45 = vcombine.low %v10013_v20, %v10025_v60  ;;  %v19666_v61 = vcombine.high %v9988_v12, %v10000_v52  ;;  %v19668_v40 = vcombine.high %v9989_v31, %v10001_v37  ;;  %v9871_v60 = vld [vmem:[#allocation8 + $0x1ca8] sm:$0xff]  ;;  %v9846_v12 = vld [vmem:[#allocation8 + $0x1be0] sm:$0xff] }
0x1004   :  { %v16922_v7 = vadd.f32 %v16921_v56, %v16879_v1  ;;  %v16881_v55 = vadd.f32 %v16880_v26, %v16838_v49  ;;  %v16923_v41 = vpop.f32.mrf.mxu1  ;;  %17077 = vmatprep.subr.bf16.mxu1 %v19740_v21  ;;  %v9977_v21 = vld [vmem:[#allocation8 + $0x1ff8] sm:$0xff]  ;;  %v19667_v49 = vcombine.low %v9989_v31, %v10001_v37  ;;  %v19642_v30 = vcombine.high %v9964_v32, %v9976_v43  ;;  %v9940_v56 = vld [vmem:[#allocation8 + $0x1ed0] sm:$0xff]  ;;  %v9858_v52 = vld [vmem:[#allocation8 + $0x1c40] sm:$0xff] }
0x1005   :  { %v16882_v16 = vpop.f32.mrf.mxu0  ;;  %v19644_v1 = vcombine.high %v9965_v24, %v9977_v21  ;;  %v9952_v26 = vld [vmem:[#allocation8 + $0x1f30] sm:$0xff]  ;;  %v9847_v31 = vld [vmem:[#allocation8 + $0x1be8] sm:$0xff] }
0x1006   :  { %17448 = vst [vmem:[#allocation11 + $0x10] sm:$0xff] %v16922_v7  ;;  %v16924_v27 = vadd.f32 %v16923_v41, %v16881_v55  ;;  %v16883_v47 = vadd.f32 %v16882_v16, %v16840_v44  ;;  %v16925_v42 = vpop.f32.mrf.mxu1  ;;  %v9941_v44 = vld [vmem:[#allocation8 + $0x1ed8] sm:$0xff]  ;;  %v19641_v55 = vcombine.low %v9964_v32, %v9976_v43  ;;  %v19643_v41 = vcombine.low %v9965_v24, %v9977_v21  ;;  %v9916_v16 = vld [vmem:[#allocation8 + $0x1e10] sm:$0xff]  ;;  %v9859_v37 = vld [vmem:[#allocation8 + $0x1c48] sm:$0xff] }
0x1007   :  { %v16884_v19 = vpop.f32.mrf.mxu0  ;;  %v9953_v7 = vld [vmem:[#allocation8 + $0x1f38] sm:$0xff]  ;;  %v19618_v25 = vcombine.high %v9940_v56, %v9952_v26  ;;  %v9835_v32 = vld [vmem:[#allocation8 + $0x1b88] sm:$0xff]  ;;  %v19525_v43 = vcombine.low %v9846_v12, %v9858_v52 }
0x1008   :  { %17449 = vst [vmem:[#allocation11 + $0x18] sm:$0xff] %v16924_v27  ;;  %v16926_v36 = vadd.f32 %v16925_v42, %v16883_v47  ;;  %v16885_v14 = vadd.f32 %v16884_v19, %v16842_v3  ;;  %v16927_v6 = vpop.f32.mrf.mxu1  ;;  %v19620_v46 = vcombine.high %v9941_v44, %v9953_v7  ;;  %v9929_v3 = vld [vmem:[#allocation8 + $0x1e78] sm:$0xff]  ;;  %v19617_v27 = vcombine.low %v9940_v56, %v9952_v26  ;;  %v9894_v19 = vld [vmem:[#allocation8 + $0x1d60] sm:$0xff] }
0x1009   :  { %v19619_v47 = vcombine.low %v9941_v44, %v9953_v7  ;;  %v19594_v42 = vcombine.high %v9916_v16, %v9928_v29 }
0x100a   :  { %17454 = vst [vmem:[#allocation11 + $0x40] sm:$0xff] %v16926_v36  ;;  %v16928_v33 = vadd.f32 %v16927_v6, %v16885_v14  ;;  %17035 = vmatpush2.bf16.xpose.msra.mxu0 %v19737_v4  ;;  %v19596_v4 = vcombine.high %v9917_v13, %v9929_v3  ;;  %v9907_v36 = vld [vmem:[#allocation8 + $0x1dc8] sm:$0xff]  ;;  %v19593_v14 = vcombine.low %v9916_v16, %v9928_v29 }
0x100b   :  { %17078 = vmatpush2.bf16.xpose.msra.mxu1 %v19739_v2  ;;  %17036 = vmatprep.subr.bf16.mxu0 %v19714_v0  ;;  %v9906_v2 = vld [vmem:[#allocation8 + $0x1dc0] sm:$0xff]  ;;  %v9895_v0 = vld [vmem:[#allocation8 + $0x1d68] sm:$0xff] }
0x100c   :  { %17455 = vst [vmem:[#allocation11 + $0x48] sm:$0xff] %v16928_v33  ;;  %17079 = vmatprep.subr.bf16.mxu1 %v19716_v11  ;;  %v19595_v11 = vcombine.low %v9917_v13, %v9929_v3  ;;  %v19574_v6 = vcombine.high %v9894_v19, %v9906_v2  ;;  %v19576_v33 = vcombine.high %v9895_v0, %v9907_v36 }
0x100d   :  { %v19573_v20 = vcombine.low %v9894_v19, %v9906_v2 }
0x1012   :  { %17037 = vmatpush2.bf16.xpose.msra.mxu0 %v19713_v15  ;;  %v9883_v15 = vld [vmem:[#allocation8 + $0x1d08] sm:$0xff] }
0x1013   :  { %17080 = vmatpush2.bf16.xpose.msra.mxu1 %v19715_v18  ;;  %17038 = vmatprep.subr.bf16.mxu0 %v19690_v50  ;;  %v19575_v18 = vcombine.low %v9895_v0, %v9907_v36  ;;  %v19550_v50 = vcombine.high %v9870_v58, %v9882_v57 }
0x1014   :  { %17081 = vmatprep.subr.bf16.mxu1 %v19692_v38  ;;  %v19552_v38 = vcombine.high %v9871_v60, %v9883_v15 }
0x101a   :  { %17039 = vmatpush2.bf16.xpose.msra.mxu0 %v19689_v59  ;;  %v19549_v59 = vcombine.low %v9870_v58, %v9882_v57 }
0x101b   :  { %17082 = vmatpush2.bf16.xpose.msra.mxu1 %v19691_v45  ;;  %17040 = vmatprep.subr.bf16.mxu0 %v19666_v61  ;;  %v19551_v45 = vcombine.low %v9871_v60, %v9883_v15  ;;  %v19526_v61 = vcombine.high %v9846_v12, %v9858_v52  ;;  %v10086_v15 = vld [vmem:[#allocation8 + $0x2360] sm:$0xff] }
0x101c   :  { %17083 = vmatprep.subr.bf16.mxu1 %v19668_v40  ;;  %v19528_v40 = vcombine.high %v9847_v31, %v9859_v37 }
0x1022   :  { %17041 = vmatpush2.bf16.xpose.msra.mxu0 %v19665_v23  ;;  %v9798_v23 = vld [vmem:[#allocation8 + $0x1a60] sm:$0xff] }
0x1023   :  { %17084 = vmatpush2.bf16.xpose.msra.mxu1 %v19667_v49  ;;  %17042 = vmatprep.subr.bf16.mxu0 %v19642_v30  ;;  %v9810_v49 = vld [vmem:[#allocation8 + $0x1ac0] sm:$0xff]  ;;  %v9799_v30 = vld [vmem:[#allocation8 + $0x1a68] sm:$0xff] }
0x1024   :  { %17085 = vmatprep.subr.bf16.mxu1 %v19644_v1  ;;  %v9811_v1 = vld [vmem:[#allocation8 + $0x1ac8] sm:$0xff]  ;;  %v19478_v44 = vcombine.high %v9798_v23, %v9810_v49  ;;  %v19477_v16 = vcombine.low %v9798_v23, %v9810_v49 }
0x1025   :  { %v19480_v7 = vcombine.high %v9799_v30, %v9811_v1  ;;  %v19479_v29 = vcombine.low %v9799_v30, %v9811_v1 }
0x102a   :  { %17043 = vmatpush2.bf16.xpose.msra.mxu0 %v19641_v55  ;;  %v9774_v55 = vld [vmem:[#allocation8 + $0x19a0] sm:$0xff] }
0x102b   :  { %17086 = vmatpush2.bf16.xpose.msra.mxu1 %v19643_v41  ;;  %17044 = vmatprep.subr.bf16.mxu0 %v19618_v25  ;;  %v9786_v41 = vld [vmem:[#allocation8 + $0x1a00] sm:$0xff]  ;;  %v9775_v25 = vld [vmem:[#allocation8 + $0x19a8] sm:$0xff] }
0x102c   :  { %17087 = vmatprep.subr.bf16.mxu1 %v19620_v46  ;;  %v9787_v46 = vld [vmem:[#allocation8 + $0x1a08] sm:$0xff]  ;;  %v19454_v13 = vcombine.high %v9774_v55, %v9786_v41  ;;  %v19453_v19 = vcombine.low %v9774_v55, %v9786_v41 }
0x102d   :  { %v19456_v3 = vcombine.high %v9775_v25, %v9787_v46  ;;  %v19455_v2 = vcombine.low %v9775_v25, %v9787_v46 }
0x1032   :  { %17045 = vmatpush2.bf16.xpose.msra.mxu0 %v19617_v27  ;;  %v9750_v27 = vld [vmem:[#allocation8 + $0x18e0] sm:$0xff] }
0x1033   :  { %17088 = vmatpush2.bf16.xpose.msra.mxu1 %v19619_v47  ;;  %17046 = vmatprep.subr.bf16.mxu0 %v19594_v42  ;;  %v9762_v47 = vld [vmem:[#allocation8 + $0x1940] sm:$0xff]  ;;  %v9751_v42 = vld [vmem:[#allocation8 + $0x18e8] sm:$0xff] }
0x1034   :  { %17089 = vmatprep.subr.bf16.mxu1 %v19596_v4  ;;  %v9763_v4 = vld [vmem:[#allocation8 + $0x1948] sm:$0xff]  ;;  %v19430_v0 = vcombine.high %v9750_v27, %v9762_v47  ;;  %v19429_v58 = vcombine.low %v9750_v27, %v9762_v47 }
0x1035   :  { %v19432_v36 = vcombine.high %v9751_v42, %v9763_v4  ;;  %v19431_v57 = vcombine.low %v9751_v42, %v9763_v4 }
0x103a   :  { %17047 = vmatpush2.bf16.xpose.msra.mxu0 %v19593_v14  ;;  %v9726_v14 = vld [vmem:[#allocation8 + $0x1820] sm:$0xff] }
0x103b   :  { %17090 = vmatpush2.bf16.xpose.msra.mxu1 %v19595_v11  ;;  %17102 = vmatprep.subr.bf16.mxu0 %v19574_v6  ;;  %v9738_v11 = vld [vmem:[#allocation8 + $0x1880] sm:$0xff]  ;;  %v9727_v6 = vld [vmem:[#allocation8 + $0x1828] sm:$0xff] }
0x103c   :  { %17145 = vmatprep.subr.bf16.mxu1 %v19576_v33  ;;  %v9739_v33 = vld [vmem:[#allocation8 + $0x1888] sm:$0xff]  ;;  %v19405_v12 = vcombine.low %v9726_v14, %v9738_v11 }
0x103d   :  { %v19408_v60 = vcombine.high %v9727_v6, %v9739_v33  ;;  %v19407_v52 = vcombine.low %v9727_v6, %v9739_v33 }
0x1041   :  { %17049 = vmatmul.mubr.bf16.vlgmr.msra.gmra.mxu0 %v22594_v54  ;;  %v9822_v54 = vld [vmem:[#allocation8 + $0x1b20] sm:$0xff] }
0x1042   :  { %17092 = vmatmul.mubr.bf16.vlgmr.msra.gmra.mxu1 %v22595_v8  ;;  %17103 = vmatpush1.bf16.xpose.msra.mxu0 %v19573_v20  ;;  %v9834_v8 = vld [vmem:[#allocation8 + $0x1b80] sm:$0xff]  ;;  %v19406_v20 = vcombine.high %v9726_v14, %v9738_v11 }
0x1043   :  { %17134 = vmatprep.mubr.bf16.mxu0 %v22217_v53  ;;  %17146 = vmatpush1.bf16.xpose.msra.mxu1 %v19575_v18  ;;  %v9823_v53 = vld [vmem:[#allocation8 + $0x1b28] sm:$0xff]  ;;  %v19502_v24 = vcombine.high %v9822_v54, %v9834_v8  ;;  %v19501_v56 = vcombine.low %v9822_v54, %v9834_v8  ;;  %v10098_v18 = vld [vmem:[#allocation8 + $0x23c0] sm:$0xff] }
0x1044   :  { %17177 = vmatprep.mubr.bf16.mxu1 %v22220_v35  ;;  %17104 = vmatprep.subr.bf16.mxu0 %v19550_v50  ;;  %v19527_v35 = vcombine.low %v9847_v31, %v9859_v37  ;;  %v19504_v21 = vcombine.high %v9823_v53, %v9835_v32  ;;  %v19503_v26 = vcombine.low %v9823_v53, %v9835_v32  ;;  %v10087_v50 = vld [vmem:[#allocation8 + $0x2368] sm:$0xff] }
0x1045   :  { %17147 = vmatprep.subr.bf16.mxu1 %v19552_v38  ;;  %v10099_v38 = vld [vmem:[#allocation8 + $0x23c8] sm:$0xff]  ;;  %v19766_v31 = vcombine.high %v10086_v15, %v10098_v18  ;;  %v19765_v54 = vcombine.low %v10086_v15, %v10098_v18 }
0x1046   :  { %v19768_v37 = vcombine.high %v10087_v50, %v10099_v38  ;;  %v19767_v8 = vcombine.low %v10087_v50, %v10099_v38 }
0x104a   :  { %17105 = vmatpush1.bf16.xpose.msra.mxu0 %v19549_v59  ;;  %v10062_v59 = vld [vmem:[#allocation8 + $0x22a0] sm:$0xff] }
0x104b   :  { %17148 = vmatpush1.bf16.xpose.msra.mxu1 %v19551_v45  ;;  %17106 = vmatprep.subr.bf16.mxu0 %v19526_v61  ;;  %v10074_v45 = vld [vmem:[#allocation8 + $0x2300] sm:$0xff]  ;;  %v10063_v61 = vld [vmem:[#allocation8 + $0x22a8] sm:$0xff] }
0x104c   :  { %17149 = vmatprep.subr.bf16.mxu1 %v19528_v40  ;;  %v10075_v40 = vld [vmem:[#allocation8 + $0x2308] sm:$0xff]  ;;  %v19742_v53 = vcombine.high %v10062_v59, %v10074_v45  ;;  %v19741_v23 = vcombine.low %v10062_v59, %v10074_v45 }
0x104d   :  { %v19744_v32 = vcombine.high %v10063_v61, %v10075_v40  ;;  %v19743_v49 = vcombine.low %v10063_v61, %v10075_v40 }
0x1052   :  { %17107 = vmatpush1.bf16.xpose.msra.mxu0 %v19525_v43  ;;  %v10038_v43 = vld [vmem:[#allocation8 + $0x21e0] sm:$0xff] }
0x1053   :  { %17150 = vmatpush1.bf16.xpose.msra.mxu1 %v19527_v35  ;;  %17108 = vmatprep.subr.bf16.mxu0 %v19502_v24  ;;  %v10050_v35 = vld [vmem:[#allocation8 + $0x2240] sm:$0xff]  ;;  %v10039_v24 = vld [vmem:[#allocation8 + $0x21e8] sm:$0xff] }
0x1054   :  { %17151 = vmatprep.subr.bf16.mxu1 %v19504_v21  ;;  %v10051_v21 = vld [vmem:[#allocation8 + $0x2248] sm:$0xff]  ;;  %v19718_v30 = vcombine.high %v10038_v43, %v10050_v35  ;;  %v19717_v55 = vcombine.low %v10038_v43, %v10050_v35 }
0x1055   :  { %v19720_v1 = vcombine.high %v10039_v24, %v10051_v21  ;;  %v19719_v41 = vcombine.low %v10039_v24, %v10051_v21 }
0x105a   :  { %17109 = vmatpush1.bf16.xpose.msra.mxu0 %v19501_v56  ;;  %v10014_v56 = vld [vmem:[#allocation8 + $0x2120] sm:$0xff] }
0x105b   :  { %17152 = vmatpush1.bf16.xpose.msra.mxu1 %v19503_v26  ;;  %17110 = vmatprep.subr.bf16.mxu0 %v19478_v44  ;;  %v10026_v26 = vld [vmem:[#allocation8 + $0x2180] sm:$0xff]  ;;  %v10015_v44 = vld [vmem:[#allocation8 + $0x2128] sm:$0xff] }
0x105c   :  { %17153 = vmatprep.subr.bf16.mxu1 %v19480_v7  ;;  %v10027_v7 = vld [vmem:[#allocation8 + $0x2188] sm:$0xff]  ;;  %v19694_v25 = vcombine.high %v10014_v56, %v10026_v26  ;;  %v19693_v27 = vcombine.low %v10014_v56, %v10026_v26  ;;  %v9885_v56 = vld [vmem:[#allocation8 + $0x1d18] sm:$0xff] }
0x105d   :  { %v19696_v46 = vcombine.high %v10015_v44, %v10027_v7  ;;  %v19695_v47 = vcombine.low %v10015_v44, %v10027_v7 }
0x1062   :  { %17111 = vmatpush1.bf16.xpose.msra.mxu0 %v19477_v16  ;;  %v9990_v16 = vld [vmem:[#allocation8 + $0x2060] sm:$0xff] }
0x1063   :  { %17154 = vmatpush1.bf16.xpose.msra.mxu1 %v19479_v29  ;;  %17112 = vmatprep.subr.bf16.mxu0 %v19454_v13  ;;  %v10002_v29 = vld [vmem:[#allocation8 + $0x20c0] sm:$0xff]  ;;  %v9991_v13 = vld [vmem:[#allocation8 + $0x2068] sm:$0xff] }
0x1064   :  { %17155 = vmatprep.subr.bf16.mxu1 %v19456_v3  ;;  %v10003_v3 = vld [vmem:[#allocation8 + $0x20c8] sm:$0xff]  ;;  %v19670_v42 = vcombine.high %v9990_v16, %v10002_v29  ;;  %v19669_v14 = vcombine.low %v9990_v16, %v10002_v29 }
0x1065   :  { %v19672_v4 = vcombine.high %v9991_v13, %v10003_v3  ;;  %v19671_v11 = vcombine.low %v9991_v13, %v10003_v3 }
0x106a   :  { %17113 = vmatpush1.bf16.xpose.msra.mxu0 %v19453_v19  ;;  %v9966_v19 = vld [vmem:[#allocation8 + $0x1fa0] sm:$0xff] }
0x106b   :  { %17156 = vmatpush1.bf16.xpose.msra.mxu1 %v19455_v2  ;;  %17114 = vmatprep.subr.bf16.mxu0 %v19430_v0  ;;  %v9978_v2 = vld [vmem:[#allocation8 + $0x2000] sm:$0xff]  ;;  %v9967_v0 = vld [vmem:[#allocation8 + $0x1fa8] sm:$0xff] }
0x106c   :  { %17157 = vmatprep.subr.bf16.mxu1 %v19432_v36  ;;  %v9979_v36 = vld [vmem:[#allocation8 + $0x2008] sm:$0xff]  ;;  %v19646_v6 = vcombine.high %v9966_v19, %v9978_v2  ;;  %v19645_v15 = vcombine.low %v9966_v19, %v9978_v2  ;;  %v9800_v19 = vld [vmem:[#allocation8 + $0x1a70] sm:$0xff] }
0x106d   :  { %v19648_v33 = vcombine.high %v9967_v0, %v9979_v36  ;;  %v19647_v18 = vcombine.low %v9967_v0, %v9979_v36  ;;  %v9812_v2 = vld [vmem:[#allocation8 + $0x1ad0] sm:$0xff]  ;;  %v9801_v0 = vld [vmem:[#allocation8 + $0x1a78] sm:$0xff] }
0x106e   :  { %v9813_v36 = vld [vmem:[#allocation8 + $0x1ad8] sm:$0xff] }
0x1072   :  { %17115 = vmatpush1.bf16.xpose.msra.mxu0 %v19429_v58  ;;  %v9942_v58 = vld [vmem:[#allocation8 + $0x1ee0] sm:$0xff] }
0x1073   :  { %17158 = vmatpush1.bf16.xpose.msra.mxu1 %v19431_v57  ;;  %17116 = vmatprep.subr.bf16.mxu0 %v19406_v20  ;;  %v9954_v57 = vld [vmem:[#allocation8 + $0x1f40] sm:$0xff]  ;;  %v9943_v20 = vld [vmem:[#allocation8 + $0x1ee8] sm:$0xff] }
0x1074   :  { %17159 = vmatprep.subr.bf16.mxu1 %v19408_v60  ;;  %v9955_v60 = vld [vmem:[#allocation8 + $0x1f48] sm:$0xff]  ;;  %v19622_v50 = vcombine.high %v9942_v58, %v9954_v57  ;;  %v19621_v59 = vcombine.low %v9942_v58, %v9954_v57  ;;  %v9776_v58 = vld [vmem:[#allocation8 + $0x19b0] sm:$0xff] }
0x1075   :  { %v19624_v38 = vcombine.high %v9943_v20, %v9955_v60  ;;  %v19623_v45 = vcombine.low %v9943_v20, %v9955_v60  ;;  %v9788_v57 = vld [vmem:[#allocation8 + $0x1a10] sm:$0xff]  ;;  %v9777_v20 = vld [vmem:[#allocation8 + $0x19b8] sm:$0xff] }
0x1076   :  { %v9789_v60 = vld [vmem:[#allocation8 + $0x1a18] sm:$0xff] }
0x107a   :  { %17117 = vmatpush1.bf16.xpose.msra.mxu0 %v19405_v12  ;;  %v9918_v12 = vld [vmem:[#allocation8 + $0x1e20] sm:$0xff] }
0x107b   :  { %17160 = vmatpush1.bf16.xpose.msra.mxu1 %v19407_v52  ;;  %17118 = vmatprep.subr.bf16.mxu0 %v19766_v31  ;;  %v9930_v52 = vld [vmem:[#allocation8 + $0x1e80] sm:$0xff]  ;;  %v9919_v31 = vld [vmem:[#allocation8 + $0x1e28] sm:$0xff] }
0x107c   :  { %17161 = vmatprep.subr.bf16.mxu1 %v19768_v37  ;;  %v9931_v37 = vld [vmem:[#allocation8 + $0x1e88] sm:$0xff]  ;;  %v19598_v61 = vcombine.high %v9918_v12, %v9930_v52  ;;  %v19597_v43 = vcombine.low %v9918_v12, %v9930_v52  ;;  %v9752_v12 = vld [vmem:[#allocation8 + $0x18f0] sm:$0xff] }
0x107d   :  { %v19600_v40 = vcombine.high %v9919_v31, %v9931_v37  ;;  %v19599_v35 = vcombine.low %v9919_v31, %v9931_v37  ;;  %v9764_v52 = vld [vmem:[#allocation8 + $0x1950] sm:$0xff]  ;;  %v9753_v31 = vld [vmem:[#allocation8 + $0x18f8] sm:$0xff] }
0x107e   :  { %v9765_v37 = vld [vmem:[#allocation8 + $0x1958] sm:$0xff] }
0x1082   :  { %17119 = vmatpush2.bf16.xpose.msra.mxu0 %v19765_v54  ;;  %v9896_v54 = vld [vmem:[#allocation8 + $0x1d70] sm:$0xff] }
0x1083   :  { %17162 = vmatpush2.bf16.xpose.msra.mxu1 %v19767_v8  ;;  %17120 = vmatprep.subr.bf16.mxu0 %v19742_v53  ;;  %v9908_v8 = vld [vmem:[#allocation8 + $0x1dd0] sm:$0xff]  ;;  %v9897_v53 = vld [vmem:[#allocation8 + $0x1d78] sm:$0xff] }
0x1084   :  { %17163 = vmatprep.subr.bf16.mxu1 %v19744_v32  ;;  %v9909_v32 = vld [vmem:[#allocation8 + $0x1dd8] sm:$0xff]  ;;  %v19578_v24 = vcombine.high %v9896_v54, %v9908_v8 }
0x1085   :  { %v19580_v21 = vcombine.high %v9897_v53, %v9909_v32  ;;  %v19579_v26 = vcombine.low %v9897_v53, %v9909_v32  ;;  %v9729_v53 = vld [vmem:[#allocation8 + $0x1838] sm:$0xff] }
0x1086   :  { %v9741_v32 = vld [vmem:[#allocation8 + $0x1898] sm:$0xff] }
0x108a   :  { %17121 = vmatpush2.bf16.xpose.msra.mxu0 %v19741_v23  ;;  %v9872_v23 = vld [vmem:[#allocation8 + $0x1cb0] sm:$0xff] }
0x108b   :  { %17164 = vmatpush2.bf16.xpose.msra.mxu1 %v19743_v49  ;;  %17122 = vmatprep.subr.bf16.mxu0 %v19718_v30  ;;  %v9884_v49 = vld [vmem:[#allocation8 + $0x1d10] sm:$0xff]  ;;  %v19577_v30 = vcombine.low %v9896_v54, %v9908_v8 }
0x108c   :  { %17165 = vmatprep.subr.bf16.mxu1 %v19720_v1  ;;  %v9873_v1 = vld [vmem:[#allocation8 + $0x1cb8] sm:$0xff]  ;;  %v19554_v44 = vcombine.high %v9872_v23, %v9884_v49  ;;  %v19553_v16 = vcombine.low %v9872_v23, %v9884_v49  ;;  %v9728_v54 = vld [vmem:[#allocation8 + $0x1830] sm:$0xff] }
0x108d   :  { %v19556_v7 = vcombine.high %v9873_v1, %v9885_v56  ;;  %v19555_v29 = vcombine.low %v9873_v1, %v9885_v56  ;;  %v9740_v8 = vld [vmem:[#allocation8 + $0x1890] sm:$0xff]  ;;  %v10101_v1 = vld [vmem:[#allocation8 + $0x23d8] sm:$0xff] }
0x108e   :  { %v10088_v23 = vld [vmem:[#allocation8 + $0x2370] sm:$0xff]  ;;  %v19409_v56 = vcombine.low %v9728_v54, %v9740_v8 }
0x108f   :  { %v10100_v49 = vld [vmem:[#allocation8 + $0x23d0] sm:$0xff] }
0x1092   :  { %17123 = vmatpush2.bf16.xpose.msra.mxu0 %v19717_v55  ;;  %v9848_v55 = vld [vmem:[#allocation8 + $0x1bf0] sm:$0xff] }
0x1093   :  { %17166 = vmatpush2.bf16.xpose.msra.mxu1 %v19719_v41  ;;  %17124 = vmatprep.subr.bf16.mxu0 %v19694_v25  ;;  %v9860_v41 = vld [vmem:[#allocation8 + $0x1c50] sm:$0xff]  ;;  %v9849_v25 = vld [vmem:[#allocation8 + $0x1bf8] sm:$0xff] }
0x1094   :  { %17167 = vmatprep.subr.bf16.mxu1 %v19696_v46  ;;  %v9861_v46 = vld [vmem:[#allocation8 + $0x1c58] sm:$0xff]  ;;  %v19530_v13 = vcombine.high %v9848_v55, %v9860_v41 }
0x1095   :  { %v19532_v3 = vcombine.high %v9849_v25, %v9861_v46 }
0x109a   :  { %17125 = vmatpush2.bf16.xpose.msra.mxu0 %v19693_v27  ;;  %v9837_v27 = vld [vmem:[#allocation8 + $0x1b98] sm:$0xff] }
0x109b   :  { %17168 = vmatpush2.bf16.xpose.msra.mxu1 %v19695_v47  ;;  %17126 = vmatprep.subr.bf16.mxu0 %v19670_v42  ;;  %v19529_v47 = vcombine.low %v9848_v55, %v9860_v41  ;;  %v10064_v55 = vld [vmem:[#allocation8 + $0x22b0] sm:$0xff] }
0x109c   :  { %17169 = vmatprep.subr.bf16.mxu1 %v19672_v4  ;;  %v10076_v41 = vld [vmem:[#allocation8 + $0x2310] sm:$0xff] }
0x10a2   :  { %17127 = vmatpush2.bf16.xpose.msra.mxu0 %v19669_v14 }
0x10a3   :  { %17170 = vmatpush2.bf16.xpose.msra.mxu1 %v19671_v11  ;;  %17128 = vmatprep.subr.bf16.mxu0 %v19646_v6  ;;  %v19482_v6 = vcombine.high %v9800_v19, %v9812_v2 }
0x10a4   :  { %17171 = vmatprep.subr.bf16.mxu1 %v19648_v33  ;;  %v19484_v33 = vcombine.high %v9801_v0, %v9813_v36 }
0x10aa   :  { %17129 = vmatpush2.bf16.xpose.msra.mxu0 %v19645_v15  ;;  %v19481_v15 = vcombine.low %v9800_v19, %v9812_v2  ;;  %v10016_v19 = vld [vmem:[#allocation8 + $0x2130] sm:$0xff] }
0x10ab   :  { %17172 = vmatpush2.bf16.xpose.msra.mxu1 %v19647_v18  ;;  %17130 = vmatprep.subr.bf16.mxu0 %v19622_v50  ;;  %v19483_v18 = vcombine.low %v9801_v0, %v9813_v36  ;;  %v19458_v50 = vcombine.high %v9776_v58, %v9788_v57  ;;  %v10028_v2 = vld [vmem:[#allocation8 + $0x2190] sm:$0xff]  ;;  %v10017_v0 = vld [vmem:[#allocation8 + $0x2138] sm:$0xff] }
0x10ac   :  { %17173 = vmatprep.subr.bf16.mxu1 %v19624_v38  ;;  %v19460_v38 = vcombine.high %v9777_v20, %v9789_v60  ;;  %v10029_v36 = vld [vmem:[#allocation8 + $0x2198] sm:$0xff] }
0x10b2   :  { %17131 = vmatpush2.bf16.xpose.msra.mxu0 %v19621_v59  ;;  %v19457_v59 = vcombine.low %v9776_v58, %v9788_v57  ;;  %v9992_v58 = vld [vmem:[#allocation8 + $0x2070] sm:$0xff] }
0x10b3   :  { %17174 = vmatpush2.bf16.xpose.msra.mxu1 %v19623_v45  ;;  %17132 = vmatprep.subr.bf16.mxu0 %v19598_v61  ;;  %v19459_v45 = vcombine.low %v9777_v20, %v9789_v60  ;;  %v19434_v61 = vcombine.high %v9752_v12, %v9764_v52  ;;  %v10004_v57 = vld [vmem:[#allocation8 + $0x20d0] sm:$0xff]  ;;  %v9993_v20 = vld [vmem:[#allocation8 + $0x2078] sm:$0xff] }
0x10b4   :  { %17175 = vmatprep.subr.bf16.mxu1 %v19600_v40  ;;  %v19436_v40 = vcombine.high %v9753_v31, %v9765_v37  ;;  %v10005_v60 = vld [vmem:[#allocation8 + $0x20d8] sm:$0xff] }
0x10ba   :  { %17133 = vmatpush2.bf16.xpose.msra.mxu0 %v19597_v43  ;;  %v19433_v43 = vcombine.low %v9752_v12, %v9764_v52  ;;  %v9968_v12 = vld [vmem:[#allocation8 + $0x1fb0] sm:$0xff] }
0x10bb   :  { %17176 = vmatpush2.bf16.xpose.msra.mxu1 %v19599_v35  ;;  %17188 = vmatprep.subr.bf16.mxu0 %v19578_v24  ;;  %v19435_v35 = vcombine.low %v9753_v31, %v9765_v37  ;;  %v19410_v24 = vcombine.high %v9728_v54, %v9740_v8  ;;  %v9980_v52 = vld [vmem:[#allocation8 + $0x2010] sm:$0xff]  ;;  %v9969_v31 = vld [vmem:[#allocation8 + $0x1fb8] sm:$0xff] }
0x10bc   :  { %17231 = vmatprep.subr.bf16.mxu1 %v19580_v21  ;;  %v19412_v21 = vcombine.high %v9729_v53, %v9741_v32  ;;  %v9981_v37 = vld [vmem:[#allocation8 + $0x2018] sm:$0xff]  ;;  %v9944_v54 = vld [vmem:[#allocation8 + $0x1ef0] sm:$0xff] }
0x10bd   :  { %v9956_v8 = vld [vmem:[#allocation8 + $0x1f50] sm:$0xff] }
0x10c1   :  { %17135 = vmatmul.mubr.bf16.vlgmr.msra.gmra.mxu0 %v22606_v9  ;;  %v9824_v9 = vld [vmem:[#allocation8 + $0x1b30] sm:$0xff] }
0x10c2   :  { %17178 = vmatmul.mubr.bf16.vlgmr.msra.gmra.mxu1 %v22607_v34  ;;  %17189 = vmatpush1.bf16.xpose.msra.mxu0 %v19577_v30  ;;  %v9836_v34 = vld [vmem:[#allocation8 + $0x1b90] sm:$0xff]  ;;  %v10089_v30 = vld [vmem:[#allocation8 + $0x2378] sm:$0xff] }
0x10c3   :  { %17220 = vmatprep.mubr.bf16.mxu0 %v22241_v10  ;;  %17232 = vmatpush1.bf16.xpose.msra.mxu1 %v19579_v26  ;;  %v9825_v10 = vld [vmem:[#allocation8 + $0x1b38] sm:$0xff]  ;;  %v19506_v42 = vcombine.high %v9824_v9, %v9836_v34  ;;  %v19505_v14 = vcombine.low %v9824_v9, %v9836_v34  ;;  %v19411_v26 = vcombine.low %v9729_v53, %v9741_v32  ;;  %v10040_v9 = vld [vmem:[#allocation8 + $0x21f0] sm:$0xff] }
0x10c4   :  { %17263 = vmatprep.mubr.bf16.mxu1 %v22244_v48  ;;  %17190 = vmatprep.subr.bf16.mxu0 %v19554_v44  ;;  %v19531_v48 = vcombine.low %v9849_v25, %v9861_v46  ;;  %v19508_v4 = vcombine.high %v9825_v10, %v9837_v27  ;;  %v19507_v11 = vcombine.low %v9825_v10, %v9837_v27  ;;  %v10065_v25 = vld [vmem:[#allocation8 + $0x22b8] sm:$0xff]  ;;  %v10052_v34 = vld [vmem:[#allocation8 + $0x2250] sm:$0xff] }
0x10c5   :  { %17233 = vmatprep.subr.bf16.mxu1 %v19556_v7  ;;  %v19770_v44 = vcombine.high %v10088_v23, %v10100_v49  ;;  %v19772_v7 = vcombine.high %v10089_v30, %v10101_v1  ;;  %v10077_v46 = vld [vmem:[#allocation8 + $0x2318] sm:$0xff] }
0x10c6   :  { %v10041_v10 = vld [vmem:[#allocation8 + $0x21f8] sm:$0xff] }
0x10c7   :  { %v10053_v27 = vld [vmem:[#allocation8 + $0x2258] sm:$0xff] }
0x10c8   :  { %v9945_v53 = vld [vmem:[#allocation8 + $0x1ef8] sm:$0xff] }
0x10c9   :  { %v9957_v32 = vld [vmem:[#allocation8 + $0x1f58] sm:$0xff] }
0x10ca   :  { %17191 = vmatpush1.bf16.xpose.msra.mxu0 %v19553_v16  ;;  %v19769_v16 = vcombine.low %v10088_v23, %v10100_v49  ;;  %v9920_v23 = vld [vmem:[#allocation8 + $0x1e30] sm:$0xff] }
0x10cb   :  { %17234 = vmatpush1.bf16.xpose.msra.mxu1 %v19555_v29  ;;  %17192 = vmatprep.subr.bf16.mxu0 %v19530_v13  ;;  %v19771_v29 = vcombine.low %v10089_v30, %v10101_v1  ;;  %v19746_v13 = vcombine.high %v10064_v55, %v10076_v41  ;;  %v9932_v49 = vld [vmem:[#allocation8 + $0x1e90] sm:$0xff]  ;;  %v9921_v30 = vld [vmem:[#allocation8 + $0x1e38] sm:$0xff] }
0x10cc   :  { %17235 = vmatprep.subr.bf16.mxu1 %v19532_v3  ;;  %v19748_v3 = vcombine.high %v10065_v25, %v10077_v46  ;;  %v9933_v1 = vld [vmem:[#allocation8 + $0x1e98] sm:$0xff] }
0x10d2   :  { %17193 = vmatpush1.bf16.xpose.msra.mxu0 %v19529_v47  ;;  %v19745_v47 = vcombine.low %v10064_v55, %v10076_v41  ;;  %v9898_v55 = vld [vmem:[#allocation8 + $0x1d80] sm:$0xff] }
0x10d3   :  { %17236 = vmatpush1.bf16.xpose.msra.mxu1 %v19531_v48  ;;  %17194 = vmatprep.subr.bf16.mxu0 %v19506_v42  ;;  %v19747_v48 = vcombine.low %v10065_v25, %v10077_v46  ;;  %v19722_v42 = vcombine.high %v10040_v9, %v10052_v34  ;;  %v9910_v41 = vld [vmem:[#allocation8 + $0x1de0] sm:$0xff]  ;;  %v9899_v25 = vld [vmem:[#allocation8 + $0x1d88] sm:$0xff] }
0x10d4   :  { %17237 = vmatprep.subr.bf16.mxu1 %v19508_v4  ;;  %v19724_v4 = vcombine.high %v10041_v10, %v10053_v27  ;;  %v9911_v46 = vld [vmem:[#allocation8 + $0x1de8] sm:$0xff] }
0x10da   :  { %17195 = vmatpush1.bf16.xpose.msra.mxu0 %v19505_v14  ;;  %v19721_v14 = vcombine.low %v10040_v9, %v10052_v34  ;;  %v9874_v9 = vld [vmem:[#allocation8 + $0x1cc0] sm:$0xff] }
0x10db   :  { %17238 = vmatpush1.bf16.xpose.msra.mxu1 %v19507_v11  ;;  %17196 = vmatprep.subr.bf16.mxu0 %v19482_v6  ;;  %v19723_v11 = vcombine.low %v10041_v10, %v10053_v27  ;;  %v19698_v6 = vcombine.high %v10016_v19, %v10028_v2  ;;  %v9886_v34 = vld [vmem:[#allocation8 + $0x1d20] sm:$0xff]  ;;  %v19581_v10 = vcombine.low %v9898_v55, %v9910_v41  ;;  %v9875_v27 = vld [vmem:[#allocation8 + $0x1cc8] sm:$0xff] }
0x10dc   :  { %17239 = vmatprep.subr.bf16.mxu1 %v19484_v33  ;;  %v19700_v33 = vcombine.high %v10017_v0, %v10029_v36 }
0x10e2   :  { %17197 = vmatpush1.bf16.xpose.msra.mxu0 %v19481_v15  ;;  %v19697_v15 = vcombine.low %v10016_v19, %v10028_v2  ;;  %v9850_v19 = vld [vmem:[#allocation8 + $0x1c00] sm:$0xff] }
0x10e3   :  { %17240 = vmatpush1.bf16.xpose.msra.mxu1 %v19483_v18  ;;  %17198 = vmatprep.subr.bf16.mxu0 %v19458_v50  ;;  %v19699_v18 = vcombine.low %v10017_v0, %v10029_v36  ;;  %v19674_v50 = vcombine.high %v9992_v58, %v10004_v57  ;;  %v9862_v2 = vld [vmem:[#allocation8 + $0x1c60] sm:$0xff]  ;;  %v9851_v0 = vld [vmem:[#allocation8 + $0x1c08] sm:$0xff] }
0x10e4   :  { %17241 = vmatprep.subr.bf16.mxu1 %v19460_v38  ;;  %v19676_v38 = vcombine.high %v9993_v20, %v10005_v60  ;;  %v9863_v36 = vld [vmem:[#allocation8 + $0x1c68] sm:$0xff] }
0x10ea   :  { %17199 = vmatpush1.bf16.xpose.msra.mxu0 %v19457_v59  ;;  %v19673_v59 = vcombine.low %v9992_v58, %v10004_v57  ;;  %v9839_v58 = vld [vmem:[#allocation8 + $0x1ba8] sm:$0xff]  ;;  %v19533_v57 = vcombine.low %v9850_v19, %v9862_v2 }
0x10eb   :  { %17242 = vmatpush1.bf16.xpose.msra.mxu1 %v19459_v45  ;;  %17200 = vmatprep.subr.bf16.mxu0 %v19434_v61  ;;  %v19675_v45 = vcombine.low %v9993_v20, %v10005_v60  ;;  %v19650_v61 = vcombine.high %v9968_v12, %v9980_v52 }
0x10ec   :  { %17243 = vmatprep.subr.bf16.mxu1 %v19436_v40  ;;  %v19652_v40 = vcombine.high %v9969_v31, %v9981_v37 }
0x10f2   :  { %17201 = vmatpush1.bf16.xpose.msra.mxu0 %v19433_v43  ;;  %v19649_v43 = vcombine.low %v9968_v12, %v9980_v52 }
0x10f3   :  { %17244 = vmatpush1.bf16.xpose.msra.mxu1 %v19435_v35  ;;  %17202 = vmatprep.subr.bf16.mxu0 %v19410_v24  ;;  %v19651_v35 = vcombine.low %v9969_v31, %v9981_v37  ;;  %v19626_v24 = vcombine.high %v9944_v54, %v9956_v8 }
0x10f4   :  { %17245 = vmatprep.subr.bf16.mxu1 %v19412_v21  ;;  %v19628_v21 = vcombine.high %v9945_v53, %v9957_v32 }
0x10fa   :  { %17203 = vmatpush1.bf16.xpose.msra.mxu0 %v19409_v56  ;;  %v19625_v56 = vcombine.low %v9944_v54, %v9956_v8 }
0x10fb   :  { %17246 = vmatpush1.bf16.xpose.msra.mxu1 %v19411_v26  ;;  %17204 = vmatprep.subr.bf16.mxu0 %v19770_v44  ;;  %v19627_v26 = vcombine.low %v9945_v53, %v9957_v32  ;;  %v19602_v44 = vcombine.high %v9920_v23, %v9932_v49 }
0x10fc   :  { %17247 = vmatprep.subr.bf16.mxu1 %v19772_v7  ;;  %v19604_v7 = vcombine.high %v9921_v30, %v9933_v1 }
0x1102   :  { %17205 = vmatpush2.bf16.xpose.msra.mxu0 %v19769_v16  ;;  %v19601_v16 = vcombine.low %v9920_v23, %v9932_v49 }
0x1103   :  { %17248 = vmatpush2.bf16.xpose.msra.mxu1 %v19771_v29  ;;  %17206 = vmatprep.subr.bf16.mxu0 %v19746_v13  ;;  %v19603_v29 = vcombine.low %v9921_v30, %v9933_v1  ;;  %v19582_v13 = vcombine.high %v9898_v55, %v9910_v41 }
0x1104   :  { %17249 = vmatprep.subr.bf16.mxu1 %v19748_v3  ;;  %v19584_v3 = vcombine.high %v9899_v25, %v9911_v46 }
0x110a   :  { %17207 = vmatpush2.bf16.xpose.msra.mxu0 %v19745_v47  ;;  %v9887_v47 = vld [vmem:[#allocation8 + $0x1d28] sm:$0xff] }
0x110b   :  { %17250 = vmatpush2.bf16.xpose.msra.mxu1 %v19747_v48  ;;  %17208 = vmatprep.subr.bf16.mxu0 %v19722_v42  ;;  %v19583_v48 = vcombine.low %v9899_v25, %v9911_v46  ;;  %v19558_v42 = vcombine.high %v9874_v9, %v9886_v34 }
0x110c   :  { %17251 = vmatprep.subr.bf16.mxu1 %v19724_v4  ;;  %v19560_v4 = vcombine.high %v9875_v27, %v9887_v47 }
0x1112   :  { %17209 = vmatpush2.bf16.xpose.msra.mxu0 %v19721_v14  ;;  %v19557_v14 = vcombine.low %v9874_v9, %v9886_v34 }
0x1113   :  { %17252 = vmatpush2.bf16.xpose.msra.mxu1 %v19723_v11  ;;  %17210 = vmatprep.subr.bf16.mxu0 %v19698_v6  ;;  %v19559_v11 = vcombine.low %v9875_v27, %v9887_v47  ;;  %v19534_v6 = vcombine.high %v9850_v19, %v9862_v2  ;;  %v10066_v47 = vld [vmem:[#allocation8 + $0x22c0] sm:$0xff] }
0x1114   :  { %17253 = vmatprep.subr.bf16.mxu1 %v19700_v33  ;;  %v19536_v33 = vcombine.high %v9851_v0, %v9863_v36 }
0x111a   :  { %17211 = vmatpush2.bf16.xpose.msra.mxu0 %v19697_v15  ;;  %v9802_v15 = vld [vmem:[#allocation8 + $0x1a80] sm:$0xff] }
0x111b   :  { %17254 = vmatpush2.bf16.xpose.msra.mxu1 %v19699_v18  ;;  %17212 = vmatprep.subr.bf16.mxu0 %v19674_v50  ;;  %v9814_v18 = vld [vmem:[#allocation8 + $0x1ae0] sm:$0xff]  ;;  %v9803_v50 = vld [vmem:[#allocation8 + $0x1a88] sm:$0xff] }
0x111c   :  { %17255 = vmatprep.subr.bf16.mxu1 %v19676_v38  ;;  %v9815_v38 = vld [vmem:[#allocation8 + $0x1ae8] sm:$0xff]  ;;  %v19486_v31 = vcombine.high %v9802_v15, %v9814_v18  ;;  %v19485_v54 = vcombine.low %v9802_v15, %v9814_v18 }
0x111d   :  { %v19488_v37 = vcombine.high %v9803_v50, %v9815_v38  ;;  %v19487_v8 = vcombine.low %v9803_v50, %v9815_v38 }
0x1122   :  { %17213 = vmatpush2.bf16.xpose.msra.mxu0 %v19673_v59  ;;  %v9778_v59 = vld [vmem:[#allocation8 + $0x19c0] sm:$0xff] }
0x1123   :  { %17256 = vmatpush2.bf16.xpose.msra.mxu1 %v19675_v45  ;;  %17214 = vmatprep.subr.bf16.mxu0 %v19650_v61  ;;  %v9790_v45 = vld [vmem:[#allocation8 + $0x1a20] sm:$0xff]  ;;  %v9779_v61 = vld [vmem:[#allocation8 + $0x19c8] sm:$0xff] }
0x1124   :  { %17257 = vmatprep.subr.bf16.mxu1 %v19652_v40  ;;  %v9791_v40 = vld [vmem:[#allocation8 + $0x1a28] sm:$0xff]  ;;  %v19462_v53 = vcombine.high %v9778_v59, %v9790_v45  ;;  %v19461_v23 = vcombine.low %v9778_v59, %v9790_v45 }
0x1125   :  { %v19464_v32 = vcombine.high %v9779_v61, %v9791_v40  ;;  %v19463_v49 = vcombine.low %v9779_v61, %v9791_v40 }
0x112a   :  { %17215 = vmatpush2.bf16.xpose.msra.mxu0 %v19649_v43  ;;  %v9754_v43 = vld [vmem:[#allocation8 + $0x1900] sm:$0xff] }
0x112b   :  { %17258 = vmatpush2.bf16.xpose.msra.mxu1 %v19651_v35  ;;  %17216 = vmatprep.subr.bf16.mxu0 %v19626_v24  ;;  %v9766_v35 = vld [vmem:[#allocation8 + $0x1960] sm:$0xff]  ;;  %v9755_v24 = vld [vmem:[#allocation8 + $0x1908] sm:$0xff] }
0x112c   :  { %17259 = vmatprep.subr.bf16.mxu1 %v19628_v21  ;;  %v9767_v21 = vld [vmem:[#allocation8 + $0x1968] sm:$0xff]  ;;  %v19438_v30 = vcombine.high %v9754_v43, %v9766_v35  ;;  %v19437_v55 = vcombine.low %v9754_v43, %v9766_v35 }
0x112d   :  { %v19440_v1 = vcombine.high %v9755_v24, %v9767_v21  ;;  %v19439_v41 = vcombine.low %v9755_v24, %v9767_v21 }
0x1132   :  { %17217 = vmatpush2.bf16.xpose.msra.mxu0 %v19625_v56  ;;  %v9730_v56 = vld [vmem:[#allocation8 + $0x1840] sm:$0xff] }
0x1133   :  { %17260 = vmatpush2.bf16.xpose.msra.mxu1 %v19627_v26  ;;  %17218 = vmatprep.subr.bf16.mxu0 %v19602_v44  ;;  %v9742_v26 = vld [vmem:[#allocation8 + $0x18a0] sm:$0xff]  ;;  %v9731_v44 = vld [vmem:[#allocation8 + $0x1848] sm:$0xff] }
0x1134   :  { %17261 = vmatprep.subr.bf16.mxu1 %v19604_v7  ;;  %v9743_v7 = vld [vmem:[#allocation8 + $0x18a8] sm:$0xff]  ;;  %v19414_v25 = vcombine.high %v9730_v56, %v9742_v26  ;;  %v19413_v9 = vcombine.low %v9730_v56, %v9742_v26 }
0x1135   :  { %v19416_v46 = vcombine.high %v9731_v44, %v9743_v7  ;;  %v19415_v34 = vcombine.low %v9731_v44, %v9743_v7 }
0x113a   :  { %17219 = vmatpush2.bf16.xpose.msra.mxu0 %v19601_v16  ;;  %v10090_v16 = vld [vmem:[#allocation8 + $0x2380] sm:$0xff] }
0x113b   :  { %17262 = vmatpush2.bf16.xpose.msra.mxu1 %v19603_v29  ;;  %17274 = vmatprep.subr.bf16.mxu0 %v19582_v13  ;;  %v10102_v29 = vld [vmem:[#allocation8 + $0x23e0] sm:$0xff]  ;;  %v10091_v13 = vld [vmem:[#allocation8 + $0x2388] sm:$0xff] }
0x113c   :  { %17317 = vmatprep.subr.bf16.mxu1 %v19584_v3  ;;  %v10103_v3 = vld [vmem:[#allocation8 + $0x23e8] sm:$0xff]  ;;  %v19773_v19 = vcombine.low %v10090_v16, %v10102_v29 }
0x113d   :  { %v19776_v27 = vcombine.high %v10091_v13, %v10103_v3  ;;  %v19775_v2 = vcombine.low %v10091_v13, %v10103_v3 }
0x1141   :  { %17221 = vmatmul.mubr.bf16.vlgmr.msra.gmra.mxu0 %v22618_v17  ;;  %v9826_v17 = vld [vmem:[#allocation8 + $0x1b40] sm:$0xff] }
0x1142   :  { %17264 = vmatmul.mubr.bf16.vlgmr.msra.gmra.mxu1 %v22619_v62  ;;  %17275 = vmatpush1.bf16.xpose.msra.mxu0 %v19581_v10  ;;  %v9838_v62 = vld [vmem:[#allocation8 + $0x1ba0] sm:$0xff]  ;;  %v19774_v10 = vcombine.high %v10090_v16, %v10102_v29 }
0x1143   :  { %17306 = vmatprep.mubr.bf16.mxu0 %v22267_v39  ;;  %17318 = vmatpush1.bf16.xpose.msra.mxu1 %v19583_v48  ;;  %v9827_v39 = vld [vmem:[#allocation8 + $0x1b48] sm:$0xff]  ;;  %v19510_v20 = vcombine.high %v9826_v17, %v9838_v62  ;;  %v19509_v12 = vcombine.low %v9826_v17, %v9838_v62  ;;  %v10078_v48 = vld [vmem:[#allocation8 + $0x2320] sm:$0xff] }
0x1144   :  { %17349 = vmatprep.mubr.bf16.mxu1 %v22270_v5  ;;  %17276 = vmatprep.subr.bf16.mxu0 %v19558_v42  ;;  %v19535_v5 = vcombine.low %v9851_v0, %v9863_v36  ;;  %v19512_v60 = vcombine.high %v9827_v39, %v9839_v58  ;;  %v19511_v52 = vcombine.low %v9827_v39, %v9839_v58  ;;  %v10067_v42 = vld [vmem:[#allocation8 + $0x22c8] sm:$0xff] }
0x1145   :  { %17319 = vmatprep.subr.bf16.mxu1 %v19560_v4  ;;  %v10079_v4 = vld [vmem:[#allocation8 + $0x2328] sm:$0xff]  ;;  %v19750_v0 = vcombine.high %v10066_v47, %v10078_v48  ;;  %v19749_v17 = vcombine.low %v10066_v47, %v10078_v48 }
0x1146   :  { %v19752_v36 = vcombine.high %v10067_v42, %v10079_v4  ;;  %v19751_v62 = vcombine.low %v10067_v42, %v10079_v4 }
0x114a   :  { %17277 = vmatpush1.bf16.xpose.msra.mxu0 %v19557_v14  ;;  %v10042_v14 = vld [vmem:[#allocation8 + $0x2200] sm:$0xff] }
0x114b   :  { %17320 = vmatpush1.bf16.xpose.msra.mxu1 %v19559_v11  ;;  %17278 = vmatprep.subr.bf16.mxu0 %v19534_v6  ;;  %v10054_v11 = vld [vmem:[#allocation8 + $0x2260] sm:$0xff]  ;;  %v10043_v6 = vld [vmem:[#allocation8 + $0x2208] sm:$0xff] }
0x114c   :  { %17321 = vmatprep.subr.bf16.mxu1 %v19536_v33  ;;  %v10055_v33 = vld [vmem:[#allocation8 + $0x2268] sm:$0xff]  ;;  %v19726_v39 = vcombine.high %v10042_v14, %v10054_v11  ;;  %v19725_v15 = vcombine.low %v10042_v14, %v10054_v11  ;;  %v9889_v14 = vld [vmem:[#allocation8 + $0x1d38] sm:$0xff] }
0x114d   :  { %v19728_v58 = vcombine.high %v10043_v6, %v10055_v33  ;;  %v19727_v18 = vcombine.low %v10043_v6, %v10055_v33 }
0x1152   :  { %17279 = vmatpush1.bf16.xpose.msra.mxu0 %v19533_v57  ;;  %v10018_v57 = vld [vmem:[#allocation8 + $0x2140] sm:$0xff] }
0x1153   :  { %17322 = vmatpush1.bf16.xpose.msra.mxu1 %v19535_v5  ;;  %17280 = vmatprep.subr.bf16.mxu0 %v19510_v20  ;;  %v10030_v5 = vld [vmem:[#allocation8 + $0x21a0] sm:$0xff]  ;;  %v10019_v20 = vld [vmem:[#allocation8 + $0x2148] sm:$0xff] }
0x1154   :  { %17323 = vmatprep.subr.bf16.mxu1 %v19512_v60  ;;  %v10031_v60 = vld [vmem:[#allocation8 + $0x21a8] sm:$0xff]  ;;  %v19702_v50 = vcombine.high %v10018_v57, %v10030_v5  ;;  %v19701_v59 = vcombine.low %v10018_v57, %v10030_v5 }
0x1155   :  { %v19704_v38 = vcombine.high %v10019_v20, %v10031_v60  ;;  %v19703_v45 = vcombine.low %v10019_v20, %v10031_v60 }
0x115a   :  { %17281 = vmatpush1.bf16.xpose.msra.mxu0 %v19509_v12  ;;  %v9994_v12 = vld [vmem:[#allocation8 + $0x2080] sm:$0xff] }
0x115b   :  { %17324 = vmatpush1.bf16.xpose.msra.mxu1 %v19511_v52  ;;  %17282 = vmatprep.subr.bf16.mxu0 %v19486_v31  ;;  %v10006_v52 = vld [vmem:[#allocation8 + $0x20e0] sm:$0xff]  ;;  %v9995_v31 = vld [vmem:[#allocation8 + $0x2088] sm:$0xff] }
0x115c   :  { %17325 = vmatprep.subr.bf16.mxu1 %v19488_v37  ;;  %v10007_v37 = vld [vmem:[#allocation8 + $0x20e8] sm:$0xff]  ;;  %v19678_v61 = vcombine.high %v9994_v12, %v10006_v52  ;;  %v19677_v43 = vcombine.low %v9994_v12, %v10006_v52  ;;  %v9804_v12 = vld [vmem:[#allocation8 + $0x1a90] sm:$0xff] }
0x115d   :  { %v19680_v40 = vcombine.high %v9995_v31, %v10007_v37  ;;  %v19679_v35 = vcombine.low %v9995_v31, %v10007_v37  ;;  %v9816_v52 = vld [vmem:[#allocation8 + $0x1af0] sm:$0xff]  ;;  %v9805_v31 = vld [vmem:[#allocation8 + $0x1a98] sm:$0xff] }
0x115e   :  { %v9817_v37 = vld [vmem:[#allocation8 + $0x1af8] sm:$0xff] }
0x1162   :  { %17283 = vmatpush1.bf16.xpose.msra.mxu0 %v19485_v54  ;;  %v9970_v54 = vld [vmem:[#allocation8 + $0x1fc0] sm:$0xff] }
0x1163   :  { %17326 = vmatpush1.bf16.xpose.msra.mxu1 %v19487_v8  ;;  %17284 = vmatprep.subr.bf16.mxu0 %v19462_v53  ;;  %v9982_v8 = vld [vmem:[#allocation8 + $0x2020] sm:$0xff]  ;;  %v9971_v53 = vld [vmem:[#allocation8 + $0x1fc8] sm:$0xff] }
0x1164   :  { %17327 = vmatprep.subr.bf16.mxu1 %v19464_v32  ;;  %v9983_v32 = vld [vmem:[#allocation8 + $0x2028] sm:$0xff]  ;;  %v19654_v24 = vcombine.high %v9970_v54, %v9982_v8  ;;  %v19653_v56 = vcombine.low %v9970_v54, %v9982_v8  ;;  %v9780_v54 = vld [vmem:[#allocation8 + $0x19d0] sm:$0xff] }
0x1165   :  { %v19656_v21 = vcombine.high %v9971_v53, %v9983_v32  ;;  %v19655_v26 = vcombine.low %v9971_v53, %v9983_v32  ;;  %v9792_v8 = vld [vmem:[#allocation8 + $0x1a30] sm:$0xff]  ;;  %v9781_v53 = vld [vmem:[#allocation8 + $0x19d8] sm:$0xff] }
0x1166   :  { %v9793_v32 = vld [vmem:[#allocation8 + $0x1a38] sm:$0xff] }
0x116a   :  { %17285 = vmatpush1.bf16.xpose.msra.mxu0 %v19461_v23  ;;  %v9946_v23 = vld [vmem:[#allocation8 + $0x1f00] sm:$0xff] }
0x116b   :  { %17328 = vmatpush1.bf16.xpose.msra.mxu1 %v19463_v49  ;;  %17286 = vmatprep.subr.bf16.mxu0 %v19438_v30  ;;  %v9958_v49 = vld [vmem:[#allocation8 + $0x1f60] sm:$0xff]  ;;  %v9947_v30 = vld [vmem:[#allocation8 + $0x1f08] sm:$0xff] }
0x116c   :  { %17329 = vmatprep.subr.bf16.mxu1 %v19440_v1  ;;  %v9959_v1 = vld [vmem:[#allocation8 + $0x1f68] sm:$0xff]  ;;  %v19630_v44 = vcombine.high %v9946_v23, %v9958_v49  ;;  %v19629_v16 = vcombine.low %v9946_v23, %v9958_v49  ;;  %v9756_v23 = vld [vmem:[#allocation8 + $0x1910] sm:$0xff] }
0x116d   :  { %v19632_v7 = vcombine.high %v9947_v30, %v9959_v1  ;;  %v19631_v29 = vcombine.low %v9947_v30, %v9959_v1  ;;  %v9768_v49 = vld [vmem:[#allocation8 + $0x1970] sm:$0xff]  ;;  %v9757_v30 = vld [vmem:[#allocation8 + $0x1918] sm:$0xff] }
0x116e   :  { %v9769_v1 = vld [vmem:[#allocation8 + $0x1978] sm:$0xff] }
0x1172   :  { %17287 = vmatpush1.bf16.xpose.msra.mxu0 %v19437_v55  ;;  %v9922_v55 = vld [vmem:[#allocation8 + $0x1e40] sm:$0xff] }
0x1173   :  { %17330 = vmatpush1.bf16.xpose.msra.mxu1 %v19439_v41  ;;  %17288 = vmatprep.subr.bf16.mxu0 %v19414_v25  ;;  %v9934_v41 = vld [vmem:[#allocation8 + $0x1ea0] sm:$0xff]  ;;  %v9923_v25 = vld [vmem:[#allocation8 + $0x1e48] sm:$0xff] }
0x1174   :  { %17331 = vmatprep.subr.bf16.mxu1 %v19416_v46  ;;  %v9935_v46 = vld [vmem:[#allocation8 + $0x1ea8] sm:$0xff]  ;;  %v19606_v13 = vcombine.high %v9922_v55, %v9934_v41  ;;  %v19605_v47 = vcombine.low %v9922_v55, %v9934_v41  ;;  %v9732_v55 = vld [vmem:[#allocation8 + $0x1850] sm:$0xff] }
0x1175   :  { %v19608_v3 = vcombine.high %v9923_v25, %v9935_v46  ;;  %v19607_v48 = vcombine.low %v9923_v25, %v9935_v46  ;;  %v9744_v41 = vld [vmem:[#allocation8 + $0x18b0] sm:$0xff]  ;;  %v9733_v25 = vld [vmem:[#allocation8 + $0x1858] sm:$0xff] }
0x1176   :  { %v9745_v46 = vld [vmem:[#allocation8 + $0x18b8] sm:$0xff] }
0x117a   :  { %17289 = vmatpush1.bf16.xpose.msra.mxu0 %v19413_v9  ;;  %v9900_v9 = vld [vmem:[#allocation8 + $0x1d90] sm:$0xff] }
0x117b   :  { %17332 = vmatpush1.bf16.xpose.msra.mxu1 %v19415_v34  ;;  %17290 = vmatprep.subr.bf16.mxu0 %v19774_v10  ;;  %v9912_v34 = vld [vmem:[#allocation8 + $0x1df0] sm:$0xff]  ;;  %v9901_v10 = vld [vmem:[#allocation8 + $0x1d98] sm:$0xff] }
0x117c   :  { %17333 = vmatprep.subr.bf16.mxu1 %v19776_v27  ;;  %v9913_v27 = vld [vmem:[#allocation8 + $0x1df8] sm:$0xff]  ;;  %v19586_v42 = vcombine.high %v9900_v9, %v9912_v34 }
0x117d   :  { %v19588_v4 = vcombine.high %v9901_v10, %v9913_v27  ;;  %v19587_v11 = vcombine.low %v9901_v10, %v9913_v27  ;;  %v10093_v10 = vld [vmem:[#allocation8 + $0x2398] sm:$0xff] }
0x117e   :  { %v10105_v27 = vld [vmem:[#allocation8 + $0x23f8] sm:$0xff] }
0x1182   :  { %17291 = vmatpush2.bf16.xpose.msra.mxu0 %v19773_v19  ;;  %v9876_v19 = vld [vmem:[#allocation8 + $0x1cd0] sm:$0xff] }
0x1183   :  { %17334 = vmatpush2.bf16.xpose.msra.mxu1 %v19775_v2  ;;  %17292 = vmatprep.subr.bf16.mxu0 %v19750_v0  ;;  %v9888_v2 = vld [vmem:[#allocation8 + $0x1d30] sm:$0xff]  ;;  %v19585_v0 = vcombine.low %v9900_v9, %v9912_v34 }
0x1184   :  { %17335 = vmatprep.subr.bf16.mxu1 %v19752_v36  ;;  %v9877_v36 = vld [vmem:[#allocation8 + $0x1cd8] sm:$0xff]  ;;  %v19562_v6 = vcombine.high %v9876_v19, %v9888_v2  ;;  %v19561_v57 = vcombine.low %v9876_v19, %v9888_v2  ;;  %v10092_v9 = vld [vmem:[#allocation8 + $0x2390] sm:$0xff] }
0x1185   :  { %v19564_v33 = vcombine.high %v9877_v36, %v9889_v14  ;;  %v19563_v5 = vcombine.low %v9877_v36, %v9889_v14  ;;  %v10104_v34 = vld [vmem:[#allocation8 + $0x23f0] sm:$0xff]  ;;  %v10081_v36 = vld [vmem:[#allocation8 + $0x2338] sm:$0xff] }
0x1186   :  { %v10068_v19 = vld [vmem:[#allocation8 + $0x22d0] sm:$0xff]  ;;  %v19777_v14 = vcombine.low %v10092_v9, %v10104_v34 }
0x1187   :  { %v10080_v2 = vld [vmem:[#allocation8 + $0x2330] sm:$0xff] }
0x118a   :  { %17293 = vmatpush2.bf16.xpose.msra.mxu0 %v19749_v17  ;;  %v9852_v17 = vld [vmem:[#allocation8 + $0x1c10] sm:$0xff] }
0x118b   :  { %17336 = vmatpush2.bf16.xpose.msra.mxu1 %v19751_v62  ;;  %17294 = vmatprep.subr.bf16.mxu0 %v19726_v39  ;;  %v9864_v62 = vld [vmem:[#allocation8 + $0x1c70] sm:$0xff]  ;;  %v9853_v39 = vld [vmem:[#allocation8 + $0x1c18] sm:$0xff] }
0x118c   :  { %17337 = vmatprep.subr.bf16.mxu1 %v19728_v58  ;;  %v9865_v58 = vld [vmem:[#allocation8 + $0x1c78] sm:$0xff]  ;;  %v19538_v20 = vcombine.high %v9852_v17, %v9864_v62 }
0x118d   :  { %v19540_v60 = vcombine.high %v9853_v39, %v9865_v58 }
0x1192   :  { %17295 = vmatpush2.bf16.xpose.msra.mxu0 %v19725_v15  ;;  %v9841_v15 = vld [vmem:[#allocation8 + $0x1bb8] sm:$0xff] }
0x1193   :  { %17338 = vmatpush2.bf16.xpose.msra.mxu1 %v19727_v18  ;;  %17296 = vmatprep.subr.bf16.mxu0 %v19702_v50  ;;  %v19537_v18 = vcombine.low %v9852_v17, %v9864_v62  ;;  %v10044_v17 = vld [vmem:[#allocation8 + $0x2210] sm:$0xff] }
0x1194   :  { %17339 = vmatprep.subr.bf16.mxu1 %v19704_v38  ;;  %v10056_v62 = vld [vmem:[#allocation8 + $0x2270] sm:$0xff] }
0x119a   :  { %17297 = vmatpush2.bf16.xpose.msra.mxu0 %v19701_v59 }
0x119b   :  { %17340 = vmatpush2.bf16.xpose.msra.mxu1 %v19703_v45  ;;  %17298 = vmatprep.subr.bf16.mxu0 %v19678_v61  ;;  %v19490_v61 = vcombine.high %v9804_v12, %v9816_v52 }
0x119c   :  { %17341 = vmatprep.subr.bf16.mxu1 %v19680_v40  ;;  %v19492_v40 = vcombine.high %v9805_v31, %v9817_v37 }
0x11a2   :  { %17299 = vmatpush2.bf16.xpose.msra.mxu0 %v19677_v43  ;;  %v19489_v43 = vcombine.low %v9804_v12, %v9816_v52  ;;  %v9996_v12 = vld [vmem:[#allocation8 + $0x2090] sm:$0xff] }
0x11a3   :  { %17342 = vmatpush2.bf16.xpose.msra.mxu1 %v19679_v35  ;;  %17300 = vmatprep.subr.bf16.mxu0 %v19654_v24  ;;  %v19491_v35 = vcombine.low %v9805_v31, %v9817_v37  ;;  %v19466_v24 = vcombine.high %v9780_v54, %v9792_v8  ;;  %v10008_v52 = vld [vmem:[#allocation8 + $0x20f0] sm:$0xff]  ;;  %v9997_v31 = vld [vmem:[#allocation8 + $0x2098] sm:$0xff] }
0x11a4   :  { %17343 = vmatprep.subr.bf16.mxu1 %v19656_v21  ;;  %v19468_v21 = vcombine.high %v9781_v53, %v9793_v32  ;;  %v10009_v37 = vld [vmem:[#allocation8 + $0x20f8] sm:$0xff] }
0x11aa   :  { %17301 = vmatpush2.bf16.xpose.msra.mxu0 %v19653_v56  ;;  %v19465_v56 = vcombine.low %v9780_v54, %v9792_v8  ;;  %v9972_v54 = vld [vmem:[#allocation8 + $0x1fd0] sm:$0xff] }
0x11ab   :  { %17344 = vmatpush2.bf16.xpose.msra.mxu1 %v19655_v26  ;;  %17302 = vmatprep.subr.bf16.mxu0 %v19630_v44  ;;  %v19467_v26 = vcombine.low %v9781_v53, %v9793_v32  ;;  %v19442_v44 = vcombine.high %v9756_v23, %v9768_v49  ;;  %v9984_v8 = vld [vmem:[#allocation8 + $0x2030] sm:$0xff]  ;;  %v9973_v53 = vld [vmem:[#allocation8 + $0x1fd8] sm:$0xff] }
0x11ac   :  { %17345 = vmatprep.subr.bf16.mxu1 %v19632_v7  ;;  %v19444_v7 = vcombine.high %v9757_v30, %v9769_v1  ;;  %v9985_v32 = vld [vmem:[#allocation8 + $0x2038] sm:$0xff] }
0x11b2   :  { %17303 = vmatpush2.bf16.xpose.msra.mxu0 %v19629_v16  ;;  %v19441_v16 = vcombine.low %v9756_v23, %v9768_v49  ;;  %v9948_v23 = vld [vmem:[#allocation8 + $0x1f10] sm:$0xff] }
0x11b3   :  { %17346 = vmatpush2.bf16.xpose.msra.mxu1 %v19631_v29  ;;  %17304 = vmatprep.subr.bf16.mxu0 %v19606_v13  ;;  %v19443_v29 = vcombine.low %v9757_v30, %v9769_v1  ;;  %v19418_v13 = vcombine.high %v9732_v55, %v9744_v41  ;;  %v9960_v49 = vld [vmem:[#allocation8 + $0x1f70] sm:$0xff]  ;;  %v9949_v30 = vld [vmem:[#allocation8 + $0x1f18] sm:$0xff] }
0x11b4   :  { %17347 = vmatprep.subr.bf16.mxu1 %v19608_v3  ;;  %v19420_v3 = vcombine.high %v9733_v25, %v9745_v46  ;;  %v9961_v1 = vld [vmem:[#allocation8 + $0x1f78] sm:$0xff] }
0x11ba   :  { %17305 = vmatpush2.bf16.xpose.msra.mxu0 %v19605_v47  ;;  %v19417_v47 = vcombine.low %v9732_v55, %v9744_v41  ;;  %v9924_v55 = vld [vmem:[#allocation8 + $0x1e50] sm:$0xff] }
0x11bb   :  { %17348 = vmatpush2.bf16.xpose.msra.mxu1 %v19607_v48  ;;  %17360 = vmatprep.subr.bf16.mxu0 %v19586_v42  ;;  %v19419_v48 = vcombine.low %v9733_v25, %v9745_v46  ;;  %v19778_v42 = vcombine.high %v10092_v9, %v10104_v34  ;;  %v9936_v41 = vld [vmem:[#allocation8 + $0x1eb0] sm:$0xff]  ;;  %v9925_v25 = vld [vmem:[#allocation8 + $0x1e58] sm:$0xff] }
0x11bc   :  { %17403 = vmatprep.subr.bf16.mxu1 %v19588_v4  ;;  %v19780_v4 = vcombine.high %v10093_v10, %v10105_v27  ;;  %v9937_v46 = vld [vmem:[#allocation8 + $0x1eb8] sm:$0xff]  ;;  %v19609_v9 = vcombine.low %v9924_v55, %v9936_v41 }
0x11bd   :  { %v19611_v34 = vcombine.low %v9925_v25, %v9937_v46 }
0x11c1   :  { %17307 = vmatmul.mubr.bf16.vlgmr.msra.gmra.mxu0 %v22622_v51  ;;  %v9828_v51 = vld [vmem:[#allocation8 + $0x1b50] sm:$0xff] }
0x11c2   :  { %17350 = vmatmul.mubr.bf16.vlgmr.msra.gmra.mxu1 %v22623_v63  ;;  %17361 = vmatpush1.bf16.xpose.msra.mxu0 %v19585_v0  ;;  %v9840_v63 = vld [vmem:[#allocation8 + $0x1bb0] sm:$0xff]  ;;  %v10069_v0 = vld [vmem:[#allocation8 + $0x22d8] sm:$0xff] }
0x11c3   :  { %17392 = vmatprep.mubr.bf16.mxu0 %v22289_v28  ;;  %17404 = vmatpush1.bf16.xpose.msra.mxu1 %v19587_v11  ;;  %v9829_v28 = vld [vmem:[#allocation8 + $0x1b58] sm:$0xff]  ;;  %v19514_v50 = vcombine.high %v9828_v51, %v9840_v63  ;;  %v19513_v59 = vcombine.low %v9828_v51, %v9840_v63  ;;  %v19779_v11 = vcombine.low %v10093_v10, %v10105_v27  ;;  %v10020_v51 = vld [vmem:[#allocation8 + $0x2150] sm:$0xff] }
0x11c4   :  { %17435 = vmatprep.mubr.bf16.mxu1 %v22292_v22  ;;  %17362 = vmatprep.subr.bf16.mxu0 %v19562_v6  ;;  %v19539_v22 = vcombine.low %v9853_v39, %v9865_v58  ;;  %v19516_v38 = vcombine.high %v9829_v28, %v9841_v15  ;;  %v19515_v45 = vcombine.low %v9829_v28, %v9841_v15  ;;  %v10045_v39 = vld [vmem:[#allocation8 + $0x2218] sm:$0xff]  ;;  %v10032_v63 = vld [vmem:[#allocation8 + $0x21b0] sm:$0xff] }
0x11c5   :  { %17405 = vmatprep.subr.bf16.mxu1 %v19564_v33  ;;  %v19754_v6 = vcombine.high %v10068_v19, %v10080_v2  ;;  %v19756_v33 = vcombine.high %v10069_v0, %v10081_v36  ;;  %v10057_v58 = vld [vmem:[#allocation8 + $0x2278] sm:$0xff]  ;;  %v22636_v27 = vld [vmem:[#allocation65_spill] sm:$0xff] }
0x11c6   :  { %v10021_v28 = vld [vmem:[#allocation8 + $0x2158] sm:$0xff] }
0x11c7   :  { %v10033_v15 = vld [vmem:[#allocation8 + $0x21b8] sm:$0xff] }
0x11c8   :  { %v22635_v10 = vld [vmem:[#allocation62_spill] sm:$0xff] }
0x11ca   :  { %17363 = vmatpush1.bf16.xpose.msra.mxu0 %v19561_v57  ;;  %v19753_v57 = vcombine.low %v10068_v19, %v10080_v2 }
0x11cb   :  { %17406 = vmatpush1.bf16.xpose.msra.mxu1 %v19563_v5  ;;  %17364 = vmatprep.subr.bf16.mxu0 %v19538_v20  ;;  %v19755_v5 = vcombine.low %v10069_v0, %v10081_v36  ;;  %v19730_v20 = vcombine.high %v10044_v17, %v10056_v62 }
0x11cc   :  { %17407 = vmatprep.subr.bf16.mxu1 %v19540_v60  ;;  %v19732_v60 = vcombine.high %v10045_v39, %v10057_v58 }
0x11d2   :  { %17365 = vmatpush1.bf16.xpose.msra.mxu0 %v19537_v18  ;;  %v19729_v18 = vcombine.low %v10044_v17, %v10056_v62 }
0x11d3   :  { %17408 = vmatpush1.bf16.xpose.msra.mxu1 %v19539_v22  ;;  %17366 = vmatprep.subr.bf16.mxu0 %v19514_v50  ;;  %v19731_v22 = vcombine.low %v10045_v39, %v10057_v58  ;;  %v19706_v50 = vcombine.high %v10020_v51, %v10032_v63 }
0x11d4   :  { %17409 = vmatprep.subr.bf16.mxu1 %v19516_v38  ;;  %v19708_v38 = vcombine.high %v10021_v28, %v10033_v15 }
0x11da   :  { %17367 = vmatpush1.bf16.xpose.msra.mxu0 %v19513_v59  ;;  %v19705_v59 = vcombine.low %v10020_v51, %v10032_v63  ;;  %v21624_v63 = vld [vmem:[#allocation10] sm:$0x3f] }
0x11db   :  { %17410 = vmatpush1.bf16.xpose.msra.mxu1 %v19515_v45  ;;  %17368 = vmatprep.subr.bf16.mxu0 %v19490_v61  ;;  %v19707_v45 = vcombine.low %v10021_v28, %v10033_v15  ;;  %v19682_v61 = vcombine.high %v9996_v12, %v10008_v52  ;;  %v22637_v28 = vld [vmem:[#allocation20_spill] sm:$0xff] }
0x11dc   :  { %17411 = vmatprep.subr.bf16.mxu1 %v19492_v40  ;;  %v19684_v40 = vcombine.high %v9997_v31, %v10009_v37  ;;  %v10127_v15 = vrot.slane %v21624_v63, %v22637_v28 }
0x11e2   :  { %17369 = vmatpush1.bf16.xpose.msra.mxu0 %v19489_v43  ;;  %v19681_v43 = vcombine.low %v9996_v12, %v10008_v52 }
0x11e3   :  { %17412 = vmatpush1.bf16.xpose.msra.mxu1 %v19491_v35  ;;  %17370 = vmatprep.subr.bf16.mxu0 %v19466_v24  ;;  %v19683_v35 = vcombine.low %v9997_v31, %v10009_v37  ;;  %v19658_v24 = vcombine.high %v9972_v54, %v9984_v8 }
0x11e4   :  { %17413 = vmatprep.subr.bf16.mxu1 %v19468_v21  ;;  %v19660_v21 = vcombine.high %v9973_v53, %v9985_v32 }
0x11ea   :  { %17371 = vmatpush1.bf16.xpose.msra.mxu0 %v19465_v56  ;;  %v19657_v56 = vcombine.low %v9972_v54, %v9984_v8 }
0x11eb   :  { %17414 = vmatpush1.bf16.xpose.msra.mxu1 %v19467_v26  ;;  %17372 = vmatprep.subr.bf16.mxu0 %v19442_v44  ;;  %v19659_v26 = vcombine.low %v9973_v53, %v9985_v32  ;;  %v19634_v44 = vcombine.high %v9948_v23, %v9960_v49 }
0x11ec   :  { %17415 = vmatprep.subr.bf16.mxu1 %v19444_v7  ;;  %v19636_v7 = vcombine.high %v9949_v30, %v9961_v1 }
0x11f2   :  { %17373 = vmatpush1.bf16.xpose.msra.mxu0 %v19441_v16  ;;  %v19633_v16 = vcombine.low %v9948_v23, %v9960_v49 }
0x11f3   :  { %17416 = vmatpush1.bf16.xpose.msra.mxu1 %v19443_v29  ;;  %17374 = vmatprep.subr.bf16.mxu0 %v19418_v13  ;;  %v19635_v29 = vcombine.low %v9949_v30, %v9961_v1  ;;  %v19610_v13 = vcombine.high %v9924_v55, %v9936_v41 }
0x11f4   :  { %17417 = vmatprep.subr.bf16.mxu1 %v19420_v3  ;;  %v19612_v3 = vcombine.high %v9925_v25, %v9937_v46 }
0x11fa   :  { %17375 = vmatpush1.bf16.xpose.msra.mxu0 %v19417_v47  ;;  %v16964_v47 = vpop.f32.mrf.mxu0 }
0x11fb   :  { %17418 = vmatpush1.bf16.xpose.msra.mxu1 %v19419_v48  ;;  %17376 = vmatprep.subr.bf16.mxu0 %v19778_v42  ;;  %v17007_v48 = vpop.f32.mrf.mxu1  ;;  %v16965_v12 = vadd.f32 %v16964_v47, %v10127_v15 }
0x11fc   :  { %17419 = vmatprep.subr.bf16.mxu1 %v19780_v4  ;;  %v16966_v42 = vpop.f32.mrf.mxu0 }
0x11fd   :  { %v17009_v4 = vpop.f32.mrf.mxu1 }
0x11fe   :  { %v16968_v19 = vpop.f32.mrf.mxu0 }
0x11ff   :  { %v17011_v2 = vpop.f32.mrf.mxu1 }
0x1200   :  { %v16970_v0 = vpop.f32.mrf.mxu0 }
0x1201   :  { %v17013_v36 = vpop.f32.mrf.mxu1 }
0x1202   :  { %17377 = vmatpush2.bf16.xpose.msra.mxu0 %v19777_v14  ;;  %v17050_v14 = vpop.f32.mrf.mxu0 }
0x1203   :  { %17420 = vmatpush2.bf16.xpose.msra.mxu1 %v19779_v11  ;;  %17378 = vmatprep.subr.bf16.mxu0 %v19754_v6  ;;  %v17093_v11 = vpop.f32.mrf.mxu1 }
0x1204   :  { %17421 = vmatprep.subr.bf16.mxu1 %v19756_v33  ;;  %v17052_v6 = vpop.f32.mrf.mxu0 }
0x1205   :  { %v17095_v33 = vpop.f32.mrf.mxu1 }
0x1206   :  { %v17054_v17 = vpop.f32.mrf.mxu0 }
0x1207   :  { %v17097_v62 = vpop.f32.mrf.mxu1 }
0x1208   :  { %v17056_v39 = vpop.f32.mrf.mxu0 }
0x1209   :  { %v17099_v58 = vpop.f32.mrf.mxu1 }
0x120a   :  { %17379 = vmatpush2.bf16.xpose.msra.mxu0 %v19753_v57  ;;  %v17136_v57 = vpop.f32.mrf.mxu0 }
0x120b   :  { %17422 = vmatpush2.bf16.xpose.msra.mxu1 %v19755_v5  ;;  %17380 = vmatprep.subr.bf16.mxu0 %v19730_v20  ;;  %v17179_v5 = vpop.f32.mrf.mxu1 }
0x120c   :  { %17423 = vmatprep.subr.bf16.mxu1 %v19732_v60  ;;  %v17138_v20 = vpop.f32.mrf.mxu0 }
0x120d   :  { %v17181_v60 = vpop.f32.mrf.mxu1 }
0x120e   :  { %v17140_v51 = vpop.f32.mrf.mxu0 }
0x1212   :  { %17381 = vmatpush2.bf16.xpose.msra.mxu0 %v19729_v18  ;;  %v17183_v18 = vpop.f32.mrf.mxu1 }
0x1213   :  { %17424 = vmatpush2.bf16.xpose.msra.mxu1 %v19731_v22  ;;  %17382 = vmatprep.subr.bf16.mxu0 %v19706_v50  ;;  %v22638_v22 = vld [vmem:[#allocation61_spill] sm:$0xff] }
0x1214   :  { %17425 = vmatprep.subr.bf16.mxu1 %v19708_v38  ;;  %v10131_v50 = vrot.slane %v21624_v63, %v22638_v22  ;;  %v17142_v38 = vpop.f32.mrf.mxu0  ;;  %v17185_v52 = vpop.f32.mrf.mxu1 }
0x1216   :  { %v17222_v31 = vpop.f32.mrf.mxu0  ;;  %v16967_v37 = vadd.f32 %v16966_v42, %v10131_v50  ;;  %v16971_v8 = vadd.f32 %v16970_v0, %v10131_v50 }
0x1218   :  { %v17010_v54 = vadd.f32 %v17009_v4, %v16967_v37 }
0x121a   :  { %17383 = vmatpush2.bf16.xpose.msra.mxu0 %v19705_v59  ;;  %v17265_v59 = vpop.f32.mrf.mxu1 }
0x121b   :  { %17426 = vmatpush2.bf16.xpose.msra.mxu1 %v19707_v45  ;;  %17384 = vmatprep.subr.bf16.mxu0 %v19682_v61  ;;  %v17008_v45 = vadd.f32 %v17007_v48, %v16965_v12  ;;  %v16969_v61 = vadd.f32 %v16968_v19, %v10127_v15 }
0x121c   :  { %17427 = vmatprep.subr.bf16.mxu1 %v19684_v40  ;;  %v17224_v40 = vpop.f32.mrf.mxu0  ;;  %v17267_v32 = vpop.f32.mrf.mxu1 }
0x121d   :  { %v17051_v53 = vadd.f32 %v17050_v14, %v17008_v45 }
0x121e   :  { %v17269_v30 = vpop.f32.mrf.mxu1 }
0x121f   :  { %v17094_v23 = vadd.f32 %v17093_v11, %v17051_v53 }
0x1220   :  { %v17271_v41 = vpop.f32.mrf.mxu1 }
0x1222   :  { %17385 = vmatpush2.bf16.xpose.msra.mxu0 %v19681_v43  ;;  %v17012_v43 = vadd.f32 %v17011_v2, %v16969_v61 }
0x1223   :  { %17428 = vmatpush2.bf16.xpose.msra.mxu1 %v19683_v35  ;;  %17386 = vmatprep.subr.bf16.mxu0 %v19658_v24  ;;  %v17053_v35 = vadd.f32 %v17052_v6, %v17010_v54  ;;  %v17226_v24 = vpop.f32.mrf.mxu0 }
0x1224   :  { %17429 = vmatprep.subr.bf16.mxu1 %v19660_v21  ;;  %v17014_v21 = vadd.f32 %v17013_v36, %v16971_v8  ;;  %v17055_v49 = vadd.f32 %v17054_v17, %v17012_v43 }
0x1225   :  { %v17096_v1 = vadd.f32 %v17095_v33, %v17053_v35 }
0x1227   :  { %v17139_v55 = vadd.f32 %v17138_v20, %v17096_v1 }
0x122a   :  { %17387 = vmatpush2.bf16.xpose.msra.mxu0 %v19657_v56  ;;  %v17057_v56 = vadd.f32 %v17056_v39, %v17014_v21 }
0x122b   :  { %17430 = vmatpush2.bf16.xpose.msra.mxu1 %v19659_v26  ;;  %17388 = vmatprep.subr.bf16.mxu0 %v19634_v44  ;;  %v17137_v26 = vadd.f32 %v17136_v57, %v17094_v23  ;;  %v17228_v44 = vpop.f32.mrf.mxu0 }
0x122c   :  { %17431 = vmatprep.subr.bf16.mxu1 %v19636_v7  ;;  %v17098_v7 = vadd.f32 %v17097_v62, %v17055_v49  ;;  %v17100_v46 = vadd.f32 %v17099_v58, %v17057_v56 }
0x1232   :  { %17389 = vmatpush2.bf16.xpose.msra.mxu0 %v19633_v16  ;;  %v17180_v16 = vadd.f32 %v17179_v5, %v17137_v26 }
0x1233   :  { %17432 = vmatpush2.bf16.xpose.msra.mxu1 %v19635_v29  ;;  %17390 = vmatprep.subr.bf16.mxu0 %v19610_v13  ;;  %v17141_v29 = vadd.f32 %v17140_v51, %v17098_v7 }
0x1234   :  { %17433 = vmatprep.subr.bf16.mxu1 %v19612_v3  ;;  %v17182_v3 = vadd.f32 %v17181_v60, %v17139_v55 }
0x1236   :  { %v17225_v47 = vadd.f32 %v17224_v40, %v17182_v3 }
0x1238   :  { %v17268_v0 = vadd.f32 %v17267_v32, %v17225_v47 }
0x123a   :  { %17391 = vmatpush2.bf16.xpose.msra.mxu0 %v19609_v9  ;;  %v17143_v9 = vadd.f32 %v17142_v38, %v17100_v46 }
0x123b   :  { %17434 = vmatpush2.bf16.xpose.msra.mxu1 %v19611_v34  ;;  %v17223_v34 = vadd.f32 %v17222_v31, %v17180_v16 }
0x123c   :  { %v17186_v42 = vadd.f32 %v17185_v52, %v17143_v9 }
0x123d   :  { %v17266_v4 = vadd.f32 %v17265_v59, %v17223_v34 }
0x123e   :  { %v17229_v36 = vadd.f32 %v17228_v44, %v17186_v42 }
0x1240   :  { %v17272_v62 = vadd.f32 %v17271_v41, %v17229_v36 }
0x1241   :  { %17393 = vmatmul.mubr.bf16.vlgmr.msra.gmra.mxu0 %v22635_v10 }
0x1242   :  { %17436 = vmatmul.mubr.bf16.vlgmr.msra.gmra.mxu1 %v22636_v27  ;;  %v17184_v27 = vadd.f32 %v17183_v18, %v17141_v29 }
0x1244   :  { %v17227_v19 = vadd.f32 %v17226_v24, %v17184_v27 }
0x1246   :  { %v17270_v6 = vadd.f32 %v17269_v30, %v17227_v19 }
0x1281   :  { %v17308_v25 = vpop.f32.mrf.mxu0 }
0x1282   :  { %v17351_v13 = vpop.f32.mrf.mxu1  ;;  %v17309_v14 = vadd.f32 %v17308_v25, %v17266_v4 }
0x1283   :  { %v17310_v10 = vpop.f32.mrf.mxu0 }
0x1284   :  { %v17353_v48 = vpop.f32.mrf.mxu1  ;;  %v17311_v33 = vadd.f32 %v17310_v10, %v17268_v0  ;;  %v17352_v39 = vadd.f32 %v17351_v13, %v17309_v14 }
0x1285   :  { %v17312_v2 = vpop.f32.mrf.mxu0 }
0x1286   :  { %v17355_v11 = vpop.f32.mrf.mxu1  ;;  %v17313_v58 = vadd.f32 %v17312_v2, %v17270_v6  ;;  %v17354_v20 = vadd.f32 %v17353_v48, %v17311_v33 }
0x1287   :  { %v17314_v17 = vpop.f32.mrf.mxu0 }
0x1288   :  { %v17357_v57 = vpop.f32.mrf.mxu1  ;;  %v17315_v60 = vadd.f32 %v17314_v17, %v17272_v62  ;;  %v17356_v15 = vadd.f32 %v17355_v11, %v17313_v58 }
0x128a   :  { %v17358_v12 = vadd.f32 %v17357_v57, %v17315_v60 }
0x1301   :  { %v17394_v5 = vpop.f32.mrf.mxu0 }
0x1302   :  { %v17395_v51 = vadd.f32 %v17394_v5, %v17352_v39  ;;  %v17437_v63 = vpop.f32.mrf.mxu1 }
0x1303   :  { %v17396_v28 = vpop.f32.mrf.mxu0 }
0x1304   :  { %v17438_v18 = vadd.f32 %v17437_v63, %v17395_v51  ;;  %v17397_v22 = vadd.f32 %v17396_v28, %v17354_v20  ;;  %v17439_v50 = vpop.f32.mrf.mxu1 }
0x1305   :  { %v17398_v38 = vpop.f32.mrf.mxu0 }
0x1306   :  { %17450 = vst [vmem:[#allocation11 + $0x20] sm:$0xff] %v17438_v18  ;;  %v17440_v52 = vadd.f32 %v17439_v50, %v17397_v22  ;;  %v17399_v31 = vadd.f32 %v17398_v38, %v17356_v15  ;;  %v17441_v37 = vpop.f32.mrf.mxu1 }
0x1307   :  { %v17400_v59 = vpop.f32.mrf.mxu0 }
0x1308   :  { %17451 = vst [vmem:[#allocation11 + $0x28] sm:$0xff] %v17440_v52  ;;  %v17442_v45 = vadd.f32 %v17441_v37, %v17399_v31  ;;  %v17401_v61 = vadd.f32 %v17400_v59, %v17358_v12  ;;  %v17443_v40 = vpop.f32.mrf.mxu1 }
0x130a   :  { %17456 = vst [vmem:[#allocation11 + $0x50] sm:$0xff] %v17442_v45  ;;  %v17444_v54 = vadd.f32 %v17443_v40, %v17401_v61 }
0x130c   :  { %17457 = vst [vmem:[#allocation11 + $0x58] sm:$0xff] %v17444_v54 }
0x130d   :  { %21736 = shalt.err (!%p21733_p1)
}
0x130e   :  { %17469 = dma.vmem_to_hbm [thread:$0]  %s17464_s4, 1536, %s22513_s5, [#allocation4], %s21760_s9, %s21760_s9, %s21761_s10  }
0x130f   :  { %21751 = dma.done.wait [#allocation4], 1536  }
0x1310   :  { %21752 = vsyncadd [#allocation4], 4294965760 }
0x1311   :  { %17473 = vsyncpa [#allocation3], 1 }
0x1312   :  { %17474 = vsyncpa [#allocation6], 1 }
0x1313   :  { %17475 = vsyncpa [#allocation9], 1 }
0x1314   :  { %17476 = vsyncpa [#allocation4], 1 }

</bundles_post_ra>
